<compile_context>
chip_gen: v6e
topology: v6e:2x2x1
jax: 0.10.0
libtpu: 0.0.40
codegen_flags: <defaults>
</compile_context>

<pallas_src>
import functools

import jax
import jax.numpy as jnp
from jax import lax
from jax.experimental import pallas as pl
from jax.experimental.pallas import tpu as pltpu


def _convt_kernel(x_ref, w_ref, b_ref, o_ref, acc_ref, *, T, tq, NwP, G):
    # x_ref  : (G, tq+T-1, W_p, Cin)   compute-dtype halo'd input row windows
    # w_ref  : (T*T, Cin, CoutPP)      compute-dtype per-tap weight matrices
    # b_ref  : (1, CoutPP)             f32 bias (phase-major columns, zero-padded lanes)
    # o_ref  : (G*tq*NwP, CoutPP)      lane-dense output slab (phase-major columns)
    # acc_ref: (G*tq*NwP, CoutPP) f32  VMEM accumulator
    rows = G * tq * NwP
    t = 0
    for j in range(T):
        for i in range(T):
            # Shifted tap window: lanes stay = Cin, only sublane regrouping (no lane concat).
            xt = x_ref[:, j:j + tq, i:i + NwP, :].reshape(rows, -1)
            d = jnp.dot(xt, w_ref[t], preferred_element_type=jnp.float32)
            if t == 0:
                acc_ref[...] = d
            else:
                acc_ref[...] += d          # per-tap accumulate (MRB-friendly on v7x)
            t += 1
    o_ref[...] = (acc_ref[...] + b_ref[...]).astype(o_ref.dtype)


def conv_transpose2d(x, weight, bias=None, *, stride, padding,
                     w_lrmul=1.0, b_lrmul=1.0, q_tile=None,
                     compute_dtype=jnp.bfloat16):
    """x: (N, Cin, H, W); weight: (Cin, Cout, K, K); bias: (Cout,) or None. Returns NCHW."""
    N, Cin, H, W = x.shape
    Cin_w, Cout, K, K2 = weight.shape
    assert Cin == Cin_w and K == K2
    s, p = int(stride), int(padding)
    Hout = (H - 1) * s - 2 * p + K
    Wout = (W - 1) * s - 2 * p + K
    assert Hout > 0 and Wout > 0
    out_dtype = x.dtype
    cdt = jnp.dtype(compute_dtype)
    cb = cdt.itemsize
    ob = jnp.dtype(out_dtype).itemsize

    T = -(-K // s)                      # taps per phase per spatial dim
    TT = T * T
    ext = max(0, (K - 1 - p) // s)      # extra virtual rows/cols past the input
    Mh = H + ext                        # virtual output rows per phase
    Nw = W + ext                        # virtual output cols per phase
    NwP = -(-Nw // 16) * 16             # padded width (zero cols; cropped in wrapper)
    W_p = NwP + T - 1                   # window width incl. halo
    CoutP = s * s * Cout                # phases folded into the lane dim
    CoutPP = -(-CoutP // 128) * 128     # lane-dense (128-multiple) -> unmasked stores

    # ---- generation-aware VMEM budget (fallback assumes v7x's 64 MiB per core) ----
    try:
        vmem_phys = int(pltpu.get_tpu_info().vmem_capacity_bytes)
        if vmem_phys <= 0:
            raise ValueError("bad vmem capacity")
    except Exception:
        vmem_phys = 64 * 1024 * 1024
    vmem_limit = int(min(vmem_phys * 3 // 4, 100 * 1024 * 1024))  # ~48 MiB v7x, ~96 MiB v5e/v6e
    tile_budget = max(vmem_limit - 2 * 1024 * 1024, 4 * 1024 * 1024)

    # footprint model: 2x-buffered input & output blocks, f32 acc (+1 temp),
    # per-tap operand relayout temp, and (up to 2x-buffered) weight/bias blocks.
    fixed = 2 * (TT * Cin * CoutPP * cb + CoutPP * 4)
    per_row = 2 * W_p * Cin * cb + NwP * (2 * CoutPP * ob + 2 * CoutPP * 4 + 2 * Cin * cb)
    halo = 2 * (T - 1) * W_p * Cin * cb

    if q_tile is None:
        avail = tile_budget - fixed - halo
        tq = int(min(Mh, max(1, avail // per_row)))
    else:
        tq = int(min(max(1, int(q_tile)), Mh))
    nQ = -(-Mh // tq)
    Qpad = nQ * tq
    NQ = N * nQ                          # batch folded into the row-tile axis

    rows_per_win = tq * NwP
    per_win = per_row * tq + halo
    g_vmem = max(1, (tile_budget - fixed) // per_win)
    g_target = max(1, -(-512 // rows_per_win))        # fill the MXU M-dim (~512 rows/step)
    g_cap = max(1, NQ // 2) if NQ >= 2 else 1         # keep >=2 grid steps (v7x megacore)
    G = int(max(1, min(g_target, g_vmem, g_cap, NQ)))
    NQpad = -(-NQ // G) * G
    n_steps = NQpad // G
    rows_blk = G * tq * NwP

    # ---- input: NCHW -> NHWC (compute dtype), zero-pad, static overlapping row windows ----
    x_nhwc = jnp.transpose(x, (0, 2, 3, 1)).astype(cdt)
    x_pad = jnp.pad(x_nhwc, ((0, 0), (T - 1, Qpad - H), (T - 1, NwP - W), (0, 0)))
    if nQ == 1:
        x_win = x_pad[:, None]                                    # (N, 1, tq+T-1, W_p, Cin)
    else:
        # Static overlapping slices (no gather): duplication is only the (T-1)-row halo.
        x_win = jnp.stack([x_pad[:, q * tq:q * tq + tq + T - 1] for q in range(nQ)], axis=1)
    x_win = x_win.reshape(NQ, tq + T - 1, W_p, Cin)
    if NQpad > NQ:
        x_win = jnp.pad(x_win, ((0, NQpad - NQ), (0, 0), (0, 0), (0, 0)))
    # TODO(synk): for very large images keep x in HBM (memory_space=pl.ANY) and DMA the
    # halo'd row windows in-kernel with pltpu.make_async_copy to drop this extra copy.

    # ---- per-tap weight matrices: (T*T, Cin, CoutPP), lanes phase-major then channel ----
    # w_taps[j*T+i, ci, (a*s+b)*Cout+co] = w_lrmul * weight[ci, co, a+(T-1-j)*s, b+(T-1-i)*s]
    Ts = T * s
    w_sc = weight.astype(jnp.float32) * jnp.float32(w_lrmul)              # (Cin,Cout,K,K)
    w_sc = jnp.pad(w_sc, ((0, 0), (0, 0), (0, Ts - K), (0, Ts - K)))      # zero taps kh>=K
    w_sc = w_sc.reshape(Cin, Cout, T, s, T, s)[:, :, ::-1, :, ::-1, :]    # (ci,co,j,a,i,b)
    w_taps = jnp.transpose(w_sc, (2, 4, 0, 3, 5, 1)).reshape(TT, Cin, CoutP)
    w_taps = jnp.pad(w_taps, ((0, 0), (0, 0), (0, CoutPP - CoutP))).astype(cdt)

    if bias is None:
        b_vec = jnp.zeros((Cout,), jnp.float32)
    else:
        b_vec = bias.astype(jnp.float32) * jnp.float32(b_lrmul)
    b_lane = jnp.pad(jnp.tile(b_vec, s * s), (0, CoutPP - CoutP)).reshape(1, CoutPP)

    kernel = functools.partial(_convt_kernel, T=T, tq=tq, NwP=NwP, G=G)

    def _call(single_buffer_consts):
        def const_spec(shape, imap):
            if single_buffer_consts:
                return pl.BlockSpec(shape, imap, pipeline_mode=pl.Buffered(1))
            return pl.BlockSpec(shape, imap)

        grid_spec = pltpu.PrefetchScalarGridSpec(
            num_scalar_prefetch=0,
            grid=(n_steps,),
            in_specs=[
                # TODO(synk): on v5e, pipeline_mode=pl.Buffered(3) here if input DMA is exposed.
                pl.BlockSpec((G, tq + T - 1, W_p, Cin), lambda t: (t, 0, 0, 0)),
                const_spec((TT, Cin, CoutPP), lambda t: (0, 0, 0)),
                const_spec((1, CoutPP), lambda t: (0, 0)),
            ],
            out_specs=pl.BlockSpec((rows_blk, CoutPP), lambda t: (t, 0)),
            scratch_shapes=[pltpu.VMEM((rows_blk, CoutPP), jnp.float32)],
        )
        return pl.pallas_call(
            kernel,
            out_shape=jax.ShapeDtypeStruct((NQpad * tq * NwP, CoutPP), out_dtype),
            grid_spec=grid_spec,
            compiler_params=pltpu.CompilerParams(
                dimension_semantics=("parallel",),
                vmem_limit_bytes=vmem_limit),
        )(x_win, w_taps, b_lane)

    try:
        out_flat = _call(True)
    except Exception:
        # pl.Buffered(1) / pipeline_mode unsupported on this jax -> default double buffering.
        out_flat = _call(False)

    # ---- phase-major slab -> NCHW (layout plumbing, outside the kernel) ----
    # TODO(synk): emit NHWC / fuse the phase un-shuffle into the consumer to save the two
    # extra HBM passes below when the downstream op accepts channels-last input.
    out_w = out_flat.reshape(NQpad, tq, NwP, CoutPP)[:NQ, :, :, :CoutP]
    out_w = out_w.reshape(N, Qpad, NwP, s, s, Cout)                  # (n, m, nn, a, b, co)
    out_full = jnp.transpose(out_w, (0, 1, 3, 2, 4, 5)).reshape(N, Qpad * s, NwP * s, Cout)
    out = out_full[:, p:p + Hout, p:p + Wout, :]
    return jnp.transpose(out, (0, 3, 1, 2))


if __name__ == "__main__":
    def ref_conv_transpose(x, weight, bias, s, p, w_lrmul, b_lrmul):
        K = weight.shape[2]
        w_conv = jnp.transpose((weight * w_lrmul)[:, :, ::-1, ::-1], (1, 0, 2, 3))  # OIHW
        out = lax.conv_general_dilated(
            x.astype(jnp.float32), w_conv.astype(jnp.float32),
            window_strides=(1, 1),
            padding=[(K - 1 - p, K - 1 - p)] * 2,
            lhs_dilation=(s, s),
            dimension_numbers=("NCHW", "OIHW", "NCHW"),
            precision=lax.Precision.HIGHEST)
        if bias is not None:
            out = out + (bias * b_lrmul)[None, :, None, None]
        return out

    def run_case(name, *, N, Cin, Cout, H, W, K, s, p, use_bias=True,
                 compute_dtype=jnp.bfloat16, q_tile=None, tol=2.5e-2, key=None):
        kx, kw, kb = jax.random.split(key, 3)
        gain, lrmul, use_wscale = 2 ** 0.5, 1.0, False
        he_std = gain * (Cin * K ** 2) ** (-0.5)
        if use_wscale:
            init_std, w_lrmul = 1.0 / lrmul, he_std * lrmul
        else:
            init_std, w_lrmul = he_std / lrmul, lrmul
        b_lrmul = lrmul
        x = jax.random.normal(kx, (N, Cin, H, W), jnp.float32)
        weight = jax.random.normal(kw, (Cin, Cout, K, K), jnp.float32) * init_std
        bias = (jax.random.normal(kb, (Cout,), jnp.float32) * 0.1) if use_bias else None

        out = conv_transpose2d(x, weight, bias, stride=s, padding=p,
                               w_lrmul=w_lrmul, b_lrmul=b_lrmul,
                               q_tile=q_tile, compute_dtype=compute_dtype)
        out = jax.block_until_ready(out)
        ref = ref_conv_transpose(x, weight, bias, s, p, w_lrmul, b_lrmul)

        Hout = (H - 1) * s - 2 * p + K
        Wout = (W - 1) * s - 2 * p + K
        assert out.shape == (N, Cout, Hout, Wout), (name, out.shape)
        assert out.dtype == x.dtype, (name, out.dtype)
        err = float(jnp.max(jnp.abs(out.astype(jnp.float32) - ref)))
        assert jnp.allclose(out.astype(jnp.float32), ref, atol=tol, rtol=tol), (name, err)

    keys = jax.random.split(jax.random.PRNGKey(0), 8)
    # Main config (StyleGAN-style 2x upsample, small shapes): bf16 compute + f32 precision knob.
    run_case("base_bf16", N=2, Cin=4, Cout=8, H=16, W=16, K=4, s=2, p=1,
             compute_dtype=jnp.bfloat16, tol=2.5e-2, key=keys[0])
    run_case("base_f32", N=2, Cin=4, Cout=8, H=16, W=16, K=4, s=2, p=1,
             compute_dtype=jnp.float32, tol=1e-2, key=keys[1])
    # Row-tiling with halo + multi-window grouping.
    run_case("tiled_halo", N=2, Cin=4, Cout=8, H=16, W=16, K=4, s=2, p=1,
             q_tile=8, compute_dtype=jnp.float32, tol=1e-2, key=keys[2])
    # Edge cases for the polyphase indexing (review correctness concerns).
    run_case("k_not_mult_s", N=2, Cin=4, Cout=8, H=12, W=12, K=3, s=2, p=1,
             compute_dtype=jnp.float32, tol=1e-2, key=keys[3])
    run_case("pad_eq_km1", N=2, Cin=4, Cout=8, H=16, W=16, K=4, s=2, p=3,
             compute_dtype=jnp.float32, tol=1e-2, key=keys[4])
    run_case("stride1", N=2, Cin=4, Cout=8, H=16, W=16, K=3, s=1, p=1,
             compute_dtype=jnp.float32, tol=1e-2, key=keys[5])
    # Odd batch + small image -> exercises G>1 window grouping and zero-window padding.
    run_case("multi_window_group", N=5, Cin=4, Cout=8, H=8, W=8, K=4, s=2, p=1,
             compute_dtype=jnp.float32, tol=1e-2, key=keys[6])
    run_case("no_bias", N=2, Cin=4, Cout=8, H=16, W=16, K=4, s=2, p=1,
             use_bias=False, compute_dtype=jnp.float32, tol=1e-2, key=keys[7])

    print("KERNEL_OK")
</pallas_src>

<mosaic_0001>
module attributes {stable_mosaic.version = 11 : i64} {
  func.func @_convt_kernel(%arg0: i32, %arg1: memref<1x18x33x4xbf16, #tpu.memory_space<vmem>>, %arg2: memref<4x4x128xbf16, #tpu.memory_space<vmem>>, %arg3: memref<1x128xf32, #tpu.memory_space<vmem>>, %arg4: memref<544x128xf32, #tpu.memory_space<vmem>>, %arg5: memref<544x128xf32, #tpu.memory_space<vmem>>) attributes {dimension_semantics = [#tpu.dimension_semantics<parallel>], iteration_bounds = array<i64: 2>, scalar_prefetch = 0 : i64, scratch_operands = 1 : i64, tpu.core_type = #tpu.core_type<tc>, window_params = [{transform_indices = @transform_0, window_bounds = array<i64: 1, 18, 33, 4>}, {pipeline_mode = #tpu.pipeline_mode<synchronous>, transform_indices = @transform_1, window_bounds = array<i64: 4, 4, 128>}, {pipeline_mode = #tpu.pipeline_mode<synchronous>, transform_indices = @transform_2, window_bounds = array<i64: 1, 128>}, {transform_indices = @transform_3, window_bounds = array<i64: 544, 128>}]} {
    %c0 = arith.constant 0 : index
    %c0_0 = arith.constant 0 : index
    %c0_1 = arith.constant 0 : index
    %c0_2 = arith.constant 0 : index
    %0 = vector.load %arg1[%c0, %c0_0, %c0_1, %c0_2] : memref<1x18x33x4xbf16, #tpu.memory_space<vmem>>, vector<1x17x32x4xbf16>
    %1 = vector.shape_cast %0 : vector<1x17x32x4xbf16> to vector<544x4xbf16>
    %c0_3 = arith.constant 0 : index
    %c0_4 = arith.constant 0 : index
    %c0_5 = arith.constant 0 : index
    %2 = vector.load %arg2[%c0_3, %c0_4, %c0_5] : memref<4x4x128xbf16, #tpu.memory_space<vmem>>, vector<1x4x128xbf16>
    %3 = vector.shape_cast %2 : vector<1x4x128xbf16> to vector<4x128xbf16>
    %cst = arith.constant dense<0.000000e+00> : vector<544x128xf32>
    %4 = tpu.matmul %1, %3, %cst {dimension_numbers = #tpu.dot_dimension_numbers<[1], [0], [0], [1], [0, 0, 1, 1], [], []>} : vector<544x4xbf16>, vector<4x128xbf16>, vector<544x128xf32> -> vector<544x128xf32>
    %c0_6 = arith.constant 0 : index
    %c0_7 = arith.constant 0 : index
    %5 = vector.load %arg5[%c0_6, %c0_7] : memref<544x128xf32, #tpu.memory_space<vmem>>, vector<544x128xf32>
    tpu.vector_store %arg5[%c0_6, %c0_7], %4 {strides = array<i32>} : memref<544x128xf32, #tpu.memory_space<vmem>>, vector<544x128xf32>,
    %c0_8 = arith.constant 0 : index
    %c0_9 = arith.constant 0 : index
    %c1 = arith.constant 1 : index
    %c0_10 = arith.constant 0 : index
    %6 = vector.load %arg1[%c0_8, %c0_9, %c1, %c0_10] : memref<1x18x33x4xbf16, #tpu.memory_space<vmem>>, vector<1x17x32x4xbf16>
    %7 = vector.shape_cast %6 : vector<1x17x32x4xbf16> to vector<544x4xbf16>
    %c1_11 = arith.constant 1 : index
    %c0_12 = arith.constant 0 : index
    %c0_13 = arith.constant 0 : index
    %8 = vector.load %arg2[%c1_11, %c0_12, %c0_13] : memref<4x4x128xbf16, #tpu.memory_space<vmem>>, vector<1x4x128xbf16>
    %9 = vector.shape_cast %8 : vector<1x4x128xbf16> to vector<4x128xbf16>
    %cst_14 = arith.constant dense<0.000000e+00> : vector<544x128xf32>
    %10 = tpu.matmul %7, %9, %cst_14 {dimension_numbers = #tpu.dot_dimension_numbers<[1], [0], [0], [1], [0, 0, 1, 1], [], []>} : vector<544x4xbf16>, vector<4x128xbf16>, vector<544x128xf32> -> vector<544x128xf32>
    %c0_15 = arith.constant 0 : index
    %c0_16 = arith.constant 0 : index
    %11 = vector.load %arg5[%c0_15, %c0_16] : memref<544x128xf32, #tpu.memory_space<vmem>>, vector<544x128xf32>
    %12 = arith.addf %11, %10 : vector<544x128xf32>
    %c0_17 = arith.constant 0 : index
    %c0_18 = arith.constant 0 : index
    %13 = vector.load %arg5[%c0_17, %c0_18] : memref<544x128xf32, #tpu.memory_space<vmem>>, vector<544x128xf32>
    tpu.vector_store %arg5[%c0_17, %c0_18], %12 {strides = array<i32>} : memref<544x128xf32, #tpu.memory_space<vmem>>, vector<544x128xf32>,
    %c0_19 = arith.constant 0 : index
    %c1_20 = arith.constant 1 : index
    %c0_21 = arith.constant 0 : index
    %c0_22 = arith.constant 0 : index
    %14 = vector.load %arg1[%c0_19, %c1_20, %c0_21, %c0_22] : memref<1x18x33x4xbf16, #tpu.memory_space<vmem>>, vector<1x17x32x4xbf16>
    %15 = vector.shape_cast %14 : vector<1x17x32x4xbf16> to vector<544x4xbf16>
    %c2 = arith.constant 2 : index
    %c0_23 = arith.constant 0 : index
    %c0_24 = arith.constant 0 : index
    %16 = vector.load %arg2[%c2, %c0_23, %c0_24] : memref<4x4x128xbf16, #tpu.memory_space<vmem>>, vector<1x4x128xbf16>
    %17 = vector.shape_cast %16 : vector<1x4x128xbf16> to vector<4x128xbf16>
    %cst_25 = arith.constant dense<0.000000e+00> : vector<544x128xf32>
    %18 = tpu.matmul %15, %17, %cst_25 {dimension_numbers = #tpu.dot_dimension_numbers<[1], [0], [0], [1], [0, 0, 1, 1], [], []>} : vector<544x4xbf16>, vector<4x128xbf16>, vector<544x128xf32> -> vector<544x128xf32>
    %c0_26 = arith.constant 0 : index
    %c0_27 = arith.constant 0 : index
    %19 = vector.load %arg5[%c0_26, %c0_27] : memref<544x128xf32, #tpu.memory_space<vmem>>, vector<544x128xf32>
    %20 = arith.addf %19, %18 : vector<544x128xf32>
    %c0_28 = arith.constant 0 : index
    %c0_29 = arith.constant 0 : index
    %21 = vector.load %arg5[%c0_28, %c0_29] : memref<544x128xf32, #tpu.memory_space<vmem>>, vector<544x128xf32>
    tpu.vector_store %arg5[%c0_28, %c0_29], %20 {strides = array<i32>} : memref<544x128xf32, #tpu.memory_space<vmem>>, vector<544x128xf32>,
    %c0_30 = arith.constant 0 : index
    %c1_31 = arith.constant 1 : index
    %c1_32 = arith.constant 1 : index
    %c0_33 = arith.constant 0 : index
    %22 = vector.load %arg1[%c0_30, %c1_31, %c1_32, %c0_33] : memref<1x18x33x4xbf16, #tpu.memory_space<vmem>>, vector<1x17x32x4xbf16>
    %23 = vector.shape_cast %22 : vector<1x17x32x4xbf16> to vector<544x4xbf16>
    %c3 = arith.constant 3 : index
    %c0_34 = arith.constant 0 : index
    %c0_35 = arith.constant 0 : index
    %24 = vector.load %arg2[%c3, %c0_34, %c0_35] : memref<4x4x128xbf16, #tpu.memory_space<vmem>>, vector<1x4x128xbf16>
    %25 = vector.shape_cast %24 : vector<1x4x128xbf16> to vector<4x128xbf16>
    %cst_36 = arith.constant dense<0.000000e+00> : vector<544x128xf32>
    %26 = tpu.matmul %23, %25, %cst_36 {dimension_numbers = #tpu.dot_dimension_numbers<[1], [0], [0], [1], [0, 0, 1, 1], [], []>} : vector<544x4xbf16>, vector<4x128xbf16>, vector<544x128xf32> -> vector<544x128xf32>
    %c0_37 = arith.constant 0 : index
    %c0_38 = arith.constant 0 : index
    %27 = vector.load %arg5[%c0_37, %c0_38] : memref<544x128xf32, #tpu.memory_space<vmem>>, vector<544x128xf32>
    %28 = arith.addf %27, %26 : vector<544x128xf32>
    %c0_39 = arith.constant 0 : index
    %c0_40 = arith.constant 0 : index
    %29 = vector.load %arg5[%c0_39, %c0_40] : memref<544x128xf32, #tpu.memory_space<vmem>>, vector<544x128xf32>
    tpu.vector_store %arg5[%c0_39, %c0_40], %28 {strides = array<i32>} : memref<544x128xf32, #tpu.memory_space<vmem>>, vector<544x128xf32>,
    %c0_41 = arith.constant 0 : index
    %c0_42 = arith.constant 0 : index
    %30 = vector.load %arg5[%c0_41, %c0_42] : memref<544x128xf32, #tpu.memory_space<vmem>>, vector<544x128xf32>
    %c0_43 = arith.constant 0 : index
    %c0_44 = arith.constant 0 : index
    %31 = vector.load %arg3[%c0_43, %c0_44] : memref<1x128xf32, #tpu.memory_space<vmem>>, vector<1x128xf32>
    %32 = vector.broadcast %31 : vector<1x128xf32> to vector<544x128xf32>
    %33 = arith.addf %30, %32 : vector<544x128xf32>
    %c0_45 = arith.constant 0 : index
    %c0_46 = arith.constant 0 : index
    %34 = vector.load %arg4[%c0_45, %c0_46] : memref<544x128xf32, #tpu.memory_space<vmem>>, vector<544x128xf32>
    tpu.vector_store %arg4[%c0_45, %c0_46], %33 {strides = array<i32>} : memref<544x128xf32, #tpu.memory_space<vmem>>, vector<544x128xf32>,
    return
  }
  func.func @transform_0(%arg0: i32) -> (i32, i32, i32, i32) {
    %c0_i32 = arith.constant 0 : i32
    %c0_i32_0 = arith.constant 0 : i32
    %c0_i32_1 = arith.constant 0 : i32
    %c0_i32_2 = arith.constant 0 : i32
    return %arg0, %c0_i32, %c0_i32_0, %c0_i32_1 : i32, i32, i32, i32
  }
  func.func @transform_1(%arg0: i32) -> (i32, i32, i32) {
    %c0_i32 = arith.constant 0 : i32
    %c0_i32_0 = arith.constant 0 : i32
    %c0_i32_1 = arith.constant 0 : i32
    %c0_i32_2 = arith.constant 0 : i32
    return %c0_i32, %c0_i32_0, %c0_i32_1 : i32, i32, i32
  }
  func.func @transform_2(%arg0: i32) -> (i32, i32) {
    %c0_i32 = arith.constant 0 : i32
    %c0_i32_0 = arith.constant 0 : i32
    %c0_i32_1 = arith.constant 0 : i32
    return %c0_i32, %c0_i32_0 : i32, i32
  }
  func.func @transform_3(%arg0: i32) -> (i32, i32) {
    %c0_i32 = arith.constant 0 : i32
    %c0_i32_0 = arith.constant 0 : i32
    return %arg0, %c0_i32 : i32, i32
  }
}

module attributes {stable_mosaic.version = 11 : i64} {
  func.func @_convt_kernel(%arg0: i32, %arg1: memref<1x18x33x4xbf16, #tpu.memory_space<vmem>>, %arg2: memref<4x4x128xbf16, #tpu.memory_space<vmem>>, %arg3: memref<1x128xf32, #tpu.memory_space<vmem>>, %arg4: memref<544x128xf32, #tpu.memory_space<vmem>>, %arg5: memref<544x128xf32, #tpu.memory_space<vmem>>) attributes {dimension_semantics = [#tpu.dimension_semantics<parallel>], iteration_bounds = array<i64: 2>, scalar_prefetch = 0 : i64, scratch_operands = 1 : i64, tpu.core_type = #tpu.core_type<tc>, window_params = [{transform_indices = @transform_0, window_bounds = array<i64: 1, 18, 33, 4>}, {pipeline_mode = #tpu.pipeline_mode<synchronous>, transform_indices = @transform_1, window_bounds = array<i64: 4, 4, 128>}, {pipeline_mode = #tpu.pipeline_mode<synchronous>, transform_indices = @transform_2, window_bounds = array<i64: 1, 128>}, {transform_indices = @transform_3, window_bounds = array<i64: 544, 128>}]} {
    %c0 = arith.constant 0 : index
    %c0_0 = arith.constant 0 : index
    %c0_1 = arith.constant 0 : index
    %c0_2 = arith.constant 0 : index
    %0 = vector.load %arg1[%c0, %c0_0, %c0_1, %c0_2] : memref<1x18x33x4xbf16, #tpu.memory_space<vmem>>, vector<1x17x32x4xbf16>
    %1 = vector.shape_cast %0 : vector<1x17x32x4xbf16> to vector<544x4xbf16>
    %c0_3 = arith.constant 0 : index
    %c0_4 = arith.constant 0 : index
    %c0_5 = arith.constant 0 : index
    %2 = vector.load %arg2[%c0_3, %c0_4, %c0_5] : memref<4x4x128xbf16, #tpu.memory_space<vmem>>, vector<1x4x128xbf16>
    %3 = vector.shape_cast %2 : vector<1x4x128xbf16> to vector<4x128xbf16>
    %cst = arith.constant dense<0.000000e+00> : vector<544x128xf32>
    %4 = tpu.matmul %1, %3, %cst {dimension_numbers = #tpu.dot_dimension_numbers<[1], [0], [0], [1], [0, 0, 1, 1], [], []>} : vector<544x4xbf16>, vector<4x128xbf16>, vector<544x128xf32> -> vector<544x128xf32>
    %c0_6 = arith.constant 0 : index
    %c0_7 = arith.constant 0 : index
    %5 = vector.load %arg5[%c0_6, %c0_7] : memref<544x128xf32, #tpu.memory_space<vmem>>, vector<544x128xf32>
    tpu.vector_store %arg5[%c0_6, %c0_7], %4 {strides = array<i32>} : memref<544x128xf32, #tpu.memory_space<vmem>>, vector<544x128xf32>,
    %c0_8 = arith.constant 0 : index
    %c0_9 = arith.constant 0 : index
    %c1 = arith.constant 1 : index
    %c0_10 = arith.constant 0 : index
    %6 = vector.load %arg1[%c0_8, %c0_9, %c1, %c0_10] : memref<1x18x33x4xbf16, #tpu.memory_space<vmem>>, vector<1x17x32x4xbf16>
    %7 = vector.shape_cast %6 : vector<1x17x32x4xbf16> to vector<544x4xbf16>
    %c1_11 = arith.constant 1 : index
    %c0_12 = arith.constant 0 : index
    %c0_13 = arith.constant 0 : index
    %8 = vector.load %arg2[%c1_11, %c0_12, %c0_13] : memref<4x4x128xbf16, #tpu.memory_space<vmem>>, vector<1x4x128xbf16>
    %9 = vector.shape_cast %8 : vector<1x4x128xbf16> to vector<4x128xbf16>
    %cst_14 = arith.constant dense<0.000000e+00> : vector<544x128xf32>
    %10 = tpu.matmul %7, %9, %cst_14 {dimension_numbers = #tpu.dot_dimension_numbers<[1], [0], [0], [1], [0, 0, 1, 1], [], []>} : vector<544x4xbf16>, vector<4x128xbf16>, vector<544x128xf32> -> vector<544x128xf32>
    %c0_15 = arith.constant 0 : index
    %c0_16 = arith.constant 0 : index
    %11 = vector.load %arg5[%c0_15, %c0_16] : memref<544x128xf32, #tpu.memory_space<vmem>>, vector<544x128xf32>
    %12 = arith.addf %11, %10 : vector<544x128xf32>
    %c0_17 = arith.constant 0 : index
    %c0_18 = arith.constant 0 : index
    %13 = vector.load %arg5[%c0_17, %c0_18] : memref<544x128xf32, #tpu.memory_space<vmem>>, vector<544x128xf32>
    tpu.vector_store %arg5[%c0_17, %c0_18], %12 {strides = array<i32>} : memref<544x128xf32, #tpu.memory_space<vmem>>, vector<544x128xf32>,
    %c0_19 = arith.constant 0 : index
    %c1_20 = arith.constant 1 : index
    %c0_21 = arith.constant 0 : index
    %c0_22 = arith.constant 0 : index
    %14 = vector.load %arg1[%c0_19, %c1_20, %c0_21, %c0_22] : memref<1x18x33x4xbf16, #tpu.memory_space<vmem>>, vector<1x17x32x4xbf16>
    %15 = vector.shape_cast %14 : vector<1x17x32x4xbf16> to vector<544x4xbf16>
    %c2 = arith.constant 2 : index
    %c0_23 = arith.constant 0 : index
    %c0_24 = arith.constant 0 : index
    %16 = vector.load %arg2[%c2, %c0_23, %c0_24] : memref<4x4x128xbf16, #tpu.memory_space<vmem>>, vector<1x4x128xbf16>
    %17 = vector.shape_cast %16 : vector<1x4x128xbf16> to vector<4x128xbf16>
    %cst_25 = arith.constant dense<0.000000e+00> : vector<544x128xf32>
    %18 = tpu.matmul %15, %17, %cst_25 {dimension_numbers = #tpu.dot_dimension_numbers<[1], [0], [0], [1], [0, 0, 1, 1], [], []>} : vector<544x4xbf16>, vector<4x128xbf16>, vector<544x128xf32> -> vector<544x128xf32>
    %c0_26 = arith.constant 0 : index
    %c0_27 = arith.constant 0 : index
    %19 = vector.load %arg5[%c0_26, %c0_27] : memref<544x128xf32, #tpu.memory_space<vmem>>, vector<544x128xf32>
    %20 = arith.addf %19, %18 : vector<544x128xf32>
    %c0_28 = arith.constant 0 : index
    %c0_29 = arith.constant 0 : index
    %21 = vector.load %arg5[%c0_28, %c0_29] : memref<544x128xf32, #tpu.memory_space<vmem>>, vector<544x128xf32>
    tpu.vector_store %arg5[%c0_28, %c0_29], %20 {strides = array<i32>} : memref<544x128xf32, #tpu.memory_space<vmem>>, vector<544x128xf32>,
    %c0_30 = arith.constant 0 : index
    %c1_31 = arith.constant 1 : index
    %c1_32 = arith.constant 1 : index
    %c0_33 = arith.constant 0 : index
    %22 = vector.load %arg1[%c0_30, %c1_31, %c1_32, %c0_33] : memref<1x18x33x4xbf16, #tpu.memory_space<vmem>>, vector<1x17x32x4xbf16>
    %23 = vector.shape_cast %22 : vector<1x17x32x4xbf16> to vector<544x4xbf16>
    %c3 = arith.constant 3 : index
    %c0_34 = arith.constant 0 : index
    %c0_35 = arith.constant 0 : index
    %24 = vector.load %arg2[%c3, %c0_34, %c0_35] : memref<4x4x128xbf16, #tpu.memory_space<vmem>>, vector<1x4x128xbf16>
    %25 = vector.shape_cast %24 : vector<1x4x128xbf16> to vector<4x128xbf16>
    %cst_36 = arith.constant dense<0.000000e+00> : vector<544x128xf32>
    %26 = tpu.matmul %23, %25, %cst_36 {dimension_numbers = #tpu.dot_dimension_numbers<[1], [0], [0], [1], [0, 0, 1, 1], [], []>} : vector<544x4xbf16>, vector<4x128xbf16>, vector<544x128xf32> -> vector<544x128xf32>
    %c0_37 = arith.constant 0 : index
    %c0_38 = arith.constant 0 : index
    %27 = vector.load %arg5[%c0_37, %c0_38] : memref<544x128xf32, #tpu.memory_space<vmem>>, vector<544x128xf32>
    %28 = arith.addf %27, %26 : vector<544x128xf32>
    %c0_39 = arith.constant 0 : index
    %c0_40 = arith.constant 0 : index
    %29 = vector.load %arg5[%c0_39, %c0_40] : memref<544x128xf32, #tpu.memory_space<vmem>>, vector<544x128xf32>
    tpu.vector_store %arg5[%c0_39, %c0_40], %28 {strides = array<i32>} : memref<544x128xf32, #tpu.memory_space<vmem>>, vector<544x128xf32>,
    %c0_41 = arith.constant 0 : index
    %c0_42 = arith.constant 0 : index
    %30 = vector.load %arg5[%c0_41, %c0_42] : memref<544x128xf32, #tpu.memory_space<vmem>>, vector<544x128xf32>
    %c0_43 = arith.constant 0 : index
    %c0_44 = arith.constant 0 : index
    %31 = vector.load %arg3[%c0_43, %c0_44] : memref<1x128xf32, #tpu.memory_space<vmem>>, vector<1x128xf32>
    %32 = vector.broadcast %31 : vector<1x128xf32> to vector<544x128xf32>
    %33 = arith.addf %30, %32 : vector<544x128xf32>
    %c0_45 = arith.constant 0 : index
    %c0_46 = arith.constant 0 : index
    %34 = vector.load %arg4[%c0_45, %c0_46] : memref<544x128xf32, #tpu.memory_space<vmem>>, vector<544x128xf32>
    tpu.vector_store %arg4[%c0_45, %c0_46], %33 {strides = array<i32>} : memref<544x128xf32, #tpu.memory_space<vmem>>, vector<544x128xf32>,
    return
  }
  func.func @transform_0(%arg0: i32) -> (i32, i32, i32, i32) {
    %c0_i32 = arith.constant 0 : i32
    %c0_i32_0 = arith.constant 0 : i32
    %c0_i32_1 = arith.constant 0 : i32
    %c0_i32_2 = arith.constant 0 : i32
    return %arg0, %c0_i32, %c0_i32_0, %c0_i32_1 : i32, i32, i32, i32
  }
  func.func @transform_1(%arg0: i32) -> (i32, i32, i32) {
    %c0_i32 = arith.constant 0 : i32
    %c0_i32_0 = arith.constant 0 : i32
    %c0_i32_1 = arith.constant 0 : i32
    %c0_i32_2 = arith.constant 0 : i32
    return %c0_i32, %c0_i32_0, %c0_i32_1 : i32, i32, i32
  }
  func.func @transform_2(%arg0: i32) -> (i32, i32) {
    %c0_i32 = arith.constant 0 : i32
    %c0_i32_0 = arith.constant 0 : i32
    %c0_i32_1 = arith.constant 0 : i32
    return %c0_i32, %c0_i32_0 : i32, i32
  }
  func.func @transform_3(%arg0: i32) -> (i32, i32) {
    %c0_i32 = arith.constant 0 : i32
    %c0_i32_0 = arith.constant 0 : i32
    return %arg0, %c0_i32 : i32, i32
  }
}

</mosaic_0001>

<bundles_post_ra>
// kernel: tpu_custom_call.1
= control target key start
LH: loop header
LB: loop body
LE: loop exit
PB: predicated region body
PF: predicated region fallthrough
CT: control target
= control target key end

     0   :  { %8 = vsyncpa [#allocation4], 0  ;;  %s7449_s0 = inlined_call_operand.vmem [shape: bf16[2,18,33,4], index: 0, kind: input, shape index: {}]   ;;  %s7450_s1 = inlined_call_operand.vmem [shape: bf16[4,4,128], index: 1, kind: input, shape index: {}]   ;;  %s7451_s2 = inlined_call_operand.vmem [shape: f32[1,128], index: 2, kind: input, shape index: {}]   ;;  %s7452_s3 = inlined_call_operand.hbm [shape: f32[1088,128], index: 3, kind: output, shape index: {}]  }
   0x1   :  { %10 = vsyncpa [#allocation4 + $0x1], 0  ;;  %s6195_s12 = smov 0   ;;  %s6197_s13 = smov 0  }
   0x2   :  { %s6199_s14 = smov 0   ;;  %s6201_s15 = smov 0  }
   0x3 LB: > { %s6216_s16 = sadd.s32 4294967295, %s6170_s15   ;;  %s5137_s17 = sadd.s32 4294967294, %s6170_s15   ;;  %s6170_s15 = sphi %s6201_s15, %s7510_s15   ;;  %s6166_s14 = sphi %s6199_s14, %s7509_s14   ;;  %s6162_s13 = sphi %s6197_s13, %s7508_s13   ;;  %s6158_s12 = sphi %s6195_s12, %s7507_s12  }
   0x4   : > { %s6220_s18 = sadd.s32 1, %s6170_s15   ;;  %s91_s19 = sadd.s32 1, %s6166_s14 }
   0x5   : > { %s88_s20 = ssub.s32 %s6170_s15, %s6220_s18  ;;  %p101_p0 = scmp.ne.s32.totalorder %s6166_s14, %s6162_s13 }
   0x6   : > { %p89_p1 = scmp.eq.s32.totalorder %s88_s20, 0  ;;  %p102_p2 = scmp.eq.s32.totalorder %s6216_s16, 1 }
   0x7   : > { %p107_p3 = scmp.ne.s32.totalorder %s6162_s13, %s6158_s12  ;;  %p108_p4 = scmp.eq.s32.totalorder %s5137_s17, 1 }
   0x8   : > { %s6231_s21 = scalar_select %p89_p1, %s6166_s14, %s91_s19  }
   0x9   : > { %p6233_p5 = por %p102_p2, %p101_p0  ;;  %p6237_p6 = por %p108_p4, %p107_p3 }
   0xa   : > { %p5140_p7 = scmp.ge.s32.totalorder %s6170_s15, 1  ;;  %p140_p8 = scmp.lt.s32.totalorder %s6170_s15, 3 }
   0xc   : > { %p141_p9 = pnand %p5140_p7, %p140_p8 }
   0xe   : > { %144 = sbr.rel (%p141_p9) target bundleno = 532 (0x214), region = 32 }
  0x13   : > { %v239_v0 = vld [vmem:[%s7450_s1] sm:$0x3]  ;;  %vm513_vm0 = vcmask 1041408   ;;  %p164_p10 = scmp.lt.s32.totalorder %s6216_s16, 1  ;;  %v5210_v2 = vld [vmem:[%s7450_s1 + $0x2] sm:$0x3] }
  0x14   : > { %5995 = vmatprep.subr.msk.bf16.mxu0 %vm513_vm0, %v239_v0  ;;  %v515_v1 = vsel %vm513_vm0, %v239_v0, 0  ;;  %v5347_v3 = vld [vmem:[%s7450_s1 + $0x4] sm:$0x3]  ;;  %5996 = vmatprep.subr.msk.bf16.mxu1 %vm513_vm0, %v5210_v2  ;;  %v1933_v4 = vsel %vm513_vm0, %v5210_v2, 0  ;;  %v5501_v5 = vld [vmem:[%s7450_s1 + $0x6] sm:$0x3] }
  0x15   : > { %5716 = vmatpush3.bf16.msra.mxu0 %v515_v1  ;;  %s165_s30 = scalar_select %p164_p10, %s6216_s16, 1  ;;  %5786 = vmatpush3.bf16.msra.mxu1 %v1933_v4  ;;  %vm410_vm1 = vcmask 31744   ;;  %vm975_vm2 = vsmask.f32 3328  ;;  %v2788_v8 = vsel %vm513_vm0, %v5347_v3, 0  ;;  %v4339_v39 = vsel %vm513_vm0, %v5501_v5, 0 }
  0x16   : > { %5997 = vmatprep.subr.msk.bf16.mxu0 %vm513_vm0, %v5347_v3  ;;  %5998 = vmatprep.subr.msk.bf16.mxu1 %vm513_vm0, %v5501_v5  ;;  %vm976_vm3 = vsmask.f32 7440  ;;  %s161_s10 = sand.u32 1, %s6162_s13   ;;  %s5574_s24 = smul.u32 8704, %s6216_s16 }
  0x17   : > { %s6000_s6 = smul.u32 360, %s165_s30  ;;  %vm6284_vm4 = vmor %vm975_vm2, %vm976_vm3  ;;  %s7409_s16 = scalar_lea.sflag [#allocation4], %s161_s10 }
  0x18   : > { %s5999_s11 = smul.u32 544, %s161_s10  ;;  %s7400_s28 = scalar_lea.hbm %s7452_s3, %s5574_s24 }
  0x19   : > { %s6266_s9 = scalar_lea.vmem %s7449_s0, %s6000_s6  ;;  %s6172_s30 = smov [#allocation3]  }
  0x1a   : > { %v6042_v6 = vld [vmem:[%s6266_s9] sm:$0xff]   ;;  %v6043_v7 = vld [vmem:[%s6266_s9 + $0x8] sm:$0xff]   ;;  %v6044_v9 = vld [vmem:[%s6266_s9 + $0x14] sm:$0xff]   ;;  %s7197_s20 = scalar_lea.vmem [#allocation3], %s5999_s11  ;;  %s6114_s4 = sshll.u32 %s6172_s30, 4  ;;  %s6115_s4 = int_to_ptr.vmem [resolvable:$false] %s6114_s4 }
  0x1b   : > { %5717 = vmatprep.mubr.msk.bf16.mxu0 %vm410_vm1, %v6042_v6  ;;  %v890_v10 = vld [vmem:[%s6266_s9] sm:$0xf]  ;;  %v891_v11 = vld [vmem:[%s6266_s9 + $0x4] sm:$0xf]  ;;  %v892_v12 = vld [vmem:[%s6266_s9 + $0x8] sm:$0xf] }
  0x1c   : > { %5718 = vmatmul.mubr.msk.bf16.vlgmr.msra.gmra.mxu0 %vm410_vm1, %v6043_v7  ;;  %v6045_v13 = vld [vmem:[%s6266_s9 + $0x1c] sm:$0xff]   ;;  %v979_v14 = vshrl.u32 %v890_v10, 16  ;;  %v982_v15 = vshll.u32 %v890_v10, 16  ;;  %v988_v16 = vshll.u32 %v891_v11, 16  ;;  %v992_v17 = vshrl.u32 %v891_v11, 16  ;;  %v6046_v35 = vld [vmem:[%s6266_s9 + $0x28] sm:$0xff]  }
  0x1d   : > { %5721 = vmatprep.mubr.msk.bf16.mxu0 %vm410_vm1, %v6044_v9  ;;  %5856 = vmatpush3.bf16.msra.mxu0 %v2788_v8  ;;  %v893_v18 = vld [vmem:[%s6266_s9 + $0xc] sm:$0xf]  ;;  %v998_v19 = vshll.u32 %v892_v12, 16  ;;  %v1002_v20 = vshrl.u32 %v892_v12, 16  ;;  %v894_v21 = vld [vmem:[%s6266_s9 + $0x10] sm:$0x1] }
  0x1e   : > { %v1008_v22 = vshll.u32 %v893_v18, 16  ;;  %v1012_v23 = vshrl.u32 %v893_v18, 16  ;;  %v981_v24 = vrot.slane %v979_v14, 4  ;;  %v984_v25 = vrot.slane %v982_v15, 5  ;;  %v895_v40 = vld [vmem:[%s6266_s9 + $0x14] sm:$0xf] }
  0x1f   : > { %v990_v26 = vrot.slane %v988_v16, 5  ;;  %v994_v27 = vrot.slane %v992_v17, 4  ;;  %v1000_v28 = vrot.slane %v998_v19, 5  ;;  %v1004_v29 = vrot.slane %v1002_v20, 4  ;;  %v896_v41 = vld [vmem:[%s6266_s9 + $0x18] sm:$0xf] }
  0x20   : > { %v1010_v30 = vrot.slane %v1008_v22, 5  ;;  %v1014_v31 = vrot.slane %v1012_v23, 4  ;;  %v985_v32 = vor.u32 %v984_v25, %v981_v24  ;;  %v1018_v34 = vshll.u32 %v894_v21, 16  ;;  %v897_v45 = vld [vmem:[%s6266_s9 + $0x1c] sm:$0xf]  ;;  %v6047_v62 = vld [vmem:[%s6266_s9 + $0x30] sm:$0xff]  }
  0x21   : > { %v995_v33 = vor.u32 %v994_v27, %v990_v26  ;;  %v1005_v37 = vor.u32 %v1004_v29, %v1000_v28  ;;  %v1023_v46 = vshrl.u32 %v895_v40, 16  ;;  %v1026_v49 = vshll.u32 %v895_v40, 16  ;;  %v898_v51 = vld [vmem:[%s6266_s9 + $0x20] sm:$0xf]  ;;  %v899_v56 = vld [vmem:[%s6266_s9 + $0x24] sm:$0x1] }
  0x22   : > { %v1015_v38 = vor.u32 %v1014_v31, %v1010_v30  ;;  %v986_v42 = vrot.slane %v985_v32, 4  ;;  %v1020_v44 = vrot.slane %v1018_v34, 5  ;;  %v1032_v50 = vshll.u32 %v896_v41, 16  ;;  %v6048_v6 = vld [vmem:[%s6266_s9 + $0x3c] sm:$0xff]   ;;  %v900_v7 = vld [vmem:[%s6266_s9 + $0x28] sm:$0xf] }
  0x23   : > { %v996_v43 = vrot.slane %v995_v33, 4  ;;  %v1006_v47 = vrot.slane %v1005_v37, 4  ;;  %v1025_v54 = vrot.slane %v1023_v46, 4  ;;  %v1036_v55 = vshrl.u32 %v896_v41, 16  ;;  %v901_v11 = vld [vmem:[%s6266_s9 + $0x2c] sm:$0xf] }
  0x24   : > { %5722 = vmatmul.mubr.msk.bf16.gmra.mxu0 %vm410_vm1, %v6045_v13  ;;  %v1016_v48 = vrot.slane %v1015_v38, 4  ;;  %v991_v52 = vsel %vm6284_vm4, %v986_v42, %v990_v26  ;;  %v1028_v60 = vrot.slane %v1026_v49, 5  ;;  %v1034_v63 = vrot.slane %v1032_v50, 5  ;;  %v902_v16 = vld [vmem:[%s6266_s9 + $0x30] sm:$0xf]  ;;  %v6049_v34 = vld [vmem:[%s6266_s9 + $0x44] sm:$0xff]  }
  0x25   : > { %5725 = vmatprep.mubr.msk.bf16.mxu0 %vm410_vm1, %v6046_v35  ;;  %v1001_v53 = vsel %vm6284_vm4, %v996_v43, %v1000_v28  ;;  %v1011_v58 = vsel %vm6284_vm4, %v1006_v47, %v1010_v30  ;;  %v1038_v0 = vrot.slane %v1036_v55, 4  ;;  %v1042_v1 = vshll.u32 %v897_v45, 16  ;;  %v903_v21 = vld [vmem:[%s6266_s9 + $0x34] sm:$0xf]  ;;  %v904_v40 = vld [vmem:[%s6266_s9 + $0x38] sm:$0x1] }
  0x26   : > { %v5211_v57 = vcombine.low %v991_v52, %v1001_v53  ;;  %v1021_v59 = vsel %vm6284_vm4, %v1016_v48, %v1020_v44  ;;  %v1029_v2 = vor.u32 %v1028_v60, %v1025_v54  ;;  %v1046_v3 = vshrl.u32 %v897_v45, 16  ;;  %v6050_v45 = vld [vmem:[%s6266_s9 + $0x50] sm:$0xff]   ;;  %v905_v46 = vld [vmem:[%s6266_s9 + $0x3c] sm:$0xf]  ;;  %s5075_s25 = sshll.u32 %s7197_s20, 4  ;;  %s6116_s5 = scalar_lea.vmem %s6115_s4, 17408  ;;  %s7402_s25 = int_to_ptr.vmem [resolvable:$true] %s5075_s25 }
  0x27   : > { %v5212_v61 = vcombine.low %v1011_v58, %v1021_v59  ;;  %v1052_v4 = vshll.u32 %v898_v51, 16  ;;  %v1056_v5 = vshrl.u32 %v898_v51, 16  ;;  %v1039_v8 = vor.u32 %v1038_v0, %v1034_v63  ;;  %v906_v51 = vld [vmem:[%s6266_s9 + $0x40] sm:$0xf]  ;;  %s6110_s29 = scalar_lea.vmem %s7402_s25, 8704  ;;  %p6117_p0 = scmp.lt.s32.totalorder %s7402_s25, %s6115_s4 }
  0x28   : > { %5787 = vmatprep.mubr.msk.bf16.mxu1 %vm410_vm1, %v5211_v57  ;;  %v1044_v9 = vrot.slane %v1042_v1, 5  ;;  %v1062_v10 = vshll.u32 %v899_v56, 16  ;;  %v1030_v12 = vrot.slane %v1029_v2, 4  ;;  %v1048_v13 = vrot.slane %v1046_v3, 4  ;;  %v907_v56 = vld [vmem:[%s6266_s9 + $0x44] sm:$0xf]  ;;  %p6111_p11 = scmp.ne.s32.totalorder %s7402_s25, %s6110_s29  ;;  %p6118_p1 = scmp.lt.s32.totalorder %s6116_s5, %s6110_s29 }
  0x29   : > { %5788 = vmatmul.mubr.msk.bf16.vlgmr.msra.gmra.mxu1 %vm410_vm1, %v5212_v61  ;;  %v1054_v14 = vrot.slane %v1052_v4, 5  ;;  %v1058_v15 = vrot.slane %v1056_v5, 4  ;;  %v1040_v17 = vrot.slane %v1039_v8, 4  ;;  %v1067_v19 = vshrl.u32 %v900_v7, 16  ;;  %v908_v5 = vld [vmem:[%s6266_s9 + $0x48] sm:$0xf] }
  0x2a   : > { %5926 = vmatpush3.bf16.msra.mxu1 %v4339_v39  ;;  %v1064_v18 = vrot.slane %v1062_v10, 5  ;;  %v1070_v20 = vshll.u32 %v900_v7, 16  ;;  %v1035_v22 = vsel %vm6284_vm4, %v1030_v12, %v1034_v63  ;;  %v1049_v23 = vor.u32 %v1048_v13, %v1044_v9  ;;  %p6112_p12 = pnand %p6111_p11, %p6233_p5  ;;  %p6119_p2 = por %p6118_p1, %p6117_p0 }
  0x2b   : > { %v1059_v24 = vor.u32 %v1058_v15, %v1054_v14  ;;  %v1076_v25 = vshll.u32 %v901_v11, 16  ;;  %v1045_v26 = vsel %vm6284_vm4, %v1040_v17, %v1044_v9  ;;  %v1069_v27 = vrot.slane %v1067_v19, 4  ;;  %v6051_v9 = vld [vmem:[%s6266_s9 + $0x58] sm:$0xff]   ;;  %v909_v15 = vld [vmem:[%s6266_s9 + $0x4c] sm:$0x1] }
  0x2c   : > { %5726 = vmatmul.mubr.msk.bf16.gmra.mxu0 %vm410_vm1, %v6047_v62  ;;  %v1072_v28 = vrot.slane %v1070_v20, 5  ;;  %v1080_v29 = vshrl.u32 %v901_v11, 16  ;;  %v5213_v30 = vcombine.low %v1035_v22, %v1045_v26  ;;  %v1050_v31 = vrot.slane %v1049_v23, 4  ;;  %v911_v22 = vld [vmem:[%s6266_s9 + $0x54] sm:$0xf]  ;;  %p6113_p13 = pneg %p6112_p12 }
  0x2d   : > { %5729 = vmatprep.mubr.msk.bf16.mxu0 %vm410_vm1, %v6048_v6  ;;  %v1060_v32 = vrot.slane %v1059_v24, 4  ;;  %v1078_v33 = vrot.slane %v1076_v25, 5  ;;  %v1086_v38 = vshll.u32 %v902_v16, 16  ;;  %v1090_v39 = vshrl.u32 %v902_v16, 16  ;;  %v6052_v16 = vld [vmem:[%s6266_s9 + $0x64] sm:$0xff]  }
  0x2e   : > { %v1073_v35 = vor.u32 %v1072_v28, %v1069_v27  ;;  %v1082_v37 = vrot.slane %v1080_v29, 4  ;;  %5791 = vmatprep.mubr.msk.bf16.mxu1 %vm410_vm1, %v5213_v30  ;;  %v1055_v41 = vsel %vm6284_vm4, %v1050_v31, %v1054_v14  ;;  %v1096_v43 = vshll.u32 %v903_v21, 16  ;;  %p6120_p3 = pnand %p6119_p2, %p6113_p13 }
  0x2f   : > { %v1065_v42 = vsel %vm6284_vm4, %v1060_v32, %v1064_v18  ;;  %v1100_v44 = vshrl.u32 %v903_v21, 16  ;;  %v1088_v50 = vrot.slane %v1086_v38, 5  ;;  %v1092_v52 = vrot.slane %v1090_v39, 4  ;;  %v910_v21 = vld [vmem:[%s6266_s9 + $0x50] sm:$0xf] }
  0x30   : > { %v5214_v47 = vcombine.low %v1055_v41, %v1065_v42  ;;  %v1074_v48 = vrot.slane %v1073_v35, 4  ;;  %v1083_v49 = vor.u32 %v1082_v37, %v1078_v33  ;;  %v1098_v53 = vrot.slane %v1096_v43, 5  ;;  %v912_v39 = vld [vmem:[%s6266_s9 + $0x58] sm:$0xf]  ;;  %v913_v41 = vld [vmem:[%s6266_s9 + $0x5c] sm:$0xf] }
  0x31   : > { %v1102_v54 = vrot.slane %v1100_v44, 4  ;;  %v1106_v55 = vshll.u32 %v904_v40, 16  ;;  %v1111_v59 = vshrl.u32 %v905_v46, 16  ;;  %v1114_v60 = vshll.u32 %v905_v46, 16  ;;  %v914_v46 = vld [vmem:[%s6266_s9 + $0x60] sm:$0x1] }
  0x32   : > { %5792 = vmatmul.mubr.msk.bf16.gmra.mxu1 %vm410_vm1, %v5214_v47  ;;  %v1079_v57 = vsel %vm6284_vm4, %v1074_v48, %v1078_v33  ;;  %v1084_v58 = vrot.slane %v1083_v49, 4  ;;  %v1093_v61 = vor.u32 %v1092_v52, %v1088_v50  ;;  %v1120_v0 = vshll.u32 %v906_v51, 16  ;;  %v915_v52 = vld [vmem:[%s6266_s9 + $0x64] sm:$0xf] }
  0x33   : > { %v1103_v62 = vor.u32 %v1102_v54, %v1098_v53  ;;  %v1108_v63 = vrot.slane %v1106_v55, 5  ;;  %v1113_v2 = vrot.slane %v1111_v59, 4  ;;  %v1116_v3 = vrot.slane %v1114_v60, 5 }
  0x34   : > { %5730 = vmatmul.mubr.msk.bf16.gmra.mxu0 %vm410_vm1, %v6049_v34  ;;  %v1089_v1 = vsel %vm6284_vm4, %v1084_v58, %v1088_v50  ;;  %v1124_v4 = vshrl.u32 %v906_v51, 16  ;;  %v1094_v7 = vrot.slane %v1093_v61, 4  ;;  %v1122_v10 = vrot.slane %v1120_v0, 5  ;;  %v6053_v50 = vld [vmem:[%s6266_s9 + $0x6c] sm:$0xff]   ;;  %v916_v58 = vld [vmem:[%s6266_s9 + $0x68] sm:$0xf] }
  0x35   : > { %5733 = vmatprep.mubr.msk.bf16.mxu0 %vm410_vm1, %v6050_v45  ;;  %v5215_v6 = vcombine.low %v1079_v57, %v1089_v1  ;;  %v1104_v8 = vrot.slane %v1103_v62, 4  ;;  %v1117_v11 = vor.u32 %v1116_v3, %v1113_v2  ;;  %v1130_v13 = vshll.u32 %v907_v56, 16  ;;  %v6054_v57 = vld [vmem:[%s6266_s9 + $0x78] sm:$0xff]  }
  0x36   : > { %v1126_v12 = vrot.slane %v1124_v4, 4  ;;  %v1134_v14 = vshrl.u32 %v907_v56, 16  ;;  %v1099_v17 = vsel %vm6284_vm4, %v1094_v7, %v1098_v53  ;;  %v1140_v19 = vshll.u32 %v908_v5, 16 }
  0x37   : > { %5795 = vmatprep.mubr.msk.bf16.mxu1 %vm410_vm1, %v5215_v6  ;;  %v1109_v18 = vsel %vm6284_vm4, %v1104_v8, %v1108_v63  ;;  %v1144_v20 = vshrl.u32 %v908_v5, 16  ;;  %v1118_v24 = vrot.slane %v1117_v11, 4  ;;  %v1132_v26 = vrot.slane %v1130_v13, 5 }
  0x38   : > { %v5216_v23 = vcombine.low %v1099_v17, %v1109_v18  ;;  %v1127_v25 = vor.u32 %v1126_v12, %v1122_v10  ;;  %v1136_v27 = vrot.slane %v1134_v14, 4  ;;  %v1142_v28 = vrot.slane %v1140_v19, 5  ;;  %v917_v14 = vld [vmem:[%s6266_s9 + $0x6c] sm:$0xf] }
  0x39   : > { %v1146_v29 = vrot.slane %v1144_v20, 4  ;;  %v1150_v30 = vshll.u32 %v909_v15, 16  ;;  %v1123_v31 = vsel %vm6284_vm4, %v1118_v24, %v1122_v10  ;;  %v1155_v33 = vshrl.u32 %v910_v21, 16 }
  0x3a   : > { %5796 = vmatmul.mubr.msk.bf16.gmra.mxu1 %vm410_vm1, %v5216_v23  ;;  %v1128_v32 = vrot.slane %v1127_v25, 4  ;;  %v1158_v34 = vshll.u32 %v910_v21, 16  ;;  %v1137_v35 = vor.u32 %v1136_v27, %v1132_v26  ;;  %v1164_v40 = vshll.u32 %v911_v22, 16  ;;  %v919_v21 = vld [vmem:[%s6266_s9 + $0x74] sm:$0x1]  ;;  %v6055_v25 = vld [vmem:[%s6266_s9 + $0x80] sm:$0xff]  }
  0x3b   : > { %v1147_v37 = vor.u32 %v1146_v29, %v1142_v28  ;;  %v1152_v38 = vrot.slane %v1150_v30, 5  ;;  %v1157_v43 = vrot.slane %v1155_v33, 4  ;;  %v1168_v45 = vshrl.u32 %v911_v22, 16  ;;  %v920_v27 = vld [vmem:[%s6266_s9 + $0x78] sm:$0xf] }
  0x3c   : > { %5734 = vmatmul.mubr.msk.bf16.gmra.mxu0 %vm410_vm1, %v6051_v9  ;;  %v1133_v42 = vsel %vm6284_vm4, %v1128_v32, %v1132_v26  ;;  %v1160_v44 = vrot.slane %v1158_v34, 5  ;;  %v1138_v48 = vrot.slane %v1137_v35, 4  ;;  %v1166_v51 = vrot.slane %v1164_v40, 5  ;;  %v6056_v32 = vld [vmem:[%s6266_s9 + $0x8c] sm:$0xff]  }
  0x3d   : > { %5737 = vmatprep.mubr.msk.bf16.mxu0 %vm410_vm1, %v6052_v16  ;;  %v5217_v47 = vcombine.low %v1123_v31, %v1133_v42  ;;  %v1148_v49 = vrot.slane %v1147_v37, 4  ;;  %v1170_v54 = vrot.slane %v1168_v45, 4  ;;  %v1174_v55 = vshll.u32 %v912_v39, 16  ;;  %v918_v16 = vld [vmem:[%s6266_s9 + $0x70] sm:$0xf] }
  0x3e   : > { %v1161_v53 = vor.u32 %v1160_v44, %v1157_v43  ;;  %v1178_v56 = vshrl.u32 %v912_v39, 16  ;;  %v1143_v59 = vsel %vm6284_vm4, %v1138_v48, %v1142_v28  ;;  %v1184_v61 = vshll.u32 %v913_v41, 16  ;;  %v921_v42 = vld [vmem:[%s6266_s9 + $0x7c] sm:$0xf] }
  0x3f   : > { %5799 = vmatprep.mubr.msk.bf16.mxu1 %vm410_vm1, %v5217_v47  ;;  %v1153_v60 = vsel %vm6284_vm4, %v1148_v49, %v1152_v38  ;;  %v1188_v62 = vshrl.u32 %v913_v41, 16  ;;  %v1171_v1 = vor.u32 %v1170_v54, %v1166_v51  ;;  %v1176_v2 = vrot.slane %v1174_v55, 5  ;;  %v922_v49 = vld [vmem:[%s6266_s9 + $0x80] sm:$0xf] }
  0x40   : > { %v5218_v63 = vcombine.low %v1143_v59, %v1153_v60  ;;  %v1162_v0 = vrot.slane %v1161_v53, 4  ;;  %v1180_v3 = vrot.slane %v1178_v56, 4  ;;  %v1186_v4 = vrot.slane %v1184_v61, 5  ;;  %v923_v56 = vld [vmem:[%s6266_s9 + $0x84] sm:$0xf] }
  0x41   : > { %v1190_v5 = vrot.slane %v1188_v62, 4  ;;  %v1194_v6 = vshll.u32 %v914_v46, 16  ;;  %v1172_v8 = vrot.slane %v1171_v1, 4  ;;  %v1199_v9 = vshrl.u32 %v915_v52, 16  ;;  %v924_v61 = vld [vmem:[%s6266_s9 + $0x88] sm:$0x1] }
  0x42   : > { %5800 = vmatmul.mubr.msk.bf16.gmra.mxu1 %vm410_vm1, %v5218_v63  ;;  %v1167_v7 = vsel %vm6284_vm4, %v1162_v0, %v1166_v51  ;;  %v1202_v10 = vshll.u32 %v915_v52, 16  ;;  %v1181_v11 = vor.u32 %v1180_v3, %v1176_v2  ;;  %v1208_v15 = vshll.u32 %v916_v58, 16 }
  0x43   : > { %v1191_v12 = vor.u32 %v1190_v5, %v1186_v4  ;;  %v1196_v13 = vrot.slane %v1194_v6, 5  ;;  %v1177_v17 = vsel %vm6284_vm4, %v1172_v8, %v1176_v2  ;;  %v1201_v18 = vrot.slane %v1199_v9, 4  ;;  %v6057_v2 = vld [vmem:[%s6266_s9 + $0x94] sm:$0xff]  }
  0x44   : > { %5738 = vmatmul.mubr.msk.bf16.gmra.mxu0 %vm410_vm1, %v6053_v50  ;;  %v1204_v19 = vrot.slane %v1202_v10, 5  ;;  %v1212_v20 = vshrl.u32 %v916_v58, 16  ;;  %v5219_v22 = vcombine.low %v1167_v7, %v1177_v17  ;;  %v1182_v23 = vrot.slane %v1181_v11, 4  ;;  %v6058_v11 = vld [vmem:[%s6266_s9 + $0xa0] sm:$0xff]   ;;  %v926_v17 = vld [vmem:[%s6266_s9 + $0x90] sm:$0xf] }
  0x45   : > { %5741 = vmatprep.mubr.msk.bf16.mxu0 %vm410_vm1, %v6054_v57  ;;  %v1192_v24 = vrot.slane %v1191_v12, 4  ;;  %v1210_v26 = vrot.slane %v1208_v15, 5  ;;  %v1218_v30 = vshll.u32 %v917_v14, 16  ;;  %v1222_v31 = vshrl.u32 %v917_v14, 16  ;;  %v925_v12 = vld [vmem:[%s6266_s9 + $0x8c] sm:$0xf] }
  0x46   : > { %v1205_v28 = vor.u32 %v1204_v19, %v1201_v18  ;;  %v1214_v29 = vrot.slane %v1212_v20, 4  ;;  %5803 = vmatprep.mubr.msk.bf16.mxu1 %vm410_vm1, %v5219_v22  ;;  %v1187_v33 = vsel %vm6284_vm4, %v1182_v23, %v1186_v4  ;;  %v1228_v35 = vshll.u32 %v918_v16, 16  ;;  %v927_v22 = vld [vmem:[%s6266_s9 + $0x94] sm:$0xf] }
  0x47   : > { %v1197_v34 = vsel %vm6284_vm4, %v1192_v24, %v1196_v13  ;;  %v1232_v37 = vshrl.u32 %v918_v16, 16  ;;  %v1220_v41 = vrot.slane %v1218_v30, 5  ;;  %v1224_v43 = vrot.slane %v1222_v31, 4 }
  0x48   : > { %v5220_v38 = vcombine.low %v1187_v33, %v1197_v34  ;;  %v1206_v39 = vrot.slane %v1205_v28, 4  ;;  %v1215_v40 = vor.u32 %v1214_v29, %v1210_v26  ;;  %v1230_v44 = vrot.slane %v1228_v35, 5 }
  0x49   : > { %v1234_v45 = vrot.slane %v1232_v37, 4  ;;  %v1238_v46 = vshll.u32 %v919_v21, 16  ;;  %v1243_v50 = vshrl.u32 %v920_v27, 16  ;;  %v1246_v51 = vshll.u32 %v920_v27, 16  ;;  %v928_v27 = vld [vmem:[%s6266_s9 + $0x98] sm:$0xf] }
  0x4a   : > { %5804 = vmatmul.mubr.msk.bf16.gmra.mxu1 %vm410_vm1, %v5220_v38  ;;  %v1211_v47 = vsel %vm6284_vm4, %v1206_v39, %v1210_v26  ;;  %v1216_v48 = vrot.slane %v1215_v40, 4  ;;  %v1225_v52 = vor.u32 %v1224_v43, %v1220_v41  ;;  %v1252_v55 = vshll.u32 %v921_v42, 16 }
  0x4b   : > { %v1235_v53 = vor.u32 %v1234_v45, %v1230_v44  ;;  %v1240_v54 = vrot.slane %v1238_v46, 5  ;;  %v1245_v58 = vrot.slane %v1243_v50, 4  ;;  %v1248_v59 = vrot.slane %v1246_v51, 5  ;;  %v929_v46 = vld [vmem:[%s6266_s9 + $0x9c] sm:$0x1]  ;;  %v6060_v51 = vld [vmem:[%s6266_s9 + $0xb4] sm:$0xff]  }
  0x4c   : > { %5742 = vmatmul.mubr.msk.bf16.gmra.mxu0 %vm410_vm1, %v6055_v25  ;;  %v1221_v57 = vsel %vm6284_vm4, %v1216_v48, %v1220_v41  ;;  %v1256_v60 = vshrl.u32 %v921_v42, 16  ;;  %v1226_v63 = vrot.slane %v1225_v52, 4  ;;  %v1254_v1 = vrot.slane %v1252_v55, 5  ;;  %v6059_v41 = vld [vmem:[%s6266_s9 + $0xa8] sm:$0xff]   ;;  %v930_v52 = vld [vmem:[%s6266_s9 + $0xa0] sm:$0xf] }
  0x4d   : > { %5745 = vmatprep.mubr.msk.bf16.mxu0 %vm410_vm1, %v6056_v32  ;;  %v5221_v62 = vcombine.low %v1211_v47, %v1221_v57  ;;  %v1236_v0 = vrot.slane %v1235_v53, 4  ;;  %v1249_v3 = vor.u32 %v1248_v59, %v1245_v58  ;;  %v1262_v5 = vshll.u32 %v922_v49, 16  ;;  %v931_v57 = vld [vmem:[%s6266_s9 + $0xa4] sm:$0xf] }
  0x4e   : > { %v1258_v4 = vrot.slane %v1256_v60, 4  ;;  %v1266_v6 = vshrl.u32 %v922_v49, 16  ;;  %v1231_v7 = vsel %vm6284_vm4, %v1226_v63, %v1230_v44  ;;  %v1272_v9 = vshll.u32 %v923_v56, 16 }
  0x4f   : > { %5807 = vmatprep.mubr.msk.bf16.mxu1 %vm410_vm1, %v5221_v62  ;;  %v1241_v8 = vsel %vm6284_vm4, %v1236_v0, %v1240_v54  ;;  %v1276_v10 = vshrl.u32 %v923_v56, 16  ;;  %v1250_v14 = vrot.slane %v1249_v3, 4  ;;  %v1264_v16 = vrot.slane %v1262_v5, 5  ;;  %v932_v5 = vld [vmem:[%s6266_s9 + $0xa8] sm:$0xf] }
  0x50   : > { %v5222_v13 = vcombine.low %v1231_v7, %v1241_v8  ;;  %v1259_v15 = vor.u32 %v1258_v4, %v1254_v1  ;;  %v1268_v18 = vrot.slane %v1266_v6, 4  ;;  %v1274_v19 = vrot.slane %v1272_v9, 5 }
  0x51   : > { %v1278_v20 = vrot.slane %v1276_v10, 4  ;;  %v1282_v21 = vshll.u32 %v924_v61, 16  ;;  %v1255_v23 = vsel %vm6284_vm4, %v1250_v14, %v1254_v1  ;;  %v1287_v25 = vshrl.u32 %v925_v12, 16 }
  0x52   : > { %5808 = vmatmul.mubr.msk.bf16.gmra.mxu1 %vm410_vm1, %v5222_v13  ;;  %v1260_v24 = vrot.slane %v1259_v15, 4  ;;  %v1290_v26 = vshll.u32 %v925_v12, 16  ;;  %v1269_v28 = vor.u32 %v1268_v18, %v1264_v16  ;;  %v1296_v31 = vshll.u32 %v926_v17, 16  ;;  %v6061_v15 = vld [vmem:[%s6266_s9 + $0xbc] sm:$0xff]  }
  0x53   : > { %v1279_v29 = vor.u32 %v1278_v20, %v1274_v19  ;;  %v1284_v30 = vrot.slane %v1282_v21, 5  ;;  %v1289_v33 = vrot.slane %v1287_v25, 4  ;;  %v1300_v35 = vshrl.u32 %v926_v17, 16  ;;  %v934_v17 = vld [vmem:[%s6266_s9 + $0xb0] sm:$0x1] }
  0x54   : > { %5746 = vmatmul.mubr.msk.bf16.gmra.mxu0 %vm410_vm1, %v6057_v2  ;;  %v1265_v32 = vsel %vm6284_vm4, %v1260_v24, %v1264_v16  ;;  %v1292_v34 = vrot.slane %v1290_v26, 5  ;;  %v1270_v38 = vrot.slane %v1269_v28, 4  ;;  %v1298_v40 = vrot.slane %v1296_v31, 5  ;;  %v936_v28 = vld [vmem:[%s6266_s9 + $0xb8] sm:$0xf] }
  0x55   : > { %5749 = vmatprep.mubr.msk.bf16.mxu0 %vm410_vm1, %v6058_v11  ;;  %v5223_v37 = vcombine.low %v1255_v23, %v1265_v32  ;;  %v1280_v39 = vrot.slane %v1279_v29, 4  ;;  %v1302_v43 = vrot.slane %v1300_v35, 4  ;;  %v1306_v44 = vshll.u32 %v927_v22, 16  ;;  %v933_v11 = vld [vmem:[%s6266_s9 + $0xac] sm:$0xf] }
  0x56   : > { %v1293_v42 = vor.u32 %v1292_v34, %v1289_v33  ;;  %v1310_v45 = vshrl.u32 %v927_v22, 16  ;;  %v1275_v47 = vsel %vm6284_vm4, %v1270_v38, %v1274_v19  ;;  %v1316_v49 = vshll.u32 %v928_v27, 16  ;;  %v6062_v22 = vld [vmem:[%s6266_s9 + $0xc8] sm:$0xff]   ;;  %v935_v23 = vld [vmem:[%s6266_s9 + $0xb4] sm:$0xf] }
  0x57   : > { %5811 = vmatprep.mubr.msk.bf16.mxu1 %vm410_vm1, %v5223_v37  ;;  %v1285_v48 = vsel %vm6284_vm4, %v1280_v39, %v1284_v30  ;;  %v1320_v50 = vshrl.u32 %v928_v27, 16  ;;  %v1303_v55 = vor.u32 %v1302_v43, %v1298_v40  ;;  %v1308_v56 = vrot.slane %v1306_v44, 5 }
  0x58   : > { %v5224_v53 = vcombine.low %v1275_v47, %v1285_v48  ;;  %v1294_v54 = vrot.slane %v1293_v42, 4  ;;  %v1312_v58 = vrot.slane %v1310_v45, 4  ;;  %v1318_v59 = vrot.slane %v1316_v49, 5  ;;  %v937_v45 = vld [vmem:[%s6266_s9 + $0xbc] sm:$0xf] }
  0x59   : > { %v1322_v60 = vrot.slane %v1320_v50, 4  ;;  %v1326_v61 = vshll.u32 %v929_v46, 16  ;;  %v1304_v63 = vrot.slane %v1303_v55, 4  ;;  %v1331_v0 = vshrl.u32 %v930_v52, 16  ;;  %v938_v47 = vld [vmem:[%s6266_s9 + $0xc0] sm:$0xf] }
  0x5a   : > { %5812 = vmatmul.mubr.msk.bf16.gmra.mxu1 %vm410_vm1, %v5224_v53  ;;  %v1299_v62 = vsel %vm6284_vm4, %v1294_v54, %v1298_v40  ;;  %v1334_v1 = vshll.u32 %v930_v52, 16  ;;  %v1313_v2 = vor.u32 %v1312_v58, %v1308_v56  ;;  %v1340_v6 = vshll.u32 %v931_v57, 16  ;;  %v939_v52 = vld [vmem:[%s6266_s9 + $0xc4] sm:$0x1]  ;;  %v940_v58 = vld [vmem:[%s6266_s9 + $0xc8] sm:$0xf] }
  0x5b   : > { %v1323_v3 = vor.u32 %v1322_v60, %v1318_v59  ;;  %v1328_v4 = vrot.slane %v1326_v61, 5  ;;  %v1309_v7 = vsel %vm6284_vm4, %v1304_v63, %v1308_v56  ;;  %v1333_v8 = vrot.slane %v1331_v0, 4  ;;  %v6063_v56 = vld [vmem:[%s6266_s9 + $0xd0] sm:$0xff]   ;;  %v6064_v63 = vld [vmem:[%s6266_s9 + $0xdc] sm:$0xff]  }
  0x5c   : > { %5750 = vmatmul.mubr.msk.bf16.gmra.mxu0 %vm410_vm1, %v6059_v41  ;;  %v1336_v9 = vrot.slane %v1334_v1, 5  ;;  %v1344_v10 = vshrl.u32 %v931_v57, 16  ;;  %v5225_v12 = vcombine.low %v1299_v62, %v1309_v7  ;;  %v1314_v13 = vrot.slane %v1313_v2, 4 }
  0x5d   : > { %5753 = vmatprep.mubr.msk.bf16.mxu0 %vm410_vm1, %v6060_v51  ;;  %v1324_v14 = vrot.slane %v1323_v3, 4  ;;  %v1342_v16 = vrot.slane %v1340_v6, 5  ;;  %v1350_v20 = vshll.u32 %v932_v5, 16  ;;  %v1354_v21 = vshrl.u32 %v932_v5, 16 }
  0x5e   : > { %v1337_v18 = vor.u32 %v1336_v9, %v1333_v8  ;;  %v1346_v19 = vrot.slane %v1344_v10, 4  ;;  %5815 = vmatprep.mubr.msk.bf16.mxu1 %vm410_vm1, %v5225_v12  ;;  %v1319_v24 = vsel %vm6284_vm4, %v1314_v13, %v1318_v59  ;;  %v1360_v26 = vshll.u32 %v933_v11, 16  ;;  %v941_v8 = vld [vmem:[%s6266_s9 + $0xcc] sm:$0xf] }
  0x5f   : > { %v1329_v25 = vsel %vm6284_vm4, %v1324_v14, %v1328_v4  ;;  %v1364_v27 = vshrl.u32 %v933_v11, 16  ;;  %v1352_v32 = vrot.slane %v1350_v20, 5  ;;  %v1356_v33 = vrot.slane %v1354_v21, 4  ;;  %v942_v20 = vld [vmem:[%s6266_s9 + $0xd0] sm:$0xf] }
  0x60   : > { %v5226_v29 = vcombine.low %v1319_v24, %v1329_v25  ;;  %v1338_v30 = vrot.slane %v1337_v18, 4  ;;  %v1347_v31 = vor.u32 %v1346_v19, %v1342_v16  ;;  %v1362_v34 = vrot.slane %v1360_v26, 5 }
  0x61   : > { %v1366_v35 = vrot.slane %v1364_v27, 4  ;;  %v1370_v37 = vshll.u32 %v934_v17, 16  ;;  %v1375_v40 = vshrl.u32 %v935_v23, 16  ;;  %v1378_v41 = vshll.u32 %v935_v23, 16  ;;  %v944_v27 = vld [vmem:[%s6266_s9 + $0xd8] sm:$0x1] }
  0x62   : > { %5816 = vmatmul.mubr.msk.bf16.gmra.mxu1 %vm410_vm1, %v5226_v29  ;;  %v1343_v38 = vsel %vm6284_vm4, %v1338_v30, %v1342_v16  ;;  %v1348_v39 = vrot.slane %v1347_v31, 4  ;;  %v1357_v42 = vor.u32 %v1356_v33, %v1352_v32  ;;  %v1384_v46 = vshll.u32 %v936_v28, 16  ;;  %v6065_v31 = vld [vmem:[%s6266_s9 + $0xe4] sm:$0xff]  }
  0x63   : > { %v1367_v43 = vor.u32 %v1366_v35, %v1362_v34  ;;  %v1372_v44 = vrot.slane %v1370_v37, 5  ;;  %v1377_v49 = vrot.slane %v1375_v40, 4  ;;  %v1380_v50 = vrot.slane %v1378_v41, 5 }
  0x64   : > { %5754 = vmatmul.mubr.msk.bf16.gmra.mxu0 %vm410_vm1, %v6061_v15  ;;  %v1353_v48 = vsel %vm6284_vm4, %v1348_v39, %v1352_v32  ;;  %v1388_v51 = vshrl.u32 %v936_v28, 16  ;;  %v1358_v54 = vrot.slane %v1357_v42, 4  ;;  %v1386_v57 = vrot.slane %v1384_v46, 5 }
  0x65   : > { %5757 = vmatprep.mubr.msk.bf16.mxu0 %vm410_vm1, %v6062_v22  ;;  %v5227_v53 = vcombine.low %v1343_v38, %v1353_v48  ;;  %v1368_v55 = vrot.slane %v1367_v43, 4  ;;  %v1381_v59 = vor.u32 %v1380_v50, %v1377_v49  ;;  %v1394_v61 = vshll.u32 %v937_v45, 16  ;;  %v943_v22 = vld [vmem:[%s6266_s9 + $0xd4] sm:$0xf]  ;;  %v945_v43 = vld [vmem:[%s6266_s9 + $0xdc] sm:$0xf] }
  0x66   : > { %v1390_v60 = vrot.slane %v1388_v51, 4  ;;  %v1398_v62 = vshrl.u32 %v937_v45, 16  ;;  %v1363_v0 = vsel %vm6284_vm4, %v1358_v54, %v1362_v34  ;;  %v1404_v2 = vshll.u32 %v938_v47, 16  ;;  %v6066_v38 = vld [vmem:[%s6266_s9 + $0xf0] sm:$0xff]   ;;  %v946_v48 = vld [vmem:[%s6266_s9 + $0xe0] sm:$0xf] }
  0x67   : > { %5819 = vmatprep.mubr.msk.bf16.mxu1 %vm410_vm1, %v5227_v53  ;;  %v1373_v1 = vsel %vm6284_vm4, %v1368_v55, %v1372_v44  ;;  %v1408_v3 = vshrl.u32 %v938_v47, 16  ;;  %v1382_v5 = vrot.slane %v1381_v59, 4  ;;  %v1396_v7 = vrot.slane %v1394_v61, 5  ;;  %v947_v53 = vld [vmem:[%s6266_s9 + $0xe4] sm:$0xf] }
  0x68   : > { %v5228_v4 = vcombine.low %v1363_v0, %v1373_v1  ;;  %v1391_v6 = vor.u32 %v1390_v60, %v1386_v57  ;;  %v1400_v9 = vrot.slane %v1398_v62, 4  ;;  %v1406_v10 = vrot.slane %v1404_v2, 5 }
  0x69   : > { %v1410_v11 = vrot.slane %v1408_v3, 4  ;;  %v1414_v12 = vshll.u32 %v939_v52, 16  ;;  %v1387_v13 = vsel %vm6284_vm4, %v1382_v5, %v1386_v57  ;;  %v1419_v15 = vshrl.u32 %v940_v58, 16 }
  0x6a   : > { %5820 = vmatmul.mubr.msk.bf16.gmra.mxu1 %vm410_vm1, %v5228_v4  ;;  %v1392_v14 = vrot.slane %v1391_v6, 4  ;;  %v1422_v16 = vshll.u32 %v940_v58, 16  ;;  %v1401_v17 = vor.u32 %v1400_v9, %v1396_v7  ;;  %v1428_v21 = vshll.u32 %v941_v8, 16  ;;  %v948_v58 = vld [vmem:[%s6266_s9 + $0xe8] sm:$0xf] }
  0x6b   : > { %v1411_v18 = vor.u32 %v1410_v11, %v1406_v10  ;;  %v1416_v19 = vrot.slane %v1414_v12, 5  ;;  %v1421_v24 = vrot.slane %v1419_v15, 4  ;;  %v1432_v26 = vshrl.u32 %v941_v8, 16  ;;  %v949_v12 = vld [vmem:[%s6266_s9 + $0xec] sm:$0x1] }
  0x6c   : > { %5758 = vmatmul.mubr.msk.bf16.gmra.mxu0 %vm410_vm1, %v6063_v56  ;;  %v1397_v23 = vsel %vm6284_vm4, %v1392_v14, %v1396_v7  ;;  %v1424_v25 = vrot.slane %v1422_v16, 5  ;;  %v1402_v29 = vrot.slane %v1401_v17, 4  ;;  %v1430_v32 = vrot.slane %v1428_v21, 5  ;;  %v6067_v7 = vld [vmem:[%s6266_s9 + $0xf8] sm:$0xff]   ;;  %v6068_v17 = vld [vmem:[%s6266_s9 + $0x104] sm:$0xff]  }
  0x6d   : > { %5761 = vmatprep.mubr.msk.bf16.mxu0 %vm410_vm1, %v6064_v63  ;;  %v5229_v28 = vcombine.low %v1387_v13, %v1397_v23  ;;  %v1412_v30 = vrot.slane %v1411_v18, 4  ;;  %v1434_v34 = vrot.slane %v1432_v26, 4  ;;  %v1438_v35 = vshll.u32 %v942_v20, 16  ;;  %v950_v18 = vld [vmem:[%s6266_s9 + $0xf0] sm:$0xf] }
  0x6e   : > { %v1425_v33 = vor.u32 %v1424_v25, %v1421_v24  ;;  %v1442_v37 = vshrl.u32 %v942_v20, 16  ;;  %v1407_v39 = vsel %vm6284_vm4, %v1402_v29, %v1406_v10  ;;  %v1448_v41 = vshll.u32 %v943_v22, 16  ;;  %v951_v23 = vld [vmem:[%s6266_s9 + $0xf4] sm:$0xf] }
  0x6f   : > { %5823 = vmatprep.mubr.msk.bf16.mxu1 %vm410_vm1, %v5229_v28  ;;  %v1417_v40 = vsel %vm6284_vm4, %v1412_v30, %v1416_v19  ;;  %v1452_v42 = vshrl.u32 %v943_v22, 16  ;;  %v1435_v46 = vor.u32 %v1434_v34, %v1430_v32  ;;  %v1440_v47 = vrot.slane %v1438_v35, 5  ;;  %v952_v28 = vld [vmem:[%s6266_s9 + $0xf8] sm:$0xf] }
  0x70   : > { %v5230_v44 = vcombine.low %v1407_v39, %v1417_v40  ;;  %v1426_v45 = vrot.slane %v1425_v33, 4  ;;  %v1444_v49 = vrot.slane %v1442_v37, 4  ;;  %v1450_v50 = vrot.slane %v1448_v41, 5 }
  0x71   : > { %v1454_v51 = vrot.slane %v1452_v42, 4  ;;  %v1458_v52 = vshll.u32 %v944_v27, 16  ;;  %v1436_v55 = vrot.slane %v1435_v46, 4  ;;  %v1463_v56 = vshrl.u32 %v945_v43, 16  ;;  %v953_v42 = vld [vmem:[%s6266_s9 + $0xfc] sm:$0xf] }
  0x72   : > { %5824 = vmatmul.mubr.msk.bf16.gmra.mxu1 %vm410_vm1, %v5230_v44  ;;  %v1431_v54 = vsel %vm6284_vm4, %v1426_v45, %v1430_v32  ;;  %v1466_v57 = vshll.u32 %v945_v43, 16  ;;  %v1445_v59 = vor.u32 %v1444_v49, %v1440_v47  ;;  %v1472_v62 = vshll.u32 %v946_v48, 16  ;;  %v6069_v46 = vld [vmem:[%s6266_s9 + $0x10c] sm:$0xff]  }
  0x73   : > { %v1455_v60 = vor.u32 %v1454_v51, %v1450_v50  ;;  %v1460_v61 = vrot.slane %v1458_v52, 5  ;;  %v1441_v63 = vsel %vm6284_vm4, %v1436_v55, %v1440_v47  ;;  %v1465_v0 = vrot.slane %v1463_v56, 4  ;;  %v954_v52 = vld [vmem:[%s6266_s9 + $0x100] sm:$0x1] }
  0x74   : > { %5762 = vmatmul.mubr.msk.bf16.gmra.mxu0 %vm410_vm1, %v6065_v31  ;;  %v1468_v1 = vrot.slane %v1466_v57, 5  ;;  %v1476_v2 = vshrl.u32 %v946_v48, 16  ;;  %v5231_v3 = vcombine.low %v1431_v54, %v1441_v63  ;;  %v1446_v4 = vrot.slane %v1445_v59, 4  ;;  %v956_v59 = vld [vmem:[%s6266_s9 + $0x108] sm:$0xf] }
  0x75   : > { %5765 = vmatprep.mubr.msk.bf16.mxu0 %vm410_vm1, %v6066_v38  ;;  %v1456_v5 = vrot.slane %v1455_v60, 4  ;;  %v1474_v6 = vrot.slane %v1472_v62, 5  ;;  %v1482_v10 = vshll.u32 %v947_v53, 16  ;;  %v1486_v11 = vshrl.u32 %v947_v53, 16  ;;  %v6070_v53 = vld [vmem:[%s6266_s9 + $0x118] sm:$0xff]  }
  0x76   : > { %v1469_v8 = vor.u32 %v1468_v1, %v1465_v0  ;;  %v1478_v9 = vrot.slane %v1476_v2, 4  ;;  %5827 = vmatprep.mubr.msk.bf16.mxu1 %vm410_vm1, %v5231_v3  ;;  %v1451_v13 = vsel %vm6284_vm4, %v1446_v4, %v1450_v50  ;;  %v1492_v15 = vshll.u32 %v948_v58, 16 }
  0x77   : > { %v1461_v14 = vsel %vm6284_vm4, %v1456_v5, %v1460_v61  ;;  %v1496_v16 = vshrl.u32 %v948_v58, 16  ;;  %v1484_v22 = vrot.slane %v1482_v10, 5  ;;  %v1488_v24 = vrot.slane %v1486_v11, 4  ;;  %v955_v58 = vld [vmem:[%s6266_s9 + $0x104] sm:$0xf] }
  0x78   : > { %v5232_v19 = vcombine.low %v1451_v13, %v1461_v14  ;;  %v1470_v20 = vrot.slane %v1469_v8, 4  ;;  %v1479_v21 = vor.u32 %v1478_v9, %v1474_v6  ;;  %v1494_v25 = vrot.slane %v1492_v15, 5  ;;  %v958_v13 = vld [vmem:[%s6266_s9 + $0x110] sm:$0xf] }
  0x79   : > { %v1498_v26 = vrot.slane %v1496_v16, 4  ;;  %v1502_v27 = vshll.u32 %v949_v12, 16  ;;  %v1507_v31 = vshrl.u32 %v950_v18, 16  ;;  %v1510_v32 = vshll.u32 %v950_v18, 16  ;;  %v959_v18 = vld [vmem:[%s6266_s9 + $0x114] sm:$0x1] }
  0x7a   : > { %5828 = vmatmul.mubr.msk.bf16.gmra.mxu1 %vm410_vm1, %v5232_v19  ;;  %v1475_v29 = vsel %vm6284_vm4, %v1470_v20, %v1474_v6  ;;  %v1480_v30 = vrot.slane %v1479_v21, 4  ;;  %v1489_v33 = vor.u32 %v1488_v24, %v1484_v22  ;;  %v1516_v37 = vshll.u32 %v951_v23, 16  ;;  %v957_v6 = vld [vmem:[%s6266_s9 + $0x10c] sm:$0xf]  ;;  %v960_v24 = vld [vmem:[%s6266_s9 + $0x118] sm:$0xf] }
  0x7b   : > { %v1499_v34 = vor.u32 %v1498_v26, %v1494_v25  ;;  %v1504_v35 = vrot.slane %v1502_v27, 5  ;;  %v1509_v39 = vrot.slane %v1507_v31, 4  ;;  %v1512_v40 = vrot.slane %v1510_v32, 5 }
  0x7c   : > { %5766 = vmatmul.mubr.msk.bf16.gmra.mxu0 %vm410_vm1, %v6067_v7  ;;  %v1485_v38 = vsel %vm6284_vm4, %v1480_v30, %v1484_v22  ;;  %v1520_v41 = vshrl.u32 %v951_v23, 16  ;;  %v1490_v44 = vrot.slane %v1489_v33, 4  ;;  %v1518_v47 = vrot.slane %v1516_v37, 5  ;;  %v6071_v22 = vld [vmem:[%s6266_s9 + $0x120] sm:$0xff]   ;;  %v961_v30 = vld [vmem:[%s6266_s9 + $0x11c] sm:$0xf] }
  0x7d   : > { %5769 = vmatprep.mubr.msk.bf16.mxu0 %vm410_vm1, %v6068_v17  ;;  %v5233_v43 = vcombine.low %v1475_v29, %v1485_v38  ;;  %v1500_v45 = vrot.slane %v1499_v34, 4  ;;  %v1513_v48 = vor.u32 %v1512_v40, %v1509_v39  ;;  %v1526_v50 = vshll.u32 %v952_v28, 16  ;;  %v6072_v29 = vld [vmem:[%s6266_s9 + $0x12c] sm:$0xff]  }
  0x7e   : > { %v1522_v49 = vrot.slane %v1520_v41, 4  ;;  %v1530_v51 = vshrl.u32 %v952_v28, 16  ;;  %v1495_v54 = vsel %vm6284_vm4, %v1490_v44, %v1494_v25  ;;  %v1536_v56 = vshll.u32 %v953_v42, 16 }
  0x7f   : > { %5831 = vmatprep.mubr.msk.bf16.mxu1 %vm410_vm1, %v5233_v43  ;;  %v1505_v55 = vsel %vm6284_vm4, %v1500_v45, %v1504_v35  ;;  %v1540_v57 = vshrl.u32 %v953_v42, 16  ;;  %v1514_v61 = vrot.slane %v1513_v48, 4  ;;  %v1528_v63 = vrot.slane %v1526_v50, 5 }
  0x80   : > { %v5234_v60 = vcombine.low %v1495_v54, %v1505_v55  ;;  %v1523_v62 = vor.u32 %v1522_v49, %v1518_v47  ;;  %v1532_v0 = vrot.slane %v1530_v51, 4  ;;  %v1538_v1 = vrot.slane %v1536_v56, 5  ;;  %v962_v51 = vld [vmem:[%s6266_s9 + $0x120] sm:$0xf] }
  0x81   : > { %v1542_v2 = vrot.slane %v1540_v57, 4  ;;  %v1546_v3 = vshll.u32 %v954_v52, 16  ;;  %v1519_v4 = vsel %vm6284_vm4, %v1514_v61, %v1518_v47  ;;  %v1551_v7 = vshrl.u32 %v955_v58, 16 }
  0x82   : > { %5832 = vmatmul.mubr.msk.bf16.gmra.mxu1 %vm410_vm1, %v5234_v60  ;;  %v1524_v5 = vrot.slane %v1523_v62, 4  ;;  %v1554_v8 = vshll.u32 %v955_v58, 16  ;;  %v1533_v9 = vor.u32 %v1532_v0, %v1528_v63  ;;  %v1560_v12 = vshll.u32 %v956_v59, 16  ;;  %v964_v58 = vld [vmem:[%s6266_s9 + $0x128] sm:$0x1]  ;;  %v6073_v62 = vld [vmem:[%s6266_s9 + $0x134] sm:$0xff]  }
  0x83   : > { %v1543_v10 = vor.u32 %v1542_v2, %v1538_v1  ;;  %v1548_v11 = vrot.slane %v1546_v3, 5  ;;  %v1553_v15 = vrot.slane %v1551_v7, 4  ;;  %v1564_v17 = vshrl.u32 %v956_v59, 16  ;;  %v965_v0 = vld [vmem:[%s6266_s9 + $0x12c] sm:$0xf] }
  0x84   : > { %5770 = vmatmul.mubr.msk.bf16.gmra.mxu0 %vm410_vm1, %v6069_v46  ;;  %v1529_v14 = vsel %vm6284_vm4, %v1524_v5, %v1528_v63  ;;  %v1556_v16 = vrot.slane %v1554_v8, 5  ;;  %v1534_v20 = vrot.slane %v1533_v9, 4  ;;  %v1562_v23 = vrot.slane %v1560_v12, 5  ;;  %v6074_v5 = vld [vmem:[%s6266_s9 + $0x140] sm:$0xff]  }
  0x85   : > { %5773 = vmatprep.mubr.msk.bf16.mxu0 %vm410_vm1, %v6070_v53  ;;  %v5235_v19 = vcombine.low %v1519_v4, %v1529_v14  ;;  %v1544_v21 = vrot.slane %v1543_v10, 4  ;;  %v1566_v26 = vrot.slane %v1564_v17, 4  ;;  %v1570_v27 = vshll.u32 %v957_v6, 16  ;;  %v963_v53 = vld [vmem:[%s6266_s9 + $0x124] sm:$0xf] }
  0x86   : > { %v1557_v25 = vor.u32 %v1556_v16, %v1553_v15  ;;  %v1574_v28 = vshrl.u32 %v957_v6, 16  ;;  %v1539_v31 = vsel %vm6284_vm4, %v1534_v20, %v1538_v1  ;;  %v1580_v33 = vshll.u32 %v958_v13, 16  ;;  %v966_v14 = vld [vmem:[%s6266_s9 + $0x130] sm:$0xf] }
  0x87   : > { %5835 = vmatprep.mubr.msk.bf16.mxu1 %vm410_vm1, %v5235_v19  ;;  %v1549_v32 = vsel %vm6284_vm4, %v1544_v21, %v1548_v11  ;;  %v1584_v34 = vshrl.u32 %v958_v13, 16  ;;  %v1567_v38 = vor.u32 %v1566_v26, %v1562_v23  ;;  %v1572_v39 = vrot.slane %v1570_v27, 5  ;;  %v967_v21 = vld [vmem:[%s6266_s9 + $0x134] sm:$0xf] }
  0x88   : > { %v5236_v35 = vcombine.low %v1539_v31, %v1549_v32  ;;  %v1558_v37 = vrot.slane %v1557_v25, 4  ;;  %v1576_v40 = vrot.slane %v1574_v28, 4  ;;  %v1582_v41 = vrot.slane %v1580_v33, 5  ;;  %v968_v28 = vld [vmem:[%s6266_s9 + $0x138] sm:$0xf] }
  0x89   : > { %v1586_v42 = vrot.slane %v1584_v34, 4  ;;  %v1590_v43 = vshll.u32 %v959_v18, 16  ;;  %v1568_v45 = vrot.slane %v1567_v38, 4  ;;  %v1595_v46 = vshrl.u32 %v960_v24, 16  ;;  %v969_v33 = vld [vmem:[%s6266_s9 + $0x13c] sm:$0x1] }
  0x8a   : > { %5836 = vmatmul.mubr.msk.bf16.gmra.mxu1 %vm410_vm1, %v5236_v35  ;;  %v1563_v44 = vsel %vm6284_vm4, %v1558_v37, %v1562_v23  ;;  %v1598_v47 = vshll.u32 %v960_v24, 16  ;;  %v1577_v48 = vor.u32 %v1576_v40, %v1572_v39  ;;  %v1604_v52 = vshll.u32 %v961_v30, 16 }
  0x8b   : > { %v1587_v49 = vor.u32 %v1586_v42, %v1582_v41  ;;  %v1592_v50 = vrot.slane %v1590_v43, 5  ;;  %v1573_v54 = vsel %vm6284_vm4, %v1568_v45, %v1572_v39  ;;  %v1597_v55 = vrot.slane %v1595_v46, 4  ;;  %v6075_v39 = vld [vmem:[%s6266_s9 + $0x148] sm:$0xff]  }
  0x8c   : > { %5774 = vmatmul.mubr.msk.bf16.gmra.mxu0 %vm410_vm1, %v6071_v22  ;;  %v1600_v56 = vrot.slane %v1598_v47, 5  ;;  %v1608_v57 = vshrl.u32 %v961_v30, 16  ;;  %v5237_v59 = vcombine.low %v1563_v44, %v1573_v54  ;;  %v1578_v60 = vrot.slane %v1577_v48, 4  ;;  %v6076_v48 = vld [vmem:[%s6266_s9 + $0x14] sm:$0xff]   ;;  %v971_v54 = vld [vmem:[%s6266_s9 + $0x144] sm:$0xf] }
  0x8d   : > { %5777 = vmatprep.mubr.msk.bf16.mxu0 %vm410_vm1, %v6072_v29  ;;  %v1588_v61 = vrot.slane %v1587_v49, 4  ;;  %v1606_v63 = vrot.slane %v1604_v52, 5  ;;  %v1614_v3 = vshll.u32 %v962_v51, 16  ;;  %v1618_v4 = vshrl.u32 %v962_v51, 16  ;;  %v970_v49 = vld [vmem:[%s6266_s9 + $0x140] sm:$0xf] }
  0x8e   : > { %v1601_v1 = vor.u32 %v1600_v56, %v1597_v55  ;;  %v1610_v2 = vrot.slane %v1608_v57, 4  ;;  %5839 = vmatprep.mubr.msk.bf16.mxu1 %vm410_vm1, %v5237_v59  ;;  %v1583_v6 = vsel %vm6284_vm4, %v1578_v60, %v1582_v41  ;;  %v1624_v8 = vshll.u32 %v963_v53, 16  ;;  %v972_v59 = vld [vmem:[%s6266_s9 + $0x148] sm:$0xf] }
  0x8f   : > { %v1593_v7 = vsel %vm6284_vm4, %v1588_v61, %v1592_v50  ;;  %v1628_v9 = vshrl.u32 %v963_v53, 16  ;;  %v1616_v13 = vrot.slane %v1614_v3, 5  ;;  %v1620_v15 = vrot.slane %v1618_v4, 4 }
  0x90   : > { %v5238_v10 = vcombine.low %v1583_v6, %v1593_v7  ;;  %v1602_v11 = vrot.slane %v1601_v1, 4  ;;  %v1611_v12 = vor.u32 %v1610_v2, %v1606_v63  ;;  %v1626_v16 = vrot.slane %v1624_v8, 5 }
  0x91   : > { %v1630_v17 = vrot.slane %v1628_v9, 4  ;;  %v1634_v18 = vshll.u32 %v964_v58, 16  ;;  %v1639_v22 = vshrl.u32 %v965_v0, 16  ;;  %v1642_v23 = vshll.u32 %v965_v0, 16  ;;  %v973_v0 = vld [vmem:[%s6266_s9 + $0x14c] sm:$0xf] }
  0x92   : > { %5840 = vmatmul.mubr.msk.bf16.gmra.mxu1 %vm410_vm1, %v5238_v10  ;;  %v1607_v19 = vsel %vm6284_vm4, %v1602_v11, %v1606_v63  ;;  %v1612_v20 = vrot.slane %v1611_v12, 4  ;;  %v1621_v24 = vor.u32 %v1620_v15, %v1616_v13  ;;  %v1648_v27 = vshll.u32 %v966_v14, 16 }
  0x93   : > { %v1631_v25 = vor.u32 %v1630_v17, %v1626_v16  ;;  %v1636_v26 = vrot.slane %v1634_v18, 5  ;;  %v1641_v30 = vrot.slane %v1639_v22, 4  ;;  %v1644_v31 = vrot.slane %v1642_v23, 5  ;;  %v6077_v17 = vld [vmem:[%s6266_s9 + $0x1c] sm:$0xff]   ;;  %v974_v18 = vld [vmem:[%s6266_s9 + $0x150] sm:$0x1] }
  0x94   : > { %5778 = vmatmul.mubr.msk.bf16.gmra.mxu0 %vm410_vm1, %v6073_v62  ;;  %v1617_v29 = vsel %vm6284_vm4, %v1612_v20, %v1616_v13  ;;  %v1652_v32 = vshrl.u32 %v966_v14, 16  ;;  %v1622_v35 = vrot.slane %v1621_v24, 4  ;;  %v1650_v38 = vrot.slane %v1648_v27, 5  ;;  %v6078_v23 = vld [vmem:[%s6266_s9 + $0x28] sm:$0xff]   ;;  %v5416_v24 = vld [vmem:[%s6266_s9 + $0x14] sm:$0xf] }
  0x95   : > { %5781 = vmatprep.mubr.msk.bf16.mxu0 %vm410_vm1, %v6074_v5  ;;  %v5239_v34 = vcombine.low %v1607_v19, %v1617_v29  ;;  %v1632_v37 = vrot.slane %v1631_v25, 4  ;;  %v1645_v40 = vor.u32 %v1644_v31, %v1641_v30  ;;  %v1658_v42 = vshll.u32 %v967_v21, 16  ;;  %v5417_v29 = vld [vmem:[%s6266_s9 + $0x18] sm:$0xf] }
  0x96   : > { %v1654_v41 = vrot.slane %v1652_v32, 4  ;;  %v1662_v43 = vshrl.u32 %v967_v21, 16  ;;  %v1627_v44 = vsel %vm6284_vm4, %v1622_v35, %v1626_v16  ;;  %v1668_v46 = vshll.u32 %v968_v28, 16 }
  0x97   : > { %5843 = vmatprep.mubr.msk.bf16.mxu1 %vm410_vm1, %v5239_v34  ;;  %v1637_v45 = vsel %vm6284_vm4, %v1632_v37, %v1636_v26  ;;  %v1672_v47 = vshrl.u32 %v968_v28, 16  ;;  %v1646_v51 = vrot.slane %v1645_v40, 4  ;;  %v1660_v53 = vrot.slane %v1658_v42, 5  ;;  %v5418_v42 = vld [vmem:[%s6266_s9 + $0x1c] sm:$0xf] }
  0x98   : > { %v5240_v50 = vcombine.low %v1627_v44, %v1637_v45  ;;  %v1655_v52 = vor.u32 %v1654_v41, %v1650_v38  ;;  %v1664_v55 = vrot.slane %v1662_v43, 4  ;;  %v1670_v56 = vrot.slane %v1668_v46, 5 }
  0x99   : > { %v1674_v57 = vrot.slane %v1672_v47, 4  ;;  %v1678_v58 = vshll.u32 %v969_v33, 16  ;;  %v1651_v60 = vsel %vm6284_vm4, %v1646_v51, %v1650_v38  ;;  %v1683_v62 = vshrl.u32 %v970_v49, 16 }
  0x9a   : > { %5844 = vmatmul.mubr.msk.bf16.gmra.mxu1 %vm410_vm1, %v5240_v50  ;;  %v1656_v61 = vrot.slane %v1655_v52, 4  ;;  %v1686_v63 = vshll.u32 %v970_v49, 16  ;;  %v1665_v1 = vor.u32 %v1664_v55, %v1660_v53  ;;  %v1692_v4 = vshll.u32 %v971_v54, 16  ;;  %v6079_v52 = vld [vmem:[%s6266_s9 + $0x30] sm:$0xff]  }
  0x9b   : > { %v1675_v2 = vor.u32 %v1674_v57, %v1670_v56  ;;  %v1680_v3 = vrot.slane %v1678_v58, 5  ;;  %v1685_v6 = vrot.slane %v1683_v62, 4  ;;  %v1696_v8 = vshrl.u32 %v971_v54, 16  ;;  %v5420_v54 = vld [vmem:[%s6266_s9 + $0x24] sm:$0x1] }
  0x9c   : > { %5782 = vmatmul.mubr.msk.bf16.gmra.mxu0 %vm410_vm1, %v6075_v39  ;;  %v1661_v5 = vsel %vm6284_vm4, %v1656_v61, %v1660_v53  ;;  %v1688_v7 = vrot.slane %v1686_v63, 5  ;;  %v1666_v10 = vrot.slane %v1665_v1, 4  ;;  %v1694_v12 = vrot.slane %v1692_v4, 5  ;;  %v5422_v1 = vld [vmem:[%s6266_s9 + $0x2c] sm:$0xf] }
  0x9d   : > { %5857 = vmatprep.mubr.msk.bf16.mxu0 %vm410_vm1, %v6076_v48  ;;  %v5241_v9 = vcombine.low %v1651_v60, %v1661_v5  ;;  %v1676_v11 = vrot.slane %v1675_v2, 4  ;;  %v1698_v14 = vrot.slane %v1696_v8, 4  ;;  %v1702_v15 = vshll.u32 %v972_v59, 16  ;;  %v5419_v48 = vld [vmem:[%s6266_s9 + $0x20] sm:$0xf] }
  0x9e   : > { %v1689_v13 = vor.u32 %v1688_v7, %v1685_v6  ;;  %v1706_v16 = vshrl.u32 %v972_v59, 16  ;;  %v1671_v19 = vsel %vm6284_vm4, %v1666_v10, %v1670_v56  ;;  %v1712_v21 = vshll.u32 %v973_v0, 16  ;;  %v6080_v59 = vld [vmem:[%s6266_s9 + $0x3c] sm:$0xff]   ;;  %v5421_v60 = vld [vmem:[%s6266_s9 + $0x28] sm:$0xf] }
  0x9f   : > { %5847 = vmatprep.mubr.msk.bf16.mxu1 %vm410_vm1, %v5241_v9  ;;  %v1681_v20 = vsel %vm6284_vm4, %v1676_v11, %v1680_v3  ;;  %v1716_v22 = vshrl.u32 %v973_v0, 16  ;;  %v1699_v27 = vor.u32 %v1698_v14, %v1694_v12  ;;  %v1704_v28 = vrot.slane %v1702_v15, 5 }
  0xa0   : > { %v5242_v25 = vcombine.low %v1671_v19, %v1681_v20  ;;  %v1690_v26 = vrot.slane %v1689_v13, 4  ;;  %v1708_v30 = vrot.slane %v1706_v16, 4  ;;  %v1714_v31 = vrot.slane %v1712_v21, 5  ;;  %v5424_v19 = vld [vmem:[%s6266_s9 + $0x34] sm:$0xf] }
  0xa1   : > { %v1718_v32 = vrot.slane %v1716_v22, 4  ;;  %v1722_v33 = vshll.u32 %v974_v18, 16  ;;  %v1700_v35 = vrot.slane %v1699_v27, 4  ;;  %v3385_v37 = vshrl.u32 %v5416_v24, 16 }
  0xa2   : > { %5848 = vmatmul.mubr.msk.bf16.gmra.mxu1 %vm410_vm1, %v5242_v25  ;;  %v1695_v34 = vsel %vm6284_vm4, %v1690_v26, %v1694_v12  ;;  %v3388_v38 = vshll.u32 %v5416_v24, 16  ;;  %v1709_v39 = vor.u32 %v1708_v30, %v1704_v28  ;;  %v3394_v43 = vshll.u32 %v5417_v29, 16  ;;  %v5425_v24 = vld [vmem:[%s6266_s9 + $0x38] sm:$0x1]  ;;  %v5426_v30 = vld [vmem:[%s6266_s9 + $0x3c] sm:$0xf] }
  0xa3   : > { %v1719_v40 = vor.u32 %v1718_v32, %v1714_v31  ;;  %v1724_v41 = vrot.slane %v1722_v33, 5  ;;  %v1705_v44 = vsel %vm6284_vm4, %v1700_v35, %v1704_v28  ;;  %v3387_v45 = vrot.slane %v3385_v37, 4  ;;  %v6081_v28 = vld [vmem:[%s6266_s9 + $0x44] sm:$0xff]   ;;  %v6082_v35 = vld [vmem:[%s6266_s9 + $0x50] sm:$0xff]  }
  0xa4   : > { %5858 = vmatmul.mubr.msk.bf16.vlgmr.msra.gmra.mxu0 %vm410_vm1, %v6077_v17  ;;  %v3390_v46 = vrot.slane %v3388_v38, 5  ;;  %v3398_v47 = vshrl.u32 %v5417_v29, 16  ;;  %v5243_v49 = vcombine.low %v1695_v34, %v1705_v44  ;;  %v1710_v50 = vrot.slane %v1709_v39, 4  ;;  %v5423_v17 = vld [vmem:[%s6266_s9 + $0x30] sm:$0xf] }
  0xa5   : > { %5861 = vmatprep.mubr.msk.bf16.mxu0 %vm410_vm1, %v6078_v23  ;;  %v1720_v51 = vrot.slane %v1719_v40, 4  ;;  %v3396_v53 = vrot.slane %v3394_v43, 5  ;;  %v3404_v57 = vshll.u32 %v5418_v42, 16  ;;  %v3408_v58 = vshrl.u32 %v5418_v42, 16 }
  0xa6   : > { %v3391_v55 = vor.u32 %v3390_v46, %v3387_v45  ;;  %v3400_v56 = vrot.slane %v3398_v47, 4  ;;  %5851 = vmatprep.mubr.msk.bf16.mxu1 %vm410_vm1, %v5243_v49  ;;  %v1715_v61 = vsel %vm6284_vm4, %v1710_v50, %v1714_v31  ;;  %v3414_v63 = vshll.u32 %v5419_v48, 16  ;;  %v5427_v45 = vld [vmem:[%s6266_s9 + $0x40] sm:$0xf] }
  0xa7   : > { %v1725_v62 = vsel %vm6284_vm4, %v1720_v51, %v1724_v41  ;;  %v3418_v0 = vshrl.u32 %v5419_v48, 16  ;;  %v3406_v5 = vrot.slane %v3404_v57, 5  ;;  %v3410_v6 = vrot.slane %v3408_v58, 4  ;;  %v5428_v57 = vld [vmem:[%s6266_s9 + $0x44] sm:$0xf] }
  0xa8   : > { %v5244_v2 = vcombine.low %v1715_v61, %v1725_v62  ;;  %v3392_v3 = vrot.slane %v3391_v55, 4  ;;  %v3401_v4 = vor.u32 %v3400_v56, %v3396_v53  ;;  %v3416_v7 = vrot.slane %v3414_v63, 5 }
  0xa9   : > { %v3420_v8 = vrot.slane %v3418_v0, 4  ;;  %v3424_v9 = vshll.u32 %v5420_v54, 16  ;;  %v3429_v12 = vshrl.u32 %v5421_v60, 16  ;;  %v3432_v13 = vshll.u32 %v5421_v60, 16  ;;  %v5430_v0 = vld [vmem:[%s6266_s9 + $0x4c] sm:$0x1] }
  0xaa   : > { %5852 = vmatmul.mubr.msk.bf16.gmra.mxu1 %vm410_vm1, %v5244_v2  ;;  %v3397_v10 = vsel %vm6284_vm4, %v3392_v3, %v3396_v53  ;;  %v3402_v11 = vrot.slane %v3401_v4, 4  ;;  %v3411_v14 = vor.u32 %v3410_v6, %v3406_v5  ;;  %v3438_v18 = vshll.u32 %v5422_v1, 16  ;;  %v6083_v4 = vld [vmem:[%s6266_s9 + $0x58] sm:$0xff]  }
  0xab   : > { %v3421_v15 = vor.u32 %v3420_v8, %v3416_v7  ;;  %v3426_v16 = vrot.slane %v3424_v9, 5  ;;  %v3431_v21 = vrot.slane %v3429_v12, 4  ;;  %v3434_v22 = vrot.slane %v3432_v13, 5 }
  0xac   : > { %5862 = vmatmul.mubr.msk.bf16.gmra.mxu0 %vm410_vm1, %v6079_v52  ;;  %v3407_v20 = vsel %vm6284_vm4, %v3402_v11, %v3406_v5  ;;  %v3442_v23 = vshrl.u32 %v5422_v1, 16  ;;  %v3412_v25 = vrot.slane %v3411_v14, 4  ;;  %v3440_v29 = vrot.slane %v3438_v18, 5 }
  0xad   : > { %5865 = vmatprep.mubr.msk.bf16.mxu0 %vm410_vm1, %v6080_v59  ;;  %v5502_v26 = vcombine.low %v3397_v10, %v3407_v20  ;;  %v3422_v27 = vrot.slane %v3421_v15, 4  ;;  %v3435_v31 = vor.u32 %v3434_v22, %v3431_v21  ;;  %v3448_v33 = vshll.u32 %v5423_v17, 16  ;;  %v5429_v59 = vld [vmem:[%s6266_s9 + $0x48] sm:$0xf]  ;;  %v5431_v15 = vld [vmem:[%s6266_s9 + $0x50] sm:$0xf] }
  0xae   : > { %v3444_v32 = vrot.slane %v3442_v23, 4  ;;  %v3452_v34 = vshrl.u32 %v5423_v17, 16  ;;  %v3417_v37 = vsel %vm6284_vm4, %v3412_v25, %v3416_v7  ;;  %v3458_v39 = vshll.u32 %v5424_v19, 16  ;;  %v6084_v10 = vld [vmem:[%s6266_s9 + $0x64] sm:$0xff]   ;;  %v5432_v20 = vld [vmem:[%s6266_s9 + $0x54] sm:$0xf] }
  0xaf   : > { %5927 = vmatprep.mubr.msk.bf16.mxu1 %vm410_vm1, %v5502_v26  ;;  %v3427_v38 = vsel %vm6284_vm4, %v3422_v27, %v3426_v16  ;;  %v3462_v40 = vshrl.u32 %v5424_v19, 16  ;;  %v3436_v42 = vrot.slane %v3435_v31, 4  ;;  %v3450_v44 = vrot.slane %v3448_v33, 5  ;;  %v5433_v25 = vld [vmem:[%s6266_s9 + $0x58] sm:$0xf] }
  0xb0   : > { %v5503_v41 = vcombine.low %v3417_v37, %v3427_v38  ;;  %v3445_v43 = vor.u32 %v3444_v32, %v3440_v29  ;;  %v3454_v46 = vrot.slane %v3452_v34, 4  ;;  %v3460_v47 = vrot.slane %v3458_v39, 5 }
  0xb1   : > { %v3464_v48 = vrot.slane %v3462_v40, 4  ;;  %v3468_v49 = vshll.u32 %v5425_v24, 16  ;;  %v3441_v50 = vsel %vm6284_vm4, %v3436_v42, %v3440_v29  ;;  %v3473_v52 = vshrl.u32 %v5426_v30, 16 }
  0xb2   : > { %5928 = vmatmul.mubr.msk.bf16.vlgmr.msra.gmra.mxu1 %vm410_vm1, %v5503_v41  ;;  %v3446_v51 = vrot.slane %v3445_v43, 4  ;;  %v3476_v53 = vshll.u32 %v5426_v30, 16  ;;  %v3455_v54 = vor.u32 %v3454_v46, %v3450_v44  ;;  %v3482_v58 = vshll.u32 %v5427_v45, 16  ;;  %v5434_v30 = vld [vmem:[%s6266_s9 + $0x5c] sm:$0xf] }
  0xb3   : > { %v3465_v55 = vor.u32 %v3464_v48, %v3460_v47  ;;  %v3470_v56 = vrot.slane %v3468_v49, 5  ;;  %v3475_v61 = vrot.slane %v3473_v52, 4  ;;  %v3486_v63 = vshrl.u32 %v5427_v45, 16  ;;  %v5435_v49 = vld [vmem:[%s6266_s9 + $0x60] sm:$0x1] }
  0xb4   : > { %5866 = vmatmul.mubr.msk.bf16.gmra.mxu0 %vm410_vm1, %v6081_v28  ;;  %v3451_v60 = vsel %vm6284_vm4, %v3446_v51, %v3450_v44  ;;  %v3478_v62 = vrot.slane %v3476_v53, 5  ;;  %v3456_v2 = vrot.slane %v3455_v54, 4  ;;  %v3484_v5 = vrot.slane %v3482_v58, 5  ;;  %v6085_v44 = vld [vmem:[%s6266_s9 + $0x6c] sm:$0xff]   ;;  %v6086_v54 = vld [vmem:[%s6266_s9 + $0x78] sm:$0xff]  }
  0xb5   : > { %5869 = vmatprep.mubr.msk.bf16.mxu0 %vm410_vm1, %v6082_v35  ;;  %v5504_v1 = vcombine.low %v3441_v50, %v3451_v60  ;;  %v3466_v3 = vrot.slane %v3465_v55, 4  ;;  %v3488_v7 = vrot.slane %v3486_v63, 4  ;;  %v3492_v8 = vshll.u32 %v5428_v57, 16  ;;  %v5436_v55 = vld [vmem:[%s6266_s9 + $0x64] sm:$0xf] }
  0xb6   : > { %v3479_v6 = vor.u32 %v3478_v62, %v3475_v61  ;;  %v3496_v9 = vshrl.u32 %v5428_v57, 16  ;;  %v3461_v11 = vsel %vm6284_vm4, %v3456_v2, %v3460_v47  ;;  %v3502_v13 = vshll.u32 %v5429_v59, 16  ;;  %v5437_v60 = vld [vmem:[%s6266_s9 + $0x68] sm:$0xf] }
  0xb7   : > { %5931 = vmatprep.mubr.msk.bf16.mxu1 %vm410_vm1, %v5504_v1  ;;  %v3471_v12 = vsel %vm6284_vm4, %v3466_v3, %v3470_v56  ;;  %v3506_v14 = vshrl.u32 %v5429_v59, 16  ;;  %v3489_v18 = vor.u32 %v3488_v7, %v3484_v5  ;;  %v3494_v19 = vrot.slane %v3492_v8, 5  ;;  %v5438_v1 = vld [vmem:[%s6266_s9 + $0x6c] sm:$0xf] }
  0xb8   : > { %v5505_v16 = vcombine.low %v3461_v11, %v3471_v12  ;;  %v3480_v17 = vrot.slane %v3479_v6, 4  ;;  %v3498_v21 = vrot.slane %v3496_v9, 4  ;;  %v3504_v22 = vrot.slane %v3502_v13, 5 }
  0xb9   : > { %v3508_v23 = vrot.slane %v3506_v14, 4  ;;  %v3512_v24 = vshll.u32 %v5430_v0, 16  ;;  %v3490_v27 = vrot.slane %v3489_v18, 4  ;;  %v3517_v28 = vshrl.u32 %v5431_v15, 16  ;;  %v5439_v14 = vld [vmem:[%s6266_s9 + $0x70] sm:$0xf] }
  0xba   : > { %5932 = vmatmul.mubr.msk.bf16.gmra.mxu1 %vm410_vm1, %v5505_v16  ;;  %v3485_v26 = vsel %vm6284_vm4, %v3480_v17, %v3484_v5  ;;  %v3520_v29 = vshll.u32 %v5431_v15, 16  ;;  %v3499_v31 = vor.u32 %v3498_v21, %v3494_v19  ;;  %v3526_v34 = vshll.u32 %v5432_v20, 16  ;;  %v6087_v18 = vld [vmem:[%s6266_s9 + $0x80] sm:$0xff]  }
  0xbb   : > { %v3509_v32 = vor.u32 %v3508_v23, %v3504_v22  ;;  %v3514_v33 = vrot.slane %v3512_v24, 5  ;;  %v3495_v35 = vsel %vm6284_vm4, %v3490_v27, %v3494_v19  ;;  %v3519_v37 = vrot.slane %v3517_v28, 4  ;;  %v5440_v24 = vld [vmem:[%s6266_s9 + $0x74] sm:$0x1] }
  0xbc   : > { %5870 = vmatmul.mubr.msk.bf16.gmra.mxu0 %vm410_vm1, %v6083_v4  ;;  %v3522_v38 = vrot.slane %v3520_v29, 5  ;;  %v3530_v39 = vshrl.u32 %v5432_v20, 16  ;;  %v5506_v40 = vcombine.low %v3485_v26, %v3495_v35  ;;  %v3500_v41 = vrot.slane %v3499_v31, 4  ;;  %v5442_v31 = vld [vmem:[%s6266_s9 + $0x7c] sm:$0xf] }
  0xbd   : > { %5873 = vmatprep.mubr.msk.bf16.mxu0 %vm410_vm1, %v6084_v10  ;;  %v3510_v42 = vrot.slane %v3509_v32, 4  ;;  %v3528_v43 = vrot.slane %v3526_v34, 5  ;;  %v3536_v47 = vshll.u32 %v5433_v25, 16  ;;  %v3540_v48 = vshrl.u32 %v5433_v25, 16  ;;  %v6088_v25 = vld [vmem:[%s6266_s9 + $0x8c] sm:$0xff]  }
  0xbe   : > { %v3523_v45 = vor.u32 %v3522_v38, %v3519_v37  ;;  %v3532_v46 = vrot.slane %v3530_v39, 4  ;;  %5935 = vmatprep.mubr.msk.bf16.mxu1 %vm410_vm1, %v5506_v40  ;;  %v3505_v50 = vsel %vm6284_vm4, %v3500_v41, %v3504_v22  ;;  %v3546_v52 = vshll.u32 %v5434_v30, 16 }
  0xbf   : > { %v3515_v51 = vsel %vm6284_vm4, %v3510_v42, %v3514_v33  ;;  %v3550_v53 = vshrl.u32 %v5434_v30, 16  ;;  %v3538_v59 = vrot.slane %v3536_v47, 5  ;;  %v3542_v61 = vrot.slane %v3540_v48, 4  ;;  %v5441_v30 = vld [vmem:[%s6266_s9 + $0x78] sm:$0xf] }
  0xc0   : > { %v5507_v56 = vcombine.low %v3505_v50, %v3515_v51  ;;  %v3524_v57 = vrot.slane %v3523_v45, 4  ;;  %v3533_v58 = vor.u32 %v3532_v46, %v3528_v43  ;;  %v3548_v62 = vrot.slane %v3546_v52, 5  ;;  %v5443_v48 = vld [vmem:[%s6266_s9 + $0x80] sm:$0xf]  ;;  %v5444_v50 = vld [vmem:[%s6266_s9 + $0x84] sm:$0xf] }
  0xc1   : > { %v3552_v63 = vrot.slane %v3550_v53, 4  ;;  %v3556_v0 = vshll.u32 %v5435_v49, 16  ;;  %v3561_v4 = vshrl.u32 %v5436_v55, 16  ;;  %v3564_v5 = vshll.u32 %v5436_v55, 16  ;;  %v5445_v55 = vld [vmem:[%s6266_s9 + $0x88] sm:$0x1] }
  0xc2   : > { %5936 = vmatmul.mubr.msk.bf16.gmra.mxu1 %vm410_vm1, %v5507_v56  ;;  %v3529_v2 = vsel %vm6284_vm4, %v3524_v57, %v3528_v43  ;;  %v3534_v3 = vrot.slane %v3533_v58, 4  ;;  %v3543_v6 = vor.u32 %v3542_v61, %v3538_v59  ;;  %v3570_v9 = vshll.u32 %v5437_v60, 16  ;;  %v5446_v61 = vld [vmem:[%s6266_s9 + $0x8c] sm:$0xf] }
  0xc3   : > { %v3553_v7 = vor.u32 %v3552_v63, %v3548_v62  ;;  %v3558_v8 = vrot.slane %v3556_v0, 5  ;;  %v3563_v11 = vrot.slane %v3561_v4, 4  ;;  %v3566_v12 = vrot.slane %v3564_v5, 5 }
  0xc4   : > { %5874 = vmatmul.mubr.msk.bf16.gmra.mxu0 %vm410_vm1, %v6085_v44  ;;  %v3539_v10 = vsel %vm6284_vm4, %v3534_v3, %v3538_v59  ;;  %v3574_v13 = vshrl.u32 %v5437_v60, 16  ;;  %v3544_v16 = vrot.slane %v3543_v6, 4  ;;  %v3572_v19 = vrot.slane %v3570_v9, 5  ;;  %v6089_v59 = vld [vmem:[%s6266_s9 + $0x94] sm:$0xff]   ;;  %v5447_v3 = vld [vmem:[%s6266_s9 + $0x90] sm:$0xf] }
  0xc5   : > { %5877 = vmatprep.mubr.msk.bf16.mxu0 %vm410_vm1, %v6086_v54  ;;  %v5508_v15 = vcombine.low %v3529_v2, %v3539_v10  ;;  %v3554_v17 = vrot.slane %v3553_v7, 4  ;;  %v3567_v20 = vor.u32 %v3566_v12, %v3563_v11  ;;  %v3580_v22 = vshll.u32 %v5438_v1, 16  ;;  %v6090_v2 = vld [vmem:[%s6266_s9 + $0xa0] sm:$0xff]  }
  0xc6   : > { %v3576_v21 = vrot.slane %v3574_v13, 4  ;;  %v3584_v23 = vshrl.u32 %v5438_v1, 16  ;;  %v3549_v26 = vsel %vm6284_vm4, %v3544_v16, %v3548_v62  ;;  %v3590_v28 = vshll.u32 %v5439_v14, 16 }
  0xc7   : > { %5939 = vmatprep.mubr.msk.bf16.mxu1 %vm410_vm1, %v5508_v15  ;;  %v3559_v27 = vsel %vm6284_vm4, %v3554_v17, %v3558_v8  ;;  %v3594_v29 = vshrl.u32 %v5439_v14, 16  ;;  %v3568_v33 = vrot.slane %v3567_v20, 4  ;;  %v3582_v35 = vrot.slane %v3580_v22, 5 }
  0xc8   : > { %v5509_v32 = vcombine.low %v3549_v26, %v3559_v27  ;;  %v3577_v34 = vor.u32 %v3576_v21, %v3572_v19  ;;  %v3586_v37 = vrot.slane %v3584_v23, 4  ;;  %v3592_v38 = vrot.slane %v3590_v28, 5  ;;  %v5448_v23 = vld [vmem:[%s6266_s9 + $0x94] sm:$0xf] }
  0xc9   : > { %v3596_v39 = vrot.slane %v3594_v29, 4  ;;  %v3600_v40 = vshll.u32 %v5440_v24, 16  ;;  %v3573_v41 = vsel %vm6284_vm4, %v3568_v33, %v3572_v19  ;;  %v3605_v43 = vshrl.u32 %v5441_v30, 16 }
  0xca   : > { %5940 = vmatmul.mubr.msk.bf16.gmra.mxu1 %vm410_vm1, %v5509_v32  ;;  %v3578_v42 = vrot.slane %v3577_v34, 4  ;;  %v3608_v44 = vshll.u32 %v5441_v30, 16  ;;  %v3587_v45 = vor.u32 %v3586_v37, %v3582_v35  ;;  %v3614_v49 = vshll.u32 %v5442_v31, 16  ;;  %v5450_v30 = vld [vmem:[%s6266_s9 + $0x9c] sm:$0x1]  ;;  %v6091_v34 = vld [vmem:[%s6266_s9 + $0xa8] sm:$0xff]  }
  0xcb   : > { %v3597_v46 = vor.u32 %v3596_v39, %v3592_v38  ;;  %v3602_v47 = vrot.slane %v3600_v40, 5  ;;  %v3607_v52 = vrot.slane %v3605_v43, 4  ;;  %v3618_v54 = vshrl.u32 %v5442_v31, 16  ;;  %v5451_v37 = vld [vmem:[%s6266_s9 + $0xa0] sm:$0xf] }
  0xcc   : > { %5878 = vmatmul.mubr.msk.bf16.gmra.mxu0 %vm410_vm1, %v6087_v18  ;;  %v3583_v51 = vsel %vm6284_vm4, %v3578_v42, %v3582_v35  ;;  %v3610_v53 = vrot.slane %v3608_v44, 5  ;;  %v3588_v57 = vrot.slane %v3587_v45, 4  ;;  %v3616_v60 = vrot.slane %v3614_v49, 5  ;;  %v6092_v42 = vld [vmem:[%s6266_s9 + $0xb4] sm:$0xff]  }
  0xcd   : > { %5881 = vmatprep.mubr.msk.bf16.mxu0 %vm410_vm1, %v6088_v25  ;;  %v5510_v56 = vcombine.low %v3573_v41, %v3583_v51  ;;  %v3598_v58 = vrot.slane %v3597_v46, 4  ;;  %v3620_v63 = vrot.slane %v3618_v54, 4  ;;  %v3624_v0 = vshll.u32 %v5443_v48, 16  ;;  %v5449_v25 = vld [vmem:[%s6266_s9 + $0x98] sm:$0xf] }
  0xce   : > { %v3611_v62 = vor.u32 %v3610_v53, %v3607_v52  ;;  %v3628_v1 = vshrl.u32 %v5443_v48, 16  ;;  %v3593_v4 = vsel %vm6284_vm4, %v3588_v57, %v3592_v38  ;;  %v3634_v6 = vshll.u32 %v5444_v50, 16  ;;  %v5452_v51 = vld [vmem:[%s6266_s9 + $0xa4] sm:$0xf] }
  0xcf   : > { %5943 = vmatprep.mubr.msk.bf16.mxu1 %vm410_vm1, %v5510_v56  ;;  %v3603_v5 = vsel %vm6284_vm4, %v3598_v58, %v3602_v47  ;;  %v3638_v7 = vshrl.u32 %v5444_v50, 16  ;;  %v3621_v10 = vor.u32 %v3620_v63, %v3616_v60  ;;  %v3626_v11 = vrot.slane %v3624_v0, 5 }
  0xd0   : > { %v5511_v8 = vcombine.low %v3593_v4, %v3603_v5  ;;  %v3612_v9 = vrot.slane %v3611_v62, 4  ;;  %v3630_v12 = vrot.slane %v3628_v1, 4  ;;  %v3636_v13 = vrot.slane %v3634_v6, 5 }
  0xd1   : > { %v3640_v14 = vrot.slane %v3638_v7, 4  ;;  %v3644_v15 = vshll.u32 %v5445_v55, 16  ;;  %v3622_v17 = vrot.slane %v3621_v10, 4  ;;  %v3649_v18 = vshrl.u32 %v5446_v61, 16 }
  0xd2   : > { %5944 = vmatmul.mubr.msk.bf16.gmra.mxu1 %vm410_vm1, %v5511_v8  ;;  %v3617_v16 = vsel %vm6284_vm4, %v3612_v9, %v3616_v60  ;;  %v3652_v19 = vshll.u32 %v5446_v61, 16  ;;  %v3631_v20 = vor.u32 %v3630_v12, %v3626_v11  ;;  %v3658_v24 = vshll.u32 %v5447_v3, 16  ;;  %v5455_v8 = vld [vmem:[%s6266_s9 + $0xb0] sm:$0x1] }
  0xd3   : > { %v3641_v21 = vor.u32 %v3640_v14, %v3636_v13  ;;  %v3646_v22 = vrot.slane %v3644_v15, 5  ;;  %v3627_v26 = vsel %vm6284_vm4, %v3622_v17, %v3626_v11  ;;  %v3651_v27 = vrot.slane %v3649_v18, 4  ;;  %v6093_v14 = vld [vmem:[%s6266_s9 + $0xbc] sm:$0xff]  }
  0xd4   : > { %5882 = vmatmul.mubr.msk.bf16.gmra.mxu0 %vm410_vm1, %v6089_v59  ;;  %v3654_v28 = vrot.slane %v3652_v19, 5  ;;  %v3662_v29 = vshrl.u32 %v5447_v3, 16  ;;  %v5512_v31 = vcombine.low %v3617_v16, %v3627_v26  ;;  %v3632_v32 = vrot.slane %v3631_v20, 4  ;;  %v5453_v59 = vld [vmem:[%s6266_s9 + $0xa8] sm:$0xf] }
  0xd5   : > { %5885 = vmatprep.mubr.msk.bf16.mxu0 %vm410_vm1, %v6090_v2  ;;  %v3642_v33 = vrot.slane %v3641_v21, 4  ;;  %v3660_v35 = vrot.slane %v3658_v24, 5  ;;  %v3668_v40 = vshll.u32 %v5448_v23, 16  ;;  %v3672_v41 = vshrl.u32 %v5448_v23, 16  ;;  %v5454_v2 = vld [vmem:[%s6266_s9 + $0xac] sm:$0xf] }
  0xd6   : > { %v3655_v38 = vor.u32 %v3654_v28, %v3651_v27  ;;  %v3664_v39 = vrot.slane %v3662_v29, 4  ;;  %5947 = vmatprep.mubr.msk.bf16.mxu1 %vm410_vm1, %v5512_v31  ;;  %v3637_v43 = vsel %vm6284_vm4, %v3632_v32, %v3636_v13  ;;  %v3678_v45 = vshll.u32 %v5449_v25, 16  ;;  %v6094_v23 = vld [vmem:[%s6266_s9 + $0xc8] sm:$0xff]   ;;  %v5456_v24 = vld [vmem:[%s6266_s9 + $0xb4] sm:$0xf] }
  0xd7   : > { %v3647_v44 = vsel %vm6284_vm4, %v3642_v33, %v3646_v22  ;;  %v3682_v46 = vshrl.u32 %v5449_v25, 16  ;;  %v3670_v50 = vrot.slane %v3668_v40, 5  ;;  %v3674_v52 = vrot.slane %v3672_v41, 4 }
  0xd8   : > { %v5513_v47 = vcombine.low %v3637_v43, %v3647_v44  ;;  %v3656_v48 = vrot.slane %v3655_v38, 4  ;;  %v3665_v49 = vor.u32 %v3664_v39, %v3660_v35  ;;  %v3680_v53 = vrot.slane %v3678_v45, 5 }
  0xd9   : > { %v3684_v54 = vrot.slane %v3682_v46, 4  ;;  %v3688_v55 = vshll.u32 %v5450_v30, 16  ;;  %v3693_v60 = vshrl.u32 %v5451_v37, 16  ;;  %v3696_v61 = vshll.u32 %v5451_v37, 16  ;;  %v5457_v30 = vld [vmem:[%s6266_s9 + $0xb8] sm:$0xf] }
  0xda   : > { %5948 = vmatmul.mubr.msk.bf16.gmra.mxu1 %vm410_vm1, %v5513_v47  ;;  %v3661_v57 = vsel %vm6284_vm4, %v3656_v48, %v3660_v35  ;;  %v3666_v58 = vrot.slane %v3665_v49, 4  ;;  %v3675_v62 = vor.u32 %v3674_v52, %v3670_v50  ;;  %v3702_v1 = vshll.u32 %v5452_v51, 16  ;;  %v5458_v35 = vld [vmem:[%s6266_s9 + $0xbc] sm:$0xf] }
  0xdb   : > { %v3685_v63 = vor.u32 %v3684_v54, %v3680_v53  ;;  %v3690_v0 = vrot.slane %v3688_v55, 5  ;;  %v3695_v5 = vrot.slane %v3693_v60, 4  ;;  %v3698_v6 = vrot.slane %v3696_v61, 5 }
  0xdc   : > { %v6728_v56 = vpop.f32.mrf.mxu0  ;;  %5886 = vmatmul.mubr.msk.bf16.gmra.mxu0 %vm410_vm1, %v6091_v34  ;;  %v3671_v3 = vsel %vm6284_vm4, %v3666_v58, %v3670_v50  ;;  %v3706_v7 = vshrl.u32 %v5452_v51, 16  ;;  %v3676_v10 = vrot.slane %v3675_v62, 4  ;;  %v3704_v12 = vrot.slane %v3702_v1, 5  ;;  %v6095_v58 = vld [vmem:[%s6266_s9 + $0xd0] sm:$0xff]  }
  0xdd   : > { %5889 = vmatprep.mubr.msk.bf16.mxu0 %vm410_vm1, %v6092_v42  ;;  %v5514_v9 = vcombine.low %v3661_v57, %v3671_v3  ;;  %v3686_v11 = vrot.slane %v3685_v63, 4  ;;  %v3699_v15 = vor.u32 %v3698_v6, %v3695_v5  ;;  %v3712_v17 = vshll.u32 %v5453_v59, 16  ;;  %v5459_v42 = vld [vmem:[%s6266_s9 + $0xc0] sm:$0xf]  ;;  %v5461_v6 = vld [vmem:[%s6266_s9 + $0xc8] sm:$0xf] }
  0xde   : > { %v6738_v4 = vpop.f32.mrf.mxu0  ;;  %v3708_v16 = vrot.slane %v3706_v7, 4  ;;  %v3716_v18 = vshrl.u32 %v5453_v59, 16  ;;  %v3681_v19 = vsel %vm6284_vm4, %v3676_v10, %v3680_v53  ;;  %v3722_v21 = vshll.u32 %v5454_v2, 16  ;;  %v6096_v63 = vld [vmem:[%s6266_s9 + $0xdc] sm:$0xff]  }
  0xdf   : > { %5951 = vmatprep.mubr.msk.bf16.mxu1 %vm410_vm1, %v5514_v9  ;;  %v3691_v20 = vsel %vm6284_vm4, %v3686_v11, %v3690_v0  ;;  %v3726_v22 = vshrl.u32 %v5454_v2, 16  ;;  %v3700_v27 = vrot.slane %v3699_v15, 4  ;;  %v3714_v29 = vrot.slane %v3712_v17, 5  ;;  %v5460_v2 = vld [vmem:[%s6266_s9 + $0xc4] sm:$0x1] }
  0xe0   : > { %v6741_v13 = vpop.f32.mrf.mxu0  ;;  %v5515_v25 = vcombine.low %v3681_v19, %v3691_v20  ;;  %v3709_v28 = vor.u32 %v3708_v16, %v3704_v12  ;;  %v3718_v31 = vrot.slane %v3716_v18, 4  ;;  %v3724_v32 = vrot.slane %v3722_v21, 5 }
  0xe1   : > { %v3728_v33 = vrot.slane %v3726_v22, 4  ;;  %v3732_v34 = vshll.u32 %v5455_v8, 16  ;;  %v3705_v38 = vsel %vm6284_vm4, %v3700_v27, %v3704_v12  ;;  %v3737_v40 = vshrl.u32 %v5456_v24, 16 }
  0xe2   : > { %v6751_v26 = vpop.f32.mrf.mxu0  ;;  %5952 = vmatmul.mubr.msk.bf16.gmra.mxu1 %vm410_vm1, %v5515_v25  ;;  %v3710_v39 = vrot.slane %v3709_v28, 4  ;;  %v3740_v41 = vshll.u32 %v5456_v24, 16  ;;  %v3719_v43 = vor.u32 %v3718_v31, %v3714_v29  ;;  %v3746_v46 = vshll.u32 %v5457_v30, 16  ;;  %v5463_v28 = vld [vmem:[%s6266_s9 + $0xd0] sm:$0xf] }
  0xe3   : > { %v3729_v44 = vor.u32 %v3728_v33, %v3724_v32  ;;  %v3734_v45 = vrot.slane %v3732_v34, 5  ;;  %v3739_v49 = vrot.slane %v3737_v40, 4  ;;  %v3750_v51 = vshrl.u32 %v5457_v30, 16 }
  0xe4   : > { %v6756_v37 = vpop.f32.mrf.mxu0  ;;  %5890 = vmatmul.mubr.msk.bf16.gmra.mxu0 %vm410_vm1, %v6093_v14  ;;  %v3715_v47 = vsel %vm6284_vm4, %v3710_v39, %v3714_v29  ;;  %v3742_v50 = vrot.slane %v3740_v41, 5  ;;  %v3720_v53 = vrot.slane %v3719_v43, 4  ;;  %v3748_v55 = vrot.slane %v3746_v46, 5  ;;  %v5462_v14 = vld [vmem:[%s6266_s9 + $0xcc] sm:$0xf]  ;;  %v6097_v41 = vld [vmem:[%s6266_s9 + $0xe4] sm:$0xff]  }
  0xe5   : > { %5893 = vmatprep.mubr.msk.bf16.mxu0 %vm410_vm1, %v6094_v23  ;;  %v5516_v52 = vcombine.low %v3705_v38, %v3715_v47  ;;  %v3730_v54 = vrot.slane %v3729_v44, 4  ;;  %v3752_v60 = vrot.slane %v3750_v51, 4  ;;  %v3756_v61 = vshll.u32 %v5458_v35, 16 }
  0xe6   : > { %v6765_v48 = vpop.f32.mrf.mxu0  ;;  %v3743_v59 = vor.u32 %v3742_v50, %v3739_v49  ;;  %v3760_v62 = vshrl.u32 %v5458_v35, 16  ;;  %v3725_v0 = vsel %vm6284_vm4, %v3720_v53, %v3724_v32  ;;  %v3766_v3 = vshll.u32 %v5459_v42, 16  ;;  %v5465_v50 = vld [vmem:[%s6266_s9 + $0xd8] sm:$0x1] }
  0xe7   : > { %5955 = vmatprep.mubr.msk.bf16.mxu1 %vm410_vm1, %v5516_v52  ;;  %v3735_v1 = vsel %vm6284_vm4, %v3730_v54, %v3734_v45  ;;  %v3770_v5 = vshrl.u32 %v5459_v42, 16  ;;  %v3753_v11 = vor.u32 %v3752_v60, %v3748_v55  ;;  %v3758_v12 = vrot.slane %v3756_v61, 5  ;;  %v5464_v42 = vld [vmem:[%s6266_s9 + $0xd4] sm:$0xf] }
  0xe8   : > { %v6767_v57 = vpop.f32.mrf.mxu0  ;;  %v5517_v8 = vcombine.low %v3725_v0, %v3735_v1  ;;  %v3744_v10 = vrot.slane %v3743_v59, 4  ;;  %v3762_v16 = vrot.slane %v3760_v62, 4  ;;  %v3768_v17 = vrot.slane %v3766_v3, 5  ;;  %v6098_v54 = vld [vmem:[%s6266_s9 + $0xf0] sm:$0xff]  }
  0xe9   : > { %v5789_v7 = vpop.f32.mrf.mxu1  ;;  %v3772_v18 = vrot.slane %v3770_v5, 4  ;;  %v3754_v22 = vrot.slane %v3753_v11, 4  ;;  %v3776_v23 = vshll.u32 %v5460_v2, 16  ;;  %v3781_v24 = vshrl.u32 %v5461_v6, 16 }
  0xea   : > { %v6778_v9 = vpop.f32.mrf.mxu0  ;;  %v6782_v15 = vadd.f32 %v5789_v7, %v6728_v56  ;;  %5956 = vmatmul.mubr.msk.bf16.gmra.mxu1 %vm410_vm1, %v5517_v8  ;;  %v3749_v21 = vsel %vm6284_vm4, %v3744_v10, %v3748_v55  ;;  %v3763_v25 = vor.u32 %v3762_v16, %v3758_v12  ;;  %v3784_v29 = vshll.u32 %v5461_v6, 16  ;;  %v5466_v55 = vld [vmem:[%s6266_s9 + $0xdc] sm:$0xf]  ;;  %v5467_v16 = vld [vmem:[%s6266_s9 + $0xe0] sm:$0xf] }
  0xeb   : > { %v1969_v19 = vpop.f32.mrf.mxu1  ;;  %v3773_v27 = vor.u32 %v3772_v18, %v3768_v17  ;;  %v3759_v31 = vsel %vm6284_vm4, %v3754_v22, %v3758_v12  ;;  %v3778_v32 = vrot.slane %v3776_v23, 5  ;;  %v3783_v34 = vrot.slane %v3781_v24, 4 }
  0xec   : > { %v6785_v20 = vpop.f32.mrf.mxu0  ;;  %5894 = vmatmul.mubr.msk.bf16.gmra.mxu0 %vm410_vm1, %v6095_v58  ;;  %v6791_v56 = vadd.f32 %v1969_v19, %v6738_v4  ;;  %v3790_v35 = vshll.u32 %v5462_v14, 16  ;;  %v5518_v38 = vcombine.low %v3749_v21, %v3759_v31  ;;  %v3764_v39 = vrot.slane %v3763_v25, 4 }
  0xed   : > { %5897 = vmatprep.mubr.msk.bf16.mxu0 %vm410_vm1, %v6096_v63  ;;  %v5790_v30 = vpop.f32.mrf.mxu1  ;;  %v3774_v40 = vrot.slane %v3773_v27, 4  ;;  %v3786_v45 = vrot.slane %v3784_v29, 5  ;;  %v3794_v47 = vshrl.u32 %v5462_v14, 16  ;;  %v3800_v49 = vshll.u32 %v5463_v28, 16 }
  0xee   : > { %v6797_v33 = vpop.f32.mrf.mxu0  ;;  %v6800_v4 = vadd.f32 %v5790_v30, %v6741_v13  ;;  %v3792_v46 = vrot.slane %v3790_v35, 5  ;;  %5959 = vmatprep.mubr.msk.bf16.mxu1 %vm410_vm1, %v5518_v38  ;;  %v3769_v13 = vsel %vm6284_vm4, %v3764_v39, %v3768_v17  ;;  %v3804_v53 = vshrl.u32 %v5463_v28, 16  ;;  %v5468_v17 = vld [vmem:[%s6266_s9 + $0xe4] sm:$0xf]  ;;  %v5469_v39 = vld [vmem:[%s6266_s9 + $0xe8] sm:$0xf] }
  0xef   : > { %v1972_v43 = vpop.f32.mrf.mxu1  ;;  %v3779_v52 = vsel %vm6284_vm4, %v3774_v40, %v3778_v32  ;;  %v3787_v60 = vor.u32 %v3786_v45, %v3783_v34  ;;  %v3796_v61 = vrot.slane %v3794_v47, 4  ;;  %v3802_v62 = vrot.slane %v3800_v49, 5  ;;  %v6099_v32 = vld [vmem:[%s6266_s9 + $0xf8] sm:$0xff]  }
  0xf0   : > { %v6804_v44 = vpop.f32.mrf.mxu0  ;;  %v6808_v51 = vadd.f32 %v1972_v43, %v6751_v26  ;;  %v5519_v58 = vcombine.low %v3769_v13, %v3779_v52  ;;  %v3806_v63 = vrot.slane %v3804_v53, 4  ;;  %v3810_v26 = vshll.u32 %v5464_v42, 16  ;;  %v6100_v43 = vld [vmem:[%s6266_s9 + $0x104] sm:$0xff]   ;;  %v5470_v52 = vld [vmem:[%s6266_s9 + $0xec] sm:$0x1] }
  0xf1   : > { %v3814_v0 = vshrl.u32 %v5464_v42, 16  ;;  %v3820_v1 = vshll.u32 %v5465_v50, 16  ;;  %v3788_v5 = vrot.slane %v3787_v60, 4  ;;  %v3797_v6 = vor.u32 %v3796_v61, %v3792_v46 }
  0xf2   : > { %v6817_v59 = vpop.f32.mrf.mxu0  ;;  %v5793_v2 = vpop.f32.mrf.mxu1  ;;  %5960 = vmatmul.mubr.msk.bf16.gmra.mxu1 %vm410_vm1, %v5519_v58  ;;  %v3825_v7 = vshrl.u32 %v5466_v55, 16  ;;  %v3828_v8 = vshll.u32 %v5466_v55, 16  ;;  %v3807_v11 = vor.u32 %v3806_v63, %v3802_v62  ;;  %v3812_v12 = vrot.slane %v3810_v26, 5  ;;  %v5471_v58 = vld [vmem:[%s6266_s9 + $0xf0] sm:$0xf] }
  0xf3   : > { %v6824_v10 = vadd.f32 %v5793_v2, %v6756_v37  ;;  %v3816_v14 = vrot.slane %v3814_v0, 4  ;;  %v3793_v19 = vsel %vm6284_vm4, %v3788_v5, %v3792_v46  ;;  %v3798_v21 = vrot.slane %v3797_v6, 4  ;;  %v5472_v6 = vld [vmem:[%s6266_s9 + $0xf4] sm:$0xf] }
  0xf4   : > { %v6820_v3 = vpop.f32.mrf.mxu0  ;;  %5898 = vmatmul.mubr.msk.bf16.gmra.mxu0 %vm410_vm1, %v6097_v41  ;;  %v1985_v18 = vpop.f32.mrf.mxu1  ;;  %v3822_v22 = vrot.slane %v3820_v1, 5  ;;  %v3827_v24 = vrot.slane %v3825_v7, 4  ;;  %v3808_v25 = vrot.slane %v3807_v11, 4  ;;  %v3830_v28 = vrot.slane %v3828_v8, 5 }
  0xf5   : > { %5901 = vmatprep.mubr.msk.bf16.mxu0 %vm410_vm1, %v6098_v54  ;;  %v6834_v37 = vadd.f32 %v1985_v18, %v6765_v48  ;;  %v3817_v27 = vor.u32 %v3816_v14, %v3812_v12  ;;  %v3803_v30 = vsel %vm6284_vm4, %v3798_v21, %v3802_v62  ;;  %v3834_v34 = vshll.u32 %v5467_v16, 16 }
  0xf6   : > { %v6831_v23 = vpop.f32.mrf.mxu0  ;;  %v5794_v29 = vpop.f32.mrf.mxu1  ;;  %v3838_v35 = vshrl.u32 %v5467_v16, 16  ;;  %v3844_v38 = vshll.u32 %v5468_v17, 16  ;;  %v5520_v48 = vcombine.low %v3793_v19, %v3803_v30  ;;  %v3813_v41 = vsel %vm6284_vm4, %v3808_v25, %v3812_v12  ;;  %v5473_v19 = vld [vmem:[%s6266_s9 + $0xf8] sm:$0xf] }
  0xf7   : > { %v6843_v40 = vadd.f32 %v5794_v29, %v6767_v57  ;;  %v3818_v42 = vrot.slane %v3817_v27, 4  ;;  %v3831_v47 = vor.u32 %v3830_v28, %v3827_v24  ;;  %v3836_v49 = vrot.slane %v3834_v34, 5  ;;  %v6101_v28 = vld [vmem:[%s6266_s9 + $0x10c] sm:$0xff]  }
  0xf8   : > { %v6838_v31 = vpop.f32.mrf.mxu0  ;;  %v1988_v45 = vpop.f32.mrf.mxu1  ;;  %v3840_v50 = vrot.slane %v3838_v35, 4  ;;  %v3846_v13 = vrot.slane %v3844_v38, 5  ;;  %5963 = vmatprep.mubr.msk.bf16.mxu1 %vm410_vm1, %v5520_v48  ;;  %v3848_v54 = vshrl.u32 %v5468_v17, 16  ;;  %v3854_v55 = vshll.u32 %v5469_v39, 16  ;;  %v5474_v38 = vld [vmem:[%s6266_s9 + $0xfc] sm:$0xf] }
  0xf9   : > { %v6852_v53 = vadd.f32 %v1988_v45, %v6778_v9  ;;  %v3823_v57 = vsel %vm6284_vm4, %v3818_v42, %v3822_v22  ;;  %v3832_v63 = vrot.slane %v3831_v47, 4  ;;  %v3858_v0 = vshrl.u32 %v5469_v39, 16  ;;  %v6102_v39 = vld [vmem:[%s6266_s9 + $0x118] sm:$0xff]  }
  0xfa   : > { %v6848_v46 = vpop.f32.mrf.mxu0  ;;  %v5797_v60 = vpop.f32.mrf.mxu1  ;;  %v5521_v61 = vcombine.low %v3813_v41, %v3823_v57  ;;  %v3841_v26 = vor.u32 %v3840_v50, %v3836_v49  ;;  %v3850_v1 = vrot.slane %v3848_v54, 4  ;;  %v3856_v2 = vrot.slane %v3854_v55, 5 }
  0xfb   : > { %v6862_v9 = vadd.f32 %v5797_v60, %v6785_v20  ;;  %v3864_v5 = vshll.u32 %v5470_v52, 16  ;;  %v3837_v8 = vsel %vm6284_vm4, %v3832_v63, %v3836_v49  ;;  %v3860_v12 = vrot.slane %v3858_v0, 4  ;;  %v5475_v52 = vld [vmem:[%s6266_s9 + $0x100] sm:$0x1] }
  0xfc   : > { %v6858_v62 = vpop.f32.mrf.mxu0  ;;  %5902 = vmatmul.mubr.msk.bf16.gmra.mxu0 %vm410_vm1, %v6099_v32  ;;  %5964 = vmatmul.mubr.msk.bf16.gmra.mxu1 %vm410_vm1, %v5521_v61  ;;  %v2001_v7 = vpop.f32.mrf.mxu1  ;;  %v3842_v11 = vrot.slane %v3841_v26, 4  ;;  %v3869_v20 = vshrl.u32 %v5471_v58, 16  ;;  %v3851_v17 = vor.u32 %v3850_v1, %v3846_v13  ;;  %v3872_v21 = vshll.u32 %v5471_v58, 16  ;;  %v5476_v61 = vld [vmem:[%s6266_s9 + $0x104] sm:$0xf] }
  0xfd   : > { %5905 = vmatprep.mubr.msk.bf16.mxu0 %vm410_vm1, %v6100_v43  ;;  %v6872_v16 = vadd.f32 %v2001_v7, %v6797_v33  ;;  %v3866_v18 = vrot.slane %v3864_v5, 5  ;;  %v3861_v25 = vor.u32 %v3860_v12, %v3856_v2  ;;  %v3878_v30 = vshll.u32 %v5472_v6, 16  ;;  %v5477_v12 = vld [vmem:[%s6266_s9 + $0x108] sm:$0xf] }
  0xfe   : > { %v6869_v14 = vpop.f32.mrf.mxu0  ;;  %v5798_v22 = vpop.f32.mrf.mxu1  ;;  %v3847_v24 = vsel %vm6284_vm4, %v3842_v11, %v3846_v13  ;;  %v3871_v29 = vrot.slane %v3869_v20, 4  ;;  %v3852_v34 = vrot.slane %v3851_v17, 4  ;;  %v3874_v35 = vrot.slane %v3872_v21, 5 }
  0xff   : > { %v6881_v32 = vadd.f32 %v5798_v22, %v6804_v44  ;;  %v5522_v33 = vcombine.low %v3837_v8, %v3847_v24  ;;  %v3862_v41 = vrot.slane %v3861_v25, 4  ;;  %v3880_v43 = vrot.slane %v3878_v30, 5 }
 0x100   : > { %v6877_v27 = vpop.f32.mrf.mxu0  ;;  %v2004_v48 = vpop.f32.mrf.mxu1  ;;  %v3882_v45 = vshrl.u32 %v5472_v6, 16  ;;  %v3888_v47 = vshll.u32 %v5473_v19, 16  ;;  %v3857_v44 = vsel %vm6284_vm4, %v3852_v34, %v3856_v2  ;;  %v3875_v50 = vor.u32 %v3874_v35, %v3871_v29 }
 0x101   : > { %v6888_v49 = vadd.f32 %v2004_v48, %v6817_v59  ;;  %5967 = vmatprep.mubr.msk.bf16.mxu1 %vm410_vm1, %v5522_v33  ;;  %v3892_v13 = vshrl.u32 %v5473_v19, 16  ;;  %v3867_v54 = vsel %vm6284_vm4, %v3862_v41, %v3866_v18  ;;  %v3898_v60 = vshll.u32 %v5474_v38, 16  ;;  %v5478_v33 = vld [vmem:[%s6266_s9 + $0x10c] sm:$0xf] }
 0x102   : > { %v6885_v42 = vpop.f32.mrf.mxu0  ;;  %v5801_v57 = vpop.f32.mrf.mxu1  ;;  %v3884_v58 = vrot.slane %v3882_v45, 4  ;;  %v3890_v59 = vrot.slane %v3888_v47, 5  ;;  %v5523_v26 = vcombine.low %v3857_v44, %v3867_v54  ;;  %v3876_v0 = vrot.slane %v3875_v50, 4  ;;  %v5479_v44 = vld [vmem:[%s6266_s9 + $0x110] sm:$0xf] }
 0x103   : > { %v6901_v63 = vadd.f32 %v5801_v57, %v6820_v3  ;;  %v3894_v1 = vrot.slane %v3892_v13, 4  ;;  %v3900_v6 = vrot.slane %v3898_v60, 5  ;;  %v3902_v7 = vshrl.u32 %v5474_v38, 16  ;;  %v6104_v38 = vld [vmem:[%s6266_s9 + $0x12c] sm:$0xff]  }
 0x104   : > { %v6896_v55 = vpop.f32.mrf.mxu0  ;;  %5906 = vmatmul.mubr.msk.bf16.gmra.mxu0 %vm410_vm1, %v6101_v28  ;;  %v2017_v2 = vpop.f32.mrf.mxu1  ;;  %v3885_v5 = vor.u32 %v3884_v58, %v3880_v43  ;;  %v3908_v8 = vshll.u32 %v5475_v52, 16  ;;  %5968 = vmatmul.mubr.msk.bf16.gmra.mxu1 %vm410_vm1, %v5523_v26  ;;  %v3881_v20 = vsel %vm6284_vm4, %v3876_v0, %v3880_v43  ;;  %v3913_v18 = vshrl.u32 %v5476_v61, 16  ;;  %v6103_v28 = vld [vmem:[%s6266_s9 + $0x120] sm:$0xff]   ;;  %v5480_v0 = vld [vmem:[%s6266_s9 + $0x114] sm:$0x1] }
 0x105   : > { %5909 = vmatprep.mubr.msk.bf16.mxu0 %vm410_vm1, %v6102_v39  ;;  %v6909_v3 = vadd.f32 %v2017_v2, %v6831_v23  ;;  %v3895_v17 = vor.u32 %v3894_v1, %v3890_v59  ;;  %v3904_v22 = vrot.slane %v3902_v7, 4  ;;  %v3916_v29 = vshll.u32 %v5476_v61, 16 }
 0x106   : > { %v6904_v11 = vpop.f32.mrf.mxu0  ;;  %v5802_v19 = vpop.f32.mrf.mxu1  ;;  %v3886_v21 = vrot.slane %v3885_v5, 4  ;;  %v3910_v24 = vrot.slane %v3908_v8, 5  ;;  %v3915_v34 = vrot.slane %v3913_v18, 4  ;;  %v3922_v35 = vshll.u32 %v5477_v12, 16 }
 0x107   : > { %v6917_v30 = vadd.f32 %v5802_v19, %v6838_v31  ;;  %v3896_v23 = vrot.slane %v3895_v17, 4  ;;  %v3905_v41 = vor.u32 %v3904_v22, %v3900_v6  ;;  %v3918_v45 = vrot.slane %v3916_v29, 5  ;;  %v5481_v17 = vld [vmem:[%s6266_s9 + $0x118] sm:$0xf]  ;;  %v5482_v22 = vld [vmem:[%s6266_s9 + $0x11c] sm:$0xf] }
 0x108   : > { %v6913_v25 = vpop.f32.mrf.mxu0  ;;  %v2020_v39 = vpop.f32.mrf.mxu1  ;;  %v3891_v48 = vsel %vm6284_vm4, %v3886_v21, %v3890_v59  ;;  %v3926_v47 = vshrl.u32 %v5477_v12, 16  ;;  %v3924_v52 = vrot.slane %v3922_v35, 5  ;;  %v3932_v61 = vshll.u32 %v5478_v33, 16  ;;  %v6105_v35 = vld [vmem:[%s6266_s9 + $0x134] sm:$0xff]  }
 0x109   : > { %v6927_v50 = vadd.f32 %v2020_v39, %v6848_v46  ;;  %v5524_v31 = vcombine.low %v3881_v20, %v3891_v48  ;;  %v3901_v13 = vsel %vm6284_vm4, %v3896_v23, %v3900_v6  ;;  %v3906_v54 = vrot.slane %v3905_v41, 4  ;;  %v6106_v41 = vld [vmem:[%s6266_s9 + $0x140] sm:$0xff]  }
 0x10a   : > { %v6923_v43 = vpop.f32.mrf.mxu0  ;;  %v5805_v57 = vpop.f32.mrf.mxu1  ;;  %v3919_v59 = vor.u32 %v3918_v45, %v3915_v34  ;;  %v3928_v60 = vrot.slane %v3926_v47, 4  ;;  %v3936_v26 = vshrl.u32 %v5478_v33, 16  ;;  %v3942_v1 = vshll.u32 %v5479_v44, 16 }
 0x10b   : > { %5971 = vmatprep.mubr.msk.bf16.mxu1 %vm410_vm1, %v5524_v31  ;;  %v6936_v46 = vadd.f32 %v5805_v57, %v6858_v62  ;;  %v3946_v2 = vshrl.u32 %v5479_v44, 16  ;;  %v3911_v5 = vsel %vm6284_vm4, %v3906_v54, %v3910_v24  ;;  %v3934_v12 = vrot.slane %v3932_v61, 5  ;;  %v5484_v61 = vld [vmem:[%s6266_s9 + $0x124] sm:$0xf] }
 0x10c   : > { %v6931_v58 = vpop.f32.mrf.mxu0  ;;  %5910 = vmatmul.mubr.msk.bf16.gmra.mxu0 %vm410_vm1, %v6103_v28  ;;  %v2033_v6 = vpop.f32.mrf.mxu1  ;;  %v3920_v7 = vrot.slane %v3919_v59, 4  ;;  %v3929_v8 = vor.u32 %v3928_v60, %v3924_v52  ;;  %v5525_v62 = vcombine.low %v3901_v13, %v3911_v5  ;;  %v3938_v19 = vrot.slane %v3936_v26, 4 }
 0x10d   : > { %5913 = vmatprep.mubr.msk.bf16.mxu0 %vm410_vm1, %v6104_v38  ;;  %v6946_v18 = vadd.f32 %v2033_v6, %v6869_v14  ;;  %v3944_v21 = vrot.slane %v3942_v1, 5  ;;  %v3948_v23 = vrot.slane %v3946_v2, 4  ;;  %v3952_v33 = vshll.u32 %v5480_v0, 16 }
 0x10e   : > { %v6942_v20 = vpop.f32.mrf.mxu0  ;;  %v5806_v28 = vpop.f32.mrf.mxu1  ;;  %v3925_v24 = vsel %vm6284_vm4, %v3920_v7, %v3924_v52  ;;  %v3930_v29 = vrot.slane %v3929_v8, 4  ;;  %5972 = vmatmul.mubr.msk.bf16.gmra.mxu1 %vm410_vm1, %v5525_v62  ;;  %v3939_v38 = vor.u32 %v3938_v19, %v3934_v12  ;;  %v3957_v39 = vshrl.u32 %v5481_v17, 16  ;;  %v5483_v52 = vld [vmem:[%s6266_s9 + $0x120] sm:$0xf] }
 0x10f   : > { %v6956_v14 = vadd.f32 %v5806_v28, %v6877_v27  ;;  %v3960_v48 = vshll.u32 %v5481_v17, 16  ;;  %v3949_v44 = vor.u32 %v3948_v23, %v3944_v21  ;;  %v3954_v31 = vrot.slane %v3952_v33, 5 }
 0x110   : > { %v6951_v34 = vpop.f32.mrf.mxu0  ;;  %v2036_v45 = vpop.f32.mrf.mxu1  ;;  %v3935_v47 = vsel %vm6284_vm4, %v3930_v29, %v3934_v12  ;;  %v3966_v57 = vshll.u32 %v5482_v22, 16  ;;  %v3940_v27 = vrot.slane %v3939_v38, 4  ;;  %v3959_v60 = vrot.slane %v3957_v39, 4 }
 0x111   : > { %v6965_v54 = vadd.f32 %v2036_v45, %v6885_v42  ;;  %v5526_v59 = vcombine.low %v3925_v24, %v3935_v47  ;;  %v3950_v0 = vrot.slane %v3949_v44, 4  ;;  %v3962_v2 = vrot.slane %v3960_v48, 5  ;;  %v6107_v44 = vld [vmem:[%s6266_s9 + $0x148] sm:$0xff]  }
 0x112   : > { %v6961_v13 = vpop.f32.mrf.mxu0  ;;  %v5809_v26 = vpop.f32.mrf.mxu1  ;;  %v3968_v5 = vrot.slane %v3966_v57, 5  ;;  %v3970_v6 = vshrl.u32 %v5482_v22, 16  ;;  %v3945_v7 = vsel %vm6284_vm4, %v3940_v27, %v3944_v21  ;;  %v3976_v8 = vshll.u32 %v5483_v52, 16  ;;  %v5485_v22 = vld [vmem:[%s6266_s9 + $0x128] sm:$0x1] }
 0x113   : > { %5975 = vmatprep.mubr.msk.bf16.mxu1 %vm410_vm1, %v5526_v59  ;;  %v6973_v42 = vadd.f32 %v5809_v26, %v6896_v55  ;;  %v3980_v12 = vshrl.u32 %v5483_v52, 16  ;;  %v3955_v17 = vsel %vm6284_vm4, %v3950_v0, %v3954_v31  ;;  %v3963_v19 = vor.u32 %v3962_v2, %v3959_v60  ;;  %v5486_v55 = vld [vmem:[%s6266_s9 + $0x12c] sm:$0xf]  ;;  %v5487_v57 = vld [vmem:[%s6266_s9 + $0x130] sm:$0xf]  ;;  %v6108_v59 = vld [vmem:[%s6266_s9 + $0x154] sm:$0xff]  }
 0x114   : > { %v6968_v1 = vpop.f32.mrf.mxu0  ;;  %5914 = vmatmul.mubr.msk.bf16.gmra.mxu0 %vm410_vm1, %v6105_v35  ;;  %v2049_v62 = vpop.f32.mrf.mxu1  ;;  %v3972_v28 = vrot.slane %v3970_v6, 4  ;;  %v3986_v24 = vshll.u32 %v5484_v61, 16  ;;  %v5527_v23 = vcombine.low %v3945_v7, %v3955_v17  ;;  %v3978_v33 = vrot.slane %v3976_v8, 5 }
 0x115   : > { %5917 = vmatprep.mubr.msk.bf16.mxu0 %vm410_vm1, %v6106_v41  ;;  %v6985_v21 = vadd.f32 %v2049_v62, %v6904_v11  ;;  %v3982_v35 = vrot.slane %v3980_v12, 4  ;;  %v3964_v39 = vrot.slane %v3963_v19, 4  ;;  %v3990_v45 = vshrl.u32 %v5484_v61, 16  ;;  %v5488_v12 = vld [vmem:[%s6266_s9 + $0x134] sm:$0xf] }
 0x116   : > { %v6981_v29 = vpop.f32.mrf.mxu0  ;;  %v5810_v38 = vpop.f32.mrf.mxu1  ;;  %v3973_v48 = vor.u32 %v3972_v28, %v3968_v5  ;;  %v3988_v41 = vrot.slane %v3986_v24, 5  ;;  %5976 = vmatmul.mubr.msk.bf16.gmra.mxu1 %vm410_vm1, %v5527_v23  ;;  %v3996_v11 = vshll.u32 %v5485_v22, 16  ;;  %v4001_v27 = vshrl.u32 %v5486_v55, 16  ;;  %v5489_v23 = vld [vmem:[%s6266_s9 + $0x138] sm:$0xf] }
 0x117   : > { %v6992_v31 = vadd.f32 %v5810_v38, %v6913_v25  ;;  %v3983_v52 = vor.u32 %v3982_v35, %v3978_v33  ;;  %v3969_v26 = vsel %vm6284_vm4, %v3964_v39, %v3968_v5  ;;  %v3992_v61 = vrot.slane %v3990_v45, 4 }
 0x118   : > { %v6987_v47 = vpop.f32.mrf.mxu0  ;;  %v2052_v60 = vpop.f32.mrf.mxu1  ;;  %v3974_v0 = vrot.slane %v3973_v48, 4  ;;  %v4004_v6 = vshll.u32 %v5486_v55, 16  ;;  %v3998_v8 = vrot.slane %v3996_v11, 5  ;;  %v4003_v17 = vrot.slane %v4001_v27, 4 }
 0x119   : > { %v7001_v7 = vadd.f32 %v2052_v60, %v6923_v43  ;;  %v3984_v25 = vrot.slane %v3983_v52, 4  ;;  %v3993_v28 = vor.u32 %v3992_v61, %v3988_v41  ;;  %v4010_v24 = vshll.u32 %v5487_v57, 16 }
 0x11a   : > { %v6998_v2 = vpop.f32.mrf.mxu0  ;;  %v3979_v62 = vsel %vm6284_vm4, %v3974_v0, %v3978_v33  ;;  %v5813_v19 = vpop.f32.mrf.mxu1  ;;  %v4006_v5 = vrot.slane %v4004_v6, 5  ;;  %v4014_v38 = vshrl.u32 %v5487_v57, 16  ;;  %v5490_v57 = vld [vmem:[%s6266_s9 + $0x13c] sm:$0x1]  ;;  %v4030_v27 = vshll.u32 %v5489_v23, 16 }
 0x11b   : > { %v5528_v55 = vcombine.low %v3969_v26, %v3979_v62  ;;  %v7011_v43 = vadd.f32 %v5813_v19, %v6931_v58  ;;  %v3989_v35 = vsel %vm6284_vm4, %v3984_v25, %v3988_v41  ;;  %v3994_v33 = vrot.slane %v3993_v28, 4  ;;  %v6109_v25 = vld [vmem:[%s6266_s9 + $0x15c] sm:$0xff]  }
 0x11c   : > { %v7006_v22 = vpop.f32.mrf.mxu0  ;;  %5918 = vmatmul.mubr.msk.bf16.gmra.mxu0 %vm410_vm1, %v6107_v44  ;;  %v2065_v39 = vpop.f32.mrf.mxu1  ;;  %v4007_v48 = vor.u32 %v4006_v5, %v4003_v17  ;;  %v4012_v45 = vrot.slane %v4010_v24, 5  ;;  %v4020_v44 = vshll.u32 %v5488_v12, 16  ;;  %v4016_v11 = vrot.slane %v4014_v38, 4  ;;  %v5491_v17 = vld [vmem:[%s6266_s9 + $0x140] sm:$0xf] }
 0x11d   : > { %5921 = vmatprep.mubr.msk.bf16.mxu0 %vm410_vm1, %v6108_v59  ;;  %5979 = vmatprep.mubr.msk.bf16.mxu1 %vm410_vm1, %v5528_v55  ;;  %v7020_v58 = vadd.f32 %v2065_v39, %v6942_v20  ;;  %v4024_v41 = vshrl.u32 %v5488_v12, 16  ;;  %v3999_v59 = vsel %vm6284_vm4, %v3994_v33, %v3998_v8  ;;  %v4034_v61 = vshrl.u32 %v5489_v23, 16  ;;  %v5492_v12 = vld [vmem:[%s6266_s9 + $0x144] sm:$0xf] }
 0x11e   : > { %v7016_v52 = vpop.f32.mrf.mxu0  ;;  %v5814_v60 = vpop.f32.mrf.mxu1  ;;  %v4008_v26 = vrot.slane %v4007_v48, 4  ;;  %v4022_v0 = vrot.slane %v4020_v44, 5  ;;  %v5529_v62 = vcombine.low %v3989_v35, %v3999_v59  ;;  %v4017_v19 = vor.u32 %v4016_v11, %v4012_v45 }
 0x11f   : > { %v7030_v20 = vadd.f32 %v5814_v60, %v6951_v34  ;;  %v4026_v28 = vrot.slane %v4024_v41, 4  ;;  %v4032_v24 = vrot.slane %v4030_v27, 5  ;;  %v4036_v55 = vrot.slane %v4034_v61, 4  ;;  %v5494_v61 = vld [vmem:[%s6266_s9 + $0x14c] sm:$0xf] }
 0x120   : > { %v7025_v6 = vpop.f32.mrf.mxu0  ;;  %v2068_v5 = vpop.f32.mrf.mxu1  ;;  %v4013_v8 = vsel %vm6284_vm4, %v4008_v26, %v4012_v45  ;;  %v4040_v38 = vshll.u32 %v5490_v57, 16  ;;  %5980 = vmatmul.mubr.msk.bf16.gmra.mxu1 %vm410_vm1, %v5529_v62  ;;  %v4018_v34 = vrot.slane %v4017_v19, 4  ;;  %v4045_v39 = vshrl.u32 %v5491_v17, 16  ;;  %v5493_v45 = vld [vmem:[%s6266_s9 + $0x148] sm:$0xf] }
 0x121   : > { %v7039_v35 = vadd.f32 %v2068_v5, %v6961_v13  ;;  %v4027_v33 = vor.u32 %v4026_v28, %v4022_v0  ;;  %v4037_v44 = vor.u32 %v4036_v55, %v4032_v24  ;;  %v4048_v57 = vshll.u32 %v5491_v17, 16 }
 0x122   : > { %v7035_v23 = vpop.f32.mrf.mxu0  ;;  %v5817_v48 = vpop.f32.mrf.mxu1  ;;  %v4042_v11 = vrot.slane %v4040_v38, 5  ;;  %v4054_v27 = vshll.u32 %v5492_v12, 16  ;;  %v4023_v59 = vsel %vm6284_vm4, %v4018_v34, %v4022_v0  ;;  %v4047_v26 = vrot.slane %v4045_v39, 4 }
 0x123   : > { %7457 = vst [vmem:[#allocation6_spill] sm:$0xff] %v7039_v35  ;;  %v4028_v60 = vrot.slane %v4027_v33, 4  ;;  %v7048_v13 = vadd.f32 %v5817_v48, %v6968_v1  ;;  %v5530_v62 = vcombine.low %v4013_v8, %v4023_v59  ;;  %v4038_v19 = vrot.slane %v4037_v44, 4  ;;  %v5495_v48 = vld [vmem:[%s6266_s9 + $0x150] sm:$0x1] }
 0x124   : > { %v7041_v41 = vpop.f32.mrf.mxu0  ;;  %5922 = vmatmul.mubr.msk.bf16.gmra.mxu0 %vm410_vm1, %v6109_v25  ;;  %v2081_v28 = vpop.f32.mrf.mxu1  ;;  %v4050_v5 = vrot.slane %v4048_v57, 5  ;;  %v4056_v55 = vrot.slane %v4054_v27, 5  ;;  %v4058_v38 = vshrl.u32 %v5492_v12, 16  ;;  %v4064_v1 = vshll.u32 %v5493_v45, 16  ;;  %v5496_v27 = vld [vmem:[%s6266_s9 + $0x154] sm:$0xf] }
 0x125   : > { %7458 = vst [vmem:[#allocation7_spill] sm:$0xff] %v7048_v13  ;;  %v4033_v17 = vsel %vm6284_vm4, %v4028_v60, %v4032_v24  ;;  %v7056_v0 = vadd.f32 %v2081_v28, %v6981_v29  ;;  %5983 = vmatprep.mubr.msk.bf16.mxu1 %vm410_vm1, %v5530_v62  ;;  %v4043_v8 = vsel %vm6284_vm4, %v4038_v19, %v4042_v11  ;;  %v4068_v39 = vshrl.u32 %v5493_v45, 16 }
 0x126   : > { %v7051_v25 = vpop.f32.mrf.mxu0  ;;  %v5818_v34 = vpop.f32.mrf.mxu1  ;;  %v4051_v33 = vor.u32 %v4050_v5, %v4047_v26  ;;  %v4074_v44 = vshll.u32 %v5494_v61, 16  ;;  %v5531_v24 = vcombine.low %v4033_v17, %v4043_v8  ;;  %v4060_v12 = vrot.slane %v4058_v38, 4  ;;  %v5497_v8 = vld [vmem:[%s6266_s9 + $0x158] sm:$0xf] }
 0x127   : > { %7459 = vst [vmem:[#allocation8_spill] sm:$0xff] %v7056_v0  ;;  %v7066_v29 = vadd.f32 %v5818_v34, %v6987_v47  ;;  %v4066_v59 = vrot.slane %v4064_v1, 5  ;;  %v4070_v28 = vrot.slane %v4068_v39, 4  ;;  %v4078_v19 = vshrl.u32 %v5494_v61, 16  ;;  %v5498_v61 = vld [vmem:[%s6266_s9 + $0x15c] sm:$0xf] }
 0x128   : > { %v7062_v57 = vpop.f32.mrf.mxu0  ;;  %v2084_v60 = vpop.f32.mrf.mxu1  ;;  %v4052_v62 = vrot.slane %v4051_v33, 4  ;;  %v4076_v11 = vrot.slane %v4074_v44, 5  ;;  %5984 = vmatmul.mubr.msk.bf16.gmra.mxu1 %vm410_vm1, %v5531_v24  ;;  %v4061_v5 = vor.u32 %v4060_v12, %v4056_v55  ;;  %v4084_v17 = vshll.u32 %v5495_v48, 16 }
 0x129   : > { %7460 = vst [vmem:[#allocation9_spill] sm:$0xff] %v7066_v29  ;;  %v7072_v45 = vadd.f32 %v2084_v60, %v6998_v2  ;;  %v4089_v47 = vshrl.u32 %v5496_v27, 16  ;;  %v4071_v1 = vor.u32 %v4070_v28, %v4066_v59  ;;  %v4080_v33 = vrot.slane %v4078_v19, 4 }
 0x12a   : > { %v7068_v26 = vpop.f32.mrf.mxu0  ;;  %v4057_v38 = vsel %vm6284_vm4, %v4052_v62, %v4056_v55  ;;  %v5821_v34 = vpop.f32.mrf.mxu1  ;;  %v4092_v44 = vshll.u32 %v5496_v27, 16  ;;  %v4062_v29 = vrot.slane %v4061_v5, 4  ;;  %v4086_v2 = vrot.slane %v4084_v17, 5 }
 0x12b   : > { %7461 = vst [vmem:[#allocation10_spill] sm:$0xff] %v7072_v45  ;;  %v7081_v24 = vadd.f32 %v5821_v34, %v7006_v22  ;;  %v4091_v12 = vrot.slane %v4089_v47, 4  ;;  %v4072_v48 = vrot.slane %v4071_v1, 4  ;;  %v4081_v60 = vor.u32 %v4080_v33, %v4076_v11  ;;  %v5499_v22 = vld [vmem:[%s6266_s9 + $0x160] sm:$0xf] }
 0x12c   : > { %v7077_v39 = vpop.f32.mrf.mxu0  ;;  %v2097_v45 = vpop.f32.mrf.mxu1  ;;  %v4094_v0 = vrot.slane %v4092_v44, 5  ;;  %v4098_v13 = vshll.u32 %v5497_v8, 16  ;;  %v4067_v62 = vsel %vm6284_vm4, %v4062_v29, %v4066_v59  ;;  %v4102_v27 = vshrl.u32 %v5497_v8, 16  ;;  %v5500_v59 = vld [vmem:[%s6266_s9 + $0x164] sm:$0x1] }
 0x12d   : > { %7462 = vst [vmem:[#allocation11_spill] sm:$0xff] %v7081_v24  ;;  %v7088_v28 = vadd.f32 %v2097_v45, %v7016_v52  ;;  %v4108_v19 = vshll.u32 %v5498_v61, 16  ;;  %v5532_v5 = vcombine.low %v4057_v38, %v4067_v62  ;;  %v4077_v17 = vsel %vm6284_vm4, %v4072_v48, %v4076_v11 }
 0x12e   : > { %v7083_v55 = vpop.f32.mrf.mxu0  ;;  %v4082_v47 = vrot.slane %v4081_v60, 4  ;;  %v5822_v1 = vpop.f32.mrf.mxu1  ;;  %v4095_v34 = vor.u32 %v4094_v0, %v4091_v12  ;;  %v4100_v24 = vrot.slane %v4098_v13, 5  ;;  %v4104_v35 = vrot.slane %v4102_v27, 4 }
 0x12f   : > { %v7094_v44 = vadd.f32 %v5822_v1, %v7025_v6  ;;  %v4110_v29 = vrot.slane %v4108_v19, 5  ;;  %5987 = vmatprep.mubr.msk.bf16.mxu1 %vm410_vm1, %v5532_v5  ;;  %v4112_v38 = vshrl.u32 %v5498_v61, 16  ;;  %v4118_v11 = vshll.u32 %v5499_v22, 16 }
 0x130   : > { %v5760_v33 = vpop.f32.mrf.mxu0  ;;  %v4087_v52 = vsel %vm6284_vm4, %v4082_v47, %v4086_v2  ;;  %v2100_v45 = vpop.f32.mrf.mxu1  ;;  %v4096_v8 = vrot.slane %v4095_v34, 4  ;;  %v4105_v6 = vor.u32 %v4104_v35, %v4100_v24  ;;  %v4122_v12 = vshrl.u32 %v5499_v22, 16 }
 0x131   : > { %v5533_v60 = vcombine.low %v4077_v17, %v4087_v52  ;;  %v7101_v0 = vadd.f32 %v2100_v45, %v7035_v23  ;;  %v4114_v13 = vrot.slane %v4112_v38, 4  ;;  %v4120_v27 = vrot.slane %v4118_v11, 5 }
 0x132   : > { %v714_v48 = vpop.f32.mrf.mxu0  ;;  %v5825_v62 = vpop.f32.mrf.mxu1  ;;  %v4128_v19 = vshll.u32 %v5500_v59, 16  ;;  %v4101_v2 = vsel %vm6284_vm4, %v4096_v8, %v4100_v24  ;;  %v4106_v5 = vrot.slane %v4105_v6, 4  ;;  %v4124_v17 = vrot.slane %v4122_v12, 4 }
 0x133   : > { %5988 = vmatmul.mubr.msk.bf16.gmra.mxu1 %vm410_vm1, %v5533_v60  ;;  %v7107_v61 = vadd.f32 %v5825_v62, %v7041_v41  ;;  %v4115_v47 = vor.u32 %v4114_v13, %v4110_v29 }
 0x134   : > { %v5763_v1 = vpop.f32.mrf.mxu0  ;;  %v2113_v23 = vpop.f32.mrf.mxu1  ;;  %v4111_v35 = vsel %vm6284_vm4, %v4106_v5, %v4110_v29  ;;  %v4125_v22 = vor.u32 %v4124_v17, %v4120_v27  ;;  %v4130_v52 = vrot.slane %v4128_v19, 5 }
 0x135   : > { %v7112_v59 = vadd.f32 %v2113_v23, %v7051_v25  ;;  %v4116_v45 = vrot.slane %v4115_v47, 4  ;;  %v5534_v38 = vcombine.low %v4101_v2, %v4111_v35 }
 0x136   : > { %v727_v34 = vpop.f32.mrf.mxu0  ;;  %v5826_v11 = vpop.f32.mrf.mxu1  ;;  %v4126_v8 = vrot.slane %v4125_v22, 4 }
 0x137   : > { %v7115_v41 = vadd.f32 %v5826_v11, %v7062_v57  ;;  %5991 = vmatprep.mubr.msk.bf16.mxu1 %vm410_vm1, %v5534_v38  ;;  %v4121_v60 = vsel %vm6284_vm4, %v4116_v45, %v4120_v27 }
 0x138   : > { %v5764_v24 = vpop.f32.mrf.mxu0  ;;  %v2116_v6 = vpop.f32.mrf.mxu1  ;;  %v4131_v12 = vsel %vm6284_vm4, %v4126_v8, %v4130_v52 }
 0x139   : > { %v7123_v25 = vadd.f32 %v2116_v6, %v7068_v26  ;;  %v5535_v13 = vcombine.low %v4121_v60, %v4131_v12 }
 0x13a   : > { %v730_v29 = vpop.f32.mrf.mxu0  ;;  %v5829_v62 = vpop.f32.mrf.mxu1 }
 0x13b   : > { %v7126_v2 = vadd.f32 %v5829_v62, %v7077_v39  ;;  %5992 = vmatmul.mubr.msk.bf16.gmra.mxu1 %vm410_vm1, %v5535_v13 }
 0x13c   : > { %v5767_v19 = vpop.f32.mrf.mxu0  ;;  %v2129_v57 = vpop.f32.mrf.mxu1 }
 0x13d   : > { %v7130_v27 = vadd.f32 %v2129_v57, %v7083_v55 }
 0x13e   : > { %v743_v5 = vpop.f32.mrf.mxu0  ;;  %v5830_v17 = vpop.f32.mrf.mxu1 }
 0x13f   : > { %v7132_v36 = vadd.f32 %v5830_v17, %v5760_v33 }
 0x140   : > { %v5768_v47 = vpop.f32.mrf.mxu0  ;;  %v2132_v23 = vpop.f32.mrf.mxu1 }
 0x141   : > { %v7134_v35 = vadd.f32 %v2132_v23, %v714_v48 }
 0x142   : > { %v746_v26 = vpop.f32.mrf.mxu0  ;;  %v5833_v22 = vpop.f32.mrf.mxu1 }
 0x143   : > { %v7136_v45 = vadd.f32 %v5833_v22, %v5763_v1 }
 0x144   : > { %v5771_v52 = vpop.f32.mrf.mxu0  ;;  %v2145_v39 = vpop.f32.mrf.mxu1 }
 0x145   : > { %v7138_v11 = vadd.f32 %v2145_v39, %v727_v34 }
 0x146   : > { %v759_v38 = vpop.f32.mrf.mxu0  ;;  %v5834_v8 = vpop.f32.mrf.mxu1 }
 0x147   : > { %7463 = vst [vmem:[#allocation12_spill] sm:$0xff] %v7138_v11  ;;  %v7140_v55 = vadd.f32 %v5834_v8, %v5764_v24 }
 0x148   : > { %v5772_v60 = vpop.f32.mrf.mxu0  ;;  %v2148_v6 = vpop.f32.mrf.mxu1 }
 0x149   : > { %7464 = vst [vmem:[#allocation13_spill] sm:$0xff] %v7140_v55  ;;  %v7142_v33 = vadd.f32 %v2148_v6, %v730_v29 }
 0x14a   : > { %v762_v12 = vpop.f32.mrf.mxu0  ;;  %v5837_v13 = vpop.f32.mrf.mxu1 }
 0x14b   : > { %7465 = vst [vmem:[#allocation14_spill] sm:$0xff] %v7142_v33  ;;  %v7144_v48 = vadd.f32 %v5837_v13, %v5767_v19 }
 0x14c   : > { %v5775_v62 = vpop.f32.mrf.mxu0  ;;  %v2161_v57 = vpop.f32.mrf.mxu1 }
 0x14d   : > { %7466 = vst [vmem:[#allocation15_spill] sm:$0xff] %v7144_v48  ;;  %v7146_v1 = vadd.f32 %v2161_v57, %v743_v5 }
 0x14e   : > { %v775_v17 = vpop.f32.mrf.mxu0  ;;  %v5838_v23 = vpop.f32.mrf.mxu1 }
 0x14f   : > { %7467 = vst [vmem:[#allocation16_spill] sm:$0xff] %v7146_v1  ;;  %v7148_v34 = vadd.f32 %v5838_v23, %v5768_v47 }
 0x150   : > { %v5776_v22 = vpop.f32.mrf.mxu0  ;;  %v2164_v39 = vpop.f32.mrf.mxu1 }
 0x151   : > { %7468 = vst [vmem:[#allocation17_spill] sm:$0xff] %v7148_v34  ;;  %v7150_v24 = vadd.f32 %v2164_v39, %v746_v26 }
 0x152   : > { %v778_v11 = vpop.f32.mrf.mxu0  ;;  %v5841_v8 = vpop.f32.mrf.mxu1 }
 0x153   : > { %7469 = vst [vmem:[#allocation18_spill] sm:$0xff] %v7150_v24  ;;  %v7152_v29 = vadd.f32 %v5841_v8, %v5771_v52 }
 0x154   : > { %v5779_v55 = vpop.f32.mrf.mxu0  ;;  %v2177_v6 = vpop.f32.mrf.mxu1 }
 0x155   : > { %7470 = vst [vmem:[#allocation19_spill] sm:$0xff] %v7152_v29  ;;  %v7154_v19 = vadd.f32 %v2177_v6, %v759_v38 }
 0x156   : > { %v791_v33 = vpop.f32.mrf.mxu0  ;;  %v5842_v13 = vpop.f32.mrf.mxu1 }
 0x157   : > { %7471 = vst [vmem:[#allocation20_spill] sm:$0xff] %v7154_v19  ;;  %v7156_v5 = vadd.f32 %v5842_v13, %v5772_v60 }
 0x158   : > { %v5780_v48 = vpop.f32.mrf.mxu0  ;;  %v2180_v57 = vpop.f32.mrf.mxu1 }
 0x159   : > { %7472 = vst [vmem:[#allocation21_spill] sm:$0xff] %v7156_v5  ;;  %v7158_v47 = vadd.f32 %v2180_v57, %v762_v12 }
 0x15a   : > { %v794_v1 = vpop.f32.mrf.mxu0  ;;  %v5845_v23 = vpop.f32.mrf.mxu1 }
 0x15b   : > { %v7160_v26 = vadd.f32 %v5845_v23, %v5775_v62 }
 0x15c   : > { %v5783_v34 = vpop.f32.mrf.mxu0  ;;  %v2193_v39 = vpop.f32.mrf.mxu1 }
 0x15d   : > { %7473 = vst [vmem:[#allocation22_spill] sm:$0xff] %v7160_v26  ;;  %v7162_v52 = vadd.f32 %v2193_v39, %v775_v17 }
 0x15e   : > { %v807_v24 = vpop.f32.mrf.mxu0  ;;  %v5846_v8 = vpop.f32.mrf.mxu1 }
 0x15f   : > { %7474 = vst [vmem:[#allocation23_spill] sm:$0xff] %v7162_v52  ;;  %v7164_v38 = vadd.f32 %v5846_v8, %v5776_v22 }
 0x160   : > { %v5784_v29 = vpop.f32.mrf.mxu0  ;;  %v2196_v6 = vpop.f32.mrf.mxu1 }
 0x161   : > { %7475 = vst [vmem:[#allocation24_spill] sm:$0xff] %v7164_v38  ;;  %v7166_v60 = vadd.f32 %v2196_v6, %v778_v11 }
 0x162   : > { %v810_v19 = vpop.f32.mrf.mxu0  ;;  %v5849_v13 = vpop.f32.mrf.mxu1 }
 0x163   : > { %7476 = vst [vmem:[#allocation25_spill] sm:$0xff] %v7166_v60  ;;  %v7168_v12 = vadd.f32 %v5849_v13, %v5779_v55 }
 0x164   : > { %v5859_v5 = vpop.f32.mrf.mxu0  ;;  %v2209_v57 = vpop.f32.mrf.mxu1 }
 0x165   : > { %7477 = vst [vmem:[#allocation26_spill] sm:$0xff] %v7168_v12  ;;  %v7170_v23 = vadd.f32 %v2209_v57, %v791_v33 }
 0x166   : > { %v2824_v62 = vpop.f32.mrf.mxu0  ;;  %v5850_v26 = vpop.f32.mrf.mxu1 }
 0x167   : > { %7478 = vst [vmem:[#allocation27_spill] sm:$0xff] %v7170_v23  ;;  %v7172_v39 = vadd.f32 %v5850_v26, %v5780_v48 }
 0x168   : > { %v5860_v17 = vpop.f32.mrf.mxu0  ;;  %v2212_v22 = vpop.f32.mrf.mxu1 }
 0x169   : > { %v7174_v38 = vadd.f32 %v2212_v22, %v794_v1  ;;  %v3165_v1 = vadd.f32 %v5859_v5, %v6782_v15 }
 0x16a   : > { %v2827_v8 = vpop.f32.mrf.mxu0  ;;  %v5853_v11 = vpop.f32.mrf.mxu1 }
 0x16b   : > { %v7176_v60 = vadd.f32 %v5853_v11, %v5783_v34  ;;  %v7191_v34 = vld [vmem:[%s7451_s2] ss:$0 sm:$0xff]  ;;  %v3163_v11 = vadd.f32 %v2824_v62, %v6791_v56  ;;  %v3164_v5 = vadd.f32 %v2827_v8, %v6808_v51 }
 0x16c   : > { %v5863_v6 = vpop.f32.mrf.mxu0  ;;  %v2225_v55 = vpop.f32.mrf.mxu1 }
 0x16d   : > { %7479 = vst [vmem:[#allocation28_spill] sm:$0xff] %v7176_v60  ;;  %v7178_v12 = vadd.f32 %v2225_v55, %v807_v24 }
 0x16e   : > { %v2840_v13 = vpop.f32.mrf.mxu0  ;;  %v5854_v33 = vpop.f32.mrf.mxu1 }
 0x16f   : > { %7480 = vst [vmem:[#allocation29_spill] sm:$0xff] %v7178_v12  ;;  %v7181_v23 = vadd.f32 %v5854_v33, %v5784_v29 }
 0x170   : > { %v5864_v57 = vpop.f32.mrf.mxu0  ;;  %v2228_v52 = vpop.f32.mrf.mxu1 }
 0x171   : > { %7481 = vst [vmem:[#allocation30_spill] sm:$0xff] %v7181_v23  ;;  %v7186_v26 = vadd.f32 %v2228_v52, %v810_v19  ;;  %v3166_v23 = vadd.f32 %v5860_v17, %v6800_v4  ;;  %v3169_v4 = vadd.f32 %v5863_v6, %v6824_v10 }
 0x172   : > { %v2843_v48 = vpop.f32.mrf.mxu0  ;;  %v5929_v22 = vpop.f32.mrf.mxu1 }
 0x173   : > { %v4716_v55 = vadd.f32 %v5929_v22, %v3165_v1 }
 0x174   : > { %v5867_v24 = vpop.f32.mrf.mxu0  ;;  %v4375_v29 = vpop.f32.mrf.mxu1 }
 0x175   : > { %v4927_v12 = vadd.f32 %v7191_v34, %v4716_v55  ;;  %v4714_v60 = vadd.f32 %v4375_v29, %v3163_v11  ;;  %v3167_v11 = vadd.f32 %v2840_v13, %v6834_v37  ;;  %v3170_v29 = vadd.f32 %v5864_v57, %v6843_v40 }
 0x176   : > { %v2856_v33 = vpop.f32.mrf.mxu0  ;;  %v5930_v15 = vpop.f32.mrf.mxu1 }
 0x177   : > { %4995 = vst [vmem:[%s7197_s20 + $0x10] sm:$0xff] %v4927_v12  ;;  %v4925_v56 = vadd.f32 %v7191_v34, %v4714_v60  ;;  %v4717_v52 = vadd.f32 %v5930_v15, %v3166_v23 }
 0x178   : > { %v5868_v19 = vpop.f32.mrf.mxu0  ;;  %v4378_v62 = vpop.f32.mrf.mxu1 }
 0x179   : > { %4993 = vst [vmem:[%s7197_s20] sm:$0xff] %v4925_v56  ;;  %v4928_v17 = vadd.f32 %v7191_v34, %v4717_v52  ;;  %v4715_v22 = vadd.f32 %v4378_v62, %v3164_v5  ;;  %v3168_v56 = vadd.f32 %v2843_v48, %v6852_v53 }
 0x17a   : > { %v2859_v1 = vpop.f32.mrf.mxu0  ;;  %v5933_v51 = vpop.f32.mrf.mxu1 }
 0x17b   : > { %4996 = vst [vmem:[%s7197_s20 + $0x18] sm:$0xff] %v4928_v17  ;;  %v4926_v12 = vadd.f32 %v7191_v34, %v4715_v22  ;;  %v4720_v55 = vadd.f32 %v5933_v51, %v3169_v4  ;;  %v3173_v4 = vadd.f32 %v5867_v24, %v6862_v9  ;;  %v3171_v51 = vadd.f32 %v2856_v33, %v6872_v16 }
 0x17c   : > { %v5871_v8 = vpop.f32.mrf.mxu0  ;;  %v4391_v60 = vpop.f32.mrf.mxu1 }
 0x17d   : > { %4994 = vst [vmem:[%s7197_s20 + $0x8] sm:$0xff] %v4926_v12  ;;  %v4931_v10 = vadd.f32 %v7191_v34, %v4720_v55  ;;  %v4718_v6 = vadd.f32 %v4391_v60, %v3167_v11  ;;  %v3174_v55 = vadd.f32 %v5868_v19, %v6881_v32 }
 0x17e   : > { %v2872_v23 = vpop.f32.mrf.mxu0  ;;  %v5934_v15 = vpop.f32.mrf.mxu1 }
 0x17f   : > { %4999 = vst [vmem:[%s7197_s20 + $0x30] sm:$0xff] %v4931_v10  ;;  %v4929_v37 = vadd.f32 %v7191_v34, %v4718_v6  ;;  %v4721_v13 = vadd.f32 %v5934_v15, %v3170_v29  ;;  %v3172_v10 = vadd.f32 %v2859_v1, %v6888_v49 }
 0x180   : > { %v5872_v5 = vpop.f32.mrf.mxu0  ;;  %v4394_v52 = vpop.f32.mrf.mxu1 }
 0x181   : > { %4997 = vst [vmem:[%s7197_s20 + $0x20] sm:$0xff] %v4929_v37  ;;  %v4932_v40 = vadd.f32 %v7191_v34, %v4721_v13  ;;  %v4719_v57 = vadd.f32 %v4394_v52, %v3168_v56  ;;  %v3177_v56 = vadd.f32 %v5871_v8, %v6901_v63  ;;  %v3175_v52 = vadd.f32 %v2872_v23, %v6909_v3 }
 0x182   : > { %v2875_v62 = vpop.f32.mrf.mxu0  ;;  %v5937_v17 = vpop.f32.mrf.mxu1 }
 0x183   : > { %5000 = vst [vmem:[%s7197_s20 + $0x38] sm:$0xff] %v4932_v40  ;;  %v4930_v53 = vadd.f32 %v7191_v34, %v4719_v57  ;;  %v4724_v48 = vadd.f32 %v5937_v17, %v3173_v4  ;;  %v3178_v57 = vadd.f32 %v5872_v5, %v6917_v30 }
 0x184   : > { %v5875_v22 = vpop.f32.mrf.mxu0  ;;  %v4407_v11 = vpop.f32.mrf.mxu1 }
 0x185   : > { %4998 = vst [vmem:[%s7197_s20 + $0x28] sm:$0xff] %v4930_v53  ;;  %v4935_v9 = vadd.f32 %v7191_v34, %v4724_v48  ;;  %v4722_v24 = vadd.f32 %v4407_v11, %v3171_v51  ;;  %v3176_v53 = vadd.f32 %v2875_v62, %v6927_v50 }
 0x186   : > { %v2888_v12 = vpop.f32.mrf.mxu0  ;;  %v5938_v60 = vpop.f32.mrf.mxu1 }
 0x187   : > { %5003 = vst [vmem:[%s7197_s20 + $0x50] sm:$0xff] %v4935_v9  ;;  %v4933_v16 = vadd.f32 %v7191_v34, %v4722_v24  ;;  %v4725_v33 = vadd.f32 %v5938_v60, %v3174_v55  ;;  %v3181_v55 = vadd.f32 %v5875_v22, %v6936_v46  ;;  %v3179_v60 = vadd.f32 %v2888_v12, %v6946_v18 }
 0x188   : > { %v5876_v29 = vpop.f32.mrf.mxu0  ;;  %v4410_v6 = vpop.f32.mrf.mxu1 }
 0x189   : > { %5001 = vst [vmem:[%s7197_s20 + $0x40] sm:$0xff] %v4933_v16  ;;  %v4936_v32 = vadd.f32 %v7191_v34, %v4725_v33  ;;  %v4723_v19 = vadd.f32 %v4410_v6, %v3172_v10  ;;  %v3182_v33 = vadd.f32 %v5876_v29, %v6956_v14 }
 0x18a   : > { %v2891_v15 = vpop.f32.mrf.mxu0  ;;  %v5941_v37 = vpop.f32.mrf.mxu1 }
 0x18b   : > { %5004 = vst [vmem:[%s7197_s20 + $0x58] sm:$0xff] %v4936_v32  ;;  %v4934_v49 = vadd.f32 %v7191_v34, %v4723_v19  ;;  %v4728_v1 = vadd.f32 %v5941_v37, %v3177_v56  ;;  %v3180_v32 = vadd.f32 %v2891_v15, %v6965_v54 }
 0x18c   : > { %v5879_v13 = vpop.f32.mrf.mxu0  ;;  %v4423_v4 = vpop.f32.mrf.mxu1 }
 0x18d   : > { %5002 = vst [vmem:[%s7197_s20 + $0x48] sm:$0xff] %v4934_v49  ;;  %v4939_v63 = vadd.f32 %v7191_v34, %v4728_v1  ;;  %v4726_v8 = vadd.f32 %v4423_v4, %v3175_v52  ;;  %v3185_v52 = vadd.f32 %v5879_v13, %v6973_v42 }
 0x18e   : > { %v2904_v40 = vpop.f32.mrf.mxu0  ;;  %v5942_v17 = vpop.f32.mrf.mxu1 }
 0x18f   : > { %5007 = vst [vmem:[%s7197_s20 + $0x70] sm:$0xff] %v4939_v63  ;;  %v4937_v3 = vadd.f32 %v7191_v34, %v4726_v8  ;;  %v4729_v23 = vadd.f32 %v5942_v17, %v3178_v57  ;;  %v3183_v4 = vadd.f32 %v2904_v40, %v6985_v21 }
 0x190   : > { %v5880_v51 = vpop.f32.mrf.mxu0  ;;  %v4426_v48 = vpop.f32.mrf.mxu1 }
 0x191   : > { %5005 = vst [vmem:[%s7197_s20 + $0x60] sm:$0xff] %v4937_v3  ;;  %v4940_v30 = vadd.f32 %v7191_v34, %v4729_v23  ;;  %v4727_v5 = vadd.f32 %v4426_v48, %v3176_v53  ;;  %v3186_v8 = vadd.f32 %v5880_v51, %v6992_v31 }
 0x192   : > { %v2907_v11 = vpop.f32.mrf.mxu0  ;;  %v5945_v9 = vpop.f32.mrf.mxu1 }
 0x193   : > { %5008 = vst [vmem:[%s7197_s20 + $0x78] sm:$0xff] %v4940_v30  ;;  %v4938_v50 = vadd.f32 %v7191_v34, %v4727_v5  ;;  %v4732_v62 = vadd.f32 %v5945_v9, %v3181_v55  ;;  %v3184_v3 = vadd.f32 %v2907_v11, %v7001_v7 }
 0x194   : > { %v5883_v24 = vpop.f32.mrf.mxu0  ;;  %v4439_v10 = vpop.f32.mrf.mxu1 }
 0x195   : > { %5006 = vst [vmem:[%s7197_s20 + $0x68] sm:$0xff] %v4938_v50  ;;  %v4943_v46 = vadd.f32 %v7191_v34, %v4732_v62  ;;  %v4730_v22 = vadd.f32 %v4439_v10, %v3179_v60  ;;  %v3189_v55 = vadd.f32 %v5883_v24, %v7011_v43 }
 0x196   : > { %v2920_v16 = vpop.f32.mrf.mxu0  ;;  %v5946_v6 = vpop.f32.mrf.mxu1 }
 0x197   : > { %5011 = vst [vmem:[%s7197_s20 + $0x90] sm:$0xff] %v4943_v46  ;;  %v4941_v18 = vadd.f32 %v7191_v34, %v4730_v22  ;;  %v4733_v12 = vadd.f32 %v5946_v6, %v3182_v33  ;;  %v3187_v9 = vadd.f32 %v2920_v16, %v7020_v58  ;;  %v7482_v46 = vld [vmem:[#allocation6_spill] sm:$0xff] }
 0x198   : > { %v5884_v56 = vpop.f32.mrf.mxu0  ;;  %v4442_v19 = vpop.f32.mrf.mxu1 }
 0x199   : > { %5009 = vst [vmem:[%s7197_s20 + $0x80] sm:$0xff] %v4941_v18  ;;  %v4944_v14 = vadd.f32 %v7191_v34, %v4733_v12  ;;  %v4731_v29 = vadd.f32 %v4442_v19, %v3180_v32  ;;  %v3190_v62 = vadd.f32 %v5884_v56, %v7030_v20  ;;  %v7483_v18 = vld [vmem:[#allocation7_spill] sm:$0xff] }
 0x19a   : > { %v2923_v37 = vpop.f32.mrf.mxu0  ;;  %v5949_v49 = vpop.f32.mrf.mxu1 }
 0x19b   : > { %5012 = vst [vmem:[%s7197_s20 + $0x98] sm:$0xff] %v4944_v14  ;;  %v4942_v54 = vadd.f32 %v7191_v34, %v4731_v29  ;;  %v4736_v15 = vadd.f32 %v5949_v49, %v3185_v52  ;;  %v3188_v22 = vadd.f32 %v2923_v37, %v7482_v46  ;;  %v7484_v14 = vld [vmem:[#allocation8_spill] sm:$0xff] }
 0x19c   : > { %v5887_v1 = vpop.f32.mrf.mxu0  ;;  %v4455_v57 = vpop.f32.mrf.mxu1 }
 0x19d   : > { %5010 = vst [vmem:[%s7197_s20 + $0x88] sm:$0xff] %v4942_v54  ;;  %v4947_v42 = vadd.f32 %v7191_v34, %v4736_v15  ;;  %v4734_v13 = vadd.f32 %v4455_v57, %v3183_v4  ;;  %v3193_v12 = vadd.f32 %v5887_v1, %v7483_v18  ;;  %v7485_v15 = vld [vmem:[#allocation9_spill] sm:$0xff] }
 0x19e   : > { %v2936_v63 = vpop.f32.mrf.mxu0  ;;  %v5950_v17 = vpop.f32.mrf.mxu1 }
 0x19f   : > { %5015 = vst [vmem:[%s7197_s20 + $0xb0] sm:$0xff] %v4947_v42  ;;  %v4945_v21 = vadd.f32 %v7191_v34, %v4734_v13  ;;  %v4737_v40 = vadd.f32 %v5950_v17, %v3186_v8  ;;  %v3191_v29 = vadd.f32 %v2936_v63, %v7484_v14  ;;  %v7486_v17 = vld [vmem:[#allocation10_spill] sm:$0xff] }
 0x1a0   : > { %v5888_v53 = vpop.f32.mrf.mxu0  ;;  %v4458_v23 = vpop.f32.mrf.mxu1 }
 0x1a1   : > { %5013 = vst [vmem:[%s7197_s20 + $0xa0] sm:$0xff] %v4945_v21  ;;  %v4948_v31 = vadd.f32 %v7191_v34, %v4737_v40  ;;  %v4735_v51 = vadd.f32 %v4458_v23, %v3184_v3  ;;  %v3194_v57 = vadd.f32 %v5888_v53, %v7485_v15 }
 0x1a2   : > { %v2939_v48 = vpop.f32.mrf.mxu0  ;;  %v5953_v30 = vpop.f32.mrf.mxu1 }
 0x1a3   : > { %5016 = vst [vmem:[%s7197_s20 + $0xb8] sm:$0xff] %v4948_v31  ;;  %v4946_v7 = vadd.f32 %v7191_v34, %v4735_v51  ;;  %v4740_v11 = vadd.f32 %v5953_v30, %v3189_v55  ;;  %v3192_v3 = vadd.f32 %v2939_v48, %v7486_v17  ;;  %v7487_v55 = vld [vmem:[#allocation11_spill] sm:$0xff] }
 0x1a4   : > { %v5891_v5 = vpop.f32.mrf.mxu0  ;;  %v4471_v60 = vpop.f32.mrf.mxu1 }
 0x1a5   : > { %5014 = vst [vmem:[%s7197_s20 + $0xa8] sm:$0xff] %v4946_v7  ;;  %v4951_v43 = vadd.f32 %v7191_v34, %v4740_v11  ;;  %v4738_v24 = vadd.f32 %v4471_v60, %v3187_v9  ;;  %v3197_v31 = vadd.f32 %v5891_v5, %v7487_v55 }
 0x1a6   : > { %v2952_v50 = vpop.f32.mrf.mxu0  ;;  %v5954_v10 = vpop.f32.mrf.mxu1 }
 0x1a7   : > { %5019 = vst [vmem:[%s7197_s20 + $0xd0] sm:$0xff] %v4951_v43  ;;  %v4949_v58 = vadd.f32 %v7191_v34, %v4738_v24  ;;  %v4741_v16 = vadd.f32 %v5954_v10, %v3190_v62  ;;  %v3195_v7 = vadd.f32 %v2952_v50, %v7088_v28 }
 0x1a8   : > { %v5892_v33 = vpop.f32.mrf.mxu0  ;;  %v4474_v6 = vpop.f32.mrf.mxu1 }
 0x1a9   : > { %5017 = vst [vmem:[%s7197_s20 + $0xc0] sm:$0xff] %v4949_v58  ;;  %v4952_v20 = vadd.f32 %v7191_v34, %v4741_v16  ;;  %v4739_v56 = vadd.f32 %v4474_v6, %v3188_v22  ;;  %v3198_v43 = vadd.f32 %v5892_v33, %v7094_v44 }
 0x1aa   : > { %v2955_v32 = vpop.f32.mrf.mxu0  ;;  %v5957_v19 = vpop.f32.mrf.mxu1 }
 0x1ab   : > { %5020 = vst [vmem:[%s7197_s20 + $0xd8] sm:$0xff] %v4952_v20  ;;  %v4950_v37 = vadd.f32 %v7191_v34, %v4739_v56  ;;  %v4744_v49 = vadd.f32 %v5957_v19, %v3193_v12  ;;  %v3196_v22 = vadd.f32 %v2955_v32, %v7101_v0 }
 0x1ac   : > { %v5895_v52 = vpop.f32.mrf.mxu0  ;;  %v4487_v4 = vpop.f32.mrf.mxu1 }
 0x1ad   : > { %5018 = vst [vmem:[%s7197_s20 + $0xc8] sm:$0xff] %v4950_v37  ;;  %v4955_v1 = vadd.f32 %v7191_v34, %v4744_v49  ;;  %v4742_v8 = vadd.f32 %v4487_v4, %v3191_v29  ;;  %v3201_v18 = vadd.f32 %v5895_v52, %v7107_v61 }
 0x1ae   : > { %v2968_v54 = vpop.f32.mrf.mxu0  ;;  %v5958_v42 = vpop.f32.mrf.mxu1 }
 0x1af   : > { %5023 = vst [vmem:[%s7197_s20 + $0xf0] sm:$0xff] %v4955_v1  ;;  %v4953_v63 = vadd.f32 %v7191_v34, %v4742_v8  ;;  %v4745_v21 = vadd.f32 %v5958_v42, %v3194_v57  ;;  %v3199_v32 = vadd.f32 %v2968_v54, %v7112_v59 }
 0x1b0   : > { %v5896_v13 = vpop.f32.mrf.mxu0  ;;  %v4490_v40 = vpop.f32.mrf.mxu1 }
 0x1b1   : > { %5021 = vst [vmem:[%s7197_s20 + $0xe0] sm:$0xff] %v4953_v63  ;;  %v4956_v53 = vadd.f32 %v7191_v34, %v4745_v21  ;;  %v4743_v51 = vadd.f32 %v4490_v40, %v3192_v3  ;;  %v3202_v29 = vadd.f32 %v5896_v13, %v7115_v41 }
 0x1b2   : > { %v2971_v23 = vpop.f32.mrf.mxu0  ;;  %v5961_v30 = vpop.f32.mrf.mxu1 }
 0x1b3   : > { %5024 = vst [vmem:[%s7197_s20 + $0xf8] sm:$0xff] %v4956_v53  ;;  %v4954_v48 = vadd.f32 %v7191_v34, %v4743_v51  ;;  %v4748_v11 = vadd.f32 %v5961_v30, %v3197_v31  ;;  %v3200_v4 = vadd.f32 %v2971_v23, %v7123_v25 }
 0x1b4   : > { %v5899_v9 = vpop.f32.mrf.mxu0  ;;  %v4503_v60 = vpop.f32.mrf.mxu1 }
 0x1b5   : > { %5022 = vst [vmem:[%s7197_s20 + $0xe8] sm:$0xff] %v4954_v48  ;;  %v4959_v5 = vadd.f32 %v7191_v34, %v4748_v11  ;;  %v4746_v24 = vadd.f32 %v4503_v60, %v3195_v7  ;;  %v3205_v41 = vadd.f32 %v5899_v9, %v7126_v2 }
 0x1b6   : > { %v2984_v62 = vpop.f32.mrf.mxu0  ;;  %v5962_v10 = vpop.f32.mrf.mxu1 }
 0x1b7   : > { %5027 = vst [vmem:[%s7197_s20 + $0x110] sm:$0xff] %v4959_v5  ;;  %v4957_v28 = vadd.f32 %v7191_v34, %v4746_v24  ;;  %v4749_v50 = vadd.f32 %v5962_v10, %v3198_v43  ;;  %v3203_v25 = vadd.f32 %v2984_v62, %v7130_v27  ;;  %v7488_v43 = vld [vmem:[#allocation12_spill] sm:$0xff] }
 0x1b8   : > { %v5900_v46 = vpop.f32.mrf.mxu0  ;;  %v4506_v58 = vpop.f32.mrf.mxu1 }
 0x1b9   : > { %5025 = vst [vmem:[%s7197_s20 + $0x100] sm:$0xff] %v4957_v28  ;;  %v4960_v6 = vadd.f32 %v7191_v34, %v4749_v50  ;;  %v4747_v44 = vadd.f32 %v4506_v58, %v3196_v22  ;;  %v3206_v40 = vadd.f32 %v5900_v46, %v7132_v36  ;;  %v7489_v22 = vld [vmem:[#allocation13_spill] sm:$0xff] }
 0x1ba   : > { %v2987_v16 = vpop.f32.mrf.mxu0 }
 0x1bb   : > { %5028 = vst [vmem:[%s7197_s20 + $0x118] sm:$0xff] %v4960_v6  ;;  %v4958_v12 = vadd.f32 %v7191_v34, %v4747_v44  ;;  %v3204_v53 = vadd.f32 %v2987_v16, %v7134_v35  ;;  %v7490_v6 = vld [vmem:[#allocation14_spill] sm:$0xff] }
 0x1bc   : > { %v5903_v33 = vpop.f32.mrf.mxu0  ;;  %v5965_v20 = vpop.f32.mrf.mxu1 }
 0x1bd   : > { %5026 = vst [vmem:[%s7197_s20 + $0x108] sm:$0xff] %v4958_v12  ;;  %v4752_v56 = vadd.f32 %v5965_v20, %v3201_v18  ;;  %v3209_v11 = vadd.f32 %v5903_v33, %v7136_v45  ;;  %v7491_v20 = vld [vmem:[#allocation15_spill] sm:$0xff] }
 0x1be   : > { %v3000_v0 = vpop.f32.mrf.mxu0  ;;  %v4519_v19 = vpop.f32.mrf.mxu1 }
 0x1bf   : > { %v4963_v37 = vadd.f32 %v7191_v34, %v4752_v56  ;;  %v4750_v49 = vadd.f32 %v4519_v19, %v3199_v32  ;;  %v3207_v5 = vadd.f32 %v3000_v0, %v7488_v43 }
 0x1c0   : > { %v5904_v14 = vpop.f32.mrf.mxu0  ;;  %v5966_v61 = vpop.f32.mrf.mxu1 }
 0x1c1   : > { %5031 = vst [vmem:[%s7197_s20 + $0x130] sm:$0xff] %v4963_v37  ;;  %v4961_v15 = vadd.f32 %v7191_v34, %v4750_v49  ;;  %v4753_v59 = vadd.f32 %v5966_v61, %v3202_v29  ;;  %v3210_v28 = vadd.f32 %v5904_v14, %v7489_v22  ;;  %v7492_v29 = vld [vmem:[#allocation16_spill] sm:$0xff] }
 0x1c2   : > { %v3003_v52 = vpop.f32.mrf.mxu0  ;;  %v4522_v54 = vpop.f32.mrf.mxu1 }
 0x1c3   : > { %5029 = vst [vmem:[%s7197_s20 + $0x120] sm:$0xff] %v4961_v15  ;;  %v4964_v1 = vadd.f32 %v7191_v34, %v4753_v59  ;;  %v4751_v8 = vadd.f32 %v4522_v54, %v3200_v4  ;;  %v3208_v44 = vadd.f32 %v3003_v52, %v7490_v6  ;;  %v7493_v4 = vld [vmem:[#allocation17_spill] sm:$0xff] }
 0x1c4   : > { %v5907_v57 = vpop.f32.mrf.mxu0  ;;  %v5969_v17 = vpop.f32.mrf.mxu1 }
 0x1c5   : > { %5032 = vst [vmem:[%s7197_s20 + $0x138] sm:$0xff] %v4964_v1  ;;  %v4962_v13 = vadd.f32 %v7191_v34, %v4751_v8  ;;  %v4756_v3 = vadd.f32 %v5969_v17, %v3205_v41  ;;  %v3213_v0 = vadd.f32 %v5907_v57, %v7491_v20  ;;  %v7494_v8 = vld [vmem:[#allocation18_spill] sm:$0xff]  ;;  %v7501_v20 = vld [vmem:[#allocation25_spill] sm:$0xff] }
 0x1c6   : > { %v3016_v42 = vpop.f32.mrf.mxu0  ;;  %v4535_v21 = vpop.f32.mrf.mxu1 }
 0x1c7   : > { %5030 = vst [vmem:[%s7197_s20 + $0x128] sm:$0xff] %v4962_v13  ;;  %v4967_v23 = vadd.f32 %v7191_v34, %v4756_v3  ;;  %v4754_v55 = vadd.f32 %v4535_v21, %v3203_v25  ;;  %v3211_v37 = vadd.f32 %v3016_v42, %v7492_v29  ;;  %v7495_v21 = vld [vmem:[#allocation19_spill] sm:$0xff] }
 0x1c8   : > { %v5908_v63 = vpop.f32.mrf.mxu0  ;;  %v5970_v31 = vpop.f32.mrf.mxu1 }
 0x1c9   : > { %5035 = vst [vmem:[%s7197_s20 + $0x150] sm:$0xff] %v4967_v23  ;;  %v4965_v51 = vadd.f32 %v7191_v34, %v4754_v55  ;;  %v4757_v27 = vadd.f32 %v5970_v31, %v3206_v40  ;;  %v3214_v15 = vadd.f32 %v5908_v63, %v7493_v4  ;;  %v7496_v31 = vld [vmem:[#allocation20_spill] sm:$0xff] }
 0x1ca   : > { %v3019_v2 = vpop.f32.mrf.mxu0  ;;  %v4538_v9 = vpop.f32.mrf.mxu1 }
 0x1cb   : > { %5033 = vst [vmem:[%s7197_s20 + $0x140] sm:$0xff] %v4965_v51  ;;  %v4968_v7 = vadd.f32 %v7191_v34, %v4757_v27  ;;  %v4755_v48 = vadd.f32 %v4538_v9, %v3204_v53  ;;  %v3212_v41 = vadd.f32 %v3019_v2, %v7494_v8  ;;  %v7497_v9 = vld [vmem:[#allocation21_spill] sm:$0xff] }
 0x1cc   : > { %v5911_v30 = vpop.f32.mrf.mxu0 }
 0x1cd   : > { %5036 = vst [vmem:[%s7197_s20 + $0x158] sm:$0xff] %v4968_v7  ;;  %v4966_v60 = vadd.f32 %v7191_v34, %v4755_v48  ;;  %v3217_v40 = vadd.f32 %v5911_v30, %v7495_v21 }
 0x1ce   : > { %v3032_v36 = vpop.f32.mrf.mxu0  ;;  %v5973_v35 = vpop.f32.mrf.mxu1 }
 0x1cf   : > { %5034 = vst [vmem:[%s7197_s20 + $0x148] sm:$0xff] %v4966_v60  ;;  %v4760_v24 = vadd.f32 %v5973_v35, %v3209_v11  ;;  %v3215_v53 = vadd.f32 %v3032_v36, %v7496_v31 }
 0x1d0   : > { %v5912_v62 = vpop.f32.mrf.mxu0  ;;  %v4551_v46 = vpop.f32.mrf.mxu1 }
 0x1d1   : > { %v4971_v50 = vadd.f32 %v7191_v34, %v4760_v24  ;;  %v4758_v58 = vadd.f32 %v4551_v46, %v3207_v5  ;;  %v3218_v7 = vadd.f32 %v5912_v62, %v7497_v9  ;;  %v7498_v24 = vld [vmem:[#allocation22_spill] sm:$0xff] }
 0x1d2   : > { %v3035_v10 = vpop.f32.mrf.mxu0  ;;  %v5974_v16 = vpop.f32.mrf.mxu1 }
 0x1d3   : > { %5039 = vst [vmem:[%s7197_s20 + $0x170] sm:$0xff] %v4971_v50  ;;  %v4969_v33 = vadd.f32 %v7191_v34, %v4758_v58  ;;  %v4761_v18 = vadd.f32 %v5974_v16, %v3210_v28  ;;  %v3216_v30 = vadd.f32 %v3035_v10, %v7158_v47  ;;  %v7499_v50 = vld [vmem:[#allocation23_spill] sm:$0xff] }
 0x1d4   : > { %v5915_v45 = vpop.f32.mrf.mxu0  ;;  %v4554_v12 = vpop.f32.mrf.mxu1 }
 0x1d5   : > { %5037 = vst [vmem:[%s7197_s20 + $0x160] sm:$0xff] %v4969_v33  ;;  %v4972_v32 = vadd.f32 %v7191_v34, %v4761_v18  ;;  %v4759_v56 = vadd.f32 %v4554_v12, %v3208_v44  ;;  %v3221_v46 = vadd.f32 %v5915_v45, %v7498_v24  ;;  %v7500_v44 = vld [vmem:[#allocation24_spill] sm:$0xff] }
 0x1d6   : > { %v3048_v19 = vpop.f32.mrf.mxu0  ;;  %v5977_v14 = vpop.f32.mrf.mxu1 }
 0x1d7   : > { %5040 = vst [vmem:[%s7197_s20 + $0x178] sm:$0xff] %v4972_v32  ;;  %v4970_v49 = vadd.f32 %v7191_v34, %v4759_v56  ;;  %v4764_v61 = vadd.f32 %v5977_v14, %v3213_v0  ;;  %v3219_v58 = vadd.f32 %v3048_v19, %v7499_v50 }
 0x1d8   : > { %v4567_v52 = vpop.f32.mrf.mxu1  ;;  %v5916_v57 = vpop.f32.mrf.mxu0 }
 0x1d9   : > { %5038 = vst [vmem:[%s7197_s20 + $0x168] sm:$0xff] %v4970_v49  ;;  %v4975_v59 = vadd.f32 %v7191_v34, %v4764_v61  ;;  %v4762_v54 = vadd.f32 %v4567_v52, %v3211_v37  ;;  %v3222_v33 = vadd.f32 %v5916_v57, %v7500_v44  ;;  %v7502_v49 = vld [vmem:[#allocation26_spill] sm:$0xff] }
 0x1da   : > { %v5978_v1 = vpop.f32.mrf.mxu1  ;;  %v3051_v63 = vpop.f32.mrf.mxu0 }
 0x1db   : > { %5043 = vst [vmem:[%s7197_s20 + $0x190] sm:$0xff] %v4975_v59  ;;  %v4973_v42 = vadd.f32 %v7191_v34, %v4762_v54  ;;  %v4765_v13 = vadd.f32 %v5978_v1, %v3214_v15  ;;  %v3220_v0 = vadd.f32 %v3051_v63, %v7501_v20  ;;  %v7503_v59 = vld [vmem:[#allocation27_spill] sm:$0xff] }
 0x1dc   : > { %v4570_v17 = vpop.f32.mrf.mxu1  ;;  %v5919_v51 = vpop.f32.mrf.mxu0 }
 0x1dd   : > { %5041 = vst [vmem:[%s7197_s20 + $0x180] sm:$0xff] %v4973_v42  ;;  %v4976_v25 = vadd.f32 %v7191_v34, %v4765_v13  ;;  %v4763_v3 = vadd.f32 %v4570_v17, %v3212_v41  ;;  %v3225_v61 = vadd.f32 %v5919_v51, %v7502_v49 }
 0x1de   : > { %v3064_v36 = vpop.f32.mrf.mxu0 }
 0x1df   : > { %5044 = vst [vmem:[%s7197_s20 + $0x198] sm:$0xff] %v4976_v25  ;;  %v4974_v23 = vadd.f32 %v7191_v34, %v4763_v3  ;;  %v3223_v54 = vadd.f32 %v3064_v36, %v7503_v59 }
 0x1e0   : > { %v5981_v55 = vpop.f32.mrf.mxu1  ;;  %v5920_v16 = vpop.f32.mrf.mxu0 }
 0x1e1   : > { %5042 = vst [vmem:[%s7197_s20 + $0x188] sm:$0xff] %v4974_v23  ;;  %v4768_v2 = vadd.f32 %v5981_v55, %v3217_v40  ;;  %v3226_v8 = vadd.f32 %v5920_v16, %v7172_v39  ;;  %v7504_v39 = vld [vmem:[#allocation28_spill] sm:$0xff] }
 0x1e2   : > { %v4583_v27 = vpop.f32.mrf.mxu1  ;;  %v3067_v19 = vpop.f32.mrf.mxu0 }
 0x1e3   : > { %v4979_v48 = vadd.f32 %v7191_v34, %v4768_v2  ;;  %v4766_v11 = vadd.f32 %v4583_v27, %v3215_v53  ;;  %v3224_v25 = vadd.f32 %v3067_v19, %v7174_v38  ;;  %v7505_v2 = vld [vmem:[#allocation29_spill] sm:$0xff] }
 0x1e4   : > { %v5982_v60 = vpop.f32.mrf.mxu1  ;;  %v5923_v4 = vpop.f32.mrf.mxu0 }
 0x1e5   : > { %5047 = vst [vmem:[%s7197_s20 + $0x1b0] sm:$0xff] %v4979_v48  ;;  %v4977_v35 = vadd.f32 %v7191_v34, %v4766_v11  ;;  %v4769_v43 = vadd.f32 %v5982_v60, %v3218_v7  ;;  %v3229_v31 = vadd.f32 %v5923_v4, %v7504_v39  ;;  %v7506_v48 = vld [vmem:[#allocation30_spill] sm:$0xff] }
 0x1e6   : > { %v4586_v5 = vpop.f32.mrf.mxu1  ;;  %v3080_v42 = vpop.f32.mrf.mxu0 }
 0x1e7   : > { %5045 = vst [vmem:[%s7197_s20 + $0x1a0] sm:$0xff] %v4977_v35  ;;  %v4980_v62 = vadd.f32 %v7191_v34, %v4769_v43  ;;  %v4767_v22 = vadd.f32 %v4586_v5, %v3216_v30  ;;  %v3227_v51 = vadd.f32 %v3080_v42, %v7505_v2 }
 0x1e8   : > { %v5985_v28 = vpop.f32.mrf.mxu1  ;;  %v5924_v40 = vpop.f32.mrf.mxu0 }
 0x1e9   : > { %5048 = vst [vmem:[%s7197_s20 + $0x1b8] sm:$0xff] %v4980_v62  ;;  %v4978_v47 = vadd.f32 %v7191_v34, %v4767_v22  ;;  %v4772_v10 = vadd.f32 %v5985_v28, %v3221_v46  ;;  %v3230_v11 = vadd.f32 %v5924_v40, %v7506_v48 }
 0x1ea   : > { %v4599_v6 = vpop.f32.mrf.mxu1  ;;  %v3083_v9 = vpop.f32.mrf.mxu0 }
 0x1eb   : > { %5046 = vst [vmem:[%s7197_s20 + $0x1a8] sm:$0xff] %v4978_v47  ;;  %v4983_v45 = vadd.f32 %v7191_v34, %v4772_v10  ;;  %v4770_v18 = vadd.f32 %v4599_v6, %v3219_v58  ;;  %v3228_v43 = vadd.f32 %v3083_v9, %v7186_v26 }
 0x1ec   : > { %v5986_v12 = vpop.f32.mrf.mxu1 }
 0x1ed   : > { %5051 = vst [vmem:[%s7197_s20 + $0x1d0] sm:$0xff] %v4983_v45  ;;  %v4981_v32 = vadd.f32 %v7191_v34, %v4770_v18  ;;  %v4773_v56 = vadd.f32 %v5986_v12, %v3222_v33 }
 0x1ee   : > { %v4602_v14 = vpop.f32.mrf.mxu1 }
 0x1ef   : > { %5049 = vst [vmem:[%s7197_s20 + $0x1c0] sm:$0xff] %v4981_v32  ;;  %v4984_v29 = vadd.f32 %v7191_v34, %v4773_v56  ;;  %v4771_v37 = vadd.f32 %v4602_v14, %v3220_v0 }
 0x1f1   : > { %5052 = vst [vmem:[%s7197_s20 + $0x1d8] sm:$0xff] %v4984_v29  ;;  %v4982_v52 = vadd.f32 %v7191_v34, %v4771_v37 }
 0x1f3   : > { %v5989_v15 = vpop.f32.mrf.mxu1  ;;  %5050 = vst [vmem:[%s7197_s20 + $0x1c8] sm:$0xff] %v4982_v52 }
 0x1f4   : > { %v4776_v57 = vadd.f32 %v5989_v15, %v3225_v61 }
 0x1f5   : > { %v4615_v1 = vpop.f32.mrf.mxu1 }
 0x1f6   : > { %v4987_v41 = vadd.f32 %v7191_v34, %v4776_v57  ;;  %v4774_v13 = vadd.f32 %v4615_v1, %v3223_v54 }
 0x1f7   : > { %v5990_v17 = vpop.f32.mrf.mxu1 }
 0x1f8   : > { %5055 = vst [vmem:[%s7197_s20 + $0x1f0] sm:$0xff] %v4987_v41  ;;  %v4985_v3 = vadd.f32 %v7191_v34, %v4774_v13  ;;  %v4777_v63 = vadd.f32 %v5990_v17, %v3226_v8 }
 0x1f9   : > { %v4618_v21 = vpop.f32.mrf.mxu1 }
 0x1fa   : > { %5053 = vst [vmem:[%s7197_s20 + $0x1e0] sm:$0xff] %v4985_v3  ;;  %v4988_v23 = vadd.f32 %v7191_v34, %v4777_v63  ;;  %v4775_v55 = vadd.f32 %v4618_v21, %v3224_v25 }
 0x1fb   : > { %v5993_v38 = vpop.f32.mrf.mxu1 }
 0x1fc   : > { %5056 = vst [vmem:[%s7197_s20 + $0x1f8] sm:$0xff] %v4988_v23  ;;  %v4986_v53 = vadd.f32 %v7191_v34, %v4775_v55  ;;  %v4780_v27 = vadd.f32 %v5993_v38, %v3229_v31 }
 0x1fd   : > { %v4631_v7 = vpop.f32.mrf.mxu1 }
 0x1fe   : > { %5054 = vst [vmem:[%s7197_s20 + $0x1e8] sm:$0xff] %v4986_v53  ;;  %v4991_v60 = vadd.f32 %v7191_v34, %v4780_v27  ;;  %v4778_v30 = vadd.f32 %v4631_v7, %v3227_v51 }
 0x1ff   : > { %v5994_v35 = vpop.f32.mrf.mxu1 }
 0x200   : > { %5059 = vst [vmem:[%s7197_s20 + $0x210] sm:$0xff] %v4991_v60  ;;  %v4989_v36 = vadd.f32 %v7191_v34, %v4778_v30  ;;  %v4781_v5 = vadd.f32 %v5994_v35, %v3230_v11 }
 0x201   : > { %v4634_v24 = vpop.f32.mrf.mxu1 }
 0x202   : > { %5057 = vst [vmem:[%s7197_s20 + $0x200] sm:$0xff] %v4989_v36  ;;  %v4992_v46 = vadd.f32 %v7191_v34, %v4781_v5  ;;  %v4779_v62 = vadd.f32 %v4634_v24, %v3228_v43 }
 0x204   : > { %5060 = vst [vmem:[%s7197_s20 + $0x218] sm:$0xff] %v4992_v46  ;;  %v4990_v26 = vadd.f32 %v7191_v34, %v4779_v62 }
 0x206   : > { %5058 = vst [vmem:[%s7197_s20 + $0x208] sm:$0xff] %v4990_v26 }
 0x207   : > { %6123 = shalt.err (!%p6120_p3)
}
 0x208   : > { %s6124_s6 = scalar_lea.hbm %s7400_s28, 8704  ;;  %s6128_s9 = scalar_lea.hbm %s7452_s3, 17408 }
 0x209   : > { %p6125_p4 = scmp.ne.s32.totalorder %s7400_s28, %s6124_s6  ;;  %p6129_p9 = scmp.lt.s32.totalorder %s7400_s28, %s7452_s3 }
 0x20a   : > { %p6130_p10 = scmp.lt.s32.totalorder %s6128_s9, %s6124_s6 }
 0x20b   : > { %p6126_p7 = pnand %p6125_p4, %p6233_p5 }
 0x20c   : > { %p6131_p11 = por %p6130_p10, %p6129_p9 }
 0x20d   : > { %p6127_p8 = pneg %p6126_p7 }
 0x20f   : > { %p6132_p12 = pnand %p6131_p11, %p6127_p8 }
 0x211   : > { %6135 = shalt.err (!%p6132_p12)
}
 0x212   : > { %s6173_s17 = smov 128   ;;  %s6174_s19 = smov 8  }
 0x213   : > { %6001 = dma.vmem_to_hbm [thread:$0]  (%p6233_p5), %s7402_s25, 8704, %s7400_s28, %s7409_s16, %s6173_s17, %s6173_s17, %s6174_s19  }
 0x214 PF: > { %p6007_p13 = scmp.ge.s32.totalorder %s6170_s15, 2  ;;  %s5090_s20 = sand.u32 1, %s6158_s12  }
 0x215   : > { %s5091_s24 = scalar_lea.sflag [#allocation4], %s5090_s20 }
 0x216   : > { %p6004_p0 = pnand %p6007_p13, %p6237_p6 }
 0x218   : > { %p6005_p1 = pneg %p6004_p0 }
 0x21a   : > { %6153 = dma.done.wait (%p6005_p1), %s5091_s24, 8704  }
 0x21b   : > { %6155 = vsyncadd (%p6005_p1), %s5091_s24, 4294958592  ;;  %p13_p2 = scmp.ge.s32.totalorder %s6220_s18, 4   ;;  %s7507_s12 = smov %s6162_s13 }
 0x21c   : > { %s7508_s13 = smov %s6166_s14  ;;  %s7509_s14 = smov %s6231_s21 }
 0x21d   : > { %s7510_s15 = smov %s6220_s18  ;;  %15 = sbr.rel (!%p13_p2) target bundleno = 3 (0x3), region = 71 }
 0x222   :  { %5096 = vsyncpa [#allocation4], 1 }
 0x223   :  { %5098 = vsyncpa [#allocation4 + $0x1], 1 }

// kernel: tpu_custom_call.1
= control target key start
LH: loop header
LB: loop body
LE: loop exit
PB: predicated region body
PF: predicated region fallthrough
CT: control target
= control target key end

     0   :  { %8 = vsyncpa [#allocation4], 0  ;;  %s7449_s0 = inlined_call_operand.vmem [shape: bf16[2,18,33,4], index: 0, kind: input, shape index: {}]   ;;  %s7450_s1 = inlined_call_operand.vmem [shape: bf16[4,4,128], index: 1, kind: input, shape index: {}]   ;;  %s7451_s2 = inlined_call_operand.vmem [shape: f32[1,128], index: 2, kind: input, shape index: {}]   ;;  %s7452_s3 = inlined_call_operand.hbm [shape: f32[1088,128], index: 3, kind: output, shape index: {}]  }
   0x1   :  { %10 = vsyncpa [#allocation4 + $0x1], 0  ;;  %s6195_s12 = smov 0   ;;  %s6197_s13 = smov 0  }
   0x2   :  { %s6199_s14 = smov 0   ;;  %s6201_s15 = smov 0  }
   0x3 LB: > { %s6216_s16 = sadd.s32 4294967295, %s6170_s15   ;;  %s5137_s17 = sadd.s32 4294967294, %s6170_s15   ;;  %s6170_s15 = sphi %s6201_s15, %s7510_s15   ;;  %s6166_s14 = sphi %s6199_s14, %s7509_s14   ;;  %s6162_s13 = sphi %s6197_s13, %s7508_s13   ;;  %s6158_s12 = sphi %s6195_s12, %s7507_s12  }
   0x4   : > { %s6220_s18 = sadd.s32 1, %s6170_s15   ;;  %s91_s19 = sadd.s32 1, %s6166_s14 }
   0x5   : > { %s88_s20 = ssub.s32 %s6170_s15, %s6220_s18  ;;  %p101_p0 = scmp.ne.s32.totalorder %s6166_s14, %s6162_s13 }
   0x6   : > { %p89_p1 = scmp.eq.s32.totalorder %s88_s20, 0  ;;  %p102_p2 = scmp.eq.s32.totalorder %s6216_s16, 1 }
   0x7   : > { %p107_p3 = scmp.ne.s32.totalorder %s6162_s13, %s6158_s12  ;;  %p108_p4 = scmp.eq.s32.totalorder %s5137_s17, 1 }
   0x8   : > { %s6231_s21 = scalar_select %p89_p1, %s6166_s14, %s91_s19  }
   0x9   : > { %p6233_p5 = por %p102_p2, %p101_p0  ;;  %p6237_p6 = por %p108_p4, %p107_p3 }
   0xa   : > { %p5140_p7 = scmp.ge.s32.totalorder %s6170_s15, 1  ;;  %p140_p8 = scmp.lt.s32.totalorder %s6170_s15, 3 }
   0xc   : > { %p141_p9 = pnand %p5140_p7, %p140_p8 }
   0xe   : > { %144 = sbr.rel (%p141_p9) target bundleno = 532 (0x214), region = 32 }
  0x13   : > { %v239_v0 = vld [vmem:[%s7450_s1] sm:$0x3]  ;;  %vm513_vm0 = vcmask 1041408   ;;  %p164_p10 = scmp.lt.s32.totalorder %s6216_s16, 1  ;;  %v5210_v2 = vld [vmem:[%s7450_s1 + $0x2] sm:$0x3] }
  0x14   : > { %5995 = vmatprep.subr.msk.bf16.mxu0 %vm513_vm0, %v239_v0  ;;  %v515_v1 = vsel %vm513_vm0, %v239_v0, 0  ;;  %v5347_v3 = vld [vmem:[%s7450_s1 + $0x4] sm:$0x3]  ;;  %5996 = vmatprep.subr.msk.bf16.mxu1 %vm513_vm0, %v5210_v2  ;;  %v1933_v4 = vsel %vm513_vm0, %v5210_v2, 0  ;;  %v5501_v5 = vld [vmem:[%s7450_s1 + $0x6] sm:$0x3] }
  0x15   : > { %5716 = vmatpush3.bf16.msra.mxu0 %v515_v1  ;;  %s165_s30 = scalar_select %p164_p10, %s6216_s16, 1  ;;  %5786 = vmatpush3.bf16.msra.mxu1 %v1933_v4  ;;  %vm410_vm1 = vcmask 31744   ;;  %vm975_vm2 = vsmask.f32 3328  ;;  %v2788_v8 = vsel %vm513_vm0, %v5347_v3, 0  ;;  %v4339_v39 = vsel %vm513_vm0, %v5501_v5, 0 }
  0x16   : > { %5997 = vmatprep.subr.msk.bf16.mxu0 %vm513_vm0, %v5347_v3  ;;  %5998 = vmatprep.subr.msk.bf16.mxu1 %vm513_vm0, %v5501_v5  ;;  %vm976_vm3 = vsmask.f32 7440  ;;  %s161_s10 = sand.u32 1, %s6162_s13   ;;  %s5574_s24 = smul.u32 8704, %s6216_s16 }
  0x17   : > { %s6000_s6 = smul.u32 360, %s165_s30  ;;  %vm6284_vm4 = vmor %vm975_vm2, %vm976_vm3  ;;  %s7409_s16 = scalar_lea.sflag [#allocation4], %s161_s10 }
  0x18   : > { %s5999_s11 = smul.u32 544, %s161_s10  ;;  %s7400_s28 = scalar_lea.hbm %s7452_s3, %s5574_s24 }
  0x19   : > { %s6266_s9 = scalar_lea.vmem %s7449_s0, %s6000_s6  ;;  %s6172_s30 = smov [#allocation3]  }
  0x1a   : > { %v6042_v6 = vld [vmem:[%s6266_s9] sm:$0xff]   ;;  %v6043_v7 = vld [vmem:[%s6266_s9 + $0x8] sm:$0xff]   ;;  %v6044_v9 = vld [vmem:[%s6266_s9 + $0x14] sm:$0xff]   ;;  %s7197_s20 = scalar_lea.vmem [#allocation3], %s5999_s11  ;;  %s6114_s4 = sshll.u32 %s6172_s30, 4  ;;  %s6115_s4 = int_to_ptr.vmem [resolvable:$false] %s6114_s4 }
  0x1b   : > { %5717 = vmatprep.mubr.msk.bf16.mxu0 %vm410_vm1, %v6042_v6  ;;  %v890_v10 = vld [vmem:[%s6266_s9] sm:$0xf]  ;;  %v891_v11 = vld [vmem:[%s6266_s9 + $0x4] sm:$0xf]  ;;  %v892_v12 = vld [vmem:[%s6266_s9 + $0x8] sm:$0xf] }
  0x1c   : > { %5718 = vmatmul.mubr.msk.bf16.vlgmr.msra.gmra.mxu0 %vm410_vm1, %v6043_v7  ;;  %v6045_v13 = vld [vmem:[%s6266_s9 + $0x1c] sm:$0xff]   ;;  %v979_v14 = vshrl.u32 %v890_v10, 16  ;;  %v982_v15 = vshll.u32 %v890_v10, 16  ;;  %v988_v16 = vshll.u32 %v891_v11, 16  ;;  %v992_v17 = vshrl.u32 %v891_v11, 16  ;;  %v6046_v35 = vld [vmem:[%s6266_s9 + $0x28] sm:$0xff]  }
  0x1d   : > { %5721 = vmatprep.mubr.msk.bf16.mxu0 %vm410_vm1, %v6044_v9  ;;  %5856 = vmatpush3.bf16.msra.mxu0 %v2788_v8  ;;  %v893_v18 = vld [vmem:[%s6266_s9 + $0xc] sm:$0xf]  ;;  %v998_v19 = vshll.u32 %v892_v12, 16  ;;  %v1002_v20 = vshrl.u32 %v892_v12, 16  ;;  %v894_v21 = vld [vmem:[%s6266_s9 + $0x10] sm:$0x1] }
  0x1e   : > { %v1008_v22 = vshll.u32 %v893_v18, 16  ;;  %v1012_v23 = vshrl.u32 %v893_v18, 16  ;;  %v981_v24 = vrot.slane %v979_v14, 4  ;;  %v984_v25 = vrot.slane %v982_v15, 5  ;;  %v895_v40 = vld [vmem:[%s6266_s9 + $0x14] sm:$0xf] }
  0x1f   : > { %v990_v26 = vrot.slane %v988_v16, 5  ;;  %v994_v27 = vrot.slane %v992_v17, 4  ;;  %v1000_v28 = vrot.slane %v998_v19, 5  ;;  %v1004_v29 = vrot.slane %v1002_v20, 4  ;;  %v896_v41 = vld [vmem:[%s6266_s9 + $0x18] sm:$0xf] }
  0x20   : > { %v1010_v30 = vrot.slane %v1008_v22, 5  ;;  %v1014_v31 = vrot.slane %v1012_v23, 4  ;;  %v985_v32 = vor.u32 %v984_v25, %v981_v24  ;;  %v1018_v34 = vshll.u32 %v894_v21, 16  ;;  %v897_v45 = vld [vmem:[%s6266_s9 + $0x1c] sm:$0xf]  ;;  %v6047_v62 = vld [vmem:[%s6266_s9 + $0x30] sm:$0xff]  }
  0x21   : > { %v995_v33 = vor.u32 %v994_v27, %v990_v26  ;;  %v1005_v37 = vor.u32 %v1004_v29, %v1000_v28  ;;  %v1023_v46 = vshrl.u32 %v895_v40, 16  ;;  %v1026_v49 = vshll.u32 %v895_v40, 16  ;;  %v898_v51 = vld [vmem:[%s6266_s9 + $0x20] sm:$0xf]  ;;  %v899_v56 = vld [vmem:[%s6266_s9 + $0x24] sm:$0x1] }
  0x22   : > { %v1015_v38 = vor.u32 %v1014_v31, %v1010_v30  ;;  %v986_v42 = vrot.slane %v985_v32, 4  ;;  %v1020_v44 = vrot.slane %v1018_v34, 5  ;;  %v1032_v50 = vshll.u32 %v896_v41, 16  ;;  %v6048_v6 = vld [vmem:[%s6266_s9 + $0x3c] sm:$0xff]   ;;  %v900_v7 = vld [vmem:[%s6266_s9 + $0x28] sm:$0xf] }
  0x23   : > { %v996_v43 = vrot.slane %v995_v33, 4  ;;  %v1006_v47 = vrot.slane %v1005_v37, 4  ;;  %v1025_v54 = vrot.slane %v1023_v46, 4  ;;  %v1036_v55 = vshrl.u32 %v896_v41, 16  ;;  %v901_v11 = vld [vmem:[%s6266_s9 + $0x2c] sm:$0xf] }
  0x24   : > { %5722 = vmatmul.mubr.msk.bf16.gmra.mxu0 %vm410_vm1, %v6045_v13  ;;  %v1016_v48 = vrot.slane %v1015_v38, 4  ;;  %v991_v52 = vsel %vm6284_vm4, %v986_v42, %v990_v26  ;;  %v1028_v60 = vrot.slane %v1026_v49, 5  ;;  %v1034_v63 = vrot.slane %v1032_v50, 5  ;;  %v902_v16 = vld [vmem:[%s6266_s9 + $0x30] sm:$0xf]  ;;  %v6049_v34 = vld [vmem:[%s6266_s9 + $0x44] sm:$0xff]  }
  0x25   : > { %5725 = vmatprep.mubr.msk.bf16.mxu0 %vm410_vm1, %v6046_v35  ;;  %v1001_v53 = vsel %vm6284_vm4, %v996_v43, %v1000_v28  ;;  %v1011_v58 = vsel %vm6284_vm4, %v1006_v47, %v1010_v30  ;;  %v1038_v0 = vrot.slane %v1036_v55, 4  ;;  %v1042_v1 = vshll.u32 %v897_v45, 16  ;;  %v903_v21 = vld [vmem:[%s6266_s9 + $0x34] sm:$0xf]  ;;  %v904_v40 = vld [vmem:[%s6266_s9 + $0x38] sm:$0x1] }
  0x26   : > { %v5211_v57 = vcombine.low %v991_v52, %v1001_v53  ;;  %v1021_v59 = vsel %vm6284_vm4, %v1016_v48, %v1020_v44  ;;  %v1029_v2 = vor.u32 %v1028_v60, %v1025_v54  ;;  %v1046_v3 = vshrl.u32 %v897_v45, 16  ;;  %v6050_v45 = vld [vmem:[%s6266_s9 + $0x50] sm:$0xff]   ;;  %v905_v46 = vld [vmem:[%s6266_s9 + $0x3c] sm:$0xf]  ;;  %s5075_s25 = sshll.u32 %s7197_s20, 4  ;;  %s6116_s5 = scalar_lea.vmem %s6115_s4, 17408  ;;  %s7402_s25 = int_to_ptr.vmem [resolvable:$true] %s5075_s25 }
  0x27   : > { %v5212_v61 = vcombine.low %v1011_v58, %v1021_v59  ;;  %v1052_v4 = vshll.u32 %v898_v51, 16  ;;  %v1056_v5 = vshrl.u32 %v898_v51, 16  ;;  %v1039_v8 = vor.u32 %v1038_v0, %v1034_v63  ;;  %v906_v51 = vld [vmem:[%s6266_s9 + $0x40] sm:$0xf]  ;;  %s6110_s29 = scalar_lea.vmem %s7402_s25, 8704  ;;  %p6117_p0 = scmp.lt.s32.totalorder %s7402_s25, %s6115_s4 }
  0x28   : > { %5787 = vmatprep.mubr.msk.bf16.mxu1 %vm410_vm1, %v5211_v57  ;;  %v1044_v9 = vrot.slane %v1042_v1, 5  ;;  %v1062_v10 = vshll.u32 %v899_v56, 16  ;;  %v1030_v12 = vrot.slane %v1029_v2, 4  ;;  %v1048_v13 = vrot.slane %v1046_v3, 4  ;;  %v907_v56 = vld [vmem:[%s6266_s9 + $0x44] sm:$0xf]  ;;  %p6111_p11 = scmp.ne.s32.totalorder %s7402_s25, %s6110_s29  ;;  %p6118_p1 = scmp.lt.s32.totalorder %s6116_s5, %s6110_s29 }
  0x29   : > { %5788 = vmatmul.mubr.msk.bf16.vlgmr.msra.gmra.mxu1 %vm410_vm1, %v5212_v61  ;;  %v1054_v14 = vrot.slane %v1052_v4, 5  ;;  %v1058_v15 = vrot.slane %v1056_v5, 4  ;;  %v1040_v17 = vrot.slane %v1039_v8, 4  ;;  %v1067_v19 = vshrl.u32 %v900_v7, 16  ;;  %v908_v5 = vld [vmem:[%s6266_s9 + $0x48] sm:$0xf] }
  0x2a   : > { %5926 = vmatpush3.bf16.msra.mxu1 %v4339_v39  ;;  %v1064_v18 = vrot.slane %v1062_v10, 5  ;;  %v1070_v20 = vshll.u32 %v900_v7, 16  ;;  %v1035_v22 = vsel %vm6284_vm4, %v1030_v12, %v1034_v63  ;;  %v1049_v23 = vor.u32 %v1048_v13, %v1044_v9  ;;  %p6112_p12 = pnand %p6111_p11, %p6233_p5  ;;  %p6119_p2 = por %p6118_p1, %p6117_p0 }
  0x2b   : > { %v1059_v24 = vor.u32 %v1058_v15, %v1054_v14  ;;  %v1076_v25 = vshll.u32 %v901_v11, 16  ;;  %v1045_v26 = vsel %vm6284_vm4, %v1040_v17, %v1044_v9  ;;  %v1069_v27 = vrot.slane %v1067_v19, 4  ;;  %v6051_v9 = vld [vmem:[%s6266_s9 + $0x58] sm:$0xff]   ;;  %v909_v15 = vld [vmem:[%s6266_s9 + $0x4c] sm:$0x1] }
  0x2c   : > { %5726 = vmatmul.mubr.msk.bf16.gmra.mxu0 %vm410_vm1, %v6047_v62  ;;  %v1072_v28 = vrot.slane %v1070_v20, 5  ;;  %v1080_v29 = vshrl.u32 %v901_v11, 16  ;;  %v5213_v30 = vcombine.low %v1035_v22, %v1045_v26  ;;  %v1050_v31 = vrot.slane %v1049_v23, 4  ;;  %v911_v22 = vld [vmem:[%s6266_s9 + $0x54] sm:$0xf]  ;;  %p6113_p13 = pneg %p6112_p12 }
  0x2d   : > { %5729 = vmatprep.mubr.msk.bf16.mxu0 %vm410_vm1, %v6048_v6  ;;  %v1060_v32 = vrot.slane %v1059_v24, 4  ;;  %v1078_v33 = vrot.slane %v1076_v25, 5  ;;  %v1086_v38 = vshll.u32 %v902_v16, 16  ;;  %v1090_v39 = vshrl.u32 %v902_v16, 16  ;;  %v6052_v16 = vld [vmem:[%s6266_s9 + $0x64] sm:$0xff]  }
  0x2e   : > { %v1073_v35 = vor.u32 %v1072_v28, %v1069_v27  ;;  %v1082_v37 = vrot.slane %v1080_v29, 4  ;;  %5791 = vmatprep.mubr.msk.bf16.mxu1 %vm410_vm1, %v5213_v30  ;;  %v1055_v41 = vsel %vm6284_vm4, %v1050_v31, %v1054_v14  ;;  %v1096_v43 = vshll.u32 %v903_v21, 16  ;;  %p6120_p3 = pnand %p6119_p2, %p6113_p13 }
  0x2f   : > { %v1065_v42 = vsel %vm6284_vm4, %v1060_v32, %v1064_v18  ;;  %v1100_v44 = vshrl.u32 %v903_v21, 16  ;;  %v1088_v50 = vrot.slane %v1086_v38, 5  ;;  %v1092_v52 = vrot.slane %v1090_v39, 4  ;;  %v910_v21 = vld [vmem:[%s6266_s9 + $0x50] sm:$0xf] }
  0x30   : > { %v5214_v47 = vcombine.low %v1055_v41, %v1065_v42  ;;  %v1074_v48 = vrot.slane %v1073_v35, 4  ;;  %v1083_v49 = vor.u32 %v1082_v37, %v1078_v33  ;;  %v1098_v53 = vrot.slane %v1096_v43, 5  ;;  %v912_v39 = vld [vmem:[%s6266_s9 + $0x58] sm:$0xf]  ;;  %v913_v41 = vld [vmem:[%s6266_s9 + $0x5c] sm:$0xf] }
  0x31   : > { %v1102_v54 = vrot.slane %v1100_v44, 4  ;;  %v1106_v55 = vshll.u32 %v904_v40, 16  ;;  %v1111_v59 = vshrl.u32 %v905_v46, 16  ;;  %v1114_v60 = vshll.u32 %v905_v46, 16  ;;  %v914_v46 = vld [vmem:[%s6266_s9 + $0x60] sm:$0x1] }
  0x32   : > { %5792 = vmatmul.mubr.msk.bf16.gmra.mxu1 %vm410_vm1, %v5214_v47  ;;  %v1079_v57 = vsel %vm6284_vm4, %v1074_v48, %v1078_v33  ;;  %v1084_v58 = vrot.slane %v1083_v49, 4  ;;  %v1093_v61 = vor.u32 %v1092_v52, %v1088_v50  ;;  %v1120_v0 = vshll.u32 %v906_v51, 16  ;;  %v915_v52 = vld [vmem:[%s6266_s9 + $0x64] sm:$0xf] }
  0x33   : > { %v1103_v62 = vor.u32 %v1102_v54, %v1098_v53  ;;  %v1108_v63 = vrot.slane %v1106_v55, 5  ;;  %v1113_v2 = vrot.slane %v1111_v59, 4  ;;  %v1116_v3 = vrot.slane %v1114_v60, 5 }
  0x34   : > { %5730 = vmatmul.mubr.msk.bf16.gmra.mxu0 %vm410_vm1, %v6049_v34  ;;  %v1089_v1 = vsel %vm6284_vm4, %v1084_v58, %v1088_v50  ;;  %v1124_v4 = vshrl.u32 %v906_v51, 16  ;;  %v1094_v7 = vrot.slane %v1093_v61, 4  ;;  %v1122_v10 = vrot.slane %v1120_v0, 5  ;;  %v6053_v50 = vld [vmem:[%s6266_s9 + $0x6c] sm:$0xff]   ;;  %v916_v58 = vld [vmem:[%s6266_s9 + $0x68] sm:$0xf] }
  0x35   : > { %5733 = vmatprep.mubr.msk.bf16.mxu0 %vm410_vm1, %v6050_v45  ;;  %v5215_v6 = vcombine.low %v1079_v57, %v1089_v1  ;;  %v1104_v8 = vrot.slane %v1103_v62, 4  ;;  %v1117_v11 = vor.u32 %v1116_v3, %v1113_v2  ;;  %v1130_v13 = vshll.u32 %v907_v56, 16  ;;  %v6054_v57 = vld [vmem:[%s6266_s9 + $0x78] sm:$0xff]  }
  0x36   : > { %v1126_v12 = vrot.slane %v1124_v4, 4  ;;  %v1134_v14 = vshrl.u32 %v907_v56, 16  ;;  %v1099_v17 = vsel %vm6284_vm4, %v1094_v7, %v1098_v53  ;;  %v1140_v19 = vshll.u32 %v908_v5, 16 }
  0x37   : > { %5795 = vmatprep.mubr.msk.bf16.mxu1 %vm410_vm1, %v5215_v6  ;;  %v1109_v18 = vsel %vm6284_vm4, %v1104_v8, %v1108_v63  ;;  %v1144_v20 = vshrl.u32 %v908_v5, 16  ;;  %v1118_v24 = vrot.slane %v1117_v11, 4  ;;  %v1132_v26 = vrot.slane %v1130_v13, 5 }
  0x38   : > { %v5216_v23 = vcombine.low %v1099_v17, %v1109_v18  ;;  %v1127_v25 = vor.u32 %v1126_v12, %v1122_v10  ;;  %v1136_v27 = vrot.slane %v1134_v14, 4  ;;  %v1142_v28 = vrot.slane %v1140_v19, 5  ;;  %v917_v14 = vld [vmem:[%s6266_s9 + $0x6c] sm:$0xf] }
  0x39   : > { %v1146_v29 = vrot.slane %v1144_v20, 4  ;;  %v1150_v30 = vshll.u32 %v909_v15, 16  ;;  %v1123_v31 = vsel %vm6284_vm4, %v1118_v24, %v1122_v10  ;;  %v1155_v33 = vshrl.u32 %v910_v21, 16 }
  0x3a   : > { %5796 = vmatmul.mubr.msk.bf16.gmra.mxu1 %vm410_vm1, %v5216_v23  ;;  %v1128_v32 = vrot.slane %v1127_v25, 4  ;;  %v1158_v34 = vshll.u32 %v910_v21, 16  ;;  %v1137_v35 = vor.u32 %v1136_v27, %v1132_v26  ;;  %v1164_v40 = vshll.u32 %v911_v22, 16  ;;  %v919_v21 = vld [vmem:[%s6266_s9 + $0x74] sm:$0x1]  ;;  %v6055_v25 = vld [vmem:[%s6266_s9 + $0x80] sm:$0xff]  }
  0x3b   : > { %v1147_v37 = vor.u32 %v1146_v29, %v1142_v28  ;;  %v1152_v38 = vrot.slane %v1150_v30, 5  ;;  %v1157_v43 = vrot.slane %v1155_v33, 4  ;;  %v1168_v45 = vshrl.u32 %v911_v22, 16  ;;  %v920_v27 = vld [vmem:[%s6266_s9 + $0x78] sm:$0xf] }
  0x3c   : > { %5734 = vmatmul.mubr.msk.bf16.gmra.mxu0 %vm410_vm1, %v6051_v9  ;;  %v1133_v42 = vsel %vm6284_vm4, %v1128_v32, %v1132_v26  ;;  %v1160_v44 = vrot.slane %v1158_v34, 5  ;;  %v1138_v48 = vrot.slane %v1137_v35, 4  ;;  %v1166_v51 = vrot.slane %v1164_v40, 5  ;;  %v6056_v32 = vld [vmem:[%s6266_s9 + $0x8c] sm:$0xff]  }
  0x3d   : > { %5737 = vmatprep.mubr.msk.bf16.mxu0 %vm410_vm1, %v6052_v16  ;;  %v5217_v47 = vcombine.low %v1123_v31, %v1133_v42  ;;  %v1148_v49 = vrot.slane %v1147_v37, 4  ;;  %v1170_v54 = vrot.slane %v1168_v45, 4  ;;  %v1174_v55 = vshll.u32 %v912_v39, 16  ;;  %v918_v16 = vld [vmem:[%s6266_s9 + $0x70] sm:$0xf] }
  0x3e   : > { %v1161_v53 = vor.u32 %v1160_v44, %v1157_v43  ;;  %v1178_v56 = vshrl.u32 %v912_v39, 16  ;;  %v1143_v59 = vsel %vm6284_vm4, %v1138_v48, %v1142_v28  ;;  %v1184_v61 = vshll.u32 %v913_v41, 16  ;;  %v921_v42 = vld [vmem:[%s6266_s9 + $0x7c] sm:$0xf] }
  0x3f   : > { %5799 = vmatprep.mubr.msk.bf16.mxu1 %vm410_vm1, %v5217_v47  ;;  %v1153_v60 = vsel %vm6284_vm4, %v1148_v49, %v1152_v38  ;;  %v1188_v62 = vshrl.u32 %v913_v41, 16  ;;  %v1171_v1 = vor.u32 %v1170_v54, %v1166_v51  ;;  %v1176_v2 = vrot.slane %v1174_v55, 5  ;;  %v922_v49 = vld [vmem:[%s6266_s9 + $0x80] sm:$0xf] }
  0x40   : > { %v5218_v63 = vcombine.low %v1143_v59, %v1153_v60  ;;  %v1162_v0 = vrot.slane %v1161_v53, 4  ;;  %v1180_v3 = vrot.slane %v1178_v56, 4  ;;  %v1186_v4 = vrot.slane %v1184_v61, 5  ;;  %v923_v56 = vld [vmem:[%s6266_s9 + $0x84] sm:$0xf] }
  0x41   : > { %v1190_v5 = vrot.slane %v1188_v62, 4  ;;  %v1194_v6 = vshll.u32 %v914_v46, 16  ;;  %v1172_v8 = vrot.slane %v1171_v1, 4  ;;  %v1199_v9 = vshrl.u32 %v915_v52, 16  ;;  %v924_v61 = vld [vmem:[%s6266_s9 + $0x88] sm:$0x1] }
  0x42   : > { %5800 = vmatmul.mubr.msk.bf16.gmra.mxu1 %vm410_vm1, %v5218_v63  ;;  %v1167_v7 = vsel %vm6284_vm4, %v1162_v0, %v1166_v51  ;;  %v1202_v10 = vshll.u32 %v915_v52, 16  ;;  %v1181_v11 = vor.u32 %v1180_v3, %v1176_v2  ;;  %v1208_v15 = vshll.u32 %v916_v58, 16 }
  0x43   : > { %v1191_v12 = vor.u32 %v1190_v5, %v1186_v4  ;;  %v1196_v13 = vrot.slane %v1194_v6, 5  ;;  %v1177_v17 = vsel %vm6284_vm4, %v1172_v8, %v1176_v2  ;;  %v1201_v18 = vrot.slane %v1199_v9, 4  ;;  %v6057_v2 = vld [vmem:[%s6266_s9 + $0x94] sm:$0xff]  }
  0x44   : > { %5738 = vmatmul.mubr.msk.bf16.gmra.mxu0 %vm410_vm1, %v6053_v50  ;;  %v1204_v19 = vrot.slane %v1202_v10, 5  ;;  %v1212_v20 = vshrl.u32 %v916_v58, 16  ;;  %v5219_v22 = vcombine.low %v1167_v7, %v1177_v17  ;;  %v1182_v23 = vrot.slane %v1181_v11, 4  ;;  %v6058_v11 = vld [vmem:[%s6266_s9 + $0xa0] sm:$0xff]   ;;  %v926_v17 = vld [vmem:[%s6266_s9 + $0x90] sm:$0xf] }
  0x45   : > { %5741 = vmatprep.mubr.msk.bf16.mxu0 %vm410_vm1, %v6054_v57  ;;  %v1192_v24 = vrot.slane %v1191_v12, 4  ;;  %v1210_v26 = vrot.slane %v1208_v15, 5  ;;  %v1218_v30 = vshll.u32 %v917_v14, 16  ;;  %v1222_v31 = vshrl.u32 %v917_v14, 16  ;;  %v925_v12 = vld [vmem:[%s6266_s9 + $0x8c] sm:$0xf] }
  0x46   : > { %v1205_v28 = vor.u32 %v1204_v19, %v1201_v18  ;;  %v1214_v29 = vrot.slane %v1212_v20, 4  ;;  %5803 = vmatprep.mubr.msk.bf16.mxu1 %vm410_vm1, %v5219_v22  ;;  %v1187_v33 = vsel %vm6284_vm4, %v1182_v23, %v1186_v4  ;;  %v1228_v35 = vshll.u32 %v918_v16, 16  ;;  %v927_v22 = vld [vmem:[%s6266_s9 + $0x94] sm:$0xf] }
  0x47   : > { %v1197_v34 = vsel %vm6284_vm4, %v1192_v24, %v1196_v13  ;;  %v1232_v37 = vshrl.u32 %v918_v16, 16  ;;  %v1220_v41 = vrot.slane %v1218_v30, 5  ;;  %v1224_v43 = vrot.slane %v1222_v31, 4 }
  0x48   : > { %v5220_v38 = vcombine.low %v1187_v33, %v1197_v34  ;;  %v1206_v39 = vrot.slane %v1205_v28, 4  ;;  %v1215_v40 = vor.u32 %v1214_v29, %v1210_v26  ;;  %v1230_v44 = vrot.slane %v1228_v35, 5 }
  0x49   : > { %v1234_v45 = vrot.slane %v1232_v37, 4  ;;  %v1238_v46 = vshll.u32 %v919_v21, 16  ;;  %v1243_v50 = vshrl.u32 %v920_v27, 16  ;;  %v1246_v51 = vshll.u32 %v920_v27, 16  ;;  %v928_v27 = vld [vmem:[%s6266_s9 + $0x98] sm:$0xf] }
  0x4a   : > { %5804 = vmatmul.mubr.msk.bf16.gmra.mxu1 %vm410_vm1, %v5220_v38  ;;  %v1211_v47 = vsel %vm6284_vm4, %v1206_v39, %v1210_v26  ;;  %v1216_v48 = vrot.slane %v1215_v40, 4  ;;  %v1225_v52 = vor.u32 %v1224_v43, %v1220_v41  ;;  %v1252_v55 = vshll.u32 %v921_v42, 16 }
  0x4b   : > { %v1235_v53 = vor.u32 %v1234_v45, %v1230_v44  ;;  %v1240_v54 = vrot.slane %v1238_v46, 5  ;;  %v1245_v58 = vrot.slane %v1243_v50, 4  ;;  %v1248_v59 = vrot.slane %v1246_v51, 5  ;;  %v929_v46 = vld [vmem:[%s6266_s9 + $0x9c] sm:$0x1]  ;;  %v6060_v51 = vld [vmem:[%s6266_s9 + $0xb4] sm:$0xff]  }
  0x4c   : > { %5742 = vmatmul.mubr.msk.bf16.gmra.mxu0 %vm410_vm1, %v6055_v25  ;;  %v1221_v57 = vsel %vm6284_vm4, %v1216_v48, %v1220_v41  ;;  %v1256_v60 = vshrl.u32 %v921_v42, 16  ;;  %v1226_v63 = vrot.slane %v1225_v52, 4  ;;  %v1254_v1 = vrot.slane %v1252_v55, 5  ;;  %v6059_v41 = vld [vmem:[%s6266_s9 + $0xa8] sm:$0xff]   ;;  %v930_v52 = vld [vmem:[%s6266_s9 + $0xa0] sm:$0xf] }
  0x4d   : > { %5745 = vmatprep.mubr.msk.bf16.mxu0 %vm410_vm1, %v6056_v32  ;;  %v5221_v62 = vcombine.low %v1211_v47, %v1221_v57  ;;  %v1236_v0 = vrot.slane %v1235_v53, 4  ;;  %v1249_v3 = vor.u32 %v1248_v59, %v1245_v58  ;;  %v1262_v5 = vshll.u32 %v922_v49, 16  ;;  %v931_v57 = vld [vmem:[%s6266_s9 + $0xa4] sm:$0xf] }
  0x4e   : > { %v1258_v4 = vrot.slane %v1256_v60, 4  ;;  %v1266_v6 = vshrl.u32 %v922_v49, 16  ;;  %v1231_v7 = vsel %vm6284_vm4, %v1226_v63, %v1230_v44  ;;  %v1272_v9 = vshll.u32 %v923_v56, 16 }
  0x4f   : > { %5807 = vmatprep.mubr.msk.bf16.mxu1 %vm410_vm1, %v5221_v62  ;;  %v1241_v8 = vsel %vm6284_vm4, %v1236_v0, %v1240_v54  ;;  %v1276_v10 = vshrl.u32 %v923_v56, 16  ;;  %v1250_v14 = vrot.slane %v1249_v3, 4  ;;  %v1264_v16 = vrot.slane %v1262_v5, 5  ;;  %v932_v5 = vld [vmem:[%s6266_s9 + $0xa8] sm:$0xf] }
  0x50   : > { %v5222_v13 = vcombine.low %v1231_v7, %v1241_v8  ;;  %v1259_v15 = vor.u32 %v1258_v4, %v1254_v1  ;;  %v1268_v18 = vrot.slane %v1266_v6, 4  ;;  %v1274_v19 = vrot.slane %v1272_v9, 5 }
  0x51   : > { %v1278_v20 = vrot.slane %v1276_v10, 4  ;;  %v1282_v21 = vshll.u32 %v924_v61, 16  ;;  %v1255_v23 = vsel %vm6284_vm4, %v1250_v14, %v1254_v1  ;;  %v1287_v25 = vshrl.u32 %v925_v12, 16 }
  0x52   : > { %5808 = vmatmul.mubr.msk.bf16.gmra.mxu1 %vm410_vm1, %v5222_v13  ;;  %v1260_v24 = vrot.slane %v1259_v15, 4  ;;  %v1290_v26 = vshll.u32 %v925_v12, 16  ;;  %v1269_v28 = vor.u32 %v1268_v18, %v1264_v16  ;;  %v1296_v31 = vshll.u32 %v926_v17, 16  ;;  %v6061_v15 = vld [vmem:[%s6266_s9 + $0xbc] sm:$0xff]  }
  0x53   : > { %v1279_v29 = vor.u32 %v1278_v20, %v1274_v19  ;;  %v1284_v30 = vrot.slane %v1282_v21, 5  ;;  %v1289_v33 = vrot.slane %v1287_v25, 4  ;;  %v1300_v35 = vshrl.u32 %v926_v17, 16  ;;  %v934_v17 = vld [vmem:[%s6266_s9 + $0xb0] sm:$0x1] }
  0x54   : > { %5746 = vmatmul.mubr.msk.bf16.gmra.mxu0 %vm410_vm1, %v6057_v2  ;;  %v1265_v32 = vsel %vm6284_vm4, %v1260_v24, %v1264_v16  ;;  %v1292_v34 = vrot.slane %v1290_v26, 5  ;;  %v1270_v38 = vrot.slane %v1269_v28, 4  ;;  %v1298_v40 = vrot.slane %v1296_v31, 5  ;;  %v936_v28 = vld [vmem:[%s6266_s9 + $0xb8] sm:$0xf] }
  0x55   : > { %5749 = vmatprep.mubr.msk.bf16.mxu0 %vm410_vm1, %v6058_v11  ;;  %v5223_v37 = vcombine.low %v1255_v23, %v1265_v32  ;;  %v1280_v39 = vrot.slane %v1279_v29, 4  ;;  %v1302_v43 = vrot.slane %v1300_v35, 4  ;;  %v1306_v44 = vshll.u32 %v927_v22, 16  ;;  %v933_v11 = vld [vmem:[%s6266_s9 + $0xac] sm:$0xf] }
  0x56   : > { %v1293_v42 = vor.u32 %v1292_v34, %v1289_v33  ;;  %v1310_v45 = vshrl.u32 %v927_v22, 16  ;;  %v1275_v47 = vsel %vm6284_vm4, %v1270_v38, %v1274_v19  ;;  %v1316_v49 = vshll.u32 %v928_v27, 16  ;;  %v6062_v22 = vld [vmem:[%s6266_s9 + $0xc8] sm:$0xff]   ;;  %v935_v23 = vld [vmem:[%s6266_s9 + $0xb4] sm:$0xf] }
  0x57   : > { %5811 = vmatprep.mubr.msk.bf16.mxu1 %vm410_vm1, %v5223_v37  ;;  %v1285_v48 = vsel %vm6284_vm4, %v1280_v39, %v1284_v30  ;;  %v1320_v50 = vshrl.u32 %v928_v27, 16  ;;  %v1303_v55 = vor.u32 %v1302_v43, %v1298_v40  ;;  %v1308_v56 = vrot.slane %v1306_v44, 5 }
  0x58   : > { %v5224_v53 = vcombine.low %v1275_v47, %v1285_v48  ;;  %v1294_v54 = vrot.slane %v1293_v42, 4  ;;  %v1312_v58 = vrot.slane %v1310_v45, 4  ;;  %v1318_v59 = vrot.slane %v1316_v49, 5  ;;  %v937_v45 = vld [vmem:[%s6266_s9 + $0xbc] sm:$0xf] }
  0x59   : > { %v1322_v60 = vrot.slane %v1320_v50, 4  ;;  %v1326_v61 = vshll.u32 %v929_v46, 16  ;;  %v1304_v63 = vrot.slane %v1303_v55, 4  ;;  %v1331_v0 = vshrl.u32 %v930_v52, 16  ;;  %v938_v47 = vld [vmem:[%s6266_s9 + $0xc0] sm:$0xf] }
  0x5a   : > { %5812 = vmatmul.mubr.msk.bf16.gmra.mxu1 %vm410_vm1, %v5224_v53  ;;  %v1299_v62 = vsel %vm6284_vm4, %v1294_v54, %v1298_v40  ;;  %v1334_v1 = vshll.u32 %v930_v52, 16  ;;  %v1313_v2 = vor.u32 %v1312_v58, %v1308_v56  ;;  %v1340_v6 = vshll.u32 %v931_v57, 16  ;;  %v939_v52 = vld [vmem:[%s6266_s9 + $0xc4] sm:$0x1]  ;;  %v940_v58 = vld [vmem:[%s6266_s9 + $0xc8] sm:$0xf] }
  0x5b   : > { %v1323_v3 = vor.u32 %v1322_v60, %v1318_v59  ;;  %v1328_v4 = vrot.slane %v1326_v61, 5  ;;  %v1309_v7 = vsel %vm6284_vm4, %v1304_v63, %v1308_v56  ;;  %v1333_v8 = vrot.slane %v1331_v0, 4  ;;  %v6063_v56 = vld [vmem:[%s6266_s9 + $0xd0] sm:$0xff]   ;;  %v6064_v63 = vld [vmem:[%s6266_s9 + $0xdc] sm:$0xff]  }
  0x5c   : > { %5750 = vmatmul.mubr.msk.bf16.gmra.mxu0 %vm410_vm1, %v6059_v41  ;;  %v1336_v9 = vrot.slane %v1334_v1, 5  ;;  %v1344_v10 = vshrl.u32 %v931_v57, 16  ;;  %v5225_v12 = vcombine.low %v1299_v62, %v1309_v7  ;;  %v1314_v13 = vrot.slane %v1313_v2, 4 }
  0x5d   : > { %5753 = vmatprep.mubr.msk.bf16.mxu0 %vm410_vm1, %v6060_v51  ;;  %v1324_v14 = vrot.slane %v1323_v3, 4  ;;  %v1342_v16 = vrot.slane %v1340_v6, 5  ;;  %v1350_v20 = vshll.u32 %v932_v5, 16  ;;  %v1354_v21 = vshrl.u32 %v932_v5, 16 }
  0x5e   : > { %v1337_v18 = vor.u32 %v1336_v9, %v1333_v8  ;;  %v1346_v19 = vrot.slane %v1344_v10, 4  ;;  %5815 = vmatprep.mubr.msk.bf16.mxu1 %vm410_vm1, %v5225_v12  ;;  %v1319_v24 = vsel %vm6284_vm4, %v1314_v13, %v1318_v59  ;;  %v1360_v26 = vshll.u32 %v933_v11, 16  ;;  %v941_v8 = vld [vmem:[%s6266_s9 + $0xcc] sm:$0xf] }
  0x5f   : > { %v1329_v25 = vsel %vm6284_vm4, %v1324_v14, %v1328_v4  ;;  %v1364_v27 = vshrl.u32 %v933_v11, 16  ;;  %v1352_v32 = vrot.slane %v1350_v20, 5  ;;  %v1356_v33 = vrot.slane %v1354_v21, 4  ;;  %v942_v20 = vld [vmem:[%s6266_s9 + $0xd0] sm:$0xf] }
  0x60   : > { %v5226_v29 = vcombine.low %v1319_v24, %v1329_v25  ;;  %v1338_v30 = vrot.slane %v1337_v18, 4  ;;  %v1347_v31 = vor.u32 %v1346_v19, %v1342_v16  ;;  %v1362_v34 = vrot.slane %v1360_v26, 5 }
  0x61   : > { %v1366_v35 = vrot.slane %v1364_v27, 4  ;;  %v1370_v37 = vshll.u32 %v934_v17, 16  ;;  %v1375_v40 = vshrl.u32 %v935_v23, 16  ;;  %v1378_v41 = vshll.u32 %v935_v23, 16  ;;  %v944_v27 = vld [vmem:[%s6266_s9 + $0xd8] sm:$0x1] }
  0x62   : > { %5816 = vmatmul.mubr.msk.bf16.gmra.mxu1 %vm410_vm1, %v5226_v29  ;;  %v1343_v38 = vsel %vm6284_vm4, %v1338_v30, %v1342_v16  ;;  %v1348_v39 = vrot.slane %v1347_v31, 4  ;;  %v1357_v42 = vor.u32 %v1356_v33, %v1352_v32  ;;  %v1384_v46 = vshll.u32 %v936_v28, 16  ;;  %v6065_v31 = vld [vmem:[%s6266_s9 + $0xe4] sm:$0xff]  }
  0x63   : > { %v1367_v43 = vor.u32 %v1366_v35, %v1362_v34  ;;  %v1372_v44 = vrot.slane %v1370_v37, 5  ;;  %v1377_v49 = vrot.slane %v1375_v40, 4  ;;  %v1380_v50 = vrot.slane %v1378_v41, 5 }
  0x64   : > { %5754 = vmatmul.mubr.msk.bf16.gmra.mxu0 %vm410_vm1, %v6061_v15  ;;  %v1353_v48 = vsel %vm6284_vm4, %v1348_v39, %v1352_v32  ;;  %v1388_v51 = vshrl.u32 %v936_v28, 16  ;;  %v1358_v54 = vrot.slane %v1357_v42, 4  ;;  %v1386_v57 = vrot.slane %v1384_v46, 5 }
  0x65   : > { %5757 = vmatprep.mubr.msk.bf16.mxu0 %vm410_vm1, %v6062_v22  ;;  %v5227_v53 = vcombine.low %v1343_v38, %v1353_v48  ;;  %v1368_v55 = vrot.slane %v1367_v43, 4  ;;  %v1381_v59 = vor.u32 %v1380_v50, %v1377_v49  ;;  %v1394_v61 = vshll.u32 %v937_v45, 16  ;;  %v943_v22 = vld [vmem:[%s6266_s9 + $0xd4] sm:$0xf]  ;;  %v945_v43 = vld [vmem:[%s6266_s9 + $0xdc] sm:$0xf] }
  0x66   : > { %v1390_v60 = vrot.slane %v1388_v51, 4  ;;  %v1398_v62 = vshrl.u32 %v937_v45, 16  ;;  %v1363_v0 = vsel %vm6284_vm4, %v1358_v54, %v1362_v34  ;;  %v1404_v2 = vshll.u32 %v938_v47, 16  ;;  %v6066_v38 = vld [vmem:[%s6266_s9 + $0xf0] sm:$0xff]   ;;  %v946_v48 = vld [vmem:[%s6266_s9 + $0xe0] sm:$0xf] }
  0x67   : > { %5819 = vmatprep.mubr.msk.bf16.mxu1 %vm410_vm1, %v5227_v53  ;;  %v1373_v1 = vsel %vm6284_vm4, %v1368_v55, %v1372_v44  ;;  %v1408_v3 = vshrl.u32 %v938_v47, 16  ;;  %v1382_v5 = vrot.slane %v1381_v59, 4  ;;  %v1396_v7 = vrot.slane %v1394_v61, 5  ;;  %v947_v53 = vld [vmem:[%s6266_s9 + $0xe4] sm:$0xf] }
  0x68   : > { %v5228_v4 = vcombine.low %v1363_v0, %v1373_v1  ;;  %v1391_v6 = vor.u32 %v1390_v60, %v1386_v57  ;;  %v1400_v9 = vrot.slane %v1398_v62, 4  ;;  %v1406_v10 = vrot.slane %v1404_v2, 5 }
  0x69   : > { %v1410_v11 = vrot.slane %v1408_v3, 4  ;;  %v1414_v12 = vshll.u32 %v939_v52, 16  ;;  %v1387_v13 = vsel %vm6284_vm4, %v1382_v5, %v1386_v57  ;;  %v1419_v15 = vshrl.u32 %v940_v58, 16 }
  0x6a   : > { %5820 = vmatmul.mubr.msk.bf16.gmra.mxu1 %vm410_vm1, %v5228_v4  ;;  %v1392_v14 = vrot.slane %v1391_v6, 4  ;;  %v1422_v16 = vshll.u32 %v940_v58, 16  ;;  %v1401_v17 = vor.u32 %v1400_v9, %v1396_v7  ;;  %v1428_v21 = vshll.u32 %v941_v8, 16  ;;  %v948_v58 = vld [vmem:[%s6266_s9 + $0xe8] sm:$0xf] }
  0x6b   : > { %v1411_v18 = vor.u32 %v1410_v11, %v1406_v10  ;;  %v1416_v19 = vrot.slane %v1414_v12, 5  ;;  %v1421_v24 = vrot.slane %v1419_v15, 4  ;;  %v1432_v26 = vshrl.u32 %v941_v8, 16  ;;  %v949_v12 = vld [vmem:[%s6266_s9 + $0xec] sm:$0x1] }
  0x6c   : > { %5758 = vmatmul.mubr.msk.bf16.gmra.mxu0 %vm410_vm1, %v6063_v56  ;;  %v1397_v23 = vsel %vm6284_vm4, %v1392_v14, %v1396_v7  ;;  %v1424_v25 = vrot.slane %v1422_v16, 5  ;;  %v1402_v29 = vrot.slane %v1401_v17, 4  ;;  %v1430_v32 = vrot.slane %v1428_v21, 5  ;;  %v6067_v7 = vld [vmem:[%s6266_s9 + $0xf8] sm:$0xff]   ;;  %v6068_v17 = vld [vmem:[%s6266_s9 + $0x104] sm:$0xff]  }
  0x6d   : > { %5761 = vmatprep.mubr.msk.bf16.mxu0 %vm410_vm1, %v6064_v63  ;;  %v5229_v28 = vcombine.low %v1387_v13, %v1397_v23  ;;  %v1412_v30 = vrot.slane %v1411_v18, 4  ;;  %v1434_v34 = vrot.slane %v1432_v26, 4  ;;  %v1438_v35 = vshll.u32 %v942_v20, 16  ;;  %v950_v18 = vld [vmem:[%s6266_s9 + $0xf0] sm:$0xf] }
  0x6e   : > { %v1425_v33 = vor.u32 %v1424_v25, %v1421_v24  ;;  %v1442_v37 = vshrl.u32 %v942_v20, 16  ;;  %v1407_v39 = vsel %vm6284_vm4, %v1402_v29, %v1406_v10  ;;  %v1448_v41 = vshll.u32 %v943_v22, 16  ;;  %v951_v23 = vld [vmem:[%s6266_s9 + $0xf4] sm:$0xf] }
  0x6f   : > { %5823 = vmatprep.mubr.msk.bf16.mxu1 %vm410_vm1, %v5229_v28  ;;  %v1417_v40 = vsel %vm6284_vm4, %v1412_v30, %v1416_v19  ;;  %v1452_v42 = vshrl.u32 %v943_v22, 16  ;;  %v1435_v46 = vor.u32 %v1434_v34, %v1430_v32  ;;  %v1440_v47 = vrot.slane %v1438_v35, 5  ;;  %v952_v28 = vld [vmem:[%s6266_s9 + $0xf8] sm:$0xf] }
  0x70   : > { %v5230_v44 = vcombine.low %v1407_v39, %v1417_v40  ;;  %v1426_v45 = vrot.slane %v1425_v33, 4  ;;  %v1444_v49 = vrot.slane %v1442_v37, 4  ;;  %v1450_v50 = vrot.slane %v1448_v41, 5 }
  0x71   : > { %v1454_v51 = vrot.slane %v1452_v42, 4  ;;  %v1458_v52 = vshll.u32 %v944_v27, 16  ;;  %v1436_v55 = vrot.slane %v1435_v46, 4  ;;  %v1463_v56 = vshrl.u32 %v945_v43, 16  ;;  %v953_v42 = vld [vmem:[%s6266_s9 + $0xfc] sm:$0xf] }
  0x72   : > { %5824 = vmatmul.mubr.msk.bf16.gmra.mxu1 %vm410_vm1, %v5230_v44  ;;  %v1431_v54 = vsel %vm6284_vm4, %v1426_v45, %v1430_v32  ;;  %v1466_v57 = vshll.u32 %v945_v43, 16  ;;  %v1445_v59 = vor.u32 %v1444_v49, %v1440_v47  ;;  %v1472_v62 = vshll.u32 %v946_v48, 16  ;;  %v6069_v46 = vld [vmem:[%s6266_s9 + $0x10c] sm:$0xff]  }
  0x73   : > { %v1455_v60 = vor.u32 %v1454_v51, %v1450_v50  ;;  %v1460_v61 = vrot.slane %v1458_v52, 5  ;;  %v1441_v63 = vsel %vm6284_vm4, %v1436_v55, %v1440_v47  ;;  %v1465_v0 = vrot.slane %v1463_v56, 4  ;;  %v954_v52 = vld [vmem:[%s6266_s9 + $0x100] sm:$0x1] }
  0x74   : > { %5762 = vmatmul.mubr.msk.bf16.gmra.mxu0 %vm410_vm1, %v6065_v31  ;;  %v1468_v1 = vrot.slane %v1466_v57, 5  ;;  %v1476_v2 = vshrl.u32 %v946_v48, 16  ;;  %v5231_v3 = vcombine.low %v1431_v54, %v1441_v63  ;;  %v1446_v4 = vrot.slane %v1445_v59, 4  ;;  %v956_v59 = vld [vmem:[%s6266_s9 + $0x108] sm:$0xf] }
  0x75   : > { %5765 = vmatprep.mubr.msk.bf16.mxu0 %vm410_vm1, %v6066_v38  ;;  %v1456_v5 = vrot.slane %v1455_v60, 4  ;;  %v1474_v6 = vrot.slane %v1472_v62, 5  ;;  %v1482_v10 = vshll.u32 %v947_v53, 16  ;;  %v1486_v11 = vshrl.u32 %v947_v53, 16  ;;  %v6070_v53 = vld [vmem:[%s6266_s9 + $0x118] sm:$0xff]  }
  0x76   : > { %v1469_v8 = vor.u32 %v1468_v1, %v1465_v0  ;;  %v1478_v9 = vrot.slane %v1476_v2, 4  ;;  %5827 = vmatprep.mubr.msk.bf16.mxu1 %vm410_vm1, %v5231_v3  ;;  %v1451_v13 = vsel %vm6284_vm4, %v1446_v4, %v1450_v50  ;;  %v1492_v15 = vshll.u32 %v948_v58, 16 }
  0x77   : > { %v1461_v14 = vsel %vm6284_vm4, %v1456_v5, %v1460_v61  ;;  %v1496_v16 = vshrl.u32 %v948_v58, 16  ;;  %v1484_v22 = vrot.slane %v1482_v10, 5  ;;  %v1488_v24 = vrot.slane %v1486_v11, 4  ;;  %v955_v58 = vld [vmem:[%s6266_s9 + $0x104] sm:$0xf] }
  0x78   : > { %v5232_v19 = vcombine.low %v1451_v13, %v1461_v14  ;;  %v1470_v20 = vrot.slane %v1469_v8, 4  ;;  %v1479_v21 = vor.u32 %v1478_v9, %v1474_v6  ;;  %v1494_v25 = vrot.slane %v1492_v15, 5  ;;  %v958_v13 = vld [vmem:[%s6266_s9 + $0x110] sm:$0xf] }
  0x79   : > { %v1498_v26 = vrot.slane %v1496_v16, 4  ;;  %v1502_v27 = vshll.u32 %v949_v12, 16  ;;  %v1507_v31 = vshrl.u32 %v950_v18, 16  ;;  %v1510_v32 = vshll.u32 %v950_v18, 16  ;;  %v959_v18 = vld [vmem:[%s6266_s9 + $0x114] sm:$0x1] }
  0x7a   : > { %5828 = vmatmul.mubr.msk.bf16.gmra.mxu1 %vm410_vm1, %v5232_v19  ;;  %v1475_v29 = vsel %vm6284_vm4, %v1470_v20, %v1474_v6  ;;  %v1480_v30 = vrot.slane %v1479_v21, 4  ;;  %v1489_v33 = vor.u32 %v1488_v24, %v1484_v22  ;;  %v1516_v37 = vshll.u32 %v951_v23, 16  ;;  %v957_v6 = vld [vmem:[%s6266_s9 + $0x10c] sm:$0xf]  ;;  %v960_v24 = vld [vmem:[%s6266_s9 + $0x118] sm:$0xf] }
  0x7b   : > { %v1499_v34 = vor.u32 %v1498_v26, %v1494_v25  ;;  %v1504_v35 = vrot.slane %v1502_v27, 5  ;;  %v1509_v39 = vrot.slane %v1507_v31, 4  ;;  %v1512_v40 = vrot.slane %v1510_v32, 5 }
  0x7c   : > { %5766 = vmatmul.mubr.msk.bf16.gmra.mxu0 %vm410_vm1, %v6067_v7  ;;  %v1485_v38 = vsel %vm6284_vm4, %v1480_v30, %v1484_v22  ;;  %v1520_v41 = vshrl.u32 %v951_v23, 16  ;;  %v1490_v44 = vrot.slane %v1489_v33, 4  ;;  %v1518_v47 = vrot.slane %v1516_v37, 5  ;;  %v6071_v22 = vld [vmem:[%s6266_s9 + $0x120] sm:$0xff]   ;;  %v961_v30 = vld [vmem:[%s6266_s9 + $0x11c] sm:$0xf] }
  0x7d   : > { %5769 = vmatprep.mubr.msk.bf16.mxu0 %vm410_vm1, %v6068_v17  ;;  %v5233_v43 = vcombine.low %v1475_v29, %v1485_v38  ;;  %v1500_v45 = vrot.slane %v1499_v34, 4  ;;  %v1513_v48 = vor.u32 %v1512_v40, %v1509_v39  ;;  %v1526_v50 = vshll.u32 %v952_v28, 16  ;;  %v6072_v29 = vld [vmem:[%s6266_s9 + $0x12c] sm:$0xff]  }
  0x7e   : > { %v1522_v49 = vrot.slane %v1520_v41, 4  ;;  %v1530_v51 = vshrl.u32 %v952_v28, 16  ;;  %v1495_v54 = vsel %vm6284_vm4, %v1490_v44, %v1494_v25  ;;  %v1536_v56 = vshll.u32 %v953_v42, 16 }
  0x7f   : > { %5831 = vmatprep.mubr.msk.bf16.mxu1 %vm410_vm1, %v5233_v43  ;;  %v1505_v55 = vsel %vm6284_vm4, %v1500_v45, %v1504_v35  ;;  %v1540_v57 = vshrl.u32 %v953_v42, 16  ;;  %v1514_v61 = vrot.slane %v1513_v48, 4  ;;  %v1528_v63 = vrot.slane %v1526_v50, 5 }
  0x80   : > { %v5234_v60 = vcombine.low %v1495_v54, %v1505_v55  ;;  %v1523_v62 = vor.u32 %v1522_v49, %v1518_v47  ;;  %v1532_v0 = vrot.slane %v1530_v51, 4  ;;  %v1538_v1 = vrot.slane %v1536_v56, 5  ;;  %v962_v51 = vld [vmem:[%s6266_s9 + $0x120] sm:$0xf] }
  0x81   : > { %v1542_v2 = vrot.slane %v1540_v57, 4  ;;  %v1546_v3 = vshll.u32 %v954_v52, 16  ;;  %v1519_v4 = vsel %vm6284_vm4, %v1514_v61, %v1518_v47  ;;  %v1551_v7 = vshrl.u32 %v955_v58, 16 }
  0x82   : > { %5832 = vmatmul.mubr.msk.bf16.gmra.mxu1 %vm410_vm1, %v5234_v60  ;;  %v1524_v5 = vrot.slane %v1523_v62, 4  ;;  %v1554_v8 = vshll.u32 %v955_v58, 16  ;;  %v1533_v9 = vor.u32 %v1532_v0, %v1528_v63  ;;  %v1560_v12 = vshll.u32 %v956_v59, 16  ;;  %v964_v58 = vld [vmem:[%s6266_s9 + $0x128] sm:$0x1]  ;;  %v6073_v62 = vld [vmem:[%s6266_s9 + $0x134] sm:$0xff]  }
  0x83   : > { %v1543_v10 = vor.u32 %v1542_v2, %v1538_v1  ;;  %v1548_v11 = vrot.slane %v1546_v3, 5  ;;  %v1553_v15 = vrot.slane %v1551_v7, 4  ;;  %v1564_v17 = vshrl.u32 %v956_v59, 16  ;;  %v965_v0 = vld [vmem:[%s6266_s9 + $0x12c] sm:$0xf] }
  0x84   : > { %5770 = vmatmul.mubr.msk.bf16.gmra.mxu0 %vm410_vm1, %v6069_v46  ;;  %v1529_v14 = vsel %vm6284_vm4, %v1524_v5, %v1528_v63  ;;  %v1556_v16 = vrot.slane %v1554_v8, 5  ;;  %v1534_v20 = vrot.slane %v1533_v9, 4  ;;  %v1562_v23 = vrot.slane %v1560_v12, 5  ;;  %v6074_v5 = vld [vmem:[%s6266_s9 + $0x140] sm:$0xff]  }
  0x85   : > { %5773 = vmatprep.mubr.msk.bf16.mxu0 %vm410_vm1, %v6070_v53  ;;  %v5235_v19 = vcombine.low %v1519_v4, %v1529_v14  ;;  %v1544_v21 = vrot.slane %v1543_v10, 4  ;;  %v1566_v26 = vrot.slane %v1564_v17, 4  ;;  %v1570_v27 = vshll.u32 %v957_v6, 16  ;;  %v963_v53 = vld [vmem:[%s6266_s9 + $0x124] sm:$0xf] }
  0x86   : > { %v1557_v25 = vor.u32 %v1556_v16, %v1553_v15  ;;  %v1574_v28 = vshrl.u32 %v957_v6, 16  ;;  %v1539_v31 = vsel %vm6284_vm4, %v1534_v20, %v1538_v1  ;;  %v1580_v33 = vshll.u32 %v958_v13, 16  ;;  %v966_v14 = vld [vmem:[%s6266_s9 + $0x130] sm:$0xf] }
  0x87   : > { %5835 = vmatprep.mubr.msk.bf16.mxu1 %vm410_vm1, %v5235_v19  ;;  %v1549_v32 = vsel %vm6284_vm4, %v1544_v21, %v1548_v11  ;;  %v1584_v34 = vshrl.u32 %v958_v13, 16  ;;  %v1567_v38 = vor.u32 %v1566_v26, %v1562_v23  ;;  %v1572_v39 = vrot.slane %v1570_v27, 5  ;;  %v967_v21 = vld [vmem:[%s6266_s9 + $0x134] sm:$0xf] }
  0x88   : > { %v5236_v35 = vcombine.low %v1539_v31, %v1549_v32  ;;  %v1558_v37 = vrot.slane %v1557_v25, 4  ;;  %v1576_v40 = vrot.slane %v1574_v28, 4  ;;  %v1582_v41 = vrot.slane %v1580_v33, 5  ;;  %v968_v28 = vld [vmem:[%s6266_s9 + $0x138] sm:$0xf] }
  0x89   : > { %v1586_v42 = vrot.slane %v1584_v34, 4  ;;  %v1590_v43 = vshll.u32 %v959_v18, 16  ;;  %v1568_v45 = vrot.slane %v1567_v38, 4  ;;  %v1595_v46 = vshrl.u32 %v960_v24, 16  ;;  %v969_v33 = vld [vmem:[%s6266_s9 + $0x13c] sm:$0x1] }
  0x8a   : > { %5836 = vmatmul.mubr.msk.bf16.gmra.mxu1 %vm410_vm1, %v5236_v35  ;;  %v1563_v44 = vsel %vm6284_vm4, %v1558_v37, %v1562_v23  ;;  %v1598_v47 = vshll.u32 %v960_v24, 16  ;;  %v1577_v48 = vor.u32 %v1576_v40, %v1572_v39  ;;  %v1604_v52 = vshll.u32 %v961_v30, 16 }
  0x8b   : > { %v1587_v49 = vor.u32 %v1586_v42, %v1582_v41  ;;  %v1592_v50 = vrot.slane %v1590_v43, 5  ;;  %v1573_v54 = vsel %vm6284_vm4, %v1568_v45, %v1572_v39  ;;  %v1597_v55 = vrot.slane %v1595_v46, 4  ;;  %v6075_v39 = vld [vmem:[%s6266_s9 + $0x148] sm:$0xff]  }
  0x8c   : > { %5774 = vmatmul.mubr.msk.bf16.gmra.mxu0 %vm410_vm1, %v6071_v22  ;;  %v1600_v56 = vrot.slane %v1598_v47, 5  ;;  %v1608_v57 = vshrl.u32 %v961_v30, 16  ;;  %v5237_v59 = vcombine.low %v1563_v44, %v1573_v54  ;;  %v1578_v60 = vrot.slane %v1577_v48, 4  ;;  %v6076_v48 = vld [vmem:[%s6266_s9 + $0x14] sm:$0xff]   ;;  %v971_v54 = vld [vmem:[%s6266_s9 + $0x144] sm:$0xf] }
  0x8d   : > { %5777 = vmatprep.mubr.msk.bf16.mxu0 %vm410_vm1, %v6072_v29  ;;  %v1588_v61 = vrot.slane %v1587_v49, 4  ;;  %v1606_v63 = vrot.slane %v1604_v52, 5  ;;  %v1614_v3 = vshll.u32 %v962_v51, 16  ;;  %v1618_v4 = vshrl.u32 %v962_v51, 16  ;;  %v970_v49 = vld [vmem:[%s6266_s9 + $0x140] sm:$0xf] }
  0x8e   : > { %v1601_v1 = vor.u32 %v1600_v56, %v1597_v55  ;;  %v1610_v2 = vrot.slane %v1608_v57, 4  ;;  %5839 = vmatprep.mubr.msk.bf16.mxu1 %vm410_vm1, %v5237_v59  ;;  %v1583_v6 = vsel %vm6284_vm4, %v1578_v60, %v1582_v41  ;;  %v1624_v8 = vshll.u32 %v963_v53, 16  ;;  %v972_v59 = vld [vmem:[%s6266_s9 + $0x148] sm:$0xf] }
  0x8f   : > { %v1593_v7 = vsel %vm6284_vm4, %v1588_v61, %v1592_v50  ;;  %v1628_v9 = vshrl.u32 %v963_v53, 16  ;;  %v1616_v13 = vrot.slane %v1614_v3, 5  ;;  %v1620_v15 = vrot.slane %v1618_v4, 4 }
  0x90   : > { %v5238_v10 = vcombine.low %v1583_v6, %v1593_v7  ;;  %v1602_v11 = vrot.slane %v1601_v1, 4  ;;  %v1611_v12 = vor.u32 %v1610_v2, %v1606_v63  ;;  %v1626_v16 = vrot.slane %v1624_v8, 5 }
  0x91   : > { %v1630_v17 = vrot.slane %v1628_v9, 4  ;;  %v1634_v18 = vshll.u32 %v964_v58, 16  ;;  %v1639_v22 = vshrl.u32 %v965_v0, 16  ;;  %v1642_v23 = vshll.u32 %v965_v0, 16  ;;  %v973_v0 = vld [vmem:[%s6266_s9 + $0x14c] sm:$0xf] }
  0x92   : > { %5840 = vmatmul.mubr.msk.bf16.gmra.mxu1 %vm410_vm1, %v5238_v10  ;;  %v1607_v19 = vsel %vm6284_vm4, %v1602_v11, %v1606_v63  ;;  %v1612_v20 = vrot.slane %v1611_v12, 4  ;;  %v1621_v24 = vor.u32 %v1620_v15, %v1616_v13  ;;  %v1648_v27 = vshll.u32 %v966_v14, 16 }
  0x93   : > { %v1631_v25 = vor.u32 %v1630_v17, %v1626_v16  ;;  %v1636_v26 = vrot.slane %v1634_v18, 5  ;;  %v1641_v30 = vrot.slane %v1639_v22, 4  ;;  %v1644_v31 = vrot.slane %v1642_v23, 5  ;;  %v6077_v17 = vld [vmem:[%s6266_s9 + $0x1c] sm:$0xff]   ;;  %v974_v18 = vld [vmem:[%s6266_s9 + $0x150] sm:$0x1] }
  0x94   : > { %5778 = vmatmul.mubr.msk.bf16.gmra.mxu0 %vm410_vm1, %v6073_v62  ;;  %v1617_v29 = vsel %vm6284_vm4, %v1612_v20, %v1616_v13  ;;  %v1652_v32 = vshrl.u32 %v966_v14, 16  ;;  %v1622_v35 = vrot.slane %v1621_v24, 4  ;;  %v1650_v38 = vrot.slane %v1648_v27, 5  ;;  %v6078_v23 = vld [vmem:[%s6266_s9 + $0x28] sm:$0xff]   ;;  %v5416_v24 = vld [vmem:[%s6266_s9 + $0x14] sm:$0xf] }
  0x95   : > { %5781 = vmatprep.mubr.msk.bf16.mxu0 %vm410_vm1, %v6074_v5  ;;  %v5239_v34 = vcombine.low %v1607_v19, %v1617_v29  ;;  %v1632_v37 = vrot.slane %v1631_v25, 4  ;;  %v1645_v40 = vor.u32 %v1644_v31, %v1641_v30  ;;  %v1658_v42 = vshll.u32 %v967_v21, 16  ;;  %v5417_v29 = vld [vmem:[%s6266_s9 + $0x18] sm:$0xf] }
  0x96   : > { %v1654_v41 = vrot.slane %v1652_v32, 4  ;;  %v1662_v43 = vshrl.u32 %v967_v21, 16  ;;  %v1627_v44 = vsel %vm6284_vm4, %v1622_v35, %v1626_v16  ;;  %v1668_v46 = vshll.u32 %v968_v28, 16 }
  0x97   : > { %5843 = vmatprep.mubr.msk.bf16.mxu1 %vm410_vm1, %v5239_v34  ;;  %v1637_v45 = vsel %vm6284_vm4, %v1632_v37, %v1636_v26  ;;  %v1672_v47 = vshrl.u32 %v968_v28, 16  ;;  %v1646_v51 = vrot.slane %v1645_v40, 4  ;;  %v1660_v53 = vrot.slane %v1658_v42, 5  ;;  %v5418_v42 = vld [vmem:[%s6266_s9 + $0x1c] sm:$0xf] }
  0x98   : > { %v5240_v50 = vcombine.low %v1627_v44, %v1637_v45  ;;  %v1655_v52 = vor.u32 %v1654_v41, %v1650_v38  ;;  %v1664_v55 = vrot.slane %v1662_v43, 4  ;;  %v1670_v56 = vrot.slane %v1668_v46, 5 }
  0x99   : > { %v1674_v57 = vrot.slane %v1672_v47, 4  ;;  %v1678_v58 = vshll.u32 %v969_v33, 16  ;;  %v1651_v60 = vsel %vm6284_vm4, %v1646_v51, %v1650_v38  ;;  %v1683_v62 = vshrl.u32 %v970_v49, 16 }
  0x9a   : > { %5844 = vmatmul.mubr.msk.bf16.gmra.mxu1 %vm410_vm1, %v5240_v50  ;;  %v1656_v61 = vrot.slane %v1655_v52, 4  ;;  %v1686_v63 = vshll.u32 %v970_v49, 16  ;;  %v1665_v1 = vor.u32 %v1664_v55, %v1660_v53  ;;  %v1692_v4 = vshll.u32 %v971_v54, 16  ;;  %v6079_v52 = vld [vmem:[%s6266_s9 + $0x30] sm:$0xff]  }
  0x9b   : > { %v1675_v2 = vor.u32 %v1674_v57, %v1670_v56  ;;  %v1680_v3 = vrot.slane %v1678_v58, 5  ;;  %v1685_v6 = vrot.slane %v1683_v62, 4  ;;  %v1696_v8 = vshrl.u32 %v971_v54, 16  ;;  %v5420_v54 = vld [vmem:[%s6266_s9 + $0x24] sm:$0x1] }
  0x9c   : > { %5782 = vmatmul.mubr.msk.bf16.gmra.mxu0 %vm410_vm1, %v6075_v39  ;;  %v1661_v5 = vsel %vm6284_vm4, %v1656_v61, %v1660_v53  ;;  %v1688_v7 = vrot.slane %v1686_v63, 5  ;;  %v1666_v10 = vrot.slane %v1665_v1, 4  ;;  %v1694_v12 = vrot.slane %v1692_v4, 5  ;;  %v5422_v1 = vld [vmem:[%s6266_s9 + $0x2c] sm:$0xf] }
  0x9d   : > { %5857 = vmatprep.mubr.msk.bf16.mxu0 %vm410_vm1, %v6076_v48  ;;  %v5241_v9 = vcombine.low %v1651_v60, %v1661_v5  ;;  %v1676_v11 = vrot.slane %v1675_v2, 4  ;;  %v1698_v14 = vrot.slane %v1696_v8, 4  ;;  %v1702_v15 = vshll.u32 %v972_v59, 16  ;;  %v5419_v48 = vld [vmem:[%s6266_s9 + $0x20] sm:$0xf] }
  0x9e   : > { %v1689_v13 = vor.u32 %v1688_v7, %v1685_v6  ;;  %v1706_v16 = vshrl.u32 %v972_v59, 16  ;;  %v1671_v19 = vsel %vm6284_vm4, %v1666_v10, %v1670_v56  ;;  %v1712_v21 = vshll.u32 %v973_v0, 16  ;;  %v6080_v59 = vld [vmem:[%s6266_s9 + $0x3c] sm:$0xff]   ;;  %v5421_v60 = vld [vmem:[%s6266_s9 + $0x28] sm:$0xf] }
  0x9f   : > { %5847 = vmatprep.mubr.msk.bf16.mxu1 %vm410_vm1, %v5241_v9  ;;  %v1681_v20 = vsel %vm6284_vm4, %v1676_v11, %v1680_v3  ;;  %v1716_v22 = vshrl.u32 %v973_v0, 16  ;;  %v1699_v27 = vor.u32 %v1698_v14, %v1694_v12  ;;  %v1704_v28 = vrot.slane %v1702_v15, 5 }
  0xa0   : > { %v5242_v25 = vcombine.low %v1671_v19, %v1681_v20  ;;  %v1690_v26 = vrot.slane %v1689_v13, 4  ;;  %v1708_v30 = vrot.slane %v1706_v16, 4  ;;  %v1714_v31 = vrot.slane %v1712_v21, 5  ;;  %v5424_v19 = vld [vmem:[%s6266_s9 + $0x34] sm:$0xf] }
  0xa1   : > { %v1718_v32 = vrot.slane %v1716_v22, 4  ;;  %v1722_v33 = vshll.u32 %v974_v18, 16  ;;  %v1700_v35 = vrot.slane %v1699_v27, 4  ;;  %v3385_v37 = vshrl.u32 %v5416_v24, 16 }
  0xa2   : > { %5848 = vmatmul.mubr.msk.bf16.gmra.mxu1 %vm410_vm1, %v5242_v25  ;;  %v1695_v34 = vsel %vm6284_vm4, %v1690_v26, %v1694_v12  ;;  %v3388_v38 = vshll.u32 %v5416_v24, 16  ;;  %v1709_v39 = vor.u32 %v1708_v30, %v1704_v28  ;;  %v3394_v43 = vshll.u32 %v5417_v29, 16  ;;  %v5425_v24 = vld [vmem:[%s6266_s9 + $0x38] sm:$0x1]  ;;  %v5426_v30 = vld [vmem:[%s6266_s9 + $0x3c] sm:$0xf] }
  0xa3   : > { %v1719_v40 = vor.u32 %v1718_v32, %v1714_v31  ;;  %v1724_v41 = vrot.slane %v1722_v33, 5  ;;  %v1705_v44 = vsel %vm6284_vm4, %v1700_v35, %v1704_v28  ;;  %v3387_v45 = vrot.slane %v3385_v37, 4  ;;  %v6081_v28 = vld [vmem:[%s6266_s9 + $0x44] sm:$0xff]   ;;  %v6082_v35 = vld [vmem:[%s6266_s9 + $0x50] sm:$0xff]  }
  0xa4   : > { %5858 = vmatmul.mubr.msk.bf16.vlgmr.msra.gmra.mxu0 %vm410_vm1, %v6077_v17  ;;  %v3390_v46 = vrot.slane %v3388_v38, 5  ;;  %v3398_v47 = vshrl.u32 %v5417_v29, 16  ;;  %v5243_v49 = vcombine.low %v1695_v34, %v1705_v44  ;;  %v1710_v50 = vrot.slane %v1709_v39, 4  ;;  %v5423_v17 = vld [vmem:[%s6266_s9 + $0x30] sm:$0xf] }
  0xa5   : > { %5861 = vmatprep.mubr.msk.bf16.mxu0 %vm410_vm1, %v6078_v23  ;;  %v1720_v51 = vrot.slane %v1719_v40, 4  ;;  %v3396_v53 = vrot.slane %v3394_v43, 5  ;;  %v3404_v57 = vshll.u32 %v5418_v42, 16  ;;  %v3408_v58 = vshrl.u32 %v5418_v42, 16 }
  0xa6   : > { %v3391_v55 = vor.u32 %v3390_v46, %v3387_v45  ;;  %v3400_v56 = vrot.slane %v3398_v47, 4  ;;  %5851 = vmatprep.mubr.msk.bf16.mxu1 %vm410_vm1, %v5243_v49  ;;  %v1715_v61 = vsel %vm6284_vm4, %v1710_v50, %v1714_v31  ;;  %v3414_v63 = vshll.u32 %v5419_v48, 16  ;;  %v5427_v45 = vld [vmem:[%s6266_s9 + $0x40] sm:$0xf] }
  0xa7   : > { %v1725_v62 = vsel %vm6284_vm4, %v1720_v51, %v1724_v41  ;;  %v3418_v0 = vshrl.u32 %v5419_v48, 16  ;;  %v3406_v5 = vrot.slane %v3404_v57, 5  ;;  %v3410_v6 = vrot.slane %v3408_v58, 4  ;;  %v5428_v57 = vld [vmem:[%s6266_s9 + $0x44] sm:$0xf] }
  0xa8   : > { %v5244_v2 = vcombine.low %v1715_v61, %v1725_v62  ;;  %v3392_v3 = vrot.slane %v3391_v55, 4  ;;  %v3401_v4 = vor.u32 %v3400_v56, %v3396_v53  ;;  %v3416_v7 = vrot.slane %v3414_v63, 5 }
  0xa9   : > { %v3420_v8 = vrot.slane %v3418_v0, 4  ;;  %v3424_v9 = vshll.u32 %v5420_v54, 16  ;;  %v3429_v12 = vshrl.u32 %v5421_v60, 16  ;;  %v3432_v13 = vshll.u32 %v5421_v60, 16  ;;  %v5430_v0 = vld [vmem:[%s6266_s9 + $0x4c] sm:$0x1] }
  0xaa   : > { %5852 = vmatmul.mubr.msk.bf16.gmra.mxu1 %vm410_vm1, %v5244_v2  ;;  %v3397_v10 = vsel %vm6284_vm4, %v3392_v3, %v3396_v53  ;;  %v3402_v11 = vrot.slane %v3401_v4, 4  ;;  %v3411_v14 = vor.u32 %v3410_v6, %v3406_v5  ;;  %v3438_v18 = vshll.u32 %v5422_v1, 16  ;;  %v6083_v4 = vld [vmem:[%s6266_s9 + $0x58] sm:$0xff]  }
  0xab   : > { %v3421_v15 = vor.u32 %v3420_v8, %v3416_v7  ;;  %v3426_v16 = vrot.slane %v3424_v9, 5  ;;  %v3431_v21 = vrot.slane %v3429_v12, 4  ;;  %v3434_v22 = vrot.slane %v3432_v13, 5 }
  0xac   : > { %5862 = vmatmul.mubr.msk.bf16.gmra.mxu0 %vm410_vm1, %v6079_v52  ;;  %v3407_v20 = vsel %vm6284_vm4, %v3402_v11, %v3406_v5  ;;  %v3442_v23 = vshrl.u32 %v5422_v1, 16  ;;  %v3412_v25 = vrot.slane %v3411_v14, 4  ;;  %v3440_v29 = vrot.slane %v3438_v18, 5 }
  0xad   : > { %5865 = vmatprep.mubr.msk.bf16.mxu0 %vm410_vm1, %v6080_v59  ;;  %v5502_v26 = vcombine.low %v3397_v10, %v3407_v20  ;;  %v3422_v27 = vrot.slane %v3421_v15, 4  ;;  %v3435_v31 = vor.u32 %v3434_v22, %v3431_v21  ;;  %v3448_v33 = vshll.u32 %v5423_v17, 16  ;;  %v5429_v59 = vld [vmem:[%s6266_s9 + $0x48] sm:$0xf]  ;;  %v5431_v15 = vld [vmem:[%s6266_s9 + $0x50] sm:$0xf] }
  0xae   : > { %v3444_v32 = vrot.slane %v3442_v23, 4  ;;  %v3452_v34 = vshrl.u32 %v5423_v17, 16  ;;  %v3417_v37 = vsel %vm6284_vm4, %v3412_v25, %v3416_v7  ;;  %v3458_v39 = vshll.u32 %v5424_v19, 16  ;;  %v6084_v10 = vld [vmem:[%s6266_s9 + $0x64] sm:$0xff]   ;;  %v5432_v20 = vld [vmem:[%s6266_s9 + $0x54] sm:$0xf] }
  0xaf   : > { %5927 = vmatprep.mubr.msk.bf16.mxu1 %vm410_vm1, %v5502_v26  ;;  %v3427_v38 = vsel %vm6284_vm4, %v3422_v27, %v3426_v16  ;;  %v3462_v40 = vshrl.u32 %v5424_v19, 16  ;;  %v3436_v42 = vrot.slane %v3435_v31, 4  ;;  %v3450_v44 = vrot.slane %v3448_v33, 5  ;;  %v5433_v25 = vld [vmem:[%s6266_s9 + $0x58] sm:$0xf] }
  0xb0   : > { %v5503_v41 = vcombine.low %v3417_v37, %v3427_v38  ;;  %v3445_v43 = vor.u32 %v3444_v32, %v3440_v29  ;;  %v3454_v46 = vrot.slane %v3452_v34, 4  ;;  %v3460_v47 = vrot.slane %v3458_v39, 5 }
  0xb1   : > { %v3464_v48 = vrot.slane %v3462_v40, 4  ;;  %v3468_v49 = vshll.u32 %v5425_v24, 16  ;;  %v3441_v50 = vsel %vm6284_vm4, %v3436_v42, %v3440_v29  ;;  %v3473_v52 = vshrl.u32 %v5426_v30, 16 }
  0xb2   : > { %5928 = vmatmul.mubr.msk.bf16.vlgmr.msra.gmra.mxu1 %vm410_vm1, %v5503_v41  ;;  %v3446_v51 = vrot.slane %v3445_v43, 4  ;;  %v3476_v53 = vshll.u32 %v5426_v30, 16  ;;  %v3455_v54 = vor.u32 %v3454_v46, %v3450_v44  ;;  %v3482_v58 = vshll.u32 %v5427_v45, 16  ;;  %v5434_v30 = vld [vmem:[%s6266_s9 + $0x5c] sm:$0xf] }
  0xb3   : > { %v3465_v55 = vor.u32 %v3464_v48, %v3460_v47  ;;  %v3470_v56 = vrot.slane %v3468_v49, 5  ;;  %v3475_v61 = vrot.slane %v3473_v52, 4  ;;  %v3486_v63 = vshrl.u32 %v5427_v45, 16  ;;  %v5435_v49 = vld [vmem:[%s6266_s9 + $0x60] sm:$0x1] }
  0xb4   : > { %5866 = vmatmul.mubr.msk.bf16.gmra.mxu0 %vm410_vm1, %v6081_v28  ;;  %v3451_v60 = vsel %vm6284_vm4, %v3446_v51, %v3450_v44  ;;  %v3478_v62 = vrot.slane %v3476_v53, 5  ;;  %v3456_v2 = vrot.slane %v3455_v54, 4  ;;  %v3484_v5 = vrot.slane %v3482_v58, 5  ;;  %v6085_v44 = vld [vmem:[%s6266_s9 + $0x6c] sm:$0xff]   ;;  %v6086_v54 = vld [vmem:[%s6266_s9 + $0x78] sm:$0xff]  }
  0xb5   : > { %5869 = vmatprep.mubr.msk.bf16.mxu0 %vm410_vm1, %v6082_v35  ;;  %v5504_v1 = vcombine.low %v3441_v50, %v3451_v60  ;;  %v3466_v3 = vrot.slane %v3465_v55, 4  ;;  %v3488_v7 = vrot.slane %v3486_v63, 4  ;;  %v3492_v8 = vshll.u32 %v5428_v57, 16  ;;  %v5436_v55 = vld [vmem:[%s6266_s9 + $0x64] sm:$0xf] }
  0xb6   : > { %v3479_v6 = vor.u32 %v3478_v62, %v3475_v61  ;;  %v3496_v9 = vshrl.u32 %v5428_v57, 16  ;;  %v3461_v11 = vsel %vm6284_vm4, %v3456_v2, %v3460_v47  ;;  %v3502_v13 = vshll.u32 %v5429_v59, 16  ;;  %v5437_v60 = vld [vmem:[%s6266_s9 + $0x68] sm:$0xf] }
  0xb7   : > { %5931 = vmatprep.mubr.msk.bf16.mxu1 %vm410_vm1, %v5504_v1  ;;  %v3471_v12 = vsel %vm6284_vm4, %v3466_v3, %v3470_v56  ;;  %v3506_v14 = vshrl.u32 %v5429_v59, 16  ;;  %v3489_v18 = vor.u32 %v3488_v7, %v3484_v5  ;;  %v3494_v19 = vrot.slane %v3492_v8, 5  ;;  %v5438_v1 = vld [vmem:[%s6266_s9 + $0x6c] sm:$0xf] }
  0xb8   : > { %v5505_v16 = vcombine.low %v3461_v11, %v3471_v12  ;;  %v3480_v17 = vrot.slane %v3479_v6, 4  ;;  %v3498_v21 = vrot.slane %v3496_v9, 4  ;;  %v3504_v22 = vrot.slane %v3502_v13, 5 }
  0xb9   : > { %v3508_v23 = vrot.slane %v3506_v14, 4  ;;  %v3512_v24 = vshll.u32 %v5430_v0, 16  ;;  %v3490_v27 = vrot.slane %v3489_v18, 4  ;;  %v3517_v28 = vshrl.u32 %v5431_v15, 16  ;;  %v5439_v14 = vld [vmem:[%s6266_s9 + $0x70] sm:$0xf] }
  0xba   : > { %5932 = vmatmul.mubr.msk.bf16.gmra.mxu1 %vm410_vm1, %v5505_v16  ;;  %v3485_v26 = vsel %vm6284_vm4, %v3480_v17, %v3484_v5  ;;  %v3520_v29 = vshll.u32 %v5431_v15, 16  ;;  %v3499_v31 = vor.u32 %v3498_v21, %v3494_v19  ;;  %v3526_v34 = vshll.u32 %v5432_v20, 16  ;;  %v6087_v18 = vld [vmem:[%s6266_s9 + $0x80] sm:$0xff]  }
  0xbb   : > { %v3509_v32 = vor.u32 %v3508_v23, %v3504_v22  ;;  %v3514_v33 = vrot.slane %v3512_v24, 5  ;;  %v3495_v35 = vsel %vm6284_vm4, %v3490_v27, %v3494_v19  ;;  %v3519_v37 = vrot.slane %v3517_v28, 4  ;;  %v5440_v24 = vld [vmem:[%s6266_s9 + $0x74] sm:$0x1] }
  0xbc   : > { %5870 = vmatmul.mubr.msk.bf16.gmra.mxu0 %vm410_vm1, %v6083_v4  ;;  %v3522_v38 = vrot.slane %v3520_v29, 5  ;;  %v3530_v39 = vshrl.u32 %v5432_v20, 16  ;;  %v5506_v40 = vcombine.low %v3485_v26, %v3495_v35  ;;  %v3500_v41 = vrot.slane %v3499_v31, 4  ;;  %v5442_v31 = vld [vmem:[%s6266_s9 + $0x7c] sm:$0xf] }
  0xbd   : > { %5873 = vmatprep.mubr.msk.bf16.mxu0 %vm410_vm1, %v6084_v10  ;;  %v3510_v42 = vrot.slane %v3509_v32, 4  ;;  %v3528_v43 = vrot.slane %v3526_v34, 5  ;;  %v3536_v47 = vshll.u32 %v5433_v25, 16  ;;  %v3540_v48 = vshrl.u32 %v5433_v25, 16  ;;  %v6088_v25 = vld [vmem:[%s6266_s9 + $0x8c] sm:$0xff]  }
  0xbe   : > { %v3523_v45 = vor.u32 %v3522_v38, %v3519_v37  ;;  %v3532_v46 = vrot.slane %v3530_v39, 4  ;;  %5935 = vmatprep.mubr.msk.bf16.mxu1 %vm410_vm1, %v5506_v40  ;;  %v3505_v50 = vsel %vm6284_vm4, %v3500_v41, %v3504_v22  ;;  %v3546_v52 = vshll.u32 %v5434_v30, 16 }
  0xbf   : > { %v3515_v51 = vsel %vm6284_vm4, %v3510_v42, %v3514_v33  ;;  %v3550_v53 = vshrl.u32 %v5434_v30, 16  ;;  %v3538_v59 = vrot.slane %v3536_v47, 5  ;;  %v3542_v61 = vrot.slane %v3540_v48, 4  ;;  %v5441_v30 = vld [vmem:[%s6266_s9 + $0x78] sm:$0xf] }
  0xc0   : > { %v5507_v56 = vcombine.low %v3505_v50, %v3515_v51  ;;  %v3524_v57 = vrot.slane %v3523_v45, 4  ;;  %v3533_v58 = vor.u32 %v3532_v46, %v3528_v43  ;;  %v3548_v62 = vrot.slane %v3546_v52, 5  ;;  %v5443_v48 = vld [vmem:[%s6266_s9 + $0x80] sm:$0xf]  ;;  %v5444_v50 = vld [vmem:[%s6266_s9 + $0x84] sm:$0xf] }
  0xc1   : > { %v3552_v63 = vrot.slane %v3550_v53, 4  ;;  %v3556_v0 = vshll.u32 %v5435_v49, 16  ;;  %v3561_v4 = vshrl.u32 %v5436_v55, 16  ;;  %v3564_v5 = vshll.u32 %v5436_v55, 16  ;;  %v5445_v55 = vld [vmem:[%s6266_s9 + $0x88] sm:$0x1] }
  0xc2   : > { %5936 = vmatmul.mubr.msk.bf16.gmra.mxu1 %vm410_vm1, %v5507_v56  ;;  %v3529_v2 = vsel %vm6284_vm4, %v3524_v57, %v3528_v43  ;;  %v3534_v3 = vrot.slane %v3533_v58, 4  ;;  %v3543_v6 = vor.u32 %v3542_v61, %v3538_v59  ;;  %v3570_v9 = vshll.u32 %v5437_v60, 16  ;;  %v5446_v61 = vld [vmem:[%s6266_s9 + $0x8c] sm:$0xf] }
  0xc3   : > { %v3553_v7 = vor.u32 %v3552_v63, %v3548_v62  ;;  %v3558_v8 = vrot.slane %v3556_v0, 5  ;;  %v3563_v11 = vrot.slane %v3561_v4, 4  ;;  %v3566_v12 = vrot.slane %v3564_v5, 5 }
  0xc4   : > { %5874 = vmatmul.mubr.msk.bf16.gmra.mxu0 %vm410_vm1, %v6085_v44  ;;  %v3539_v10 = vsel %vm6284_vm4, %v3534_v3, %v3538_v59  ;;  %v3574_v13 = vshrl.u32 %v5437_v60, 16  ;;  %v3544_v16 = vrot.slane %v3543_v6, 4  ;;  %v3572_v19 = vrot.slane %v3570_v9, 5  ;;  %v6089_v59 = vld [vmem:[%s6266_s9 + $0x94] sm:$0xff]   ;;  %v5447_v3 = vld [vmem:[%s6266_s9 + $0x90] sm:$0xf] }
  0xc5   : > { %5877 = vmatprep.mubr.msk.bf16.mxu0 %vm410_vm1, %v6086_v54  ;;  %v5508_v15 = vcombine.low %v3529_v2, %v3539_v10  ;;  %v3554_v17 = vrot.slane %v3553_v7, 4  ;;  %v3567_v20 = vor.u32 %v3566_v12, %v3563_v11  ;;  %v3580_v22 = vshll.u32 %v5438_v1, 16  ;;  %v6090_v2 = vld [vmem:[%s6266_s9 + $0xa0] sm:$0xff]  }
  0xc6   : > { %v3576_v21 = vrot.slane %v3574_v13, 4  ;;  %v3584_v23 = vshrl.u32 %v5438_v1, 16  ;;  %v3549_v26 = vsel %vm6284_vm4, %v3544_v16, %v3548_v62  ;;  %v3590_v28 = vshll.u32 %v5439_v14, 16 }
  0xc7   : > { %5939 = vmatprep.mubr.msk.bf16.mxu1 %vm410_vm1, %v5508_v15  ;;  %v3559_v27 = vsel %vm6284_vm4, %v3554_v17, %v3558_v8  ;;  %v3594_v29 = vshrl.u32 %v5439_v14, 16  ;;  %v3568_v33 = vrot.slane %v3567_v20, 4  ;;  %v3582_v35 = vrot.slane %v3580_v22, 5 }
  0xc8   : > { %v5509_v32 = vcombine.low %v3549_v26, %v3559_v27  ;;  %v3577_v34 = vor.u32 %v3576_v21, %v3572_v19  ;;  %v3586_v37 = vrot.slane %v3584_v23, 4  ;;  %v3592_v38 = vrot.slane %v3590_v28, 5  ;;  %v5448_v23 = vld [vmem:[%s6266_s9 + $0x94] sm:$0xf] }
  0xc9   : > { %v3596_v39 = vrot.slane %v3594_v29, 4  ;;  %v3600_v40 = vshll.u32 %v5440_v24, 16  ;;  %v3573_v41 = vsel %vm6284_vm4, %v3568_v33, %v3572_v19  ;;  %v3605_v43 = vshrl.u32 %v5441_v30, 16 }
  0xca   : > { %5940 = vmatmul.mubr.msk.bf16.gmra.mxu1 %vm410_vm1, %v5509_v32  ;;  %v3578_v42 = vrot.slane %v3577_v34, 4  ;;  %v3608_v44 = vshll.u32 %v5441_v30, 16  ;;  %v3587_v45 = vor.u32 %v3586_v37, %v3582_v35  ;;  %v3614_v49 = vshll.u32 %v5442_v31, 16  ;;  %v5450_v30 = vld [vmem:[%s6266_s9 + $0x9c] sm:$0x1]  ;;  %v6091_v34 = vld [vmem:[%s6266_s9 + $0xa8] sm:$0xff]  }
  0xcb   : > { %v3597_v46 = vor.u32 %v3596_v39, %v3592_v38  ;;  %v3602_v47 = vrot.slane %v3600_v40, 5  ;;  %v3607_v52 = vrot.slane %v3605_v43, 4  ;;  %v3618_v54 = vshrl.u32 %v5442_v31, 16  ;;  %v5451_v37 = vld [vmem:[%s6266_s9 + $0xa0] sm:$0xf] }
  0xcc   : > { %5878 = vmatmul.mubr.msk.bf16.gmra.mxu0 %vm410_vm1, %v6087_v18  ;;  %v3583_v51 = vsel %vm6284_vm4, %v3578_v42, %v3582_v35  ;;  %v3610_v53 = vrot.slane %v3608_v44, 5  ;;  %v3588_v57 = vrot.slane %v3587_v45, 4  ;;  %v3616_v60 = vrot.slane %v3614_v49, 5  ;;  %v6092_v42 = vld [vmem:[%s6266_s9 + $0xb4] sm:$0xff]  }
  0xcd   : > { %5881 = vmatprep.mubr.msk.bf16.mxu0 %vm410_vm1, %v6088_v25  ;;  %v5510_v56 = vcombine.low %v3573_v41, %v3583_v51  ;;  %v3598_v58 = vrot.slane %v3597_v46, 4  ;;  %v3620_v63 = vrot.slane %v3618_v54, 4  ;;  %v3624_v0 = vshll.u32 %v5443_v48, 16  ;;  %v5449_v25 = vld [vmem:[%s6266_s9 + $0x98] sm:$0xf] }
  0xce   : > { %v3611_v62 = vor.u32 %v3610_v53, %v3607_v52  ;;  %v3628_v1 = vshrl.u32 %v5443_v48, 16  ;;  %v3593_v4 = vsel %vm6284_vm4, %v3588_v57, %v3592_v38  ;;  %v3634_v6 = vshll.u32 %v5444_v50, 16  ;;  %v5452_v51 = vld [vmem:[%s6266_s9 + $0xa4] sm:$0xf] }
  0xcf   : > { %5943 = vmatprep.mubr.msk.bf16.mxu1 %vm410_vm1, %v5510_v56  ;;  %v3603_v5 = vsel %vm6284_vm4, %v3598_v58, %v3602_v47  ;;  %v3638_v7 = vshrl.u32 %v5444_v50, 16  ;;  %v3621_v10 = vor.u32 %v3620_v63, %v3616_v60  ;;  %v3626_v11 = vrot.slane %v3624_v0, 5 }
  0xd0   : > { %v5511_v8 = vcombine.low %v3593_v4, %v3603_v5  ;;  %v3612_v9 = vrot.slane %v3611_v62, 4  ;;  %v3630_v12 = vrot.slane %v3628_v1, 4  ;;  %v3636_v13 = vrot.slane %v3634_v6, 5 }
  0xd1   : > { %v3640_v14 = vrot.slane %v3638_v7, 4  ;;  %v3644_v15 = vshll.u32 %v5445_v55, 16  ;;  %v3622_v17 = vrot.slane %v3621_v10, 4  ;;  %v3649_v18 = vshrl.u32 %v5446_v61, 16 }
  0xd2   : > { %5944 = vmatmul.mubr.msk.bf16.gmra.mxu1 %vm410_vm1, %v5511_v8  ;;  %v3617_v16 = vsel %vm6284_vm4, %v3612_v9, %v3616_v60  ;;  %v3652_v19 = vshll.u32 %v5446_v61, 16  ;;  %v3631_v20 = vor.u32 %v3630_v12, %v3626_v11  ;;  %v3658_v24 = vshll.u32 %v5447_v3, 16  ;;  %v5455_v8 = vld [vmem:[%s6266_s9 + $0xb0] sm:$0x1] }
  0xd3   : > { %v3641_v21 = vor.u32 %v3640_v14, %v3636_v13  ;;  %v3646_v22 = vrot.slane %v3644_v15, 5  ;;  %v3627_v26 = vsel %vm6284_vm4, %v3622_v17, %v3626_v11  ;;  %v3651_v27 = vrot.slane %v3649_v18, 4  ;;  %v6093_v14 = vld [vmem:[%s6266_s9 + $0xbc] sm:$0xff]  }
  0xd4   : > { %5882 = vmatmul.mubr.msk.bf16.gmra.mxu0 %vm410_vm1, %v6089_v59  ;;  %v3654_v28 = vrot.slane %v3652_v19, 5  ;;  %v3662_v29 = vshrl.u32 %v5447_v3, 16  ;;  %v5512_v31 = vcombine.low %v3617_v16, %v3627_v26  ;;  %v3632_v32 = vrot.slane %v3631_v20, 4  ;;  %v5453_v59 = vld [vmem:[%s6266_s9 + $0xa8] sm:$0xf] }
  0xd5   : > { %5885 = vmatprep.mubr.msk.bf16.mxu0 %vm410_vm1, %v6090_v2  ;;  %v3642_v33 = vrot.slane %v3641_v21, 4  ;;  %v3660_v35 = vrot.slane %v3658_v24, 5  ;;  %v3668_v40 = vshll.u32 %v5448_v23, 16  ;;  %v3672_v41 = vshrl.u32 %v5448_v23, 16  ;;  %v5454_v2 = vld [vmem:[%s6266_s9 + $0xac] sm:$0xf] }
  0xd6   : > { %v3655_v38 = vor.u32 %v3654_v28, %v3651_v27  ;;  %v3664_v39 = vrot.slane %v3662_v29, 4  ;;  %5947 = vmatprep.mubr.msk.bf16.mxu1 %vm410_vm1, %v5512_v31  ;;  %v3637_v43 = vsel %vm6284_vm4, %v3632_v32, %v3636_v13  ;;  %v3678_v45 = vshll.u32 %v5449_v25, 16  ;;  %v6094_v23 = vld [vmem:[%s6266_s9 + $0xc8] sm:$0xff]   ;;  %v5456_v24 = vld [vmem:[%s6266_s9 + $0xb4] sm:$0xf] }
  0xd7   : > { %v3647_v44 = vsel %vm6284_vm4, %v3642_v33, %v3646_v22  ;;  %v3682_v46 = vshrl.u32 %v5449_v25, 16  ;;  %v3670_v50 = vrot.slane %v3668_v40, 5  ;;  %v3674_v52 = vrot.slane %v3672_v41, 4 }
  0xd8   : > { %v5513_v47 = vcombine.low %v3637_v43, %v3647_v44  ;;  %v3656_v48 = vrot.slane %v3655_v38, 4  ;;  %v3665_v49 = vor.u32 %v3664_v39, %v3660_v35  ;;  %v3680_v53 = vrot.slane %v3678_v45, 5 }
  0xd9   : > { %v3684_v54 = vrot.slane %v3682_v46, 4  ;;  %v3688_v55 = vshll.u32 %v5450_v30, 16  ;;  %v3693_v60 = vshrl.u32 %v5451_v37, 16  ;;  %v3696_v61 = vshll.u32 %v5451_v37, 16  ;;  %v5457_v30 = vld [vmem:[%s6266_s9 + $0xb8] sm:$0xf] }
  0xda   : > { %5948 = vmatmul.mubr.msk.bf16.gmra.mxu1 %vm410_vm1, %v5513_v47  ;;  %v3661_v57 = vsel %vm6284_vm4, %v3656_v48, %v3660_v35  ;;  %v3666_v58 = vrot.slane %v3665_v49, 4  ;;  %v3675_v62 = vor.u32 %v3674_v52, %v3670_v50  ;;  %v3702_v1 = vshll.u32 %v5452_v51, 16  ;;  %v5458_v35 = vld [vmem:[%s6266_s9 + $0xbc] sm:$0xf] }
  0xdb   : > { %v3685_v63 = vor.u32 %v3684_v54, %v3680_v53  ;;  %v3690_v0 = vrot.slane %v3688_v55, 5  ;;  %v3695_v5 = vrot.slane %v3693_v60, 4  ;;  %v3698_v6 = vrot.slane %v3696_v61, 5 }
  0xdc   : > { %v6728_v56 = vpop.f32.mrf.mxu0  ;;  %5886 = vmatmul.mubr.msk.bf16.gmra.mxu0 %vm410_vm1, %v6091_v34  ;;  %v3671_v3 = vsel %vm6284_vm4, %v3666_v58, %v3670_v50  ;;  %v3706_v7 = vshrl.u32 %v5452_v51, 16  ;;  %v3676_v10 = vrot.slane %v3675_v62, 4  ;;  %v3704_v12 = vrot.slane %v3702_v1, 5  ;;  %v6095_v58 = vld [vmem:[%s6266_s9 + $0xd0] sm:$0xff]  }
  0xdd   : > { %5889 = vmatprep.mubr.msk.bf16.mxu0 %vm410_vm1, %v6092_v42  ;;  %v5514_v9 = vcombine.low %v3661_v57, %v3671_v3  ;;  %v3686_v11 = vrot.slane %v3685_v63, 4  ;;  %v3699_v15 = vor.u32 %v3698_v6, %v3695_v5  ;;  %v3712_v17 = vshll.u32 %v5453_v59, 16  ;;  %v5459_v42 = vld [vmem:[%s6266_s9 + $0xc0] sm:$0xf]  ;;  %v5461_v6 = vld [vmem:[%s6266_s9 + $0xc8] sm:$0xf] }
  0xde   : > { %v6738_v4 = vpop.f32.mrf.mxu0  ;;  %v3708_v16 = vrot.slane %v3706_v7, 4  ;;  %v3716_v18 = vshrl.u32 %v5453_v59, 16  ;;  %v3681_v19 = vsel %vm6284_vm4, %v3676_v10, %v3680_v53  ;;  %v3722_v21 = vshll.u32 %v5454_v2, 16  ;;  %v6096_v63 = vld [vmem:[%s6266_s9 + $0xdc] sm:$0xff]  }
  0xdf   : > { %5951 = vmatprep.mubr.msk.bf16.mxu1 %vm410_vm1, %v5514_v9  ;;  %v3691_v20 = vsel %vm6284_vm4, %v3686_v11, %v3690_v0  ;;  %v3726_v22 = vshrl.u32 %v5454_v2, 16  ;;  %v3700_v27 = vrot.slane %v3699_v15, 4  ;;  %v3714_v29 = vrot.slane %v3712_v17, 5  ;;  %v5460_v2 = vld [vmem:[%s6266_s9 + $0xc4] sm:$0x1] }
  0xe0   : > { %v6741_v13 = vpop.f32.mrf.mxu0  ;;  %v5515_v25 = vcombine.low %v3681_v19, %v3691_v20  ;;  %v3709_v28 = vor.u32 %v3708_v16, %v3704_v12  ;;  %v3718_v31 = vrot.slane %v3716_v18, 4  ;;  %v3724_v32 = vrot.slane %v3722_v21, 5 }
  0xe1   : > { %v3728_v33 = vrot.slane %v3726_v22, 4  ;;  %v3732_v34 = vshll.u32 %v5455_v8, 16  ;;  %v3705_v38 = vsel %vm6284_vm4, %v3700_v27, %v3704_v12  ;;  %v3737_v40 = vshrl.u32 %v5456_v24, 16 }
  0xe2   : > { %v6751_v26 = vpop.f32.mrf.mxu0  ;;  %5952 = vmatmul.mubr.msk.bf16.gmra.mxu1 %vm410_vm1, %v5515_v25  ;;  %v3710_v39 = vrot.slane %v3709_v28, 4  ;;  %v3740_v41 = vshll.u32 %v5456_v24, 16  ;;  %v3719_v43 = vor.u32 %v3718_v31, %v3714_v29  ;;  %v3746_v46 = vshll.u32 %v5457_v30, 16  ;;  %v5463_v28 = vld [vmem:[%s6266_s9 + $0xd0] sm:$0xf] }
  0xe3   : > { %v3729_v44 = vor.u32 %v3728_v33, %v3724_v32  ;;  %v3734_v45 = vrot.slane %v3732_v34, 5  ;;  %v3739_v49 = vrot.slane %v3737_v40, 4  ;;  %v3750_v51 = vshrl.u32 %v5457_v30, 16 }
  0xe4   : > { %v6756_v37 = vpop.f32.mrf.mxu0  ;;  %5890 = vmatmul.mubr.msk.bf16.gmra.mxu0 %vm410_vm1, %v6093_v14  ;;  %v3715_v47 = vsel %vm6284_vm4, %v3710_v39, %v3714_v29  ;;  %v3742_v50 = vrot.slane %v3740_v41, 5  ;;  %v3720_v53 = vrot.slane %v3719_v43, 4  ;;  %v3748_v55 = vrot.slane %v3746_v46, 5  ;;  %v5462_v14 = vld [vmem:[%s6266_s9 + $0xcc] sm:$0xf]  ;;  %v6097_v41 = vld [vmem:[%s6266_s9 + $0xe4] sm:$0xff]  }
  0xe5   : > { %5893 = vmatprep.mubr.msk.bf16.mxu0 %vm410_vm1, %v6094_v23  ;;  %v5516_v52 = vcombine.low %v3705_v38, %v3715_v47  ;;  %v3730_v54 = vrot.slane %v3729_v44, 4  ;;  %v3752_v60 = vrot.slane %v3750_v51, 4  ;;  %v3756_v61 = vshll.u32 %v5458_v35, 16 }
  0xe6   : > { %v6765_v48 = vpop.f32.mrf.mxu0  ;;  %v3743_v59 = vor.u32 %v3742_v50, %v3739_v49  ;;  %v3760_v62 = vshrl.u32 %v5458_v35, 16  ;;  %v3725_v0 = vsel %vm6284_vm4, %v3720_v53, %v3724_v32  ;;  %v3766_v3 = vshll.u32 %v5459_v42, 16  ;;  %v5465_v50 = vld [vmem:[%s6266_s9 + $0xd8] sm:$0x1] }
  0xe7   : > { %5955 = vmatprep.mubr.msk.bf16.mxu1 %vm410_vm1, %v5516_v52  ;;  %v3735_v1 = vsel %vm6284_vm4, %v3730_v54, %v3734_v45  ;;  %v3770_v5 = vshrl.u32 %v5459_v42, 16  ;;  %v3753_v11 = vor.u32 %v3752_v60, %v3748_v55  ;;  %v3758_v12 = vrot.slane %v3756_v61, 5  ;;  %v5464_v42 = vld [vmem:[%s6266_s9 + $0xd4] sm:$0xf] }
  0xe8   : > { %v6767_v57 = vpop.f32.mrf.mxu0  ;;  %v5517_v8 = vcombine.low %v3725_v0, %v3735_v1  ;;  %v3744_v10 = vrot.slane %v3743_v59, 4  ;;  %v3762_v16 = vrot.slane %v3760_v62, 4  ;;  %v3768_v17 = vrot.slane %v3766_v3, 5  ;;  %v6098_v54 = vld [vmem:[%s6266_s9 + $0xf0] sm:$0xff]  }
  0xe9   : > { %v5789_v7 = vpop.f32.mrf.mxu1  ;;  %v3772_v18 = vrot.slane %v3770_v5, 4  ;;  %v3754_v22 = vrot.slane %v3753_v11, 4  ;;  %v3776_v23 = vshll.u32 %v5460_v2, 16  ;;  %v3781_v24 = vshrl.u32 %v5461_v6, 16 }
  0xea   : > { %v6778_v9 = vpop.f32.mrf.mxu0  ;;  %v6782_v15 = vadd.f32 %v5789_v7, %v6728_v56  ;;  %5956 = vmatmul.mubr.msk.bf16.gmra.mxu1 %vm410_vm1, %v5517_v8  ;;  %v3749_v21 = vsel %vm6284_vm4, %v3744_v10, %v3748_v55  ;;  %v3763_v25 = vor.u32 %v3762_v16, %v3758_v12  ;;  %v3784_v29 = vshll.u32 %v5461_v6, 16  ;;  %v5466_v55 = vld [vmem:[%s6266_s9 + $0xdc] sm:$0xf]  ;;  %v5467_v16 = vld [vmem:[%s6266_s9 + $0xe0] sm:$0xf] }
  0xeb   : > { %v1969_v19 = vpop.f32.mrf.mxu1  ;;  %v3773_v27 = vor.u32 %v3772_v18, %v3768_v17  ;;  %v3759_v31 = vsel %vm6284_vm4, %v3754_v22, %v3758_v12  ;;  %v3778_v32 = vrot.slane %v3776_v23, 5  ;;  %v3783_v34 = vrot.slane %v3781_v24, 4 }
  0xec   : > { %v6785_v20 = vpop.f32.mrf.mxu0  ;;  %5894 = vmatmul.mubr.msk.bf16.gmra.mxu0 %vm410_vm1, %v6095_v58  ;;  %v6791_v56 = vadd.f32 %v1969_v19, %v6738_v4  ;;  %v3790_v35 = vshll.u32 %v5462_v14, 16  ;;  %v5518_v38 = vcombine.low %v3749_v21, %v3759_v31  ;;  %v3764_v39 = vrot.slane %v3763_v25, 4 }
  0xed   : > { %5897 = vmatprep.mubr.msk.bf16.mxu0 %vm410_vm1, %v6096_v63  ;;  %v5790_v30 = vpop.f32.mrf.mxu1  ;;  %v3774_v40 = vrot.slane %v3773_v27, 4  ;;  %v3786_v45 = vrot.slane %v3784_v29, 5  ;;  %v3794_v47 = vshrl.u32 %v5462_v14, 16  ;;  %v3800_v49 = vshll.u32 %v5463_v28, 16 }
  0xee   : > { %v6797_v33 = vpop.f32.mrf.mxu0  ;;  %v6800_v4 = vadd.f32 %v5790_v30, %v6741_v13  ;;  %v3792_v46 = vrot.slane %v3790_v35, 5  ;;  %5959 = vmatprep.mubr.msk.bf16.mxu1 %vm410_vm1, %v5518_v38  ;;  %v3769_v13 = vsel %vm6284_vm4, %v3764_v39, %v3768_v17  ;;  %v3804_v53 = vshrl.u32 %v5463_v28, 16  ;;  %v5468_v17 = vld [vmem:[%s6266_s9 + $0xe4] sm:$0xf]  ;;  %v5469_v39 = vld [vmem:[%s6266_s9 + $0xe8] sm:$0xf] }
  0xef   : > { %v1972_v43 = vpop.f32.mrf.mxu1  ;;  %v3779_v52 = vsel %vm6284_vm4, %v3774_v40, %v3778_v32  ;;  %v3787_v60 = vor.u32 %v3786_v45, %v3783_v34  ;;  %v3796_v61 = vrot.slane %v3794_v47, 4  ;;  %v3802_v62 = vrot.slane %v3800_v49, 5  ;;  %v6099_v32 = vld [vmem:[%s6266_s9 + $0xf8] sm:$0xff]  }
  0xf0   : > { %v6804_v44 = vpop.f32.mrf.mxu0  ;;  %v6808_v51 = vadd.f32 %v1972_v43, %v6751_v26  ;;  %v5519_v58 = vcombine.low %v3769_v13, %v3779_v52  ;;  %v3806_v63 = vrot.slane %v3804_v53, 4  ;;  %v3810_v26 = vshll.u32 %v5464_v42, 16  ;;  %v6100_v43 = vld [vmem:[%s6266_s9 + $0x104] sm:$0xff]   ;;  %v5470_v52 = vld [vmem:[%s6266_s9 + $0xec] sm:$0x1] }
  0xf1   : > { %v3814_v0 = vshrl.u32 %v5464_v42, 16  ;;  %v3820_v1 = vshll.u32 %v5465_v50, 16  ;;  %v3788_v5 = vrot.slane %v3787_v60, 4  ;;  %v3797_v6 = vor.u32 %v3796_v61, %v3792_v46 }
  0xf2   : > { %v6817_v59 = vpop.f32.mrf.mxu0  ;;  %v5793_v2 = vpop.f32.mrf.mxu1  ;;  %5960 = vmatmul.mubr.msk.bf16.gmra.mxu1 %vm410_vm1, %v5519_v58  ;;  %v3825_v7 = vshrl.u32 %v5466_v55, 16  ;;  %v3828_v8 = vshll.u32 %v5466_v55, 16  ;;  %v3807_v11 = vor.u32 %v3806_v63, %v3802_v62  ;;  %v3812_v12 = vrot.slane %v3810_v26, 5  ;;  %v5471_v58 = vld [vmem:[%s6266_s9 + $0xf0] sm:$0xf] }
  0xf3   : > { %v6824_v10 = vadd.f32 %v5793_v2, %v6756_v37  ;;  %v3816_v14 = vrot.slane %v3814_v0, 4  ;;  %v3793_v19 = vsel %vm6284_vm4, %v3788_v5, %v3792_v46  ;;  %v3798_v21 = vrot.slane %v3797_v6, 4  ;;  %v5472_v6 = vld [vmem:[%s6266_s9 + $0xf4] sm:$0xf] }
  0xf4   : > { %v6820_v3 = vpop.f32.mrf.mxu0  ;;  %5898 = vmatmul.mubr.msk.bf16.gmra.mxu0 %vm410_vm1, %v6097_v41  ;;  %v1985_v18 = vpop.f32.mrf.mxu1  ;;  %v3822_v22 = vrot.slane %v3820_v1, 5  ;;  %v3827_v24 = vrot.slane %v3825_v7, 4  ;;  %v3808_v25 = vrot.slane %v3807_v11, 4  ;;  %v3830_v28 = vrot.slane %v3828_v8, 5 }
  0xf5   : > { %5901 = vmatprep.mubr.msk.bf16.mxu0 %vm410_vm1, %v6098_v54  ;;  %v6834_v37 = vadd.f32 %v1985_v18, %v6765_v48  ;;  %v3817_v27 = vor.u32 %v3816_v14, %v3812_v12  ;;  %v3803_v30 = vsel %vm6284_vm4, %v3798_v21, %v3802_v62  ;;  %v3834_v34 = vshll.u32 %v5467_v16, 16 }
  0xf6   : > { %v6831_v23 = vpop.f32.mrf.mxu0  ;;  %v5794_v29 = vpop.f32.mrf.mxu1  ;;  %v3838_v35 = vshrl.u32 %v5467_v16, 16  ;;  %v3844_v38 = vshll.u32 %v5468_v17, 16  ;;  %v5520_v48 = vcombine.low %v3793_v19, %v3803_v30  ;;  %v3813_v41 = vsel %vm6284_vm4, %v3808_v25, %v3812_v12  ;;  %v5473_v19 = vld [vmem:[%s6266_s9 + $0xf8] sm:$0xf] }
  0xf7   : > { %v6843_v40 = vadd.f32 %v5794_v29, %v6767_v57  ;;  %v3818_v42 = vrot.slane %v3817_v27, 4  ;;  %v3831_v47 = vor.u32 %v3830_v28, %v3827_v24  ;;  %v3836_v49 = vrot.slane %v3834_v34, 5  ;;  %v6101_v28 = vld [vmem:[%s6266_s9 + $0x10c] sm:$0xff]  }
  0xf8   : > { %v6838_v31 = vpop.f32.mrf.mxu0  ;;  %v1988_v45 = vpop.f32.mrf.mxu1  ;;  %v3840_v50 = vrot.slane %v3838_v35, 4  ;;  %v3846_v13 = vrot.slane %v3844_v38, 5  ;;  %5963 = vmatprep.mubr.msk.bf16.mxu1 %vm410_vm1, %v5520_v48  ;;  %v3848_v54 = vshrl.u32 %v5468_v17, 16  ;;  %v3854_v55 = vshll.u32 %v5469_v39, 16  ;;  %v5474_v38 = vld [vmem:[%s6266_s9 + $0xfc] sm:$0xf] }
  0xf9   : > { %v6852_v53 = vadd.f32 %v1988_v45, %v6778_v9  ;;  %v3823_v57 = vsel %vm6284_vm4, %v3818_v42, %v3822_v22  ;;  %v3832_v63 = vrot.slane %v3831_v47, 4  ;;  %v3858_v0 = vshrl.u32 %v5469_v39, 16  ;;  %v6102_v39 = vld [vmem:[%s6266_s9 + $0x118] sm:$0xff]  }
  0xfa   : > { %v6848_v46 = vpop.f32.mrf.mxu0  ;;  %v5797_v60 = vpop.f32.mrf.mxu1  ;;  %v5521_v61 = vcombine.low %v3813_v41, %v3823_v57  ;;  %v3841_v26 = vor.u32 %v3840_v50, %v3836_v49  ;;  %v3850_v1 = vrot.slane %v3848_v54, 4  ;;  %v3856_v2 = vrot.slane %v3854_v55, 5 }
  0xfb   : > { %v6862_v9 = vadd.f32 %v5797_v60, %v6785_v20  ;;  %v3864_v5 = vshll.u32 %v5470_v52, 16  ;;  %v3837_v8 = vsel %vm6284_vm4, %v3832_v63, %v3836_v49  ;;  %v3860_v12 = vrot.slane %v3858_v0, 4  ;;  %v5475_v52 = vld [vmem:[%s6266_s9 + $0x100] sm:$0x1] }
  0xfc   : > { %v6858_v62 = vpop.f32.mrf.mxu0  ;;  %5902 = vmatmul.mubr.msk.bf16.gmra.mxu0 %vm410_vm1, %v6099_v32  ;;  %5964 = vmatmul.mubr.msk.bf16.gmra.mxu1 %vm410_vm1, %v5521_v61  ;;  %v2001_v7 = vpop.f32.mrf.mxu1  ;;  %v3842_v11 = vrot.slane %v3841_v26, 4  ;;  %v3869_v20 = vshrl.u32 %v5471_v58, 16  ;;  %v3851_v17 = vor.u32 %v3850_v1, %v3846_v13  ;;  %v3872_v21 = vshll.u32 %v5471_v58, 16  ;;  %v5476_v61 = vld [vmem:[%s6266_s9 + $0x104] sm:$0xf] }
  0xfd   : > { %5905 = vmatprep.mubr.msk.bf16.mxu0 %vm410_vm1, %v6100_v43  ;;  %v6872_v16 = vadd.f32 %v2001_v7, %v6797_v33  ;;  %v3866_v18 = vrot.slane %v3864_v5, 5  ;;  %v3861_v25 = vor.u32 %v3860_v12, %v3856_v2  ;;  %v3878_v30 = vshll.u32 %v5472_v6, 16  ;;  %v5477_v12 = vld [vmem:[%s6266_s9 + $0x108] sm:$0xf] }
  0xfe   : > { %v6869_v14 = vpop.f32.mrf.mxu0  ;;  %v5798_v22 = vpop.f32.mrf.mxu1  ;;  %v3847_v24 = vsel %vm6284_vm4, %v3842_v11, %v3846_v13  ;;  %v3871_v29 = vrot.slane %v3869_v20, 4  ;;  %v3852_v34 = vrot.slane %v3851_v17, 4  ;;  %v3874_v35 = vrot.slane %v3872_v21, 5 }
  0xff   : > { %v6881_v32 = vadd.f32 %v5798_v22, %v6804_v44  ;;  %v5522_v33 = vcombine.low %v3837_v8, %v3847_v24  ;;  %v3862_v41 = vrot.slane %v3861_v25, 4  ;;  %v3880_v43 = vrot.slane %v3878_v30, 5 }
 0x100   : > { %v6877_v27 = vpop.f32.mrf.mxu0  ;;  %v2004_v48 = vpop.f32.mrf.mxu1  ;;  %v3882_v45 = vshrl.u32 %v5472_v6, 16  ;;  %v3888_v47 = vshll.u32 %v5473_v19, 16  ;;  %v3857_v44 = vsel %vm6284_vm4, %v3852_v34, %v3856_v2  ;;  %v3875_v50 = vor.u32 %v3874_v35, %v3871_v29 }
 0x101   : > { %v6888_v49 = vadd.f32 %v2004_v48, %v6817_v59  ;;  %5967 = vmatprep.mubr.msk.bf16.mxu1 %vm410_vm1, %v5522_v33  ;;  %v3892_v13 = vshrl.u32 %v5473_v19, 16  ;;  %v3867_v54 = vsel %vm6284_vm4, %v3862_v41, %v3866_v18  ;;  %v3898_v60 = vshll.u32 %v5474_v38, 16  ;;  %v5478_v33 = vld [vmem:[%s6266_s9 + $0x10c] sm:$0xf] }
 0x102   : > { %v6885_v42 = vpop.f32.mrf.mxu0  ;;  %v5801_v57 = vpop.f32.mrf.mxu1  ;;  %v3884_v58 = vrot.slane %v3882_v45, 4  ;;  %v3890_v59 = vrot.slane %v3888_v47, 5  ;;  %v5523_v26 = vcombine.low %v3857_v44, %v3867_v54  ;;  %v3876_v0 = vrot.slane %v3875_v50, 4  ;;  %v5479_v44 = vld [vmem:[%s6266_s9 + $0x110] sm:$0xf] }
 0x103   : > { %v6901_v63 = vadd.f32 %v5801_v57, %v6820_v3  ;;  %v3894_v1 = vrot.slane %v3892_v13, 4  ;;  %v3900_v6 = vrot.slane %v3898_v60, 5  ;;  %v3902_v7 = vshrl.u32 %v5474_v38, 16  ;;  %v6104_v38 = vld [vmem:[%s6266_s9 + $0x12c] sm:$0xff]  }
 0x104   : > { %v6896_v55 = vpop.f32.mrf.mxu0  ;;  %5906 = vmatmul.mubr.msk.bf16.gmra.mxu0 %vm410_vm1, %v6101_v28  ;;  %v2017_v2 = vpop.f32.mrf.mxu1  ;;  %v3885_v5 = vor.u32 %v3884_v58, %v3880_v43  ;;  %v3908_v8 = vshll.u32 %v5475_v52, 16  ;;  %5968 = vmatmul.mubr.msk.bf16.gmra.mxu1 %vm410_vm1, %v5523_v26  ;;  %v3881_v20 = vsel %vm6284_vm4, %v3876_v0, %v3880_v43  ;;  %v3913_v18 = vshrl.u32 %v5476_v61, 16  ;;  %v6103_v28 = vld [vmem:[%s6266_s9 + $0x120] sm:$0xff]   ;;  %v5480_v0 = vld [vmem:[%s6266_s9 + $0x114] sm:$0x1] }
 0x105   : > { %5909 = vmatprep.mubr.msk.bf16.mxu0 %vm410_vm1, %v6102_v39  ;;  %v6909_v3 = vadd.f32 %v2017_v2, %v6831_v23  ;;  %v3895_v17 = vor.u32 %v3894_v1, %v3890_v59  ;;  %v3904_v22 = vrot.slane %v3902_v7, 4  ;;  %v3916_v29 = vshll.u32 %v5476_v61, 16 }
 0x106   : > { %v6904_v11 = vpop.f32.mrf.mxu0  ;;  %v5802_v19 = vpop.f32.mrf.mxu1  ;;  %v3886_v21 = vrot.slane %v3885_v5, 4  ;;  %v3910_v24 = vrot.slane %v3908_v8, 5  ;;  %v3915_v34 = vrot.slane %v3913_v18, 4  ;;  %v3922_v35 = vshll.u32 %v5477_v12, 16 }
 0x107   : > { %v6917_v30 = vadd.f32 %v5802_v19, %v6838_v31  ;;  %v3896_v23 = vrot.slane %v3895_v17, 4  ;;  %v3905_v41 = vor.u32 %v3904_v22, %v3900_v6  ;;  %v3918_v45 = vrot.slane %v3916_v29, 5  ;;  %v5481_v17 = vld [vmem:[%s6266_s9 + $0x118] sm:$0xf]  ;;  %v5482_v22 = vld [vmem:[%s6266_s9 + $0x11c] sm:$0xf] }
 0x108   : > { %v6913_v25 = vpop.f32.mrf.mxu0  ;;  %v2020_v39 = vpop.f32.mrf.mxu1  ;;  %v3891_v48 = vsel %vm6284_vm4, %v3886_v21, %v3890_v59  ;;  %v3926_v47 = vshrl.u32 %v5477_v12, 16  ;;  %v3924_v52 = vrot.slane %v3922_v35, 5  ;;  %v3932_v61 = vshll.u32 %v5478_v33, 16  ;;  %v6105_v35 = vld [vmem:[%s6266_s9 + $0x134] sm:$0xff]  }
 0x109   : > { %v6927_v50 = vadd.f32 %v2020_v39, %v6848_v46  ;;  %v5524_v31 = vcombine.low %v3881_v20, %v3891_v48  ;;  %v3901_v13 = vsel %vm6284_vm4, %v3896_v23, %v3900_v6  ;;  %v3906_v54 = vrot.slane %v3905_v41, 4  ;;  %v6106_v41 = vld [vmem:[%s6266_s9 + $0x140] sm:$0xff]  }
 0x10a   : > { %v6923_v43 = vpop.f32.mrf.mxu0  ;;  %v5805_v57 = vpop.f32.mrf.mxu1  ;;  %v3919_v59 = vor.u32 %v3918_v45, %v3915_v34  ;;  %v3928_v60 = vrot.slane %v3926_v47, 4  ;;  %v3936_v26 = vshrl.u32 %v5478_v33, 16  ;;  %v3942_v1 = vshll.u32 %v5479_v44, 16 }
 0x10b   : > { %5971 = vmatprep.mubr.msk.bf16.mxu1 %vm410_vm1, %v5524_v31  ;;  %v6936_v46 = vadd.f32 %v5805_v57, %v6858_v62  ;;  %v3946_v2 = vshrl.u32 %v5479_v44, 16  ;;  %v3911_v5 = vsel %vm6284_vm4, %v3906_v54, %v3910_v24  ;;  %v3934_v12 = vrot.slane %v3932_v61, 5  ;;  %v5484_v61 = vld [vmem:[%s6266_s9 + $0x124] sm:$0xf] }
 0x10c   : > { %v6931_v58 = vpop.f32.mrf.mxu0  ;;  %5910 = vmatmul.mubr.msk.bf16.gmra.mxu0 %vm410_vm1, %v6103_v28  ;;  %v2033_v6 = vpop.f32.mrf.mxu1  ;;  %v3920_v7 = vrot.slane %v3919_v59, 4  ;;  %v3929_v8 = vor.u32 %v3928_v60, %v3924_v52  ;;  %v5525_v62 = vcombine.low %v3901_v13, %v3911_v5  ;;  %v3938_v19 = vrot.slane %v3936_v26, 4 }
 0x10d   : > { %5913 = vmatprep.mubr.msk.bf16.mxu0 %vm410_vm1, %v6104_v38  ;;  %v6946_v18 = vadd.f32 %v2033_v6, %v6869_v14  ;;  %v3944_v21 = vrot.slane %v3942_v1, 5  ;;  %v3948_v23 = vrot.slane %v3946_v2, 4  ;;  %v3952_v33 = vshll.u32 %v5480_v0, 16 }
 0x10e   : > { %v6942_v20 = vpop.f32.mrf.mxu0  ;;  %v5806_v28 = vpop.f32.mrf.mxu1  ;;  %v3925_v24 = vsel %vm6284_vm4, %v3920_v7, %v3924_v52  ;;  %v3930_v29 = vrot.slane %v3929_v8, 4  ;;  %5972 = vmatmul.mubr.msk.bf16.gmra.mxu1 %vm410_vm1, %v5525_v62  ;;  %v3939_v38 = vor.u32 %v3938_v19, %v3934_v12  ;;  %v3957_v39 = vshrl.u32 %v5481_v17, 16  ;;  %v5483_v52 = vld [vmem:[%s6266_s9 + $0x120] sm:$0xf] }
 0x10f   : > { %v6956_v14 = vadd.f32 %v5806_v28, %v6877_v27  ;;  %v3960_v48 = vshll.u32 %v5481_v17, 16  ;;  %v3949_v44 = vor.u32 %v3948_v23, %v3944_v21  ;;  %v3954_v31 = vrot.slane %v3952_v33, 5 }
 0x110   : > { %v6951_v34 = vpop.f32.mrf.mxu0  ;;  %v2036_v45 = vpop.f32.mrf.mxu1  ;;  %v3935_v47 = vsel %vm6284_vm4, %v3930_v29, %v3934_v12  ;;  %v3966_v57 = vshll.u32 %v5482_v22, 16  ;;  %v3940_v27 = vrot.slane %v3939_v38, 4  ;;  %v3959_v60 = vrot.slane %v3957_v39, 4 }
 0x111   : > { %v6965_v54 = vadd.f32 %v2036_v45, %v6885_v42  ;;  %v5526_v59 = vcombine.low %v3925_v24, %v3935_v47  ;;  %v3950_v0 = vrot.slane %v3949_v44, 4  ;;  %v3962_v2 = vrot.slane %v3960_v48, 5  ;;  %v6107_v44 = vld [vmem:[%s6266_s9 + $0x148] sm:$0xff]  }
 0x112   : > { %v6961_v13 = vpop.f32.mrf.mxu0  ;;  %v5809_v26 = vpop.f32.mrf.mxu1  ;;  %v3968_v5 = vrot.slane %v3966_v57, 5  ;;  %v3970_v6 = vshrl.u32 %v5482_v22, 16  ;;  %v3945_v7 = vsel %vm6284_vm4, %v3940_v27, %v3944_v21  ;;  %v3976_v8 = vshll.u32 %v5483_v52, 16  ;;  %v5485_v22 = vld [vmem:[%s6266_s9 + $0x128] sm:$0x1] }
 0x113   : > { %5975 = vmatprep.mubr.msk.bf16.mxu1 %vm410_vm1, %v5526_v59  ;;  %v6973_v42 = vadd.f32 %v5809_v26, %v6896_v55  ;;  %v3980_v12 = vshrl.u32 %v5483_v52, 16  ;;  %v3955_v17 = vsel %vm6284_vm4, %v3950_v0, %v3954_v31  ;;  %v3963_v19 = vor.u32 %v3962_v2, %v3959_v60  ;;  %v5486_v55 = vld [vmem:[%s6266_s9 + $0x12c] sm:$0xf]  ;;  %v5487_v57 = vld [vmem:[%s6266_s9 + $0x130] sm:$0xf]  ;;  %v6108_v59 = vld [vmem:[%s6266_s9 + $0x154] sm:$0xff]  }
 0x114   : > { %v6968_v1 = vpop.f32.mrf.mxu0  ;;  %5914 = vmatmul.mubr.msk.bf16.gmra.mxu0 %vm410_vm1, %v6105_v35  ;;  %v2049_v62 = vpop.f32.mrf.mxu1  ;;  %v3972_v28 = vrot.slane %v3970_v6, 4  ;;  %v3986_v24 = vshll.u32 %v5484_v61, 16  ;;  %v5527_v23 = vcombine.low %v3945_v7, %v3955_v17  ;;  %v3978_v33 = vrot.slane %v3976_v8, 5 }
 0x115   : > { %5917 = vmatprep.mubr.msk.bf16.mxu0 %vm410_vm1, %v6106_v41  ;;  %v6985_v21 = vadd.f32 %v2049_v62, %v6904_v11  ;;  %v3982_v35 = vrot.slane %v3980_v12, 4  ;;  %v3964_v39 = vrot.slane %v3963_v19, 4  ;;  %v3990_v45 = vshrl.u32 %v5484_v61, 16  ;;  %v5488_v12 = vld [vmem:[%s6266_s9 + $0x134] sm:$0xf] }
 0x116   : > { %v6981_v29 = vpop.f32.mrf.mxu0  ;;  %v5810_v38 = vpop.f32.mrf.mxu1  ;;  %v3973_v48 = vor.u32 %v3972_v28, %v3968_v5  ;;  %v3988_v41 = vrot.slane %v3986_v24, 5  ;;  %5976 = vmatmul.mubr.msk.bf16.gmra.mxu1 %vm410_vm1, %v5527_v23  ;;  %v3996_v11 = vshll.u32 %v5485_v22, 16  ;;  %v4001_v27 = vshrl.u32 %v5486_v55, 16  ;;  %v5489_v23 = vld [vmem:[%s6266_s9 + $0x138] sm:$0xf] }
 0x117   : > { %v6992_v31 = vadd.f32 %v5810_v38, %v6913_v25  ;;  %v3983_v52 = vor.u32 %v3982_v35, %v3978_v33  ;;  %v3969_v26 = vsel %vm6284_vm4, %v3964_v39, %v3968_v5  ;;  %v3992_v61 = vrot.slane %v3990_v45, 4 }
 0x118   : > { %v6987_v47 = vpop.f32.mrf.mxu0  ;;  %v2052_v60 = vpop.f32.mrf.mxu1  ;;  %v3974_v0 = vrot.slane %v3973_v48, 4  ;;  %v4004_v6 = vshll.u32 %v5486_v55, 16  ;;  %v3998_v8 = vrot.slane %v3996_v11, 5  ;;  %v4003_v17 = vrot.slane %v4001_v27, 4 }
 0x119   : > { %v7001_v7 = vadd.f32 %v2052_v60, %v6923_v43  ;;  %v3984_v25 = vrot.slane %v3983_v52, 4  ;;  %v3993_v28 = vor.u32 %v3992_v61, %v3988_v41  ;;  %v4010_v24 = vshll.u32 %v5487_v57, 16 }
 0x11a   : > { %v6998_v2 = vpop.f32.mrf.mxu0  ;;  %v3979_v62 = vsel %vm6284_vm4, %v3974_v0, %v3978_v33  ;;  %v5813_v19 = vpop.f32.mrf.mxu1  ;;  %v4006_v5 = vrot.slane %v4004_v6, 5  ;;  %v4014_v38 = vshrl.u32 %v5487_v57, 16  ;;  %v5490_v57 = vld [vmem:[%s6266_s9 + $0x13c] sm:$0x1]  ;;  %v4030_v27 = vshll.u32 %v5489_v23, 16 }
 0x11b   : > { %v5528_v55 = vcombine.low %v3969_v26, %v3979_v62  ;;  %v7011_v43 = vadd.f32 %v5813_v19, %v6931_v58  ;;  %v3989_v35 = vsel %vm6284_vm4, %v3984_v25, %v3988_v41  ;;  %v3994_v33 = vrot.slane %v3993_v28, 4  ;;  %v6109_v25 = vld [vmem:[%s6266_s9 + $0x15c] sm:$0xff]  }
 0x11c   : > { %v7006_v22 = vpop.f32.mrf.mxu0  ;;  %5918 = vmatmul.mubr.msk.bf16.gmra.mxu0 %vm410_vm1, %v6107_v44  ;;  %v2065_v39 = vpop.f32.mrf.mxu1  ;;  %v4007_v48 = vor.u32 %v4006_v5, %v4003_v17  ;;  %v4012_v45 = vrot.slane %v4010_v24, 5  ;;  %v4020_v44 = vshll.u32 %v5488_v12, 16  ;;  %v4016_v11 = vrot.slane %v4014_v38, 4  ;;  %v5491_v17 = vld [vmem:[%s6266_s9 + $0x140] sm:$0xf] }
 0x11d   : > { %5921 = vmatprep.mubr.msk.bf16.mxu0 %vm410_vm1, %v6108_v59  ;;  %5979 = vmatprep.mubr.msk.bf16.mxu1 %vm410_vm1, %v5528_v55  ;;  %v7020_v58 = vadd.f32 %v2065_v39, %v6942_v20  ;;  %v4024_v41 = vshrl.u32 %v5488_v12, 16  ;;  %v3999_v59 = vsel %vm6284_vm4, %v3994_v33, %v3998_v8  ;;  %v4034_v61 = vshrl.u32 %v5489_v23, 16  ;;  %v5492_v12 = vld [vmem:[%s6266_s9 + $0x144] sm:$0xf] }
 0x11e   : > { %v7016_v52 = vpop.f32.mrf.mxu0  ;;  %v5814_v60 = vpop.f32.mrf.mxu1  ;;  %v4008_v26 = vrot.slane %v4007_v48, 4  ;;  %v4022_v0 = vrot.slane %v4020_v44, 5  ;;  %v5529_v62 = vcombine.low %v3989_v35, %v3999_v59  ;;  %v4017_v19 = vor.u32 %v4016_v11, %v4012_v45 }
 0x11f   : > { %v7030_v20 = vadd.f32 %v5814_v60, %v6951_v34  ;;  %v4026_v28 = vrot.slane %v4024_v41, 4  ;;  %v4032_v24 = vrot.slane %v4030_v27, 5  ;;  %v4036_v55 = vrot.slane %v4034_v61, 4  ;;  %v5494_v61 = vld [vmem:[%s6266_s9 + $0x14c] sm:$0xf] }
 0x120   : > { %v7025_v6 = vpop.f32.mrf.mxu0  ;;  %v2068_v5 = vpop.f32.mrf.mxu1  ;;  %v4013_v8 = vsel %vm6284_vm4, %v4008_v26, %v4012_v45  ;;  %v4040_v38 = vshll.u32 %v5490_v57, 16  ;;  %5980 = vmatmul.mubr.msk.bf16.gmra.mxu1 %vm410_vm1, %v5529_v62  ;;  %v4018_v34 = vrot.slane %v4017_v19, 4  ;;  %v4045_v39 = vshrl.u32 %v5491_v17, 16  ;;  %v5493_v45 = vld [vmem:[%s6266_s9 + $0x148] sm:$0xf] }
 0x121   : > { %v7039_v35 = vadd.f32 %v2068_v5, %v6961_v13  ;;  %v4027_v33 = vor.u32 %v4026_v28, %v4022_v0  ;;  %v4037_v44 = vor.u32 %v4036_v55, %v4032_v24  ;;  %v4048_v57 = vshll.u32 %v5491_v17, 16 }
 0x122   : > { %v7035_v23 = vpop.f32.mrf.mxu0  ;;  %v5817_v48 = vpop.f32.mrf.mxu1  ;;  %v4042_v11 = vrot.slane %v4040_v38, 5  ;;  %v4054_v27 = vshll.u32 %v5492_v12, 16  ;;  %v4023_v59 = vsel %vm6284_vm4, %v4018_v34, %v4022_v0  ;;  %v4047_v26 = vrot.slane %v4045_v39, 4 }
 0x123   : > { %7457 = vst [vmem:[#allocation6_spill] sm:$0xff] %v7039_v35  ;;  %v4028_v60 = vrot.slane %v4027_v33, 4  ;;  %v7048_v13 = vadd.f32 %v5817_v48, %v6968_v1  ;;  %v5530_v62 = vcombine.low %v4013_v8, %v4023_v59  ;;  %v4038_v19 = vrot.slane %v4037_v44, 4  ;;  %v5495_v48 = vld [vmem:[%s6266_s9 + $0x150] sm:$0x1] }
 0x124   : > { %v7041_v41 = vpop.f32.mrf.mxu0  ;;  %5922 = vmatmul.mubr.msk.bf16.gmra.mxu0 %vm410_vm1, %v6109_v25  ;;  %v2081_v28 = vpop.f32.mrf.mxu1  ;;  %v4050_v5 = vrot.slane %v4048_v57, 5  ;;  %v4056_v55 = vrot.slane %v4054_v27, 5  ;;  %v4058_v38 = vshrl.u32 %v5492_v12, 16  ;;  %v4064_v1 = vshll.u32 %v5493_v45, 16  ;;  %v5496_v27 = vld [vmem:[%s6266_s9 + $0x154] sm:$0xf] }
 0x125   : > { %7458 = vst [vmem:[#allocation7_spill] sm:$0xff] %v7048_v13  ;;  %v4033_v17 = vsel %vm6284_vm4, %v4028_v60, %v4032_v24  ;;  %v7056_v0 = vadd.f32 %v2081_v28, %v6981_v29  ;;  %5983 = vmatprep.mubr.msk.bf16.mxu1 %vm410_vm1, %v5530_v62  ;;  %v4043_v8 = vsel %vm6284_vm4, %v4038_v19, %v4042_v11  ;;  %v4068_v39 = vshrl.u32 %v5493_v45, 16 }
 0x126   : > { %v7051_v25 = vpop.f32.mrf.mxu0  ;;  %v5818_v34 = vpop.f32.mrf.mxu1  ;;  %v4051_v33 = vor.u32 %v4050_v5, %v4047_v26  ;;  %v4074_v44 = vshll.u32 %v5494_v61, 16  ;;  %v5531_v24 = vcombine.low %v4033_v17, %v4043_v8  ;;  %v4060_v12 = vrot.slane %v4058_v38, 4  ;;  %v5497_v8 = vld [vmem:[%s6266_s9 + $0x158] sm:$0xf] }
 0x127   : > { %7459 = vst [vmem:[#allocation8_spill] sm:$0xff] %v7056_v0  ;;  %v7066_v29 = vadd.f32 %v5818_v34, %v6987_v47  ;;  %v4066_v59 = vrot.slane %v4064_v1, 5  ;;  %v4070_v28 = vrot.slane %v4068_v39, 4  ;;  %v4078_v19 = vshrl.u32 %v5494_v61, 16  ;;  %v5498_v61 = vld [vmem:[%s6266_s9 + $0x15c] sm:$0xf] }
 0x128   : > { %v7062_v57 = vpop.f32.mrf.mxu0  ;;  %v2084_v60 = vpop.f32.mrf.mxu1  ;;  %v4052_v62 = vrot.slane %v4051_v33, 4  ;;  %v4076_v11 = vrot.slane %v4074_v44, 5  ;;  %5984 = vmatmul.mubr.msk.bf16.gmra.mxu1 %vm410_vm1, %v5531_v24  ;;  %v4061_v5 = vor.u32 %v4060_v12, %v4056_v55  ;;  %v4084_v17 = vshll.u32 %v5495_v48, 16 }
 0x129   : > { %7460 = vst [vmem:[#allocation9_spill] sm:$0xff] %v7066_v29  ;;  %v7072_v45 = vadd.f32 %v2084_v60, %v6998_v2  ;;  %v4089_v47 = vshrl.u32 %v5496_v27, 16  ;;  %v4071_v1 = vor.u32 %v4070_v28, %v4066_v59  ;;  %v4080_v33 = vrot.slane %v4078_v19, 4 }
 0x12a   : > { %v7068_v26 = vpop.f32.mrf.mxu0  ;;  %v4057_v38 = vsel %vm6284_vm4, %v4052_v62, %v4056_v55  ;;  %v5821_v34 = vpop.f32.mrf.mxu1  ;;  %v4092_v44 = vshll.u32 %v5496_v27, 16  ;;  %v4062_v29 = vrot.slane %v4061_v5, 4  ;;  %v4086_v2 = vrot.slane %v4084_v17, 5 }
 0x12b   : > { %7461 = vst [vmem:[#allocation10_spill] sm:$0xff] %v7072_v45  ;;  %v7081_v24 = vadd.f32 %v5821_v34, %v7006_v22  ;;  %v4091_v12 = vrot.slane %v4089_v47, 4  ;;  %v4072_v48 = vrot.slane %v4071_v1, 4  ;;  %v4081_v60 = vor.u32 %v4080_v33, %v4076_v11  ;;  %v5499_v22 = vld [vmem:[%s6266_s9 + $0x160] sm:$0xf] }
 0x12c   : > { %v7077_v39 = vpop.f32.mrf.mxu0  ;;  %v2097_v45 = vpop.f32.mrf.mxu1  ;;  %v4094_v0 = vrot.slane %v4092_v44, 5  ;;  %v4098_v13 = vshll.u32 %v5497_v8, 16  ;;  %v4067_v62 = vsel %vm6284_vm4, %v4062_v29, %v4066_v59  ;;  %v4102_v27 = vshrl.u32 %v5497_v8, 16  ;;  %v5500_v59 = vld [vmem:[%s6266_s9 + $0x164] sm:$0x1] }
 0x12d   : > { %7462 = vst [vmem:[#allocation11_spill] sm:$0xff] %v7081_v24  ;;  %v7088_v28 = vadd.f32 %v2097_v45, %v7016_v52  ;;  %v4108_v19 = vshll.u32 %v5498_v61, 16  ;;  %v5532_v5 = vcombine.low %v4057_v38, %v4067_v62  ;;  %v4077_v17 = vsel %vm6284_vm4, %v4072_v48, %v4076_v11 }
 0x12e   : > { %v7083_v55 = vpop.f32.mrf.mxu0  ;;  %v4082_v47 = vrot.slane %v4081_v60, 4  ;;  %v5822_v1 = vpop.f32.mrf.mxu1  ;;  %v4095_v34 = vor.u32 %v4094_v0, %v4091_v12  ;;  %v4100_v24 = vrot.slane %v4098_v13, 5  ;;  %v4104_v35 = vrot.slane %v4102_v27, 4 }
 0x12f   : > { %v7094_v44 = vadd.f32 %v5822_v1, %v7025_v6  ;;  %v4110_v29 = vrot.slane %v4108_v19, 5  ;;  %5987 = vmatprep.mubr.msk.bf16.mxu1 %vm410_vm1, %v5532_v5  ;;  %v4112_v38 = vshrl.u32 %v5498_v61, 16  ;;  %v4118_v11 = vshll.u32 %v5499_v22, 16 }
 0x130   : > { %v5760_v33 = vpop.f32.mrf.mxu0  ;;  %v4087_v52 = vsel %vm6284_vm4, %v4082_v47, %v4086_v2  ;;  %v2100_v45 = vpop.f32.mrf.mxu1  ;;  %v4096_v8 = vrot.slane %v4095_v34, 4  ;;  %v4105_v6 = vor.u32 %v4104_v35, %v4100_v24  ;;  %v4122_v12 = vshrl.u32 %v5499_v22, 16 }
 0x131   : > { %v5533_v60 = vcombine.low %v4077_v17, %v4087_v52  ;;  %v7101_v0 = vadd.f32 %v2100_v45, %v7035_v23  ;;  %v4114_v13 = vrot.slane %v4112_v38, 4  ;;  %v4120_v27 = vrot.slane %v4118_v11, 5 }
 0x132   : > { %v714_v48 = vpop.f32.mrf.mxu0  ;;  %v5825_v62 = vpop.f32.mrf.mxu1  ;;  %v4128_v19 = vshll.u32 %v5500_v59, 16  ;;  %v4101_v2 = vsel %vm6284_vm4, %v4096_v8, %v4100_v24  ;;  %v4106_v5 = vrot.slane %v4105_v6, 4  ;;  %v4124_v17 = vrot.slane %v4122_v12, 4 }
 0x133   : > { %5988 = vmatmul.mubr.msk.bf16.gmra.mxu1 %vm410_vm1, %v5533_v60  ;;  %v7107_v61 = vadd.f32 %v5825_v62, %v7041_v41  ;;  %v4115_v47 = vor.u32 %v4114_v13, %v4110_v29 }
 0x134   : > { %v5763_v1 = vpop.f32.mrf.mxu0  ;;  %v2113_v23 = vpop.f32.mrf.mxu1  ;;  %v4111_v35 = vsel %vm6284_vm4, %v4106_v5, %v4110_v29  ;;  %v4125_v22 = vor.u32 %v4124_v17, %v4120_v27  ;;  %v4130_v52 = vrot.slane %v4128_v19, 5 }
 0x135   : > { %v7112_v59 = vadd.f32 %v2113_v23, %v7051_v25  ;;  %v4116_v45 = vrot.slane %v4115_v47, 4  ;;  %v5534_v38 = vcombine.low %v4101_v2, %v4111_v35 }
 0x136   : > { %v727_v34 = vpop.f32.mrf.mxu0  ;;  %v5826_v11 = vpop.f32.mrf.mxu1  ;;  %v4126_v8 = vrot.slane %v4125_v22, 4 }
 0x137   : > { %v7115_v41 = vadd.f32 %v5826_v11, %v7062_v57  ;;  %5991 = vmatprep.mubr.msk.bf16.mxu1 %vm410_vm1, %v5534_v38  ;;  %v4121_v60 = vsel %vm6284_vm4, %v4116_v45, %v4120_v27 }
 0x138   : > { %v5764_v24 = vpop.f32.mrf.mxu0  ;;  %v2116_v6 = vpop.f32.mrf.mxu1  ;;  %v4131_v12 = vsel %vm6284_vm4, %v4126_v8, %v4130_v52 }
 0x139   : > { %v7123_v25 = vadd.f32 %v2116_v6, %v7068_v26  ;;  %v5535_v13 = vcombine.low %v4121_v60, %v4131_v12 }
 0x13a   : > { %v730_v29 = vpop.f32.mrf.mxu0  ;;  %v5829_v62 = vpop.f32.mrf.mxu1 }
 0x13b   : > { %v7126_v2 = vadd.f32 %v5829_v62, %v7077_v39  ;;  %5992 = vmatmul.mubr.msk.bf16.gmra.mxu1 %vm410_vm1, %v5535_v13 }
 0x13c   : > { %v5767_v19 = vpop.f32.mrf.mxu0  ;;  %v2129_v57 = vpop.f32.mrf.mxu1 }
 0x13d   : > { %v7130_v27 = vadd.f32 %v2129_v57, %v7083_v55 }
 0x13e   : > { %v743_v5 = vpop.f32.mrf.mxu0  ;;  %v5830_v17 = vpop.f32.mrf.mxu1 }
 0x13f   : > { %v7132_v36 = vadd.f32 %v5830_v17, %v5760_v33 }
 0x140   : > { %v5768_v47 = vpop.f32.mrf.mxu0  ;;  %v2132_v23 = vpop.f32.mrf.mxu1 }
 0x141   : > { %v7134_v35 = vadd.f32 %v2132_v23, %v714_v48 }
 0x142   : > { %v746_v26 = vpop.f32.mrf.mxu0  ;;  %v5833_v22 = vpop.f32.mrf.mxu1 }
 0x143   : > { %v7136_v45 = vadd.f32 %v5833_v22, %v5763_v1 }
 0x144   : > { %v5771_v52 = vpop.f32.mrf.mxu0  ;;  %v2145_v39 = vpop.f32.mrf.mxu1 }
 0x145   : > { %v7138_v11 = vadd.f32 %v2145_v39, %v727_v34 }
 0x146   : > { %v759_v38 = vpop.f32.mrf.mxu0  ;;  %v5834_v8 = vpop.f32.mrf.mxu1 }
 0x147   : > { %7463 = vst [vmem:[#allocation12_spill] sm:$0xff] %v7138_v11  ;;  %v7140_v55 = vadd.f32 %v5834_v8, %v5764_v24 }
 0x148   : > { %v5772_v60 = vpop.f32.mrf.mxu0  ;;  %v2148_v6 = vpop.f32.mrf.mxu1 }
 0x149   : > { %7464 = vst [vmem:[#allocation13_spill] sm:$0xff] %v7140_v55  ;;  %v7142_v33 = vadd.f32 %v2148_v6, %v730_v29 }
 0x14a   : > { %v762_v12 = vpop.f32.mrf.mxu0  ;;  %v5837_v13 = vpop.f32.mrf.mxu1 }
 0x14b   : > { %7465 = vst [vmem:[#allocation14_spill] sm:$0xff] %v7142_v33  ;;  %v7144_v48 = vadd.f32 %v5837_v13, %v5767_v19 }
 0x14c   : > { %v5775_v62 = vpop.f32.mrf.mxu0  ;;  %v2161_v57 = vpop.f32.mrf.mxu1 }
 0x14d   : > { %7466 = vst [vmem:[#allocation15_spill] sm:$0xff] %v7144_v48  ;;  %v7146_v1 = vadd.f32 %v2161_v57, %v743_v5 }
 0x14e   : > { %v775_v17 = vpop.f32.mrf.mxu0  ;;  %v5838_v23 = vpop.f32.mrf.mxu1 }
 0x14f   : > { %7467 = vst [vmem:[#allocation16_spill] sm:$0xff] %v7146_v1  ;;  %v7148_v34 = vadd.f32 %v5838_v23, %v5768_v47 }
 0x150   : > { %v5776_v22 = vpop.f32.mrf.mxu0  ;;  %v2164_v39 = vpop.f32.mrf.mxu1 }
 0x151   : > { %7468 = vst [vmem:[#allocation17_spill] sm:$0xff] %v7148_v34  ;;  %v7150_v24 = vadd.f32 %v2164_v39, %v746_v26 }
 0x152   : > { %v778_v11 = vpop.f32.mrf.mxu0  ;;  %v5841_v8 = vpop.f32.mrf.mxu1 }
 0x153   : > { %7469 = vst [vmem:[#allocation18_spill] sm:$0xff] %v7150_v24  ;;  %v7152_v29 = vadd.f32 %v5841_v8, %v5771_v52 }
 0x154   : > { %v5779_v55 = vpop.f32.mrf.mxu0  ;;  %v2177_v6 = vpop.f32.mrf.mxu1 }
 0x155   : > { %7470 = vst [vmem:[#allocation19_spill] sm:$0xff] %v7152_v29  ;;  %v7154_v19 = vadd.f32 %v2177_v6, %v759_v38 }
 0x156   : > { %v791_v33 = vpop.f32.mrf.mxu0  ;;  %v5842_v13 = vpop.f32.mrf.mxu1 }
 0x157   : > { %7471 = vst [vmem:[#allocation20_spill] sm:$0xff] %v7154_v19  ;;  %v7156_v5 = vadd.f32 %v5842_v13, %v5772_v60 }
 0x158   : > { %v5780_v48 = vpop.f32.mrf.mxu0  ;;  %v2180_v57 = vpop.f32.mrf.mxu1 }
 0x159   : > { %7472 = vst [vmem:[#allocation21_spill] sm:$0xff] %v7156_v5  ;;  %v7158_v47 = vadd.f32 %v2180_v57, %v762_v12 }
 0x15a   : > { %v794_v1 = vpop.f32.mrf.mxu0  ;;  %v5845_v23 = vpop.f32.mrf.mxu1 }
 0x15b   : > { %v7160_v26 = vadd.f32 %v5845_v23, %v5775_v62 }
 0x15c   : > { %v5783_v34 = vpop.f32.mrf.mxu0  ;;  %v2193_v39 = vpop.f32.mrf.mxu1 }
 0x15d   : > { %7473 = vst [vmem:[#allocation22_spill] sm:$0xff] %v7160_v26  ;;  %v7162_v52 = vadd.f32 %v2193_v39, %v775_v17 }
 0x15e   : > { %v807_v24 = vpop.f32.mrf.mxu0  ;;  %v5846_v8 = vpop.f32.mrf.mxu1 }
 0x15f   : > { %7474 = vst [vmem:[#allocation23_spill] sm:$0xff] %v7162_v52  ;;  %v7164_v38 = vadd.f32 %v5846_v8, %v5776_v22 }
 0x160   : > { %v5784_v29 = vpop.f32.mrf.mxu0  ;;  %v2196_v6 = vpop.f32.mrf.mxu1 }
 0x161   : > { %7475 = vst [vmem:[#allocation24_spill] sm:$0xff] %v7164_v38  ;;  %v7166_v60 = vadd.f32 %v2196_v6, %v778_v11 }
 0x162   : > { %v810_v19 = vpop.f32.mrf.mxu0  ;;  %v5849_v13 = vpop.f32.mrf.mxu1 }
 0x163   : > { %7476 = vst [vmem:[#allocation25_spill] sm:$0xff] %v7166_v60  ;;  %v7168_v12 = vadd.f32 %v5849_v13, %v5779_v55 }
 0x164   : > { %v5859_v5 = vpop.f32.mrf.mxu0  ;;  %v2209_v57 = vpop.f32.mrf.mxu1 }
 0x165   : > { %7477 = vst [vmem:[#allocation26_spill] sm:$0xff] %v7168_v12  ;;  %v7170_v23 = vadd.f32 %v2209_v57, %v791_v33 }
 0x166   : > { %v2824_v62 = vpop.f32.mrf.mxu0  ;;  %v5850_v26 = vpop.f32.mrf.mxu1 }
 0x167   : > { %7478 = vst [vmem:[#allocation27_spill] sm:$0xff] %v7170_v23  ;;  %v7172_v39 = vadd.f32 %v5850_v26, %v5780_v48 }
 0x168   : > { %v5860_v17 = vpop.f32.mrf.mxu0  ;;  %v2212_v22 = vpop.f32.mrf.mxu1 }
 0x169   : > { %v7174_v38 = vadd.f32 %v2212_v22, %v794_v1  ;;  %v3165_v1 = vadd.f32 %v5859_v5, %v6782_v15 }
 0x16a   : > { %v2827_v8 = vpop.f32.mrf.mxu0  ;;  %v5853_v11 = vpop.f32.mrf.mxu1 }
 0x16b   : > { %v7176_v60 = vadd.f32 %v5853_v11, %v5783_v34  ;;  %v7191_v34 = vld [vmem:[%s7451_s2] ss:$0 sm:$0xff]  ;;  %v3163_v11 = vadd.f32 %v2824_v62, %v6791_v56  ;;  %v3164_v5 = vadd.f32 %v2827_v8, %v6808_v51 }
 0x16c   : > { %v5863_v6 = vpop.f32.mrf.mxu0  ;;  %v2225_v55 = vpop.f32.mrf.mxu1 }
 0x16d   : > { %7479 = vst [vmem:[#allocation28_spill] sm:$0xff] %v7176_v60  ;;  %v7178_v12 = vadd.f32 %v2225_v55, %v807_v24 }
 0x16e   : > { %v2840_v13 = vpop.f32.mrf.mxu0  ;;  %v5854_v33 = vpop.f32.mrf.mxu1 }
 0x16f   : > { %7480 = vst [vmem:[#allocation29_spill] sm:$0xff] %v7178_v12  ;;  %v7181_v23 = vadd.f32 %v5854_v33, %v5784_v29 }
 0x170   : > { %v5864_v57 = vpop.f32.mrf.mxu0  ;;  %v2228_v52 = vpop.f32.mrf.mxu1 }
 0x171   : > { %7481 = vst [vmem:[#allocation30_spill] sm:$0xff] %v7181_v23  ;;  %v7186_v26 = vadd.f32 %v2228_v52, %v810_v19  ;;  %v3166_v23 = vadd.f32 %v5860_v17, %v6800_v4  ;;  %v3169_v4 = vadd.f32 %v5863_v6, %v6824_v10 }
 0x172   : > { %v2843_v48 = vpop.f32.mrf.mxu0  ;;  %v5929_v22 = vpop.f32.mrf.mxu1 }
 0x173   : > { %v4716_v55 = vadd.f32 %v5929_v22, %v3165_v1 }
 0x174   : > { %v5867_v24 = vpop.f32.mrf.mxu0  ;;  %v4375_v29 = vpop.f32.mrf.mxu1 }
 0x175   : > { %v4927_v12 = vadd.f32 %v7191_v34, %v4716_v55  ;;  %v4714_v60 = vadd.f32 %v4375_v29, %v3163_v11  ;;  %v3167_v11 = vadd.f32 %v2840_v13, %v6834_v37  ;;  %v3170_v29 = vadd.f32 %v5864_v57, %v6843_v40 }
 0x176   : > { %v2856_v33 = vpop.f32.mrf.mxu0  ;;  %v5930_v15 = vpop.f32.mrf.mxu1 }
 0x177   : > { %4995 = vst [vmem:[%s7197_s20 + $0x10] sm:$0xff] %v4927_v12  ;;  %v4925_v56 = vadd.f32 %v7191_v34, %v4714_v60  ;;  %v4717_v52 = vadd.f32 %v5930_v15, %v3166_v23 }
 0x178   : > { %v5868_v19 = vpop.f32.mrf.mxu0  ;;  %v4378_v62 = vpop.f32.mrf.mxu1 }
 0x179   : > { %4993 = vst [vmem:[%s7197_s20] sm:$0xff] %v4925_v56  ;;  %v4928_v17 = vadd.f32 %v7191_v34, %v4717_v52  ;;  %v4715_v22 = vadd.f32 %v4378_v62, %v3164_v5  ;;  %v3168_v56 = vadd.f32 %v2843_v48, %v6852_v53 }
 0x17a   : > { %v2859_v1 = vpop.f32.mrf.mxu0  ;;  %v5933_v51 = vpop.f32.mrf.mxu1 }
 0x17b   : > { %4996 = vst [vmem:[%s7197_s20 + $0x18] sm:$0xff] %v4928_v17  ;;  %v4926_v12 = vadd.f32 %v7191_v34, %v4715_v22  ;;  %v4720_v55 = vadd.f32 %v5933_v51, %v3169_v4  ;;  %v3173_v4 = vadd.f32 %v5867_v24, %v6862_v9  ;;  %v3171_v51 = vadd.f32 %v2856_v33, %v6872_v16 }
 0x17c   : > { %v5871_v8 = vpop.f32.mrf.mxu0  ;;  %v4391_v60 = vpop.f32.mrf.mxu1 }
 0x17d   : > { %4994 = vst [vmem:[%s7197_s20 + $0x8] sm:$0xff] %v4926_v12  ;;  %v4931_v10 = vadd.f32 %v7191_v34, %v4720_v55  ;;  %v4718_v6 = vadd.f32 %v4391_v60, %v3167_v11  ;;  %v3174_v55 = vadd.f32 %v5868_v19, %v6881_v32 }
 0x17e   : > { %v2872_v23 = vpop.f32.mrf.mxu0  ;;  %v5934_v15 = vpop.f32.mrf.mxu1 }
 0x17f   : > { %4999 = vst [vmem:[%s7197_s20 + $0x30] sm:$0xff] %v4931_v10  ;;  %v4929_v37 = vadd.f32 %v7191_v34, %v4718_v6  ;;  %v4721_v13 = vadd.f32 %v5934_v15, %v3170_v29  ;;  %v3172_v10 = vadd.f32 %v2859_v1, %v6888_v49 }
 0x180   : > { %v5872_v5 = vpop.f32.mrf.mxu0  ;;  %v4394_v52 = vpop.f32.mrf.mxu1 }
 0x181   : > { %4997 = vst [vmem:[%s7197_s20 + $0x20] sm:$0xff] %v4929_v37  ;;  %v4932_v40 = vadd.f32 %v7191_v34, %v4721_v13  ;;  %v4719_v57 = vadd.f32 %v4394_v52, %v3168_v56  ;;  %v3177_v56 = vadd.f32 %v5871_v8, %v6901_v63  ;;  %v3175_v52 = vadd.f32 %v2872_v23, %v6909_v3 }
 0x182   : > { %v2875_v62 = vpop.f32.mrf.mxu0  ;;  %v5937_v17 = vpop.f32.mrf.mxu1 }
 0x183   : > { %5000 = vst [vmem:[%s7197_s20 + $0x38] sm:$0xff] %v4932_v40  ;;  %v4930_v53 = vadd.f32 %v7191_v34, %v4719_v57  ;;  %v4724_v48 = vadd.f32 %v5937_v17, %v3173_v4  ;;  %v3178_v57 = vadd.f32 %v5872_v5, %v6917_v30 }
 0x184   : > { %v5875_v22 = vpop.f32.mrf.mxu0  ;;  %v4407_v11 = vpop.f32.mrf.mxu1 }
 0x185   : > { %4998 = vst [vmem:[%s7197_s20 + $0x28] sm:$0xff] %v4930_v53  ;;  %v4935_v9 = vadd.f32 %v7191_v34, %v4724_v48  ;;  %v4722_v24 = vadd.f32 %v4407_v11, %v3171_v51  ;;  %v3176_v53 = vadd.f32 %v2875_v62, %v6927_v50 }
 0x186   : > { %v2888_v12 = vpop.f32.mrf.mxu0  ;;  %v5938_v60 = vpop.f32.mrf.mxu1 }
 0x187   : > { %5003 = vst [vmem:[%s7197_s20 + $0x50] sm:$0xff] %v4935_v9  ;;  %v4933_v16 = vadd.f32 %v7191_v34, %v4722_v24  ;;  %v4725_v33 = vadd.f32 %v5938_v60, %v3174_v55  ;;  %v3181_v55 = vadd.f32 %v5875_v22, %v6936_v46  ;;  %v3179_v60 = vadd.f32 %v2888_v12, %v6946_v18 }
 0x188   : > { %v5876_v29 = vpop.f32.mrf.mxu0  ;;  %v4410_v6 = vpop.f32.mrf.mxu1 }
 0x189   : > { %5001 = vst [vmem:[%s7197_s20 + $0x40] sm:$0xff] %v4933_v16  ;;  %v4936_v32 = vadd.f32 %v7191_v34, %v4725_v33  ;;  %v4723_v19 = vadd.f32 %v4410_v6, %v3172_v10  ;;  %v3182_v33 = vadd.f32 %v5876_v29, %v6956_v14 }
 0x18a   : > { %v2891_v15 = vpop.f32.mrf.mxu0  ;;  %v5941_v37 = vpop.f32.mrf.mxu1 }
 0x18b   : > { %5004 = vst [vmem:[%s7197_s20 + $0x58] sm:$0xff] %v4936_v32  ;;  %v4934_v49 = vadd.f32 %v7191_v34, %v4723_v19  ;;  %v4728_v1 = vadd.f32 %v5941_v37, %v3177_v56  ;;  %v3180_v32 = vadd.f32 %v2891_v15, %v6965_v54 }
 0x18c   : > { %v5879_v13 = vpop.f32.mrf.mxu0  ;;  %v4423_v4 = vpop.f32.mrf.mxu1 }
 0x18d   : > { %5002 = vst [vmem:[%s7197_s20 + $0x48] sm:$0xff] %v4934_v49  ;;  %v4939_v63 = vadd.f32 %v7191_v34, %v4728_v1  ;;  %v4726_v8 = vadd.f32 %v4423_v4, %v3175_v52  ;;  %v3185_v52 = vadd.f32 %v5879_v13, %v6973_v42 }
 0x18e   : > { %v2904_v40 = vpop.f32.mrf.mxu0  ;;  %v5942_v17 = vpop.f32.mrf.mxu1 }
 0x18f   : > { %5007 = vst [vmem:[%s7197_s20 + $0x70] sm:$0xff] %v4939_v63  ;;  %v4937_v3 = vadd.f32 %v7191_v34, %v4726_v8  ;;  %v4729_v23 = vadd.f32 %v5942_v17, %v3178_v57  ;;  %v3183_v4 = vadd.f32 %v2904_v40, %v6985_v21 }
 0x190   : > { %v5880_v51 = vpop.f32.mrf.mxu0  ;;  %v4426_v48 = vpop.f32.mrf.mxu1 }
 0x191   : > { %5005 = vst [vmem:[%s7197_s20 + $0x60] sm:$0xff] %v4937_v3  ;;  %v4940_v30 = vadd.f32 %v7191_v34, %v4729_v23  ;;  %v4727_v5 = vadd.f32 %v4426_v48, %v3176_v53  ;;  %v3186_v8 = vadd.f32 %v5880_v51, %v6992_v31 }
 0x192   : > { %v2907_v11 = vpop.f32.mrf.mxu0  ;;  %v5945_v9 = vpop.f32.mrf.mxu1 }
 0x193   : > { %5008 = vst [vmem:[%s7197_s20 + $0x78] sm:$0xff] %v4940_v30  ;;  %v4938_v50 = vadd.f32 %v7191_v34, %v4727_v5  ;;  %v4732_v62 = vadd.f32 %v5945_v9, %v3181_v55  ;;  %v3184_v3 = vadd.f32 %v2907_v11, %v7001_v7 }
 0x194   : > { %v5883_v24 = vpop.f32.mrf.mxu0  ;;  %v4439_v10 = vpop.f32.mrf.mxu1 }
 0x195   : > { %5006 = vst [vmem:[%s7197_s20 + $0x68] sm:$0xff] %v4938_v50  ;;  %v4943_v46 = vadd.f32 %v7191_v34, %v4732_v62  ;;  %v4730_v22 = vadd.f32 %v4439_v10, %v3179_v60  ;;  %v3189_v55 = vadd.f32 %v5883_v24, %v7011_v43 }
 0x196   : > { %v2920_v16 = vpop.f32.mrf.mxu0  ;;  %v5946_v6 = vpop.f32.mrf.mxu1 }
 0x197   : > { %5011 = vst [vmem:[%s7197_s20 + $0x90] sm:$0xff] %v4943_v46  ;;  %v4941_v18 = vadd.f32 %v7191_v34, %v4730_v22  ;;  %v4733_v12 = vadd.f32 %v5946_v6, %v3182_v33  ;;  %v3187_v9 = vadd.f32 %v2920_v16, %v7020_v58  ;;  %v7482_v46 = vld [vmem:[#allocation6_spill] sm:$0xff] }
 0x198   : > { %v5884_v56 = vpop.f32.mrf.mxu0  ;;  %v4442_v19 = vpop.f32.mrf.mxu1 }
 0x199   : > { %5009 = vst [vmem:[%s7197_s20 + $0x80] sm:$0xff] %v4941_v18  ;;  %v4944_v14 = vadd.f32 %v7191_v34, %v4733_v12  ;;  %v4731_v29 = vadd.f32 %v4442_v19, %v3180_v32  ;;  %v3190_v62 = vadd.f32 %v5884_v56, %v7030_v20  ;;  %v7483_v18 = vld [vmem:[#allocation7_spill] sm:$0xff] }
 0x19a   : > { %v2923_v37 = vpop.f32.mrf.mxu0  ;;  %v5949_v49 = vpop.f32.mrf.mxu1 }
 0x19b   : > { %5012 = vst [vmem:[%s7197_s20 + $0x98] sm:$0xff] %v4944_v14  ;;  %v4942_v54 = vadd.f32 %v7191_v34, %v4731_v29  ;;  %v4736_v15 = vadd.f32 %v5949_v49, %v3185_v52  ;;  %v3188_v22 = vadd.f32 %v2923_v37, %v7482_v46  ;;  %v7484_v14 = vld [vmem:[#allocation8_spill] sm:$0xff] }
 0x19c   : > { %v5887_v1 = vpop.f32.mrf.mxu0  ;;  %v4455_v57 = vpop.f32.mrf.mxu1 }
 0x19d   : > { %5010 = vst [vmem:[%s7197_s20 + $0x88] sm:$0xff] %v4942_v54  ;;  %v4947_v42 = vadd.f32 %v7191_v34, %v4736_v15  ;;  %v4734_v13 = vadd.f32 %v4455_v57, %v3183_v4  ;;  %v3193_v12 = vadd.f32 %v5887_v1, %v7483_v18  ;;  %v7485_v15 = vld [vmem:[#allocation9_spill] sm:$0xff] }
 0x19e   : > { %v2936_v63 = vpop.f32.mrf.mxu0  ;;  %v5950_v17 = vpop.f32.mrf.mxu1 }
 0x19f   : > { %5015 = vst [vmem:[%s7197_s20 + $0xb0] sm:$0xff] %v4947_v42  ;;  %v4945_v21 = vadd.f32 %v7191_v34, %v4734_v13  ;;  %v4737_v40 = vadd.f32 %v5950_v17, %v3186_v8  ;;  %v3191_v29 = vadd.f32 %v2936_v63, %v7484_v14  ;;  %v7486_v17 = vld [vmem:[#allocation10_spill] sm:$0xff] }
 0x1a0   : > { %v5888_v53 = vpop.f32.mrf.mxu0  ;;  %v4458_v23 = vpop.f32.mrf.mxu1 }
 0x1a1   : > { %5013 = vst [vmem:[%s7197_s20 + $0xa0] sm:$0xff] %v4945_v21  ;;  %v4948_v31 = vadd.f32 %v7191_v34, %v4737_v40  ;;  %v4735_v51 = vadd.f32 %v4458_v23, %v3184_v3  ;;  %v3194_v57 = vadd.f32 %v5888_v53, %v7485_v15 }
 0x1a2   : > { %v2939_v48 = vpop.f32.mrf.mxu0  ;;  %v5953_v30 = vpop.f32.mrf.mxu1 }
 0x1a3   : > { %5016 = vst [vmem:[%s7197_s20 + $0xb8] sm:$0xff] %v4948_v31  ;;  %v4946_v7 = vadd.f32 %v7191_v34, %v4735_v51  ;;  %v4740_v11 = vadd.f32 %v5953_v30, %v3189_v55  ;;  %v3192_v3 = vadd.f32 %v2939_v48, %v7486_v17  ;;  %v7487_v55 = vld [vmem:[#allocation11_spill] sm:$0xff] }
 0x1a4   : > { %v5891_v5 = vpop.f32.mrf.mxu0  ;;  %v4471_v60 = vpop.f32.mrf.mxu1 }
 0x1a5   : > { %5014 = vst [vmem:[%s7197_s20 + $0xa8] sm:$0xff] %v4946_v7  ;;  %v4951_v43 = vadd.f32 %v7191_v34, %v4740_v11  ;;  %v4738_v24 = vadd.f32 %v4471_v60, %v3187_v9  ;;  %v3197_v31 = vadd.f32 %v5891_v5, %v7487_v55 }
 0x1a6   : > { %v2952_v50 = vpop.f32.mrf.mxu0  ;;  %v5954_v10 = vpop.f32.mrf.mxu1 }
 0x1a7   : > { %5019 = vst [vmem:[%s7197_s20 + $0xd0] sm:$0xff] %v4951_v43  ;;  %v4949_v58 = vadd.f32 %v7191_v34, %v4738_v24  ;;  %v4741_v16 = vadd.f32 %v5954_v10, %v3190_v62  ;;  %v3195_v7 = vadd.f32 %v2952_v50, %v7088_v28 }
 0x1a8   : > { %v5892_v33 = vpop.f32.mrf.mxu0  ;;  %v4474_v6 = vpop.f32.mrf.mxu1 }
 0x1a9   : > { %5017 = vst [vmem:[%s7197_s20 + $0xc0] sm:$0xff] %v4949_v58  ;;  %v4952_v20 = vadd.f32 %v7191_v34, %v4741_v16  ;;  %v4739_v56 = vadd.f32 %v4474_v6, %v3188_v22  ;;  %v3198_v43 = vadd.f32 %v5892_v33, %v7094_v44 }
 0x1aa   : > { %v2955_v32 = vpop.f32.mrf.mxu0  ;;  %v5957_v19 = vpop.f32.mrf.mxu1 }
 0x1ab   : > { %5020 = vst [vmem:[%s7197_s20 + $0xd8] sm:$0xff] %v4952_v20  ;;  %v4950_v37 = vadd.f32 %v7191_v34, %v4739_v56  ;;  %v4744_v49 = vadd.f32 %v5957_v19, %v3193_v12  ;;  %v3196_v22 = vadd.f32 %v2955_v32, %v7101_v0 }
 0x1ac   : > { %v5895_v52 = vpop.f32.mrf.mxu0  ;;  %v4487_v4 = vpop.f32.mrf.mxu1 }
 0x1ad   : > { %5018 = vst [vmem:[%s7197_s20 + $0xc8] sm:$0xff] %v4950_v37  ;;  %v4955_v1 = vadd.f32 %v7191_v34, %v4744_v49  ;;  %v4742_v8 = vadd.f32 %v4487_v4, %v3191_v29  ;;  %v3201_v18 = vadd.f32 %v5895_v52, %v7107_v61 }
 0x1ae   : > { %v2968_v54 = vpop.f32.mrf.mxu0  ;;  %v5958_v42 = vpop.f32.mrf.mxu1 }
 0x1af   : > { %5023 = vst [vmem:[%s7197_s20 + $0xf0] sm:$0xff] %v4955_v1  ;;  %v4953_v63 = vadd.f32 %v7191_v34, %v4742_v8  ;;  %v4745_v21 = vadd.f32 %v5958_v42, %v3194_v57  ;;  %v3199_v32 = vadd.f32 %v2968_v54, %v7112_v59 }
 0x1b0   : > { %v5896_v13 = vpop.f32.mrf.mxu0  ;;  %v4490_v40 = vpop.f32.mrf.mxu1 }
 0x1b1   : > { %5021 = vst [vmem:[%s7197_s20 + $0xe0] sm:$0xff] %v4953_v63  ;;  %v4956_v53 = vadd.f32 %v7191_v34, %v4745_v21  ;;  %v4743_v51 = vadd.f32 %v4490_v40, %v3192_v3  ;;  %v3202_v29 = vadd.f32 %v5896_v13, %v7115_v41 }
 0x1b2   : > { %v2971_v23 = vpop.f32.mrf.mxu0  ;;  %v5961_v30 = vpop.f32.mrf.mxu1 }
 0x1b3   : > { %5024 = vst [vmem:[%s7197_s20 + $0xf8] sm:$0xff] %v4956_v53  ;;  %v4954_v48 = vadd.f32 %v7191_v34, %v4743_v51  ;;  %v4748_v11 = vadd.f32 %v5961_v30, %v3197_v31  ;;  %v3200_v4 = vadd.f32 %v2971_v23, %v7123_v25 }
 0x1b4   : > { %v5899_v9 = vpop.f32.mrf.mxu0  ;;  %v4503_v60 = vpop.f32.mrf.mxu1 }
 0x1b5   : > { %5022 = vst [vmem:[%s7197_s20 + $0xe8] sm:$0xff] %v4954_v48  ;;  %v4959_v5 = vadd.f32 %v7191_v34, %v4748_v11  ;;  %v4746_v24 = vadd.f32 %v4503_v60, %v3195_v7  ;;  %v3205_v41 = vadd.f32 %v5899_v9, %v7126_v2 }
 0x1b6   : > { %v2984_v62 = vpop.f32.mrf.mxu0  ;;  %v5962_v10 = vpop.f32.mrf.mxu1 }
 0x1b7   : > { %5027 = vst [vmem:[%s7197_s20 + $0x110] sm:$0xff] %v4959_v5  ;;  %v4957_v28 = vadd.f32 %v7191_v34, %v4746_v24  ;;  %v4749_v50 = vadd.f32 %v5962_v10, %v3198_v43  ;;  %v3203_v25 = vadd.f32 %v2984_v62, %v7130_v27  ;;  %v7488_v43 = vld [vmem:[#allocation12_spill] sm:$0xff] }
 0x1b8   : > { %v5900_v46 = vpop.f32.mrf.mxu0  ;;  %v4506_v58 = vpop.f32.mrf.mxu1 }
 0x1b9   : > { %5025 = vst [vmem:[%s7197_s20 + $0x100] sm:$0xff] %v4957_v28  ;;  %v4960_v6 = vadd.f32 %v7191_v34, %v4749_v50  ;;  %v4747_v44 = vadd.f32 %v4506_v58, %v3196_v22  ;;  %v3206_v40 = vadd.f32 %v5900_v46, %v7132_v36  ;;  %v7489_v22 = vld [vmem:[#allocation13_spill] sm:$0xff] }
 0x1ba   : > { %v2987_v16 = vpop.f32.mrf.mxu0 }
 0x1bb   : > { %5028 = vst [vmem:[%s7197_s20 + $0x118] sm:$0xff] %v4960_v6  ;;  %v4958_v12 = vadd.f32 %v7191_v34, %v4747_v44  ;;  %v3204_v53 = vadd.f32 %v2987_v16, %v7134_v35  ;;  %v7490_v6 = vld [vmem:[#allocation14_spill] sm:$0xff] }
 0x1bc   : > { %v5903_v33 = vpop.f32.mrf.mxu0  ;;  %v5965_v20 = vpop.f32.mrf.mxu1 }
 0x1bd   : > { %5026 = vst [vmem:[%s7197_s20 + $0x108] sm:$0xff] %v4958_v12  ;;  %v4752_v56 = vadd.f32 %v5965_v20, %v3201_v18  ;;  %v3209_v11 = vadd.f32 %v5903_v33, %v7136_v45  ;;  %v7491_v20 = vld [vmem:[#allocation15_spill] sm:$0xff] }
 0x1be   : > { %v3000_v0 = vpop.f32.mrf.mxu0  ;;  %v4519_v19 = vpop.f32.mrf.mxu1 }
 0x1bf   : > { %v4963_v37 = vadd.f32 %v7191_v34, %v4752_v56  ;;  %v4750_v49 = vadd.f32 %v4519_v19, %v3199_v32  ;;  %v3207_v5 = vadd.f32 %v3000_v0, %v7488_v43 }
 0x1c0   : > { %v5904_v14 = vpop.f32.mrf.mxu0  ;;  %v5966_v61 = vpop.f32.mrf.mxu1 }
 0x1c1   : > { %5031 = vst [vmem:[%s7197_s20 + $0x130] sm:$0xff] %v4963_v37  ;;  %v4961_v15 = vadd.f32 %v7191_v34, %v4750_v49  ;;  %v4753_v59 = vadd.f32 %v5966_v61, %v3202_v29  ;;  %v3210_v28 = vadd.f32 %v5904_v14, %v7489_v22  ;;  %v7492_v29 = vld [vmem:[#allocation16_spill] sm:$0xff] }
 0x1c2   : > { %v3003_v52 = vpop.f32.mrf.mxu0  ;;  %v4522_v54 = vpop.f32.mrf.mxu1 }
 0x1c3   : > { %5029 = vst [vmem:[%s7197_s20 + $0x120] sm:$0xff] %v4961_v15  ;;  %v4964_v1 = vadd.f32 %v7191_v34, %v4753_v59  ;;  %v4751_v8 = vadd.f32 %v4522_v54, %v3200_v4  ;;  %v3208_v44 = vadd.f32 %v3003_v52, %v7490_v6  ;;  %v7493_v4 = vld [vmem:[#allocation17_spill] sm:$0xff] }
 0x1c4   : > { %v5907_v57 = vpop.f32.mrf.mxu0  ;;  %v5969_v17 = vpop.f32.mrf.mxu1 }
 0x1c5   : > { %5032 = vst [vmem:[%s7197_s20 + $0x138] sm:$0xff] %v4964_v1  ;;  %v4962_v13 = vadd.f32 %v7191_v34, %v4751_v8  ;;  %v4756_v3 = vadd.f32 %v5969_v17, %v3205_v41  ;;  %v3213_v0 = vadd.f32 %v5907_v57, %v7491_v20  ;;  %v7494_v8 = vld [vmem:[#allocation18_spill] sm:$0xff]  ;;  %v7501_v20 = vld [vmem:[#allocation25_spill] sm:$0xff] }
 0x1c6   : > { %v3016_v42 = vpop.f32.mrf.mxu0  ;;  %v4535_v21 = vpop.f32.mrf.mxu1 }
 0x1c7   : > { %5030 = vst [vmem:[%s7197_s20 + $0x128] sm:$0xff] %v4962_v13  ;;  %v4967_v23 = vadd.f32 %v7191_v34, %v4756_v3  ;;  %v4754_v55 = vadd.f32 %v4535_v21, %v3203_v25  ;;  %v3211_v37 = vadd.f32 %v3016_v42, %v7492_v29  ;;  %v7495_v21 = vld [vmem:[#allocation19_spill] sm:$0xff] }
 0x1c8   : > { %v5908_v63 = vpop.f32.mrf.mxu0  ;;  %v5970_v31 = vpop.f32.mrf.mxu1 }
 0x1c9   : > { %5035 = vst [vmem:[%s7197_s20 + $0x150] sm:$0xff] %v4967_v23  ;;  %v4965_v51 = vadd.f32 %v7191_v34, %v4754_v55  ;;  %v4757_v27 = vadd.f32 %v5970_v31, %v3206_v40  ;;  %v3214_v15 = vadd.f32 %v5908_v63, %v7493_v4  ;;  %v7496_v31 = vld [vmem:[#allocation20_spill] sm:$0xff] }
 0x1ca   : > { %v3019_v2 = vpop.f32.mrf.mxu0  ;;  %v4538_v9 = vpop.f32.mrf.mxu1 }
 0x1cb   : > { %5033 = vst [vmem:[%s7197_s20 + $0x140] sm:$0xff] %v4965_v51  ;;  %v4968_v7 = vadd.f32 %v7191_v34, %v4757_v27  ;;  %v4755_v48 = vadd.f32 %v4538_v9, %v3204_v53  ;;  %v3212_v41 = vadd.f32 %v3019_v2, %v7494_v8  ;;  %v7497_v9 = vld [vmem:[#allocation21_spill] sm:$0xff] }
 0x1cc   : > { %v5911_v30 = vpop.f32.mrf.mxu0 }
 0x1cd   : > { %5036 = vst [vmem:[%s7197_s20 + $0x158] sm:$0xff] %v4968_v7  ;;  %v4966_v60 = vadd.f32 %v7191_v34, %v4755_v48  ;;  %v3217_v40 = vadd.f32 %v5911_v30, %v7495_v21 }
 0x1ce   : > { %v3032_v36 = vpop.f32.mrf.mxu0  ;;  %v5973_v35 = vpop.f32.mrf.mxu1 }
 0x1cf   : > { %5034 = vst [vmem:[%s7197_s20 + $0x148] sm:$0xff] %v4966_v60  ;;  %v4760_v24 = vadd.f32 %v5973_v35, %v3209_v11  ;;  %v3215_v53 = vadd.f32 %v3032_v36, %v7496_v31 }
 0x1d0   : > { %v5912_v62 = vpop.f32.mrf.mxu0  ;;  %v4551_v46 = vpop.f32.mrf.mxu1 }
 0x1d1   : > { %v4971_v50 = vadd.f32 %v7191_v34, %v4760_v24  ;;  %v4758_v58 = vadd.f32 %v4551_v46, %v3207_v5  ;;  %v3218_v7 = vadd.f32 %v5912_v62, %v7497_v9  ;;  %v7498_v24 = vld [vmem:[#allocation22_spill] sm:$0xff] }
 0x1d2   : > { %v3035_v10 = vpop.f32.mrf.mxu0  ;;  %v5974_v16 = vpop.f32.mrf.mxu1 }
 0x1d3   : > { %5039 = vst [vmem:[%s7197_s20 + $0x170] sm:$0xff] %v4971_v50  ;;  %v4969_v33 = vadd.f32 %v7191_v34, %v4758_v58  ;;  %v4761_v18 = vadd.f32 %v5974_v16, %v3210_v28  ;;  %v3216_v30 = vadd.f32 %v3035_v10, %v7158_v47  ;;  %v7499_v50 = vld [vmem:[#allocation23_spill] sm:$0xff] }
 0x1d4   : > { %v5915_v45 = vpop.f32.mrf.mxu0  ;;  %v4554_v12 = vpop.f32.mrf.mxu1 }
 0x1d5   : > { %5037 = vst [vmem:[%s7197_s20 + $0x160] sm:$0xff] %v4969_v33  ;;  %v4972_v32 = vadd.f32 %v7191_v34, %v4761_v18  ;;  %v4759_v56 = vadd.f32 %v4554_v12, %v3208_v44  ;;  %v3221_v46 = vadd.f32 %v5915_v45, %v7498_v24  ;;  %v7500_v44 = vld [vmem:[#allocation24_spill] sm:$0xff] }
 0x1d6   : > { %v3048_v19 = vpop.f32.mrf.mxu0  ;;  %v5977_v14 = vpop.f32.mrf.mxu1 }
 0x1d7   : > { %5040 = vst [vmem:[%s7197_s20 + $0x178] sm:$0xff] %v4972_v32  ;;  %v4970_v49 = vadd.f32 %v7191_v34, %v4759_v56  ;;  %v4764_v61 = vadd.f32 %v5977_v14, %v3213_v0  ;;  %v3219_v58 = vadd.f32 %v3048_v19, %v7499_v50 }
 0x1d8   : > { %v4567_v52 = vpop.f32.mrf.mxu1  ;;  %v5916_v57 = vpop.f32.mrf.mxu0 }
 0x1d9   : > { %5038 = vst [vmem:[%s7197_s20 + $0x168] sm:$0xff] %v4970_v49  ;;  %v4975_v59 = vadd.f32 %v7191_v34, %v4764_v61  ;;  %v4762_v54 = vadd.f32 %v4567_v52, %v3211_v37  ;;  %v3222_v33 = vadd.f32 %v5916_v57, %v7500_v44  ;;  %v7502_v49 = vld [vmem:[#allocation26_spill] sm:$0xff] }
 0x1da   : > { %v5978_v1 = vpop.f32.mrf.mxu1  ;;  %v3051_v63 = vpop.f32.mrf.mxu0 }
 0x1db   : > { %5043 = vst [vmem:[%s7197_s20 + $0x190] sm:$0xff] %v4975_v59  ;;  %v4973_v42 = vadd.f32 %v7191_v34, %v4762_v54  ;;  %v4765_v13 = vadd.f32 %v5978_v1, %v3214_v15  ;;  %v3220_v0 = vadd.f32 %v3051_v63, %v7501_v20  ;;  %v7503_v59 = vld [vmem:[#allocation27_spill] sm:$0xff] }
 0x1dc   : > { %v4570_v17 = vpop.f32.mrf.mxu1  ;;  %v5919_v51 = vpop.f32.mrf.mxu0 }
 0x1dd   : > { %5041 = vst [vmem:[%s7197_s20 + $0x180] sm:$0xff] %v4973_v42  ;;  %v4976_v25 = vadd.f32 %v7191_v34, %v4765_v13  ;;  %v4763_v3 = vadd.f32 %v4570_v17, %v3212_v41  ;;  %v3225_v61 = vadd.f32 %v5919_v51, %v7502_v49 }
 0x1de   : > { %v3064_v36 = vpop.f32.mrf.mxu0 }
 0x1df   : > { %5044 = vst [vmem:[%s7197_s20 + $0x198] sm:$0xff] %v4976_v25  ;;  %v4974_v23 = vadd.f32 %v7191_v34, %v4763_v3  ;;  %v3223_v54 = vadd.f32 %v3064_v36, %v7503_v59 }
 0x1e0   : > { %v5981_v55 = vpop.f32.mrf.mxu1  ;;  %v5920_v16 = vpop.f32.mrf.mxu0 }
 0x1e1   : > { %5042 = vst [vmem:[%s7197_s20 + $0x188] sm:$0xff] %v4974_v23  ;;  %v4768_v2 = vadd.f32 %v5981_v55, %v3217_v40  ;;  %v3226_v8 = vadd.f32 %v5920_v16, %v7172_v39  ;;  %v7504_v39 = vld [vmem:[#allocation28_spill] sm:$0xff] }
 0x1e2   : > { %v4583_v27 = vpop.f32.mrf.mxu1  ;;  %v3067_v19 = vpop.f32.mrf.mxu0 }
 0x1e3   : > { %v4979_v48 = vadd.f32 %v7191_v34, %v4768_v2  ;;  %v4766_v11 = vadd.f32 %v4583_v27, %v3215_v53  ;;  %v3224_v25 = vadd.f32 %v3067_v19, %v7174_v38  ;;  %v7505_v2 = vld [vmem:[#allocation29_spill] sm:$0xff] }
 0x1e4   : > { %v5982_v60 = vpop.f32.mrf.mxu1  ;;  %v5923_v4 = vpop.f32.mrf.mxu0 }
 0x1e5   : > { %5047 = vst [vmem:[%s7197_s20 + $0x1b0] sm:$0xff] %v4979_v48  ;;  %v4977_v35 = vadd.f32 %v7191_v34, %v4766_v11  ;;  %v4769_v43 = vadd.f32 %v5982_v60, %v3218_v7  ;;  %v3229_v31 = vadd.f32 %v5923_v4, %v7504_v39  ;;  %v7506_v48 = vld [vmem:[#allocation30_spill] sm:$0xff] }
 0x1e6   : > { %v4586_v5 = vpop.f32.mrf.mxu1  ;;  %v3080_v42 = vpop.f32.mrf.mxu0 }
 0x1e7   : > { %5045 = vst [vmem:[%s7197_s20 + $0x1a0] sm:$0xff] %v4977_v35  ;;  %v4980_v62 = vadd.f32 %v7191_v34, %v4769_v43  ;;  %v4767_v22 = vadd.f32 %v4586_v5, %v3216_v30  ;;  %v3227_v51 = vadd.f32 %v3080_v42, %v7505_v2 }
 0x1e8   : > { %v5985_v28 = vpop.f32.mrf.mxu1  ;;  %v5924_v40 = vpop.f32.mrf.mxu0 }
 0x1e9   : > { %5048 = vst [vmem:[%s7197_s20 + $0x1b8] sm:$0xff] %v4980_v62  ;;  %v4978_v47 = vadd.f32 %v7191_v34, %v4767_v22  ;;  %v4772_v10 = vadd.f32 %v5985_v28, %v3221_v46  ;;  %v3230_v11 = vadd.f32 %v5924_v40, %v7506_v48 }
 0x1ea   : > { %v4599_v6 = vpop.f32.mrf.mxu1  ;;  %v3083_v9 = vpop.f32.mrf.mxu0 }
 0x1eb   : > { %5046 = vst [vmem:[%s7197_s20 + $0x1a8] sm:$0xff] %v4978_v47  ;;  %v4983_v45 = vadd.f32 %v7191_v34, %v4772_v10  ;;  %v4770_v18 = vadd.f32 %v4599_v6, %v3219_v58  ;;  %v3228_v43 = vadd.f32 %v3083_v9, %v7186_v26 }
 0x1ec   : > { %v5986_v12 = vpop.f32.mrf.mxu1 }
 0x1ed   : > { %5051 = vst [vmem:[%s7197_s20 + $0x1d0] sm:$0xff] %v4983_v45  ;;  %v4981_v32 = vadd.f32 %v7191_v34, %v4770_v18  ;;  %v4773_v56 = vadd.f32 %v5986_v12, %v3222_v33 }
 0x1ee   : > { %v4602_v14 = vpop.f32.mrf.mxu1 }
 0x1ef   : > { %5049 = vst [vmem:[%s7197_s20 + $0x1c0] sm:$0xff] %v4981_v32  ;;  %v4984_v29 = vadd.f32 %v7191_v34, %v4773_v56  ;;  %v4771_v37 = vadd.f32 %v4602_v14, %v3220_v0 }
 0x1f1   : > { %5052 = vst [vmem:[%s7197_s20 + $0x1d8] sm:$0xff] %v4984_v29  ;;  %v4982_v52 = vadd.f32 %v7191_v34, %v4771_v37 }
 0x1f3   : > { %v5989_v15 = vpop.f32.mrf.mxu1  ;;  %5050 = vst [vmem:[%s7197_s20 + $0x1c8] sm:$0xff] %v4982_v52 }
 0x1f4   : > { %v4776_v57 = vadd.f32 %v5989_v15, %v3225_v61 }
 0x1f5   : > { %v4615_v1 = vpop.f32.mrf.mxu1 }
 0x1f6   : > { %v4987_v41 = vadd.f32 %v7191_v34, %v4776_v57  ;;  %v4774_v13 = vadd.f32 %v4615_v1, %v3223_v54 }
 0x1f7   : > { %v5990_v17 = vpop.f32.mrf.mxu1 }
 0x1f8   : > { %5055 = vst [vmem:[%s7197_s20 + $0x1f0] sm:$0xff] %v4987_v41  ;;  %v4985_v3 = vadd.f32 %v7191_v34, %v4774_v13  ;;  %v4777_v63 = vadd.f32 %v5990_v17, %v3226_v8 }
 0x1f9   : > { %v4618_v21 = vpop.f32.mrf.mxu1 }
 0x1fa   : > { %5053 = vst [vmem:[%s7197_s20 + $0x1e0] sm:$0xff] %v4985_v3  ;;  %v4988_v23 = vadd.f32 %v7191_v34, %v4777_v63  ;;  %v4775_v55 = vadd.f32 %v4618_v21, %v3224_v25 }
 0x1fb   : > { %v5993_v38 = vpop.f32.mrf.mxu1 }
 0x1fc   : > { %5056 = vst [vmem:[%s7197_s20 + $0x1f8] sm:$0xff] %v4988_v23  ;;  %v4986_v53 = vadd.f32 %v7191_v34, %v4775_v55  ;;  %v4780_v27 = vadd.f32 %v5993_v38, %v3229_v31 }
 0x1fd   : > { %v4631_v7 = vpop.f32.mrf.mxu1 }
 0x1fe   : > { %5054 = vst [vmem:[%s7197_s20 + $0x1e8] sm:$0xff] %v4986_v53  ;;  %v4991_v60 = vadd.f32 %v7191_v34, %v4780_v27  ;;  %v4778_v30 = vadd.f32 %v4631_v7, %v3227_v51 }
 0x1ff   : > { %v5994_v35 = vpop.f32.mrf.mxu1 }
 0x200   : > { %5059 = vst [vmem:[%s7197_s20 + $0x210] sm:$0xff] %v4991_v60  ;;  %v4989_v36 = vadd.f32 %v7191_v34, %v4778_v30  ;;  %v4781_v5 = vadd.f32 %v5994_v35, %v3230_v11 }
 0x201   : > { %v4634_v24 = vpop.f32.mrf.mxu1 }
 0x202   : > { %5057 = vst [vmem:[%s7197_s20 + $0x200] sm:$0xff] %v4989_v36  ;;  %v4992_v46 = vadd.f32 %v7191_v34, %v4781_v5  ;;  %v4779_v62 = vadd.f32 %v4634_v24, %v3228_v43 }
 0x204   : > { %5060 = vst [vmem:[%s7197_s20 + $0x218] sm:$0xff] %v4992_v46  ;;  %v4990_v26 = vadd.f32 %v7191_v34, %v4779_v62 }
 0x206   : > { %5058 = vst [vmem:[%s7197_s20 + $0x208] sm:$0xff] %v4990_v26 }
 0x207   : > { %6123 = shalt.err (!%p6120_p3)
}
 0x208   : > { %s6124_s6 = scalar_lea.hbm %s7400_s28, 8704  ;;  %s6128_s9 = scalar_lea.hbm %s7452_s3, 17408 }
 0x209   : > { %p6125_p4 = scmp.ne.s32.totalorder %s7400_s28, %s6124_s6  ;;  %p6129_p9 = scmp.lt.s32.totalorder %s7400_s28, %s7452_s3 }
 0x20a   : > { %p6130_p10 = scmp.lt.s32.totalorder %s6128_s9, %s6124_s6 }
 0x20b   : > { %p6126_p7 = pnand %p6125_p4, %p6233_p5 }
 0x20c   : > { %p6131_p11 = por %p6130_p10, %p6129_p9 }
 0x20d   : > { %p6127_p8 = pneg %p6126_p7 }
 0x20f   : > { %p6132_p12 = pnand %p6131_p11, %p6127_p8 }
 0x211   : > { %6135 = shalt.err (!%p6132_p12)
}
 0x212   : > { %s6173_s17 = smov 128   ;;  %s6174_s19 = smov 8  }
 0x213   : > { %6001 = dma.vmem_to_hbm [thread:$0]  (%p6233_p5), %s7402_s25, 8704, %s7400_s28, %s7409_s16, %s6173_s17, %s6173_s17, %s6174_s19  }
 0x214 PF: > { %p6007_p13 = scmp.ge.s32.totalorder %s6170_s15, 2  ;;  %s5090_s20 = sand.u32 1, %s6158_s12  }
 0x215   : > { %s5091_s24 = scalar_lea.sflag [#allocation4], %s5090_s20 }
 0x216   : > { %p6004_p0 = pnand %p6007_p13, %p6237_p6 }
 0x218   : > { %p6005_p1 = pneg %p6004_p0 }
 0x21a   : > { %6153 = dma.done.wait (%p6005_p1), %s5091_s24, 8704  }
 0x21b   : > { %6155 = vsyncadd (%p6005_p1), %s5091_s24, 4294958592  ;;  %p13_p2 = scmp.ge.s32.totalorder %s6220_s18, 4   ;;  %s7507_s12 = smov %s6162_s13 }
 0x21c   : > { %s7508_s13 = smov %s6166_s14  ;;  %s7509_s14 = smov %s6231_s21 }
 0x21d   : > { %s7510_s15 = smov %s6220_s18  ;;  %15 = sbr.rel (!%p13_p2) target bundleno = 3 (0x3), region = 71 }
 0x222   :  { %5096 = vsyncpa [#allocation4], 1 }
 0x223   :  { %5098 = vsyncpa [#allocation4 + $0x1], 1 }

</bundles_post_ra>
